<compile_context>
chip_gen: v5e
topology: v5e:2x2
jax: 0.10.0
libtpu: 0.0.40
codegen_flags: <defaults>
</compile_context>

<pallas_src>
import math
import functools

import jax
import jax.numpy as jnp
from jax.experimental import pallas as pl
from jax.experimental.pallas import tpu as pltpu


# ----------------------------------------------------------------------------
# Kernel helpers
# ----------------------------------------------------------------------------
def _lstm_cell(g, c_prev, H):
    """LSTM cell update from pre-activation gates (f32), gate order [i,f,o,g]."""
    s = jax.nn.sigmoid(g[:, 0:3 * H])          # one contiguous sigmoid slab
    i = s[:, 0 * H:1 * H]
    f = s[:, 1 * H:2 * H]
    o = s[:, 2 * H:3 * H]
    gg = jnp.tanh(g[:, 3 * H:4 * H])           # one tanh slab
    c = f * c_prev + i * gg
    h = o * jnp.tanh(c)
    return h, c


def _split_gx(gx, T, B, H):
    """Hoist per-timestep / per-direction slices of the hoisted projection."""
    gxf = [gx[t * B:(t + 1) * B, 0:4 * H] for t in range(T)]
    gxr = [gx[t * B:(t + 1) * B, 4 * H:8 * H] for t in range(T)]
    return gxf, gxr


def _bidir_recurrence(gxf, gxr, whh, T, B, H):
    """Fused forward+reverse recurrence with one merged matmul per step.

    gxf[t]/gxr[t]: (B, 4H) f32 input-projection gates for position t.
    whh: (H, 8H) bf16 = concat([whh_fwd, whh_rev], axis=1).
    Returns (hf, hr, c_r_final): hf[t]/hr[t] are the (B, H) f32 hidden states
    at sequence position t for the fwd / rev direction.
    """
    zeros = jnp.zeros((B, H), jnp.float32)
    h_f, c_f, h_r, c_r = zeros, zeros, zeros, zeros
    hf = [None] * T
    hr = [None] * T
    # T is small & static: fully unrolled, static slices only.
    for t in range(T):
        tr = T - 1 - t
        hh = jnp.concatenate([h_f, h_r], axis=0).astype(jnp.bfloat16)   # (2B, H)
        rec = jnp.dot(hh, whh, preferred_element_type=jnp.float32)      # (2B, 8H)
        g_f = gxf[t] + rec[0:B, 0:4 * H]
        g_r = gxr[tr] + rec[B:2 * B, 4 * H:8 * H]
        h_f, c_f = _lstm_cell(g_f, c_f, H)
        h_r, c_r = _lstm_cell(g_r, c_r, H)
        hf[t] = h_f
        hr[tr] = h_r
    return hf, hr, c_r


# ----------------------------------------------------------------------------
# Fused kernel: layer0 -> layer1 -> concat -> fc
# ----------------------------------------------------------------------------
def fused_lstm_kernel(x_ref, wih0_ref, b0_ref,
                      whh0_hbm, wih1_hbm, whh1_hbm,
                      b1_ref, fcw_ref, fcb_ref,
                      logits_ref,
                      whh0_v, wih1_v, whh1_v, sem, *, T, B, H):
    # Kick off background DMA of the recurrent / layer-1 weights; they are not
    # needed until after layer-0's input projection, so the copies overlap MXU
    # work instead of sitting serially before the kernel.
    cp_whh0 = pltpu.make_async_copy(whh0_hbm, whh0_v, sem.at[0])
    cp_wih1 = pltpu.make_async_copy(wih1_hbm, wih1_v, sem.at[1])
    cp_whh1 = pltpu.make_async_copy(whh1_hbm, whh1_v, sem.at[2])
    cp_whh0.start()
    cp_wih1.start()
    cp_whh1.start()

    # ---------------- Layer 0 ----------------
    x = x_ref[...]                                                    # (T*B, E) bf16
    gx0 = (jnp.dot(x, wih0_ref[...], preferred_element_type=jnp.float32)
           + b0_ref[...])                                             # (T*B, 8H) f32
    gx0f, gx0r = _split_gx(gx0, T, B, H)

    cp_whh0.wait()
    hf0, hr0, _ = _bidir_recurrence(gx0f, gx0r, whh0_v[...], T, B, H)

    # Inter-layer activation assembled in registers; never written to HBM.
    # (inter-layer LSTM dropout: identity in inference mode)
    x1 = jnp.concatenate(
        [jnp.concatenate([hf0[t], hr0[t]], axis=1) for t in range(T)],
        axis=0).astype(jnp.bfloat16)                                  # (T*B, 2H)

    # ---------------- Layer 1 ----------------
    cp_wih1.wait()
    cp_whh1.wait()
    gx1 = (jnp.dot(x1, wih1_v[...], preferred_element_type=jnp.float32)
           + b1_ref[...])                                             # (T*B, 8H)
    gx1f, gx1r = _split_gx(gx1, T, B, H)
    hf1, hr1, c_r_fin = _bidir_recurrence(gx1f, gx1r, whh1_v[...], T, B, H)

    # PyTorch: combined = cat(hn[-1], cn[-1], lstm_out[:, -1, :])
    #   hn[-1] / cn[-1]  = last layer reverse-direction final states
    #   lstm_out[:, -1]  = cat(h_fwd@T-1, h_rev@T-1)
    combined = jnp.concatenate([hr1[0], c_r_fin, hf1[T - 1], hr1[T - 1]],
                               axis=1)                                # (B, 4H) f32
    # nn.Dropout: identity in inference mode.
    logits = (jnp.dot(combined, fcw_ref[...],
                      preferred_element_type=jnp.float32) + fcb_ref[...])
    logits_ref[...] = logits.astype(logits_ref.dtype)


# ----------------------------------------------------------------------------
# Parameter init (PyTorch-equivalent distributions, packed layouts)
# ----------------------------------------------------------------------------
def _reorder_gates(w):
    """Permute the last (4H) axis from PyTorch [i, f, g, o] to [i, f, o, g]."""
    i, f, g, o = jnp.split(w, 4, axis=-1)
    return jnp.concatenate([i, f, o, g], axis=-1)


def init_params(key, vocab_size, output_size, hidden_size, embedding_size,
                n_layers=2):
    assert n_layers == 2, "fused kernel is written for the module default (2 layers)"
    H = hidden_size
    params = {}

    key, k_emb = jax.random.split(key)
    # nn.Embedding default init: N(0, 1); stored bf16 (MXU-ready gather output).
    params['embedding'] = jax.random.normal(
        k_emb, (vocab_size, embedding_size), jnp.float32).astype(jnp.bfloat16)

    # nn.LSTM default init: U(-1/sqrt(H), 1/sqrt(H)).  Per layer, both
    # directions are packed into one (D, 8H) wih, one (H, 8H) whh (bf16) and
    # one pre-summed (1, 8H) bias (f32), with gate columns reordered [i,f,o,g].
    k = 1.0 / math.sqrt(H)
    layers = []
    for layer in range(n_layers):
        in_size = embedding_size if layer == 0 else 2 * H
        wihs, whhs, bs = [], [], []
        for _d in range(2):  # forward, reverse
            key, k1, k2, k3, k4 = jax.random.split(key, 5)
            wih = jax.random.uniform(k1, (in_size, 4 * H), jnp.float32, -k, k)
            whh = jax.random.uniform(k2, (H, 4 * H), jnp.float32, -k, k)
            bih = jax.random.uniform(k3, (4 * H,), jnp.float32, -k, k)
            bhh = jax.random.uniform(k4, (4 * H,), jnp.float32, -k, k)
            wihs.append(_reorder_gates(wih))
            whhs.append(_reorder_gates(whh))
            bs.append(_reorder_gates((bih + bhh).reshape(1, 4 * H)))
        layers.append((jnp.concatenate(wihs, axis=1).astype(jnp.bfloat16),
                       jnp.concatenate(whhs, axis=1).astype(jnp.bfloat16),
                       jnp.concatenate(bs, axis=1)))
    params['lstm'] = layers

    # nn.Linear default init: U(-1/sqrt(fan_in), 1/sqrt(fan_in)); kept f32.
    kf = 1.0 / math.sqrt(4 * H)
    key, kw, kb = jax.random.split(key, 3)
    params['fc_w'] = jax.random.uniform(kw, (4 * H, output_size),
                                        jnp.float32, -kf, kf)
    params['fc_b'] = jax.random.uniform(kb, (1, output_size),
                                        jnp.float32, -kf, kf)
    return params


# ----------------------------------------------------------------------------
# Forward
# ----------------------------------------------------------------------------
@jax.jit
def lstm_model_forward(params, tokens):
    """tokens: int32 (B, T).  Returns logits (B, output_size)."""
    B, T = tokens.shape
    wih0, whh0, b0 = params['lstm'][0]
    wih1, whh1, b1 = params['lstm'][1]
    H = whh0.shape[0]
    out_dim = params['fc_w'].shape[1]

    # Embedding lookup (plain JAX gather glue), time-major + flatten, bf16.
    # TODO(synk): the gather/transpose could be fused in-kernel via SMEM tokens.
    emb = jnp.take(params['embedding'], tokens, axis=0)          # (B, T, E) bf16
    x = jnp.transpose(emb, (1, 0, 2)).reshape(T * B, -1)         # (T*B, E) bf16

    vmem = pltpu.MemorySpace.VMEM
    return pl.pallas_call(
        functools.partial(fused_lstm_kernel, T=T, B=B, H=H),
        out_shape=jax.ShapeDtypeStruct((B, out_dim), jnp.float32),
        in_specs=[
            pl.BlockSpec(memory_space=vmem),     # x
            pl.BlockSpec(memory_space=vmem),     # wih0 (needed immediately)
            pl.BlockSpec(memory_space=vmem),     # b0
            pl.BlockSpec(memory_space=pl.ANY),   # whh0  (prefetched in-kernel)
            pl.BlockSpec(memory_space=pl.ANY),   # wih1  (prefetched in-kernel)
            pl.BlockSpec(memory_space=pl.ANY),   # whh1  (prefetched in-kernel)
            pl.BlockSpec(memory_space=vmem),     # b1
            pl.BlockSpec(memory_space=vmem),     # fc_w
            pl.BlockSpec(memory_space=vmem),     # fc_b
        ],
        out_specs=pl.BlockSpec(memory_space=vmem),
        scratch_shapes=[
            pltpu.VMEM(whh0.shape, whh0.dtype),
            pltpu.VMEM(wih1.shape, wih1.dtype),
            pltpu.VMEM(whh1.shape, whh1.dtype),
            pltpu.SemaphoreType.DMA((3,)),
        ],
    )(x, wih0, b0, whh0, wih1, whh1, b1, params['fc_w'], params['fc_b'])


# ----------------------------------------------------------------------------
if __name__ == "__main__":
    vocab_size = 50
    output_size = 3
    hidden_size = 128
    embedding_size = 256
    n_layers = 2
    B, T = 2, 8

    key = jax.random.PRNGKey(0)
    key, k_tok = jax.random.split(key)
    tokens = jax.random.randint(k_tok, (B, T), 0, vocab_size, dtype=jnp.int32)

    params = init_params(key, vocab_size, output_size, hidden_size,
                         embedding_size, n_layers)

    out = lstm_model_forward(params, tokens)
    jax.block_until_ready(out)
    assert out.shape == (B, output_size), out.shape
    print("KERNEL_OK")
</pallas_src>

<mosaic_0001>
module attributes {stable_mosaic.version = 11 : i64} {
  func.func @fused_lstm_kernel(%arg0: memref<16x256xbf16, #tpu.memory_space<vmem>>, %arg1: memref<256x1024xbf16, #tpu.memory_space<vmem>>, %arg2: memref<1x1024xf32, #tpu.memory_space<vmem>>, %arg3: memref<128x1024xbf16, #tpu.memory_space<any>>, %arg4: memref<256x1024xbf16, #tpu.memory_space<any>>, %arg5: memref<128x1024xbf16, #tpu.memory_space<any>>, %arg6: memref<1x1024xf32, #tpu.memory_space<vmem>>, %arg7: memref<512x3xf32, #tpu.memory_space<vmem>>, %arg8: memref<1x3xf32, #tpu.memory_space<vmem>>, %arg9: memref<2x3xf32, #tpu.memory_space<vmem>>, %arg10: memref<128x1024xbf16, #tpu.memory_space<vmem>>, %arg11: memref<256x1024xbf16, #tpu.memory_space<vmem>>, %arg12: memref<128x1024xbf16, #tpu.memory_space<vmem>>, %arg13: memref<3x!tpu.dma_semaphore, #tpu.memory_space<semaphore_mem>>) attributes {dimension_semantics = [], scalar_prefetch = 0 : i64, scratch_operands = 4 : i64, tpu.core_type = #tpu.core_type<tc>} {
    %c0_i32 = arith.constant 0 : i32
    %0 = tpu.memref_slice %arg13[%c0_i32] : memref<3x!tpu.dma_semaphore, #tpu.memory_space<semaphore_mem>> -> memref<1x!tpu.dma_semaphore, #tpu.memory_space<semaphore_mem>>
    %1 = tpu.memref_squeeze %0 : memref<1x!tpu.dma_semaphore, #tpu.memory_space<semaphore_mem>> -> memref<!tpu.dma_semaphore, #tpu.memory_space<semaphore_mem>>
    tpu.enqueue_dma source(%arg3 : memref<128x1024xbf16, #tpu.memory_space<any>>) target(%arg10 : memref<128x1024xbf16, #tpu.memory_space<vmem>>) target_semaphore(%1 : memref<!tpu.dma_semaphore, #tpu.memory_space<semaphore_mem>>)
    %c1_i32 = arith.constant 1 : i32
    %2 = tpu.memref_slice %arg13[%c1_i32] : memref<3x!tpu.dma_semaphore, #tpu.memory_space<semaphore_mem>> -> memref<1x!tpu.dma_semaphore, #tpu.memory_space<semaphore_mem>>
    %3 = tpu.memref_squeeze %2 : memref<1x!tpu.dma_semaphore, #tpu.memory_space<semaphore_mem>> -> memref<!tpu.dma_semaphore, #tpu.memory_space<semaphore_mem>>
    tpu.enqueue_dma source(%arg4 : memref<256x1024xbf16, #tpu.memory_space<any>>) target(%arg11 : memref<256x1024xbf16, #tpu.memory_space<vmem>>) target_semaphore(%3 : memref<!tpu.dma_semaphore, #tpu.memory_space<semaphore_mem>>)
    %c2_i32 = arith.constant 2 : i32
    %4 = tpu.memref_slice %arg13[%c2_i32] : memref<3x!tpu.dma_semaphore, #tpu.memory_space<semaphore_mem>> -> memref<1x!tpu.dma_semaphore, #tpu.memory_space<semaphore_mem>>
    %5 = tpu.memref_squeeze %4 : memref<1x!tpu.dma_semaphore, #tpu.memory_space<semaphore_mem>> -> memref<!tpu.dma_semaphore, #tpu.memory_space<semaphore_mem>>
    tpu.enqueue_dma source(%arg5 : memref<128x1024xbf16, #tpu.memory_space<any>>) target(%arg12 : memref<128x1024xbf16, #tpu.memory_space<vmem>>) target_semaphore(%5 : memref<!tpu.dma_semaphore, #tpu.memory_space<semaphore_mem>>)
    %c0 = arith.constant 0 : index
    %c0_0 = arith.constant 0 : index
    %6 = vector.load %arg0[%c0, %c0_0] : memref<16x256xbf16, #tpu.memory_space<vmem>>, vector<16x256xbf16>
    %c0_1 = arith.constant 0 : index
    %c0_2 = arith.constant 0 : index
    %7 = vector.load %arg1[%c0_1, %c0_2] : memref<256x1024xbf16, #tpu.memory_space<vmem>>, vector<256x1024xbf16>
    %cst = arith.constant dense<0.000000e+00> : vector<16x1024xf32>
    %8 = tpu.matmul %6, %7, %cst {dimension_numbers = #tpu.dot_dimension_numbers<[1], [0], [0], [1], [0, 0, 1, 1], [], []>} : vector<16x256xbf16>, vector<256x1024xbf16>, vector<16x1024xf32> -> vector<16x1024xf32>
    %c0_3 = arith.constant 0 : index
    %c0_4 = arith.constant 0 : index
    %9 = vector.load %arg2[%c0_3, %c0_4] : memref<1x1024xf32, #tpu.memory_space<vmem>>, vector<1x1024xf32>
    %10 = vector.broadcast %9 : vector<1x1024xf32> to vector<16x1024xf32>
    %11 = arith.addf %8, %10 : vector<16x1024xf32>
    %12 = vector.extract_strided_slice %11 {offsets = [0, 0], sizes = [2, 512], strides = [1, 1]} : vector<16x1024xf32> to vector<2x512xf32>
    %13 = vector.extract_strided_slice %11 {offsets = [2, 0], sizes = [2, 512], strides = [1, 1]} : vector<16x1024xf32> to vector<2x512xf32>
    %14 = vector.extract_strided_slice %11 {offsets = [4, 0], sizes = [2, 512], strides = [1, 1]} : vector<16x1024xf32> to vector<2x512xf32>
    %15 = vector.extract_strided_slice %11 {offsets = [6, 0], sizes = [2, 512], strides = [1, 1]} : vector<16x1024xf32> to vector<2x512xf32>
    %16 = vector.extract_strided_slice %11 {offsets = [8, 0], sizes = [2, 512], strides = [1, 1]} : vector<16x1024xf32> to vector<2x512xf32>
    %17 = vector.extract_strided_slice %11 {offsets = [10, 0], sizes = [2, 512], strides = [1, 1]} : vector<16x1024xf32> to vector<2x512xf32>
    %18 = vector.extract_strided_slice %11 {offsets = [12, 0], sizes = [2, 512], strides = [1, 1]} : vector<16x1024xf32> to vector<2x512xf32>
    %19 = vector.extract_strided_slice %11 {offsets = [14, 0], sizes = [2, 512], strides = [1, 1]} : vector<16x1024xf32> to vector<2x512xf32>
    %20 = vector.extract_strided_slice %11 {offsets = [0, 512], sizes = [2, 512], strides = [1, 1]} : vector<16x1024xf32> to vector<2x512xf32>
    %21 = vector.extract_strided_slice %11 {offsets = [2, 512], sizes = [2, 512], strides = [1, 1]} : vector<16x1024xf32> to vector<2x512xf32>
    %22 = vector.extract_strided_slice %11 {offsets = [4, 512], sizes = [2, 512], strides = [1, 1]} : vector<16x1024xf32> to vector<2x512xf32>
    %23 = vector.extract_strided_slice %11 {offsets = [6, 512], sizes = [2, 512], strides = [1, 1]} : vector<16x1024xf32> to vector<2x512xf32>
    %24 = vector.extract_strided_slice %11 {offsets = [8, 512], sizes = [2, 512], strides = [1, 1]} : vector<16x1024xf32> to vector<2x512xf32>
    %25 = vector.extract_strided_slice %11 {offsets = [10, 512], sizes = [2, 512], strides = [1, 1]} : vector<16x1024xf32> to vector<2x512xf32>
    %26 = vector.extract_strided_slice %11 {offsets = [12, 512], sizes = [2, 512], strides = [1, 1]} : vector<16x1024xf32> to vector<2x512xf32>
    %27 = vector.extract_strided_slice %11 {offsets = [14, 512], sizes = [2, 512], strides = [1, 1]} : vector<16x1024xf32> to vector<2x512xf32>
    %c0_i32_5 = arith.constant 0 : i32
    %28 = tpu.memref_slice %arg13[%c0_i32_5] : memref<3x!tpu.dma_semaphore, #tpu.memory_space<semaphore_mem>> -> memref<1x!tpu.dma_semaphore, #tpu.memory_space<semaphore_mem>>
    %29 = tpu.memref_squeeze %28 : memref<1x!tpu.dma_semaphore, #tpu.memory_space<semaphore_mem>> -> memref<!tpu.dma_semaphore, #tpu.memory_space<semaphore_mem>>
    tpu.wait_dma2 semaphore(%29 : memref<!tpu.dma_semaphore, #tpu.memory_space<semaphore_mem>>) src(%arg3 : memref<128x1024xbf16, #tpu.memory_space<any>>) dst(%arg10 : memref<128x1024xbf16, #tpu.memory_space<vmem>>)
    %c0_6 = arith.constant 0 : index
    %c0_7 = arith.constant 0 : index
    %30 = vector.load %arg10[%c0_6, %c0_7] : memref<128x1024xbf16, #tpu.memory_space<vmem>>, vector<128x1024xbf16>
    %cst_8 = arith.constant 0.000000e+00 : f32
    %31 = vector.broadcast %cst_8 : f32 to vector<2x128xf32>
    %32 = tpu.concatenate %31, %31 in 0 : vector<2x128xf32>, vector<2x128xf32> -> vector<4x128xf32>
    %33 = arith.truncf %32 : vector<4x128xf32> to vector<4x128xbf16>
    %cst_9 = arith.constant dense<0.000000e+00> : vector<4x1024xf32>
    %34 = tpu.matmul %33, %30, %cst_9 {dimension_numbers = #tpu.dot_dimension_numbers<[1], [0], [0], [1], [0, 0, 1, 1], [], []>} : vector<4x128xbf16>, vector<128x1024xbf16>, vector<4x1024xf32> -> vector<4x1024xf32>
    %35 = vector.extract_strided_slice %34 {offsets = [0, 0], sizes = [2, 512], strides = [1, 1]} : vector<4x1024xf32> to vector<2x512xf32>
    %36 = arith.addf %12, %35 : vector<2x512xf32>
    %37 = vector.extract_strided_slice %34 {offsets = [2, 512], sizes = [2, 512], strides = [1, 1]} : vector<4x1024xf32> to vector<2x512xf32>
    %38 = arith.addf %27, %37 : vector<2x512xf32>
    %39 = vector.extract_strided_slice %36 {offsets = [0, 0], sizes = [2, 384], strides = [1, 1]} : vector<2x512xf32> to vector<2x384xf32>
    %40 = arith.negf %39 : vector<2x384xf32>
    %41 = math.exp %40 : vector<2x384xf32>
    %cst_10 = arith.constant 1.000000e+00 : f32
    %42 = vector.broadcast %cst_10 : f32 to vector<2x384xf32>
    %43 = arith.addf %42, %41 : vector<2x384xf32>
    %44 = arith.divf %42, %43 : vector<2x384xf32>
    %45 = vector.extract_strided_slice %44 {offsets = [0, 0], sizes = [2, 128], strides = [1, 1]} : vector<2x384xf32> to vector<2x128xf32>
    %46 = vector.extract_strided_slice %44 {offsets = [0, 128], sizes = [2, 128], strides = [1, 1]} : vector<2x384xf32> to vector<2x128xf32>
    %47 = vector.extract_strided_slice %44 {offsets = [0, 256], sizes = [2, 128], strides = [1, 1]} : vector<2x384xf32> to vector<2x128xf32>
    %48 = vector.extract_strided_slice %36 {offsets = [0, 384], sizes = [2, 128], strides = [1, 1]} : vector<2x512xf32> to vector<2x128xf32>
    %49 = math.tanh %48 : vector<2x128xf32>
    %50 = arith.mulf %46, %31 : vector<2x128xf32>
    %51 = arith.mulf %45, %49 : vector<2x128xf32>
    %52 = arith.addf %50, %51 : vector<2x128xf32>
    %53 = math.tanh %52 : vector<2x128xf32>
    %54 = arith.mulf %47, %53 : vector<2x128xf32>
    %55 = vector.extract_strided_slice %38 {offsets = [0, 0], sizes = [2, 384], strides = [1, 1]} : vector<2x512xf32> to vector<2x384xf32>
    %56 = arith.negf %55 : vector<2x384xf32>
    %57 = math.exp %56 : vector<2x384xf32>
    %cst_11 = arith.constant 1.000000e+00 : f32
    %58 = vector.broadcast %cst_11 : f32 to vector<2x384xf32>
    %59 = arith.addf %58, %57 : vector<2x384xf32>
    %60 = arith.divf %58, %59 : vector<2x384xf32>
    %61 = vector.extract_strided_slice %60 {offsets = [0, 0], sizes = [2, 128], strides = [1, 1]} : vector<2x384xf32> to vector<2x128xf32>
    %62 = vector.extract_strided_slice %60 {offsets = [0, 128], sizes = [2, 128], strides = [1, 1]} : vector<2x384xf32> to vector<2x128xf32>
    %63 = vector.extract_strided_slice %60 {offsets = [0, 256], sizes = [2, 128], strides = [1, 1]} : vector<2x384xf32> to vector<2x128xf32>
    %64 = vector.extract_strided_slice %38 {offsets = [0, 384], sizes = [2, 128], strides = [1, 1]} : vector<2x512xf32> to vector<2x128xf32>
    %65 = math.tanh %64 : vector<2x128xf32>
    %66 = arith.mulf %62, %31 : vector<2x128xf32>
    %67 = arith.mulf %61, %65 : vector<2x128xf32>
    %68 = arith.addf %66, %67 : vector<2x128xf32>
    %69 = math.tanh %68 : vector<2x128xf32>
    %70 = arith.mulf %63, %69 : vector<2x128xf32>
    %71 = tpu.concatenate %54, %70 in 0 : vector<2x128xf32>, vector<2x128xf32> -> vector<4x128xf32>
    %72 = arith.truncf %71 : vector<4x128xf32> to vector<4x128xbf16>
    %cst_12 = arith.constant dense<0.000000e+00> : vector<4x1024xf32>
    %73 = tpu.matmul %72, %30, %cst_12 {dimension_numbers = #tpu.dot_dimension_numbers<[1], [0], [0], [1], [0, 0, 1, 1], [], []>} : vector<4x128xbf16>, vector<128x1024xbf16>, vector<4x1024xf32> -> vector<4x1024xf32>
    %74 = vector.extract_strided_slice %73 {offsets = [0, 0], sizes = [2, 512], strides = [1, 1]} : vector<4x1024xf32> to vector<2x512xf32>
    %75 = arith.addf %13, %74 : vector<2x512xf32>
    %76 = vector.extract_strided_slice %73 {offsets = [2, 512], sizes = [2, 512], strides = [1, 1]} : vector<4x1024xf32> to vector<2x512xf32>
    %77 = arith.addf %26, %76 : vector<2x512xf32>
    %78 = vector.extract_strided_slice %75 {offsets = [0, 0], sizes = [2, 384], strides = [1, 1]} : vector<2x512xf32> to vector<2x384xf32>
    %79 = arith.negf %78 : vector<2x384xf32>
    %80 = math.exp %79 : vector<2x384xf32>
    %cst_13 = arith.constant 1.000000e+00 : f32
    %81 = vector.broadcast %cst_13 : f32 to vector<2x384xf32>
    %82 = arith.addf %81, %80 : vector<2x384xf32>
    %83 = arith.divf %81, %82 : vector<2x384xf32>
    %84 = vector.extract_strided_slice %83 {offsets = [0, 0], sizes = [2, 128], strides = [1, 1]} : vector<2x384xf32> to vector<2x128xf32>
    %85 = vector.extract_strided_slice %83 {offsets = [0, 128], sizes = [2, 128], strides = [1, 1]} : vector<2x384xf32> to vector<2x128xf32>
    %86 = vector.extract_strided_slice %83 {offsets = [0, 256], sizes = [2, 128], strides = [1, 1]} : vector<2x384xf32> to vector<2x128xf32>
    %87 = vector.extract_strided_slice %75 {offsets = [0, 384], sizes = [2, 128], strides = [1, 1]} : vector<2x512xf32> to vector<2x128xf32>
    %88 = math.tanh %87 : vector<2x128xf32>
    %89 = arith.mulf %85, %52 : vector<2x128xf32>
    %90 = arith.mulf %84, %88 : vector<2x128xf32>
    %91 = arith.addf %89, %90 : vector<2x128xf32>
    %92 = math.tanh %91 : vector<2x128xf32>
    %93 = arith.mulf %86, %92 : vector<2x128xf32>
    %94 = vector.extract_strided_slice %77 {offsets = [0, 0], sizes = [2, 384], strides = [1, 1]} : vector<2x512xf32> to vector<2x384xf32>
    %95 = arith.negf %94 : vector<2x384xf32>
    %96 = math.exp %95 : vector<2x384xf32>
    %cst_14 = arith.constant 1.000000e+00 : f32
    %97 = vector.broadcast %cst_14 : f32 to vector<2x384xf32>
    %98 = arith.addf %97, %96 : vector<2x384xf32>
    %99 = arith.divf %97, %98 : vector<2x384xf32>
    %100 = vector.extract_strided_slice %99 {offsets = [0, 0], sizes = [2, 128], strides = [1, 1]} : vector<2x384xf32> to vector<2x128xf32>
    %101 = vector.extract_strided_slice %99 {offsets = [0, 128], sizes = [2, 128], strides = [1, 1]} : vector<2x384xf32> to vector<2x128xf32>
    %102 = vector.extract_strided_slice %99 {offsets = [0, 256], sizes = [2, 128], strides = [1, 1]} : vector<2x384xf32> to vector<2x128xf32>
    %103 = vector.extract_strided_slice %77 {offsets = [0, 384], sizes = [2, 128], strides = [1, 1]} : vector<2x512xf32> to vector<2x128xf32>
    %104 = math.tanh %103 : vector<2x128xf32>
    %105 = arith.mulf %101, %68 : vector<2x128xf32>
    %106 = arith.mulf %100, %104 : vector<2x128xf32>
    %107 = arith.addf %105, %106 : vector<2x128xf32>
    %108 = math.tanh %107 : vector<2x128xf32>
    %109 = arith.mulf %102, %108 : vector<2x128xf32>
    %110 = tpu.concatenate %93, %109 in 0 : vector<2x128xf32>, vector<2x128xf32> -> vector<4x128xf32>
    %111 = arith.truncf %110 : vector<4x128xf32> to vector<4x128xbf16>
    %cst_15 = arith.constant dense<0.000000e+00> : vector<4x1024xf32>
    %112 = tpu.matmul %111, %30, %cst_15 {dimension_numbers = #tpu.dot_dimension_numbers<[1], [0], [0], [1], [0, 0, 1, 1], [], []>} : vector<4x128xbf16>, vector<128x1024xbf16>, vector<4x1024xf32> -> vector<4x1024xf32>
    %113 = vector.extract_strided_slice %112 {offsets = [0, 0], sizes = [2, 512], strides = [1, 1]} : vector<4x1024xf32> to vector<2x512xf32>
    %114 = arith.addf %14, %113 : vector<2x512xf32>
    %115 = vector.extract_strided_slice %112 {offsets = [2, 512], sizes = [2, 512], strides = [1, 1]} : vector<4x1024xf32> to vector<2x512xf32>
    %116 = arith.addf %25, %115 : vector<2x512xf32>
    %117 = vector.extract_strided_slice %114 {offsets = [0, 0], sizes = [2, 384], strides = [1, 1]} : vector<2x512xf32> to vector<2x384xf32>
    %118 = arith.negf %117 : vector<2x384xf32>
    %119 = math.exp %118 : vector<2x384xf32>
    %cst_16 = arith.constant 1.000000e+00 : f32
    %120 = vector.broadcast %cst_16 : f32 to vector<2x384xf32>
    %121 = arith.addf %120, %119 : vector<2x384xf32>
    %122 = arith.divf %120, %121 : vector<2x384xf32>
    %123 = vector.extract_strided_slice %122 {offsets = [0, 0], sizes = [2, 128], strides = [1, 1]} : vector<2x384xf32> to vector<2x128xf32>
    %124 = vector.extract_strided_slice %122 {offsets = [0, 128], sizes = [2, 128], strides = [1, 1]} : vector<2x384xf32> to vector<2x128xf32>
    %125 = vector.extract_strided_slice %122 {offsets = [0, 256], sizes = [2, 128], strides = [1, 1]} : vector<2x384xf32> to vector<2x128xf32>
    %126 = vector.extract_strided_slice %114 {offsets = [0, 384], sizes = [2, 128], strides = [1, 1]} : vector<2x512xf32> to vector<2x128xf32>
    %127 = math.tanh %126 : vector<2x128xf32>
    %128 = arith.mulf %124, %91 : vector<2x128xf32>
    %129 = arith.mulf %123, %127 : vector<2x128xf32>
    %130 = arith.addf %128, %129 : vector<2x128xf32>
    %131 = math.tanh %130 : vector<2x128xf32>
    %132 = arith.mulf %125, %131 : vector<2x128xf32>
    %133 = vector.extract_strided_slice %116 {offsets = [0, 0], sizes = [2, 384], strides = [1, 1]} : vector<2x512xf32> to vector<2x384xf32>
    %134 = arith.negf %133 : vector<2x384xf32>
    %135 = math.exp %134 : vector<2x384xf32>
    %cst_17 = arith.constant 1.000000e+00 : f32
    %136 = vector.broadcast %cst_17 : f32 to vector<2x384xf32>
    %137 = arith.addf %136, %135 : vector<2x384xf32>
    %138 = arith.divf %136, %137 : vector<2x384xf32>
    %139 = vector.extract_strided_slice %138 {offsets = [0, 0], sizes = [2, 128], strides = [1, 1]} : vector<2x384xf32> to vector<2x128xf32>
    %140 = vector.extract_strided_slice %138 {offsets = [0, 128], sizes = [2, 128], strides = [1, 1]} : vector<2x384xf32> to vector<2x128xf32>
    %141 = vector.extract_strided_slice %138 {offsets = [0, 256], sizes = [2, 128], strides = [1, 1]} : vector<2x384xf32> to vector<2x128xf32>
    %142 = vector.extract_strided_slice %116 {offsets = [0, 384], sizes = [2, 128], strides = [1, 1]} : vector<2x512xf32> to vector<2x128xf32>
    %143 = math.tanh %142 : vector<2x128xf32>
    %144 = arith.mulf %140, %107 : vector<2x128xf32>
    %145 = arith.mulf %139, %143 : vector<2x128xf32>
    %146 = arith.addf %144, %145 : vector<2x128xf32>
    %147 = math.tanh %146 : vector<2x128xf32>
    %148 = arith.mulf %141, %147 : vector<2x128xf32>
    %149 = tpu.concatenate %132, %148 in 0 : vector<2x128xf32>, vector<2x128xf32> -> vector<4x128xf32>
    %150 = arith.truncf %149 : vector<4x128xf32> to vector<4x128xbf16>
    %cst_18 = arith.constant dense<0.000000e+00> : vector<4x1024xf32>
    %151 = tpu.matmul %150, %30, %cst_18 {dimension_numbers = #tpu.dot_dimension_numbers<[1], [0], [0], [1], [0, 0, 1, 1], [], []>} : vector<4x128xbf16>, vector<128x1024xbf16>, vector<4x1024xf32> -> vector<4x1024xf32>
    %152 = vector.extract_strided_slice %151 {offsets = [0, 0], sizes = [2, 512], strides = [1, 1]} : vector<4x1024xf32> to vector<2x512xf32>
    %153 = arith.addf %15, %152 : vector<2x512xf32>
    %154 = vector.extract_strided_slice %151 {offsets = [2, 512], sizes = [2, 512], strides = [1, 1]} : vector<4x1024xf32> to vector<2x512xf32>
    %155 = arith.addf %24, %154 : vector<2x512xf32>
    %156 = vector.extract_strided_slice %153 {offsets = [0, 0], sizes = [2, 384], strides = [1, 1]} : vector<2x512xf32> to vector<2x384xf32>
    %157 = arith.negf %156 : vector<2x384xf32>
    %158 = math.exp %157 : vector<2x384xf32>
    %cst_19 = arith.constant 1.000000e+00 : f32
    %159 = vector.broadcast %cst_19 : f32 to vector<2x384xf32>
    %160 = arith.addf %159, %158 : vector<2x384xf32>
    %161 = arith.divf %159, %160 : vector<2x384xf32>
    %162 = vector.extract_strided_slice %161 {offsets = [0, 0], sizes = [2, 128], strides = [1, 1]} : vector<2x384xf32> to vector<2x128xf32>
    %163 = vector.extract_strided_slice %161 {offsets = [0, 128], sizes = [2, 128], strides = [1, 1]} : vector<2x384xf32> to vector<2x128xf32>
    %164 = vector.extract_strided_slice %161 {offsets = [0, 256], sizes = [2, 128], strides = [1, 1]} : vector<2x384xf32> to vector<2x128xf32>
    %165 = vector.extract_strided_slice %153 {offsets = [0, 384], sizes = [2, 128], strides = [1, 1]} : vector<2x512xf32> to vector<2x128xf32>
    %166 = math.tanh %165 : vector<2x128xf32>
    %167 = arith.mulf %163, %130 : vector<2x128xf32>
    %168 = arith.mulf %162, %166 : vector<2x128xf32>
    %169 = arith.addf %167, %168 : vector<2x128xf32>
    %170 = math.tanh %169 : vector<2x128xf32>
    %171 = arith.mulf %164, %170 : vector<2x128xf32>
    %172 = vector.extract_strided_slice %155 {offsets = [0, 0], sizes = [2, 384], strides = [1, 1]} : vector<2x512xf32> to vector<2x384xf32>
    %173 = arith.negf %172 : vector<2x384xf32>
    %174 = math.exp %173 : vector<2x384xf32>
    %cst_20 = arith.constant 1.000000e+00 : f32
    %175 = vector.broadcast %cst_20 : f32 to vector<2x384xf32>
    %176 = arith.addf %175, %174 : vector<2x384xf32>
    %177 = arith.divf %175, %176 : vector<2x384xf32>
    %178 = vector.extract_strided_slice %177 {offsets = [0, 0], sizes = [2, 128], strides = [1, 1]} : vector<2x384xf32> to vector<2x128xf32>
    %179 = vector.extract_strided_slice %177 {offsets = [0, 128], sizes = [2, 128], strides = [1, 1]} : vector<2x384xf32> to vector<2x128xf32>
    %180 = vector.extract_strided_slice %177 {offsets = [0, 256], sizes = [2, 128], strides = [1, 1]} : vector<2x384xf32> to vector<2x128xf32>
    %181 = vector.extract_strided_slice %155 {offsets = [0, 384], sizes = [2, 128], strides = [1, 1]} : vector<2x512xf32> to vector<2x128xf32>
    %182 = math.tanh %181 : vector<2x128xf32>
    %183 = arith.mulf %179, %146 : vector<2x128xf32>
    %184 = arith.mulf %178, %182 : vector<2x128xf32>
    %185 = arith.addf %183, %184 : vector<2x128xf32>
    %186 = math.tanh %185 : vector<2x128xf32>
    %187 = arith.mulf %180, %186 : vector<2x128xf32>
    %188 = tpu.concatenate %171, %187 in 0 : vector<2x128xf32>, vector<2x128xf32> -> vector<4x128xf32>
    %189 = arith.truncf %188 : vector<4x128xf32> to vector<4x128xbf16>
    %cst_21 = arith.constant dense<0.000000e+00> : vector<4x1024xf32>
    %190 = tpu.matmul %189, %30, %cst_21 {dimension_numbers = #tpu.dot_dimension_numbers<[1], [0], [0], [1], [0, 0, 1, 1], [], []>} : vector<4x128xbf16>, vector<128x1024xbf16>, vector<4x1024xf32> -> vector<4x1024xf32>
    %191 = vector.extract_strided_slice %190 {offsets = [0, 0], sizes = [2, 512], strides = [1, 1]} : vector<4x1024xf32> to vector<2x512xf32>
    %192 = arith.addf %16, %191 : vector<2x512xf32>
    %193 = vector.extract_strided_slice %190 {offsets = [2, 512], sizes = [2, 512], strides = [1, 1]} : vector<4x1024xf32> to vector<2x512xf32>
    %194 = arith.addf %23, %193 : vector<2x512xf32>
    %195 = vector.extract_strided_slice %192 {offsets = [0, 0], sizes = [2, 384], strides = [1, 1]} : vector<2x512xf32> to vector<2x384xf32>
    %196 = arith.negf %195 : vector<2x384xf32>
    %197 = math.exp %196 : vector<2x384xf32>
    %cst_22 = arith.constant 1.000000e+00 : f32
    %198 = vector.broadcast %cst_22 : f32 to vector<2x384xf32>
    %199 = arith.addf %198, %197 : vector<2x384xf32>
    %200 = arith.divf %198, %199 : vector<2x384xf32>
    %201 = vector.extract_strided_slice %200 {offsets = [0, 0], sizes = [2, 128], strides = [1, 1]} : vector<2x384xf32> to vector<2x128xf32>
    %202 = vector.extract_strided_slice %200 {offsets = [0, 128], sizes = [2, 128], strides = [1, 1]} : vector<2x384xf32> to vector<2x128xf32>
    %203 = vector.extract_strided_slice %200 {offsets = [0, 256], sizes = [2, 128], strides = [1, 1]} : vector<2x384xf32> to vector<2x128xf32>
    %204 = vector.extract_strided_slice %192 {offsets = [0, 384], sizes = [2, 128], strides = [1, 1]} : vector<2x512xf32> to vector<2x128xf32>
    %205 = math.tanh %204 : vector<2x128xf32>
    %206 = arith.mulf %202, %169 : vector<2x128xf32>
    %207 = arith.mulf %201, %205 : vector<2x128xf32>
    %208 = arith.addf %206, %207 : vector<2x128xf32>
    %209 = math.tanh %208 : vector<2x128xf32>
    %210 = arith.mulf %203, %209 : vector<2x128xf32>
    %211 = vector.extract_strided_slice %194 {offsets = [0, 0], sizes = [2, 384], strides = [1, 1]} : vector<2x512xf32> to vector<2x384xf32>
    %212 = arith.negf %211 : vector<2x384xf32>
    %213 = math.exp %212 : vector<2x384xf32>
    %cst_23 = arith.constant 1.000000e+00 : f32
    %214 = vector.broadcast %cst_23 : f32 to vector<2x384xf32>
    %215 = arith.addf %214, %213 : vector<2x384xf32>
    %216 = arith.divf %214, %215 : vector<2x384xf32>
    %217 = vector.extract_strided_slice %216 {offsets = [0, 0], sizes = [2, 128], strides = [1, 1]} : vector<2x384xf32> to vector<2x128xf32>
    %218 = vector.extract_strided_slice %216 {offsets = [0, 128], sizes = [2, 128], strides = [1, 1]} : vector<2x384xf32> to vector<2x128xf32>
    %219 = vector.extract_strided_slice %216 {offsets = [0, 256], sizes = [2, 128], strides = [1, 1]} : vector<2x384xf32> to vector<2x128xf32>
    %220 = vector.extract_strided_slice %194 {offsets = [0, 384], sizes = [2, 128], strides = [1, 1]} : vector<2x512xf32> to vector<2x128xf32>
    %221 = math.tanh %220 : vector<2x128xf32>
    %222 = arith.mulf %218, %185 : vector<2x128xf32>
    %223 = arith.mulf %217, %221 : vector<2x128xf32>
    %224 = arith.addf %222, %223 : vector<2x128xf32>
    %225 = math.tanh %224 : vector<2x128xf32>
    %226 = arith.mulf %219, %225 : vector<2x128xf32>
    %227 = tpu.concatenate %210, %226 in 0 : vector<2x128xf32>, vector<2x128xf32> -> vector<4x128xf32>
    %228 = arith.truncf %227 : vector<4x128xf32> to vector<4x128xbf16>
    %cst_24 = arith.constant dense<0.000000e+00> : vector<4x1024xf32>
    %229 = tpu.matmul %228, %30, %cst_24 {dimension_numbers = #tpu.dot_dimension_numbers<[1], [0], [0], [1], [0, 0, 1, 1], [], []>} : vector<4x128xbf16>, vector<128x1024xbf16>, vector<4x1024xf32> -> vector<4x1024xf32>
    %230 = vector.extract_strided_slice %229 {offsets = [0, 0], sizes = [2, 512], strides = [1, 1]} : vector<4x1024xf32> to vector<2x512xf32>
    %231 = arith.addf %17, %230 : vector<2x512xf32>
    %232 = vector.extract_strided_slice %229 {offsets = [2, 512], sizes = [2, 512], strides = [1, 1]} : vector<4x1024xf32> to vector<2x512xf32>
    %233 = arith.addf %22, %232 : vector<2x512xf32>
    %234 = vector.extract_strided_slice %231 {offsets = [0, 0], sizes = [2, 384], strides = [1, 1]} : vector<2x512xf32> to vector<2x384xf32>
    %235 = arith.negf %234 : vector<2x384xf32>
    %236 = math.exp %235 : vector<2x384xf32>
    %cst_25 = arith.constant 1.000000e+00 : f32
    %237 = vector.broadcast %cst_25 : f32 to vector<2x384xf32>
    %238 = arith.addf %237, %236 : vector<2x384xf32>
    %239 = arith.divf %237, %238 : vector<2x384xf32>
    %240 = vector.extract_strided_slice %239 {offsets = [0, 0], sizes = [2, 128], strides = [1, 1]} : vector<2x384xf32> to vector<2x128xf32>
    %241 = vector.extract_strided_slice %239 {offsets = [0, 128], sizes = [2, 128], strides = [1, 1]} : vector<2x384xf32> to vector<2x128xf32>
    %242 = vector.extract_strided_slice %239 {offsets = [0, 256], sizes = [2, 128], strides = [1, 1]} : vector<2x384xf32> to vector<2x128xf32>
    %243 = vector.extract_strided_slice %231 {offsets = [0, 384], sizes = [2, 128], strides = [1, 1]} : vector<2x512xf32> to vector<2x128xf32>
    %244 = math.tanh %243 : vector<2x128xf32>
    %245 = arith.mulf %241, %208 : vector<2x128xf32>
    %246 = arith.mulf %240, %244 : vector<2x128xf32>
    %247 = arith.addf %245, %246 : vector<2x128xf32>
    %248 = math.tanh %247 : vector<2x128xf32>
    %249 = arith.mulf %242, %248 : vector<2x128xf32>
    %250 = vector.extract_strided_slice %233 {offsets = [0, 0], sizes = [2, 384], strides = [1, 1]} : vector<2x512xf32> to vector<2x384xf32>
    %251 = arith.negf %250 : vector<2x384xf32>
    %252 = math.exp %251 : vector<2x384xf32>
    %cst_26 = arith.constant 1.000000e+00 : f32
    %253 = vector.broadcast %cst_26 : f32 to vector<2x384xf32>
    %254 = arith.addf %253, %252 : vector<2x384xf32>
    %255 = arith.divf %253, %254 : vector<2x384xf32>
    %256 = vector.extract_strided_slice %255 {offsets = [0, 0], sizes = [2, 128], strides = [1, 1]} : vector<2x384xf32> to vector<2x128xf32>
    %257 = vector.extract_strided_slice %255 {offsets = [0, 128], sizes = [2, 128], strides = [1, 1]} : vector<2x384xf32> to vector<2x128xf32>
    %258 = vector.extract_strided_slice %255 {offsets = [0, 256], sizes = [2, 128], strides = [1, 1]} : vector<2x384xf32> to vector<2x128xf32>
    %259 = vector.extract_strided_slice %233 {offsets = [0, 384], sizes = [2, 128], strides = [1, 1]} : vector<2x512xf32> to vector<2x128xf32>
    %260 = math.tanh %259 : vector<2x128xf32>
    %261 = arith.mulf %257, %224 : vector<2x128xf32>
    %262 = arith.mulf %256, %260 : vector<2x128xf32>
    %263 = arith.addf %261, %262 : vector<2x128xf32>
    %264 = math.tanh %263 : vector<2x128xf32>
    %265 = arith.mulf %258, %264 : vector<2x128xf32>
    %266 = tpu.concatenate %249, %265 in 0 : vector<2x128xf32>, vector<2x128xf32> -> vector<4x128xf32>
    %267 = arith.truncf %266 : vector<4x128xf32> to vector<4x128xbf16>
    %cst_27 = arith.constant dense<0.000000e+00> : vector<4x1024xf32>
    %268 = tpu.matmul %267, %30, %cst_27 {dimension_numbers = #tpu.dot_dimension_numbers<[1], [0], [0], [1], [0, 0, 1, 1], [], []>} : vector<4x128xbf16>, vector<128x1024xbf16>, vector<4x1024xf32> -> vector<4x1024xf32>
    %269 = vector.extract_strided_slice %268 {offsets = [0, 0], sizes = [2, 512], strides = [1, 1]} : vector<4x1024xf32> to vector<2x512xf32>
    %270 = arith.addf %18, %269 : vector<2x512xf32>
    %271 = vector.extract_strided_slice %268 {offsets = [2, 512], sizes = [2, 512], strides = [1, 1]} : vector<4x1024xf32> to vector<2x512xf32>
    %272 = arith.addf %21, %271 : vector<2x512xf32>
    %273 = vector.extract_strided_slice %270 {offsets = [0, 0], sizes = [2, 384], strides = [1, 1]} : vector<2x512xf32> to vector<2x384xf32>
    %274 = arith.negf %273 : vector<2x384xf32>
    %275 = math.exp %274 : vector<2x384xf32>
    %cst_28 = arith.constant 1.000000e+00 : f32
    %276 = vector.broadcast %cst_28 : f32 to vector<2x384xf32>
    %277 = arith.addf %276, %275 : vector<2x384xf32>
    %278 = arith.divf %276, %277 : vector<2x384xf32>
    %279 = vector.extract_strided_slice %278 {offsets = [0, 0], sizes = [2, 128], strides = [1, 1]} : vector<2x384xf32> to vector<2x128xf32>
    %280 = vector.extract_strided_slice %278 {offsets = [0, 128], sizes = [2, 128], strides = [1, 1]} : vector<2x384xf32> to vector<2x128xf32>
    %281 = vector.extract_strided_slice %278 {offsets = [0, 256], sizes = [2, 128], strides = [1, 1]} : vector<2x384xf32> to vector<2x128xf32>
    %282 = vector.extract_strided_slice %270 {offsets = [0, 384], sizes = [2, 128], strides = [1, 1]} : vector<2x512xf32> to vector<2x128xf32>
    %283 = math.tanh %282 : vector<2x128xf32>
    %284 = arith.mulf %280, %247 : vector<2x128xf32>
    %285 = arith.mulf %279, %283 : vector<2x128xf32>
    %286 = arith.addf %284, %285 : vector<2x128xf32>
    %287 = math.tanh %286 : vector<2x128xf32>
    %288 = arith.mulf %281, %287 : vector<2x128xf32>
    %289 = vector.extract_strided_slice %272 {offsets = [0, 0], sizes = [2, 384], strides = [1, 1]} : vector<2x512xf32> to vector<2x384xf32>
    %290 = arith.negf %289 : vector<2x384xf32>
    %291 = math.exp %290 : vector<2x384xf32>
    %cst_29 = arith.constant 1.000000e+00 : f32
    %292 = vector.broadcast %cst_29 : f32 to vector<2x384xf32>
    %293 = arith.addf %292, %291 : vector<2x384xf32>
    %294 = arith.divf %292, %293 : vector<2x384xf32>
    %295 = vector.extract_strided_slice %294 {offsets = [0, 0], sizes = [2, 128], strides = [1, 1]} : vector<2x384xf32> to vector<2x128xf32>
    %296 = vector.extract_strided_slice %294 {offsets = [0, 128], sizes = [2, 128], strides = [1, 1]} : vector<2x384xf32> to vector<2x128xf32>
    %297 = vector.extract_strided_slice %294 {offsets = [0, 256], sizes = [2, 128], strides = [1, 1]} : vector<2x384xf32> to vector<2x128xf32>
    %298 = vector.extract_strided_slice %272 {offsets = [0, 384], sizes = [2, 128], strides = [1, 1]} : vector<2x512xf32> to vector<2x128xf32>
    %299 = math.tanh %298 : vector<2x128xf32>
    %300 = arith.mulf %296, %263 : vector<2x128xf32>
    %301 = arith.mulf %295, %299 : vector<2x128xf32>
    %302 = arith.addf %300, %301 : vector<2x128xf32>
    %303 = math.tanh %302 : vector<2x128xf32>
    %304 = arith.mulf %297, %303 : vector<2x128xf32>
    %305 = tpu.concatenate %288, %304 in 0 : vector<2x128xf32>, vector<2x128xf32> -> vector<4x128xf32>
    %306 = arith.truncf %305 : vector<4x128xf32> to vector<4x128xbf16>
    %cst_30 = arith.constant dense<0.000000e+00> : vector<4x1024xf32>
    %307 = tpu.matmul %306, %30, %cst_30 {dimension_numbers = #tpu.dot_dimension_numbers<[1], [0], [0], [1], [0, 0, 1, 1], [], []>} : vector<4x128xbf16>, vector<128x1024xbf16>, vector<4x1024xf32> -> vector<4x1024xf32>
    %308 = vector.extract_strided_slice %307 {offsets = [0, 0], sizes = [2, 512], strides = [1, 1]} : vector<4x1024xf32> to vector<2x512xf32>
    %309 = arith.addf %19, %308 : vector<2x512xf32>
    %310 = vector.extract_strided_slice %307 {offsets = [2, 512], sizes = [2, 512], strides = [1, 1]} : vector<4x1024xf32> to vector<2x512xf32>
    %311 = arith.addf %20, %310 : vector<2x512xf32>
    %312 = vector.extract_strided_slice %309 {offsets = [0, 0], sizes = [2, 384], strides = [1, 1]} : vector<2x512xf32> to vector<2x384xf32>
    %313 = arith.negf %312 : vector<2x384xf32>
    %314 = math.exp %313 : vector<2x384xf32>
    %cst_31 = arith.constant 1.000000e+00 : f32
    %315 = vector.broadcast %cst_31 : f32 to vector<2x384xf32>
    %316 = arith.addf %315, %314 : vector<2x384xf32>
    %317 = arith.divf %315, %316 : vector<2x384xf32>
    %318 = vector.extract_strided_slice %317 {offsets = [0, 0], sizes = [2, 128], strides = [1, 1]} : vector<2x384xf32> to vector<2x128xf32>
    %319 = vector.extract_strided_slice %317 {offsets = [0, 128], sizes = [2, 128], strides = [1, 1]} : vector<2x384xf32> to vector<2x128xf32>
    %320 = vector.extract_strided_slice %317 {offsets = [0, 256], sizes = [2, 128], strides = [1, 1]} : vector<2x384xf32> to vector<2x128xf32>
    %321 = vector.extract_strided_slice %309 {offsets = [0, 384], sizes = [2, 128], strides = [1, 1]} : vector<2x512xf32> to vector<2x128xf32>
    %322 = math.tanh %321 : vector<2x128xf32>
    %323 = arith.mulf %319, %286 : vector<2x128xf32>
    %324 = arith.mulf %318, %322 : vector<2x128xf32>
    %325 = arith.addf %323, %324 : vector<2x128xf32>
    %326 = math.tanh %325 : vector<2x128xf32>
    %327 = arith.mulf %320, %326 : vector<2x128xf32>
    %328 = vector.extract_strided_slice %311 {offsets = [0, 0], sizes = [2, 384], strides = [1, 1]} : vector<2x512xf32> to vector<2x384xf32>
    %329 = arith.negf %328 : vector<2x384xf32>
    %330 = math.exp %329 : vector<2x384xf32>
    %cst_32 = arith.constant 1.000000e+00 : f32
    %331 = vector.broadcast %cst_32 : f32 to vector<2x384xf32>
    %332 = arith.addf %331, %330 : vector<2x384xf32>
    %333 = arith.divf %331, %332 : vector<2x384xf32>
    %334 = vector.extract_strided_slice %333 {offsets = [0, 0], sizes = [2, 128], strides = [1, 1]} : vector<2x384xf32> to vector<2x128xf32>
    %335 = vector.extract_strided_slice %333 {offsets = [0, 128], sizes = [2, 128], strides = [1, 1]} : vector<2x384xf32> to vector<2x128xf32>
    %336 = vector.extract_strided_slice %333 {offsets = [0, 256], sizes = [2, 128], strides = [1, 1]} : vector<2x384xf32> to vector<2x128xf32>
    %337 = vector.extract_strided_slice %311 {offsets = [0, 384], sizes = [2, 128], strides = [1, 1]} : vector<2x512xf32> to vector<2x128xf32>
    %338 = math.tanh %337 : vector<2x128xf32>
    %339 = arith.mulf %335, %302 : vector<2x128xf32>
    %340 = arith.mulf %334, %338 : vector<2x128xf32>
    %341 = arith.addf %339, %340 : vector<2x128xf32>
    %342 = math.tanh %341 : vector<2x128xf32>
    %343 = arith.mulf %336, %342 : vector<2x128xf32>
    %344 = tpu.concatenate %54, %343 in 1 : vector<2x128xf32>, vector<2x128xf32> -> vector<2x256xf32>
    %345 = tpu.concatenate %93, %304 in 1 : vector<2x128xf32>, vector<2x128xf32> -> vector<2x256xf32>
    %346 = tpu.concatenate %132, %265 in 1 : vector<2x128xf32>, vector<2x128xf32> -> vector<2x256xf32>
    %347 = tpu.concatenate %171, %226 in 1 : vector<2x128xf32>, vector<2x128xf32> -> vector<2x256xf32>
    %348 = tpu.concatenate %210, %187 in 1 : vector<2x128xf32>, vector<2x128xf32> -> vector<2x256xf32>
    %349 = tpu.concatenate %249, %148 in 1 : vector<2x128xf32>, vector<2x128xf32> -> vector<2x256xf32>
    %350 = tpu.concatenate %288, %109 in 1 : vector<2x128xf32>, vector<2x128xf32> -> vector<2x256xf32>
    %351 = tpu.concatenate %327, %70 in 1 : vector<2x128xf32>, vector<2x128xf32> -> vector<2x256xf32>
    %352 = tpu.concatenate %344, %345, %346, %347, %348, %349, %350, %351 in 0 : vector<2x256xf32>, vector<2x256xf32>, vector<2x256xf32>, vector<2x256xf32>, vector<2x256xf32>, vector<2x256xf32>, vector<2x256xf32>, vector<2x256xf32> -> vector<16x256xf32>
    %353 = arith.truncf %352 : vector<16x256xf32> to vector<16x256xbf16>
    %c1_i32_33 = arith.constant 1 : i32
    %354 = tpu.memref_slice %arg13[%c1_i32_33] : memref<3x!tpu.dma_semaphore, #tpu.memory_space<semaphore_mem>> -> memref<1x!tpu.dma_semaphore, #tpu.memory_space<semaphore_mem>>
    %355 = tpu.memref_squeeze %354 : memref<1x!tpu.dma_semaphore, #tpu.memory_space<semaphore_mem>> -> memref<!tpu.dma_semaphore, #tpu.memory_space<semaphore_mem>>
    tpu.wait_dma2 semaphore(%355 : memref<!tpu.dma_semaphore, #tpu.memory_space<semaphore_mem>>) src(%arg4 : memref<256x1024xbf16, #tpu.memory_space<any>>) dst(%arg11 : memref<256x1024xbf16, #tpu.memory_space<vmem>>)
    %c2_i32_34 = arith.constant 2 : i32
    %356 = tpu.memref_slice %arg13[%c2_i32_34] : memref<3x!tpu.dma_semaphore, #tpu.memory_space<semaphore_mem>> -> memref<1x!tpu.dma_semaphore, #tpu.memory_space<semaphore_mem>>
    %357 = tpu.memref_squeeze %356 : memref<1x!tpu.dma_semaphore, #tpu.memory_space<semaphore_mem>> -> memref<!tpu.dma_semaphore, #tpu.memory_space<semaphore_mem>>
    tpu.wait_dma2 semaphore(%357 : memref<!tpu.dma_semaphore, #tpu.memory_space<semaphore_mem>>) src(%arg5 : memref<128x1024xbf16, #tpu.memory_space<any>>) dst(%arg12 : memref<128x1024xbf16, #tpu.memory_space<vmem>>)
    %c0_35 = arith.constant 0 : index
    %c0_36 = arith.constant 0 : index
    %358 = vector.load %arg11[%c0_35, %c0_36] : memref<256x1024xbf16, #tpu.memory_space<vmem>>, vector<256x1024xbf16>
    %cst_37 = arith.constant dense<0.000000e+00> : vector<16x1024xf32>
    %359 = tpu.matmul %353, %358, %cst_37 {dimension_numbers = #tpu.dot_dimension_numbers<[1], [0], [0], [1], [0, 0, 1, 1], [], []>} : vector<16x256xbf16>, vector<256x1024xbf16>, vector<16x1024xf32> -> vector<16x1024xf32>
    %c0_38 = arith.constant 0 : index
    %c0_39 = arith.constant 0 : index
    %360 = vector.load %arg6[%c0_38, %c0_39] : memref<1x1024xf32, #tpu.memory_space<vmem>>, vector<1x1024xf32>
    %361 = vector.broadcast %360 : vector<1x1024xf32> to vector<16x1024xf32>
    %362 = arith.addf %359, %361 : vector<16x1024xf32>
    %363 = vector.extract_strided_slice %362 {offsets = [0, 0], sizes = [2, 512], strides = [1, 1]} : vector<16x1024xf32> to vector<2x512xf32>
    %364 = vector.extract_strided_slice %362 {offsets = [2, 0], sizes = [2, 512], strides = [1, 1]} : vector<16x1024xf32> to vector<2x512xf32>
    %365 = vector.extract_strided_slice %362 {offsets = [4, 0], sizes = [2, 512], strides = [1, 1]} : vector<16x1024xf32> to vector<2x512xf32>
    %366 = vector.extract_strided_slice %362 {offsets = [6, 0], sizes = [2, 512], strides = [1, 1]} : vector<16x1024xf32> to vector<2x512xf32>
    %367 = vector.extract_strided_slice %362 {offsets = [8, 0], sizes = [2, 512], strides = [1, 1]} : vector<16x1024xf32> to vector<2x512xf32>
    %368 = vector.extract_strided_slice %362 {offsets = [10, 0], sizes = [2, 512], strides = [1, 1]} : vector<16x1024xf32> to vector<2x512xf32>
    %369 = vector.extract_strided_slice %362 {offsets = [12, 0], sizes = [2, 512], strides = [1, 1]} : vector<16x1024xf32> to vector<2x512xf32>
    %370 = vector.extract_strided_slice %362 {offsets = [14, 0], sizes = [2, 512], strides = [1, 1]} : vector<16x1024xf32> to vector<2x512xf32>
    %371 = vector.extract_strided_slice %362 {offsets = [0, 512], sizes = [2, 512], strides = [1, 1]} : vector<16x1024xf32> to vector<2x512xf32>
    %372 = vector.extract_strided_slice %362 {offsets = [2, 512], sizes = [2, 512], strides = [1, 1]} : vector<16x1024xf32> to vector<2x512xf32>
    %373 = vector.extract_strided_slice %362 {offsets = [4, 512], sizes = [2, 512], strides = [1, 1]} : vector<16x1024xf32> to vector<2x512xf32>
    %374 = vector.extract_strided_slice %362 {offsets = [6, 512], sizes = [2, 512], strides = [1, 1]} : vector<16x1024xf32> to vector<2x512xf32>
    %375 = vector.extract_strided_slice %362 {offsets = [8, 512], sizes = [2, 512], strides = [1, 1]} : vector<16x1024xf32> to vector<2x512xf32>
    %376 = vector.extract_strided_slice %362 {offsets = [10, 512], sizes = [2, 512], strides = [1, 1]} : vector<16x1024xf32> to vector<2x512xf32>
    %377 = vector.extract_strided_slice %362 {offsets = [12, 512], sizes = [2, 512], strides = [1, 1]} : vector<16x1024xf32> to vector<2x512xf32>
    %378 = vector.extract_strided_slice %362 {offsets = [14, 512], sizes = [2, 512], strides = [1, 1]} : vector<16x1024xf32> to vector<2x512xf32>
    %c0_40 = arith.constant 0 : index
    %c0_41 = arith.constant 0 : index
    %379 = vector.load %arg12[%c0_40, %c0_41] : memref<128x1024xbf16, #tpu.memory_space<vmem>>, vector<128x1024xbf16>
    %cst_42 = arith.constant 0.000000e+00 : f32
    %380 = vector.broadcast %cst_42 : f32 to vector<2x128xf32>
    %381 = tpu.concatenate %380, %380 in 0 : vector<2x128xf32>, vector<2x128xf32> -> vector<4x128xf32>
    %382 = arith.truncf %381 : vector<4x128xf32> to vector<4x128xbf16>
    %cst_43 = arith.constant dense<0.000000e+00> : vector<4x1024xf32>
    %383 = tpu.matmul %382, %379, %cst_43 {dimension_numbers = #tpu.dot_dimension_numbers<[1], [0], [0], [1], [0, 0, 1, 1], [], []>} : vector<4x128xbf16>, vector<128x1024xbf16>, vector<4x1024xf32> -> vector<4x1024xf32>
    %384 = vector.extract_strided_slice %383 {offsets = [0, 0], sizes = [2, 512], strides = [1, 1]} : vector<4x1024xf32> to vector<2x512xf32>
    %385 = arith.addf %363, %384 : vector<2x512xf32>
    %386 = vector.extract_strided_slice %383 {offsets = [2, 512], sizes = [2, 512], strides = [1, 1]} : vector<4x1024xf32> to vector<2x512xf32>
    %387 = arith.addf %378, %386 : vector<2x512xf32>
    %388 = vector.extract_strided_slice %385 {offsets = [0, 0], sizes = [2, 384], strides = [1, 1]} : vector<2x512xf32> to vector<2x384xf32>
    %389 = arith.negf %388 : vector<2x384xf32>
    %390 = math.exp %389 : vector<2x384xf32>
    %cst_44 = arith.constant 1.000000e+00 : f32
    %391 = vector.broadcast %cst_44 : f32 to vector<2x384xf32>
    %392 = arith.addf %391, %390 : vector<2x384xf32>
    %393 = arith.divf %391, %392 : vector<2x384xf32>
    %394 = vector.extract_strided_slice %393 {offsets = [0, 0], sizes = [2, 128], strides = [1, 1]} : vector<2x384xf32> to vector<2x128xf32>
    %395 = vector.extract_strided_slice %393 {offsets = [0, 128], sizes = [2, 128], strides = [1, 1]} : vector<2x384xf32> to vector<2x128xf32>
    %396 = vector.extract_strided_slice %393 {offsets = [0, 256], sizes = [2, 128], strides = [1, 1]} : vector<2x384xf32> to vector<2x128xf32>
    %397 = vector.extract_strided_slice %385 {offsets = [0, 384], sizes = [2, 128], strides = [1, 1]} : vector<2x512xf32> to vector<2x128xf32>
    %398 = math.tanh %397 : vector<2x128xf32>
    %399 = arith.mulf %395, %380 : vector<2x128xf32>
    %400 = arith.mulf %394, %398 : vector<2x128xf32>
    %401 = arith.addf %399, %400 : vector<2x128xf32>
    %402 = math.tanh %401 : vector<2x128xf32>
    %403 = arith.mulf %396, %402 : vector<2x128xf32>
    %404 = vector.extract_strided_slice %387 {offsets = [0, 0], sizes = [2, 384], strides = [1, 1]} : vector<2x512xf32> to vector<2x384xf32>
    %405 = arith.negf %404 : vector<2x384xf32>
    %406 = math.exp %405 : vector<2x384xf32>
    %cst_45 = arith.constant 1.000000e+00 : f32
    %407 = vector.broadcast %cst_45 : f32 to vector<2x384xf32>
    %408 = arith.addf %407, %406 : vector<2x384xf32>
    %409 = arith.divf %407, %408 : vector<2x384xf32>
    %410 = vector.extract_strided_slice %409 {offsets = [0, 0], sizes = [2, 128], strides = [1, 1]} : vector<2x384xf32> to vector<2x128xf32>
    %411 = vector.extract_strided_slice %409 {offsets = [0, 128], sizes = [2, 128], strides = [1, 1]} : vector<2x384xf32> to vector<2x128xf32>
    %412 = vector.extract_strided_slice %409 {offsets = [0, 256], sizes = [2, 128], strides = [1, 1]} : vector<2x384xf32> to vector<2x128xf32>
    %413 = vector.extract_strided_slice %387 {offsets = [0, 384], sizes = [2, 128], strides = [1, 1]} : vector<2x512xf32> to vector<2x128xf32>
    %414 = math.tanh %413 : vector<2x128xf32>
    %415 = arith.mulf %411, %380 : vector<2x128xf32>
    %416 = arith.mulf %410, %414 : vector<2x128xf32>
    %417 = arith.addf %415, %416 : vector<2x128xf32>
    %418 = math.tanh %417 : vector<2x128xf32>
    %419 = arith.mulf %412, %418 : vector<2x128xf32>
    %420 = tpu.concatenate %403, %419 in 0 : vector<2x128xf32>, vector<2x128xf32> -> vector<4x128xf32>
    %421 = arith.truncf %420 : vector<4x128xf32> to vector<4x128xbf16>
    %cst_46 = arith.constant dense<0.000000e+00> : vector<4x1024xf32>
    %422 = tpu.matmul %421, %379, %cst_46 {dimension_numbers = #tpu.dot_dimension_numbers<[1], [0], [0], [1], [0, 0, 1, 1], [], []>} : vector<4x128xbf16>, vector<128x1024xbf16>, vector<4x1024xf32> -> vector<4x1024xf32>
    %423 = vector.extract_strided_slice %422 {offsets = [0, 0], sizes = [2, 512], strides = [1, 1]} : vector<4x1024xf32> to vector<2x512xf32>
    %424 = arith.addf %364, %423 : vector<2x512xf32>
    %425 = vector.extract_strided_slice %422 {offsets = [2, 512], sizes = [2, 512], strides = [1, 1]} : vector<4x1024xf32> to vector<2x512xf32>
    %426 = arith.addf %377, %425 : vector<2x512xf32>
    %427 = vector.extract_strided_slice %424 {offsets = [0, 0], sizes = [2, 384], strides = [1, 1]} : vector<2x512xf32> to vector<2x384xf32>
    %428 = arith.negf %427 : vector<2x384xf32>
    %429 = math.exp %428 : vector<2x384xf32>
    %cst_47 = arith.constant 1.000000e+00 : f32
    %430 = vector.broadcast %cst_47 : f32 to vector<2x384xf32>
    %431 = arith.addf %430, %429 : vector<2x384xf32>
    %432 = arith.divf %430, %431 : vector<2x384xf32>
    %433 = vector.extract_strided_slice %432 {offsets = [0, 0], sizes = [2, 128], strides = [1, 1]} : vector<2x384xf32> to vector<2x128xf32>
    %434 = vector.extract_strided_slice %432 {offsets = [0, 128], sizes = [2, 128], strides = [1, 1]} : vector<2x384xf32> to vector<2x128xf32>
    %435 = vector.extract_strided_slice %432 {offsets = [0, 256], sizes = [2, 128], strides = [1, 1]} : vector<2x384xf32> to vector<2x128xf32>
    %436 = vector.extract_strided_slice %424 {offsets = [0, 384], sizes = [2, 128], strides = [1, 1]} : vector<2x512xf32> to vector<2x128xf32>
    %437 = math.tanh %436 : vector<2x128xf32>
    %438 = arith.mulf %434, %401 : vector<2x128xf32>
    %439 = arith.mulf %433, %437 : vector<2x128xf32>
    %440 = arith.addf %438, %439 : vector<2x128xf32>
    %441 = math.tanh %440 : vector<2x128xf32>
    %442 = arith.mulf %435, %441 : vector<2x128xf32>
    %443 = vector.extract_strided_slice %426 {offsets = [0, 0], sizes = [2, 384], strides = [1, 1]} : vector<2x512xf32> to vector<2x384xf32>
    %444 = arith.negf %443 : vector<2x384xf32>
    %445 = math.exp %444 : vector<2x384xf32>
    %cst_48 = arith.constant 1.000000e+00 : f32
    %446 = vector.broadcast %cst_48 : f32 to vector<2x384xf32>
    %447 = arith.addf %446, %445 : vector<2x384xf32>
    %448 = arith.divf %446, %447 : vector<2x384xf32>
    %449 = vector.extract_strided_slice %448 {offsets = [0, 0], sizes = [2, 128], strides = [1, 1]} : vector<2x384xf32> to vector<2x128xf32>
    %450 = vector.extract_strided_slice %448 {offsets = [0, 128], sizes = [2, 128], strides = [1, 1]} : vector<2x384xf32> to vector<2x128xf32>
    %451 = vector.extract_strided_slice %448 {offsets = [0, 256], sizes = [2, 128], strides = [1, 1]} : vector<2x384xf32> to vector<2x128xf32>
    %452 = vector.extract_strided_slice %426 {offsets = [0, 384], sizes = [2, 128], strides = [1, 1]} : vector<2x512xf32> to vector<2x128xf32>
    %453 = math.tanh %452 : vector<2x128xf32>
    %454 = arith.mulf %450, %417 : vector<2x128xf32>
    %455 = arith.mulf %449, %453 : vector<2x128xf32>
    %456 = arith.addf %454, %455 : vector<2x128xf32>
    %457 = math.tanh %456 : vector<2x128xf32>
    %458 = arith.mulf %451, %457 : vector<2x128xf32>
    %459 = tpu.concatenate %442, %458 in 0 : vector<2x128xf32>, vector<2x128xf32> -> vector<4x128xf32>
    %460 = arith.truncf %459 : vector<4x128xf32> to vector<4x128xbf16>
    %cst_49 = arith.constant dense<0.000000e+00> : vector<4x1024xf32>
    %461 = tpu.matmul %460, %379, %cst_49 {dimension_numbers = #tpu.dot_dimension_numbers<[1], [0], [0], [1], [0, 0, 1, 1], [], []>} : vector<4x128xbf16>, vector<128x1024xbf16>, vector<4x1024xf32> -> vector<4x1024xf32>
    %462 = vector.extract_strided_slice %461 {offsets = [0, 0], sizes = [2, 512], strides = [1, 1]} : vector<4x1024xf32> to vector<2x512xf32>
    %463 = arith.addf %365, %462 : vector<2x512xf32>
    %464 = vector.extract_strided_slice %461 {offsets = [2, 512], sizes = [2, 512], strides = [1, 1]} : vector<4x1024xf32> to vector<2x512xf32>
    %465 = arith.addf %376, %464 : vector<2x512xf32>
    %466 = vector.extract_strided_slice %463 {offsets = [0, 0], sizes = [2, 384], strides = [1, 1]} : vector<2x512xf32> to vector<2x384xf32>
    %467 = arith.negf %466 : vector<2x384xf32>
    %468 = math.exp %467 : vector<2x384xf32>
    %cst_50 = arith.constant 1.000000e+00 : f32
    %469 = vector.broadcast %cst_50 : f32 to vector<2x384xf32>
    %470 = arith.addf %469, %468 : vector<2x384xf32>
    %471 = arith.divf %469, %470 : vector<2x384xf32>
    %472 = vector.extract_strided_slice %471 {offsets = [0, 0], sizes = [2, 128], strides = [1, 1]} : vector<2x384xf32> to vector<2x128xf32>
    %473 = vector.extract_strided_slice %471 {offsets = [0, 128], sizes = [2, 128], strides = [1, 1]} : vector<2x384xf32> to vector<2x128xf32>
    %474 = vector.extract_strided_slice %471 {offsets = [0, 256], sizes = [2, 128], strides = [1, 1]} : vector<2x384xf32> to vector<2x128xf32>
    %475 = vector.extract_strided_slice %463 {offsets = [0, 384], sizes = [2, 128], strides = [1, 1]} : vector<2x512xf32> to vector<2x128xf32>
    %476 = math.tanh %475 : vector<2x128xf32>
    %477 = arith.mulf %473, %440 : vector<2x128xf32>
    %478 = arith.mulf %472, %476 : vector<2x128xf32>
    %479 = arith.addf %477, %478 : vector<2x128xf32>
    %480 = math.tanh %479 : vector<2x128xf32>
    %481 = arith.mulf %474, %480 : vector<2x128xf32>
    %482 = vector.extract_strided_slice %465 {offsets = [0, 0], sizes = [2, 384], strides = [1, 1]} : vector<2x512xf32> to vector<2x384xf32>
    %483 = arith.negf %482 : vector<2x384xf32>
    %484 = math.exp %483 : vector<2x384xf32>
    %cst_51 = arith.constant 1.000000e+00 : f32
    %485 = vector.broadcast %cst_51 : f32 to vector<2x384xf32>
    %486 = arith.addf %485, %484 : vector<2x384xf32>
    %487 = arith.divf %485, %486 : vector<2x384xf32>
    %488 = vector.extract_strided_slice %487 {offsets = [0, 0], sizes = [2, 128], strides = [1, 1]} : vector<2x384xf32> to vector<2x128xf32>
    %489 = vector.extract_strided_slice %487 {offsets = [0, 128], sizes = [2, 128], strides = [1, 1]} : vector<2x384xf32> to vector<2x128xf32>
    %490 = vector.extract_strided_slice %487 {offsets = [0, 256], sizes = [2, 128], strides = [1, 1]} : vector<2x384xf32> to vector<2x128xf32>
    %491 = vector.extract_strided_slice %465 {offsets = [0, 384], sizes = [2, 128], strides = [1, 1]} : vector<2x512xf32> to vector<2x128xf32>
    %492 = math.tanh %491 : vector<2x128xf32>
    %493 = arith.mulf %489, %456 : vector<2x128xf32>
    %494 = arith.mulf %488, %492 : vector<2x128xf32>
    %495 = arith.addf %493, %494 : vector<2x128xf32>
    %496 = math.tanh %495 : vector<2x128xf32>
    %497 = arith.mulf %490, %496 : vector<2x128xf32>
    %498 = tpu.concatenate %481, %497 in 0 : vector<2x128xf32>, vector<2x128xf32> -> vector<4x128xf32>
    %499 = arith.truncf %498 : vector<4x128xf32> to vector<4x128xbf16>
    %cst_52 = arith.constant dense<0.000000e+00> : vector<4x1024xf32>
    %500 = tpu.matmul %499, %379, %cst_52 {dimension_numbers = #tpu.dot_dimension_numbers<[1], [0], [0], [1], [0, 0, 1, 1], [], []>} : vector<4x128xbf16>, vector<128x1024xbf16>, vector<4x1024xf32> -> vector<4x1024xf32>
    %501 = vector.extract_strided_slice %500 {offsets = [0, 0], sizes = [2, 512], strides = [1, 1]} : vector<4x1024xf32> to vector<2x512xf32>
    %502 = arith.addf %366, %501 : vector<2x512xf32>
    %503 = vector.extract_strided_slice %500 {offsets = [2, 512], sizes = [2, 512], strides = [1, 1]} : vector<4x1024xf32> to vector<2x512xf32>
    %504 = arith.addf %375, %503 : vector<2x512xf32>
    %505 = vector.extract_strided_slice %502 {offsets = [0, 0], sizes = [2, 384], strides = [1, 1]} : vector<2x512xf32> to vector<2x384xf32>
    %506 = arith.negf %505 : vector<2x384xf32>
    %507 = math.exp %506 : vector<2x384xf32>
    %cst_53 = arith.constant 1.000000e+00 : f32
    %508 = vector.broadcast %cst_53 : f32 to vector<2x384xf32>
    %509 = arith.addf %508, %507 : vector<2x384xf32>
    %510 = arith.divf %508, %509 : vector<2x384xf32>
    %511 = vector.extract_strided_slice %510 {offsets = [0, 0], sizes = [2, 128], strides = [1, 1]} : vector<2x384xf32> to vector<2x128xf32>
    %512 = vector.extract_strided_slice %510 {offsets = [0, 128], sizes = [2, 128], strides = [1, 1]} : vector<2x384xf32> to vector<2x128xf32>
    %513 = vector.extract_strided_slice %510 {offsets = [0, 256], sizes = [2, 128], strides = [1, 1]} : vector<2x384xf32> to vector<2x128xf32>
    %514 = vector.extract_strided_slice %502 {offsets = [0, 384], sizes = [2, 128], strides = [1, 1]} : vector<2x512xf32> to vector<2x128xf32>
    %515 = math.tanh %514 : vector<2x128xf32>
    %516 = arith.mulf %512, %479 : vector<2x128xf32>
    %517 = arith.mulf %511, %515 : vector<2x128xf32>
    %518 = arith.addf %516, %517 : vector<2x128xf32>
    %519 = math.tanh %518 : vector<2x128xf32>
    %520 = arith.mulf %513, %519 : vector<2x128xf32>
    %521 = vector.extract_strided_slice %504 {offsets = [0, 0], sizes = [2, 384], strides = [1, 1]} : vector<2x512xf32> to vector<2x384xf32>
    %522 = arith.negf %521 : vector<2x384xf32>
    %523 = math.exp %522 : vector<2x384xf32>
    %cst_54 = arith.constant 1.000000e+00 : f32
    %524 = vector.broadcast %cst_54 : f32 to vector<2x384xf32>
    %525 = arith.addf %524, %523 : vector<2x384xf32>
    %526 = arith.divf %524, %525 : vector<2x384xf32>
    %527 = vector.extract_strided_slice %526 {offsets = [0, 0], sizes = [2, 128], strides = [1, 1]} : vector<2x384xf32> to vector<2x128xf32>
    %528 = vector.extract_strided_slice %526 {offsets = [0, 128], sizes = [2, 128], strides = [1, 1]} : vector<2x384xf32> to vector<2x128xf32>
    %529 = vector.extract_strided_slice %526 {offsets = [0, 256], sizes = [2, 128], strides = [1, 1]} : vector<2x384xf32> to vector<2x128xf32>
    %530 = vector.extract_strided_slice %504 {offsets = [0, 384], sizes = [2, 128], strides = [1, 1]} : vector<2x512xf32> to vector<2x128xf32>
    %531 = math.tanh %530 : vector<2x128xf32>
    %532 = arith.mulf %528, %495 : vector<2x128xf32>
    %533 = arith.mulf %527, %531 : vector<2x128xf32>
    %534 = arith.addf %532, %533 : vector<2x128xf32>
    %535 = math.tanh %534 : vector<2x128xf32>
    %536 = arith.mulf %529, %535 : vector<2x128xf32>
    %537 = tpu.concatenate %520, %536 in 0 : vector<2x128xf32>, vector<2x128xf32> -> vector<4x128xf32>
    %538 = arith.truncf %537 : vector<4x128xf32> to vector<4x128xbf16>
    %cst_55 = arith.constant dense<0.000000e+00> : vector<4x1024xf32>
    %539 = tpu.matmul %538, %379, %cst_55 {dimension_numbers = #tpu.dot_dimension_numbers<[1], [0], [0], [1], [0, 0, 1, 1], [], []>} : vector<4x128xbf16>, vector<128x1024xbf16>, vector<4x1024xf32> -> vector<4x1024xf32>
    %540 = vector.extract_strided_slice %539 {offsets = [0, 0], sizes = [2, 512], strides = [1, 1]} : vector<4x1024xf32> to vector<2x512xf32>
    %541 = arith.addf %367, %540 : vector<2x512xf32>
    %542 = vector.extract_strided_slice %539 {offsets = [2, 512], sizes = [2, 512], strides = [1, 1]} : vector<4x1024xf32> to vector<2x512xf32>
    %543 = arith.addf %374, %542 : vector<2x512xf32>
    %544 = vector.extract_strided_slice %541 {offsets = [0, 0], sizes = [2, 384], strides = [1, 1]} : vector<2x512xf32> to vector<2x384xf32>
    %545 = arith.negf %544 : vector<2x384xf32>
    %546 = math.exp %545 : vector<2x384xf32>
    %cst_56 = arith.constant 1.000000e+00 : f32
    %547 = vector.broadcast %cst_56 : f32 to vector<2x384xf32>
    %548 = arith.addf %547, %546 : vector<2x384xf32>
    %549 = arith.divf %547, %548 : vector<2x384xf32>
    %550 = vector.extract_strided_slice %549 {offsets = [0, 0], sizes = [2, 128], strides = [1, 1]} : vector<2x384xf32> to vector<2x128xf32>
    %551 = vector.extract_strided_slice %549 {offsets = [0, 128], sizes = [2, 128], strides = [1, 1]} : vector<2x384xf32> to vector<2x128xf32>
    %552 = vector.extract_strided_slice %549 {offsets = [0, 256], sizes = [2, 128], strides = [1, 1]} : vector<2x384xf32> to vector<2x128xf32>
    %553 = vector.extract_strided_slice %541 {offsets = [0, 384], sizes = [2, 128], strides = [1, 1]} : vector<2x512xf32> to vector<2x128xf32>
    %554 = math.tanh %553 : vector<2x128xf32>
    %555 = arith.mulf %551, %518 : vector<2x128xf32>
    %556 = arith.mulf %550, %554 : vector<2x128xf32>
    %557 = arith.addf %555, %556 : vector<2x128xf32>
    %558 = math.tanh %557 : vector<2x128xf32>
    %559 = arith.mulf %552, %558 : vector<2x128xf32>
    %560 = vector.extract_strided_slice %543 {offsets = [0, 0], sizes = [2, 384], strides = [1, 1]} : vector<2x512xf32> to vector<2x384xf32>
    %561 = arith.negf %560 : vector<2x384xf32>
    %562 = math.exp %561 : vector<2x384xf32>
    %cst_57 = arith.constant 1.000000e+00 : f32
    %563 = vector.broadcast %cst_57 : f32 to vector<2x384xf32>
    %564 = arith.addf %563, %562 : vector<2x384xf32>
    %565 = arith.divf %563, %564 : vector<2x384xf32>
    %566 = vector.extract_strided_slice %565 {offsets = [0, 0], sizes = [2, 128], strides = [1, 1]} : vector<2x384xf32> to vector<2x128xf32>
    %567 = vector.extract_strided_slice %565 {offsets = [0, 128], sizes = [2, 128], strides = [1, 1]} : vector<2x384xf32> to vector<2x128xf32>
    %568 = vector.extract_strided_slice %565 {offsets = [0, 256], sizes = [2, 128], strides = [1, 1]} : vector<2x384xf32> to vector<2x128xf32>
    %569 = vector.extract_strided_slice %543 {offsets = [0, 384], sizes = [2, 128], strides = [1, 1]} : vector<2x512xf32> to vector<2x128xf32>
    %570 = math.tanh %569 : vector<2x128xf32>
    %571 = arith.mulf %567, %534 : vector<2x128xf32>
    %572 = arith.mulf %566, %570 : vector<2x128xf32>
    %573 = arith.addf %571, %572 : vector<2x128xf32>
    %574 = math.tanh %573 : vector<2x128xf32>
    %575 = arith.mulf %568, %574 : vector<2x128xf32>
    %576 = tpu.concatenate %559, %575 in 0 : vector<2x128xf32>, vector<2x128xf32> -> vector<4x128xf32>
    %577 = arith.truncf %576 : vector<4x128xf32> to vector<4x128xbf16>
    %cst_58 = arith.constant dense<0.000000e+00> : vector<4x1024xf32>
    %578 = tpu.matmul %577, %379, %cst_58 {dimension_numbers = #tpu.dot_dimension_numbers<[1], [0], [0], [1], [0, 0, 1, 1], [], []>} : vector<4x128xbf16>, vector<128x1024xbf16>, vector<4x1024xf32> -> vector<4x1024xf32>
    %579 = vector.extract_strided_slice %578 {offsets = [0, 0], sizes = [2, 512], strides = [1, 1]} : vector<4x1024xf32> to vector<2x512xf32>
    %580 = arith.addf %368, %579 : vector<2x512xf32>
    %581 = vector.extract_strided_slice %578 {offsets = [2, 512], sizes = [2, 512], strides = [1, 1]} : vector<4x1024xf32> to vector<2x512xf32>
    %582 = arith.addf %373, %581 : vector<2x512xf32>
    %583 = vector.extract_strided_slice %580 {offsets = [0, 0], sizes = [2, 384], strides = [1, 1]} : vector<2x512xf32> to vector<2x384xf32>
    %584 = arith.negf %583 : vector<2x384xf32>
    %585 = math.exp %584 : vector<2x384xf32>
    %cst_59 = arith.constant 1.000000e+00 : f32
    %586 = vector.broadcast %cst_59 : f32 to vector<2x384xf32>
    %587 = arith.addf %586, %585 : vector<2x384xf32>
    %588 = arith.divf %586, %587 : vector<2x384xf32>
    %589 = vector.extract_strided_slice %588 {offsets = [0, 0], sizes = [2, 128], strides = [1, 1]} : vector<2x384xf32> to vector<2x128xf32>
    %590 = vector.extract_strided_slice %588 {offsets = [0, 128], sizes = [2, 128], strides = [1, 1]} : vector<2x384xf32> to vector<2x128xf32>
    %591 = vector.extract_strided_slice %588 {offsets = [0, 256], sizes = [2, 128], strides = [1, 1]} : vector<2x384xf32> to vector<2x128xf32>
    %592 = vector.extract_strided_slice %580 {offsets = [0, 384], sizes = [2, 128], strides = [1, 1]} : vector<2x512xf32> to vector<2x128xf32>
    %593 = math.tanh %592 : vector<2x128xf32>
    %594 = arith.mulf %590, %557 : vector<2x128xf32>
    %595 = arith.mulf %589, %593 : vector<2x128xf32>
    %596 = arith.addf %594, %595 : vector<2x128xf32>
    %597 = math.tanh %596 : vector<2x128xf32>
    %598 = arith.mulf %591, %597 : vector<2x128xf32>
    %599 = vector.extract_strided_slice %582 {offsets = [0, 0], sizes = [2, 384], strides = [1, 1]} : vector<2x512xf32> to vector<2x384xf32>
    %600 = arith.negf %599 : vector<2x384xf32>
    %601 = math.exp %600 : vector<2x384xf32>
    %cst_60 = arith.constant 1.000000e+00 : f32
    %602 = vector.broadcast %cst_60 : f32 to vector<2x384xf32>
    %603 = arith.addf %602, %601 : vector<2x384xf32>
    %604 = arith.divf %602, %603 : vector<2x384xf32>
    %605 = vector.extract_strided_slice %604 {offsets = [0, 0], sizes = [2, 128], strides = [1, 1]} : vector<2x384xf32> to vector<2x128xf32>
    %606 = vector.extract_strided_slice %604 {offsets = [0, 128], sizes = [2, 128], strides = [1, 1]} : vector<2x384xf32> to vector<2x128xf32>
    %607 = vector.extract_strided_slice %604 {offsets = [0, 256], sizes = [2, 128], strides = [1, 1]} : vector<2x384xf32> to vector<2x128xf32>
    %608 = vector.extract_strided_slice %582 {offsets = [0, 384], sizes = [2, 128], strides = [1, 1]} : vector<2x512xf32> to vector<2x128xf32>
    %609 = math.tanh %608 : vector<2x128xf32>
    %610 = arith.mulf %606, %573 : vector<2x128xf32>
    %611 = arith.mulf %605, %609 : vector<2x128xf32>
    %612 = arith.addf %610, %611 : vector<2x128xf32>
    %613 = math.tanh %612 : vector<2x128xf32>
    %614 = arith.mulf %607, %613 : vector<2x128xf32>
    %615 = tpu.concatenate %598, %614 in 0 : vector<2x128xf32>, vector<2x128xf32> -> vector<4x128xf32>
    %616 = arith.truncf %615 : vector<4x128xf32> to vector<4x128xbf16>
    %cst_61 = arith.constant dense<0.000000e+00> : vector<4x1024xf32>
    %617 = tpu.matmul %616, %379, %cst_61 {dimension_numbers = #tpu.dot_dimension_numbers<[1], [0], [0], [1], [0, 0, 1, 1], [], []>} : vector<4x128xbf16>, vector<128x1024xbf16>, vector<4x1024xf32> -> vector<4x1024xf32>
    %618 = vector.extract_strided_slice %617 {offsets = [0, 0], sizes = [2, 512], strides = [1, 1]} : vector<4x1024xf32> to vector<2x512xf32>
    %619 = arith.addf %369, %618 : vector<2x512xf32>
    %620 = vector.extract_strided_slice %617 {offsets = [2, 512], sizes = [2, 512], strides = [1, 1]} : vector<4x1024xf32> to vector<2x512xf32>
    %621 = arith.addf %372, %620 : vector<2x512xf32>
    %622 = vector.extract_strided_slice %619 {offsets = [0, 0], sizes = [2, 384], strides = [1, 1]} : vector<2x512xf32> to vector<2x384xf32>
    %623 = arith.negf %622 : vector<2x384xf32>
    %624 = math.exp %623 : vector<2x384xf32>
    %cst_62 = arith.constant 1.000000e+00 : f32
    %625 = vector.broadcast %cst_62 : f32 to vector<2x384xf32>
    %626 = arith.addf %625, %624 : vector<2x384xf32>
    %627 = arith.divf %625, %626 : vector<2x384xf32>
    %628 = vector.extract_strided_slice %627 {offsets = [0, 0], sizes = [2, 128], strides = [1, 1]} : vector<2x384xf32> to vector<2x128xf32>
    %629 = vector.extract_strided_slice %627 {offsets = [0, 128], sizes = [2, 128], strides = [1, 1]} : vector<2x384xf32> to vector<2x128xf32>
    %630 = vector.extract_strided_slice %627 {offsets = [0, 256], sizes = [2, 128], strides = [1, 1]} : vector<2x384xf32> to vector<2x128xf32>
    %631 = vector.extract_strided_slice %619 {offsets = [0, 384], sizes = [2, 128], strides = [1, 1]} : vector<2x512xf32> to vector<2x128xf32>
    %632 = math.tanh %631 : vector<2x128xf32>
    %633 = arith.mulf %629, %596 : vector<2x128xf32>
    %634 = arith.mulf %628, %632 : vector<2x128xf32>
    %635 = arith.addf %633, %634 : vector<2x128xf32>
    %636 = math.tanh %635 : vector<2x128xf32>
    %637 = arith.mulf %630, %636 : vector<2x128xf32>
    %638 = vector.extract_strided_slice %621 {offsets = [0, 0], sizes = [2, 384], strides = [1, 1]} : vector<2x512xf32> to vector<2x384xf32>
    %639 = arith.negf %638 : vector<2x384xf32>
    %640 = math.exp %639 : vector<2x384xf32>
    %cst_63 = arith.constant 1.000000e+00 : f32
    %641 = vector.broadcast %cst_63 : f32 to vector<2x384xf32>
    %642 = arith.addf %641, %640 : vector<2x384xf32>
    %643 = arith.divf %641, %642 : vector<2x384xf32>
    %644 = vector.extract_strided_slice %643 {offsets = [0, 0], sizes = [2, 128], strides = [1, 1]} : vector<2x384xf32> to vector<2x128xf32>
    %645 = vector.extract_strided_slice %643 {offsets = [0, 128], sizes = [2, 128], strides = [1, 1]} : vector<2x384xf32> to vector<2x128xf32>
    %646 = vector.extract_strided_slice %643 {offsets = [0, 256], sizes = [2, 128], strides = [1, 1]} : vector<2x384xf32> to vector<2x128xf32>
    %647 = vector.extract_strided_slice %621 {offsets = [0, 384], sizes = [2, 128], strides = [1, 1]} : vector<2x512xf32> to vector<2x128xf32>
    %648 = math.tanh %647 : vector<2x128xf32>
    %649 = arith.mulf %645, %612 : vector<2x128xf32>
    %650 = arith.mulf %644, %648 : vector<2x128xf32>
    %651 = arith.addf %649, %650 : vector<2x128xf32>
    %652 = math.tanh %651 : vector<2x128xf32>
    %653 = arith.mulf %646, %652 : vector<2x128xf32>
    %654 = tpu.concatenate %637, %653 in 0 : vector<2x128xf32>, vector<2x128xf32> -> vector<4x128xf32>
    %655 = arith.truncf %654 : vector<4x128xf32> to vector<4x128xbf16>
    %cst_64 = arith.constant dense<0.000000e+00> : vector<4x1024xf32>
    %656 = tpu.matmul %655, %379, %cst_64 {dimension_numbers = #tpu.dot_dimension_numbers<[1], [0], [0], [1], [0, 0, 1, 1], [], []>} : vector<4x128xbf16>, vector<128x1024xbf16>, vector<4x1024xf32> -> vector<4x1024xf32>
    %657 = vector.extract_strided_slice %656 {offsets = [0, 0], sizes = [2, 512], strides = [1, 1]} : vector<4x1024xf32> to vector<2x512xf32>
    %658 = arith.addf %370, %657 : vector<2x512xf32>
    %659 = vector.extract_strided_slice %656 {offsets = [2, 512], sizes = [2, 512], strides = [1, 1]} : vector<4x1024xf32> to vector<2x512xf32>
    %660 = arith.addf %371, %659 : vector<2x512xf32>
    %661 = vector.extract_strided_slice %658 {offsets = [0, 0], sizes = [2, 384], strides = [1, 1]} : vector<2x512xf32> to vector<2x384xf32>
    %662 = arith.negf %661 : vector<2x384xf32>
    %663 = math.exp %662 : vector<2x384xf32>
    %cst_65 = arith.constant 1.000000e+00 : f32
    %664 = vector.broadcast %cst_65 : f32 to vector<2x384xf32>
    %665 = arith.addf %664, %663 : vector<2x384xf32>
    %666 = arith.divf %664, %665 : vector<2x384xf32>
    %667 = vector.extract_strided_slice %666 {offsets = [0, 0], sizes = [2, 128], strides = [1, 1]} : vector<2x384xf32> to vector<2x128xf32>
    %668 = vector.extract_strided_slice %666 {offsets = [0, 128], sizes = [2, 128], strides = [1, 1]} : vector<2x384xf32> to vector<2x128xf32>
    %669 = vector.extract_strided_slice %666 {offsets = [0, 256], sizes = [2, 128], strides = [1, 1]} : vector<2x384xf32> to vector<2x128xf32>
    %670 = vector.extract_strided_slice %658 {offsets = [0, 384], sizes = [2, 128], strides = [1, 1]} : vector<2x512xf32> to vector<2x128xf32>
    %671 = math.tanh %670 : vector<2x128xf32>
    %672 = arith.mulf %668, %635 : vector<2x128xf32>
    %673 = arith.mulf %667, %671 : vector<2x128xf32>
    %674 = arith.addf %672, %673 : vector<2x128xf32>
    %675 = math.tanh %674 : vector<2x128xf32>
    %676 = arith.mulf %669, %675 : vector<2x128xf32>
    %677 = vector.extract_strided_slice %660 {offsets = [0, 0], sizes = [2, 384], strides = [1, 1]} : vector<2x512xf32> to vector<2x384xf32>
    %678 = arith.negf %677 : vector<2x384xf32>
    %679 = math.exp %678 : vector<2x384xf32>
    %cst_66 = arith.constant 1.000000e+00 : f32
    %680 = vector.broadcast %cst_66 : f32 to vector<2x384xf32>
    %681 = arith.addf %680, %679 : vector<2x384xf32>
    %682 = arith.divf %680, %681 : vector<2x384xf32>
    %683 = vector.extract_strided_slice %682 {offsets = [0, 0], sizes = [2, 128], strides = [1, 1]} : vector<2x384xf32> to vector<2x128xf32>
    %684 = vector.extract_strided_slice %682 {offsets = [0, 128], sizes = [2, 128], strides = [1, 1]} : vector<2x384xf32> to vector<2x128xf32>
    %685 = vector.extract_strided_slice %682 {offsets = [0, 256], sizes = [2, 128], strides = [1, 1]} : vector<2x384xf32> to vector<2x128xf32>
    %686 = vector.extract_strided_slice %660 {offsets = [0, 384], sizes = [2, 128], strides = [1, 1]} : vector<2x512xf32> to vector<2x128xf32>
    %687 = math.tanh %686 : vector<2x128xf32>
    %688 = arith.mulf %684, %651 : vector<2x128xf32>
    %689 = arith.mulf %683, %687 : vector<2x128xf32>
    %690 = arith.addf %688, %689 : vector<2x128xf32>
    %691 = math.tanh %690 : vector<2x128xf32>
    %692 = arith.mulf %685, %691 : vector<2x128xf32>
    %693 = tpu.concatenate %692, %690, %676, %419 in 1 : vector<2x128xf32>, vector<2x128xf32>, vector<2x128xf32>, vector<2x128xf32> -> vector<2x512xf32>
    %c0_67 = arith.constant 0 : index
    %c0_68 = arith.constant 0 : index
    %694 = vector.load %arg7[%c0_67, %c0_68] : memref<512x3xf32, #tpu.memory_space<vmem>>, vector<512x3xf32>
    %cst_69 = arith.constant dense<0.000000e+00> : vector<2x3xf32>
    %695 = tpu.matmul %693, %694, %cst_69 {dimension_numbers = #tpu.dot_dimension_numbers<[1], [0], [0], [1], [0, 0, 1, 1], [], []>} : vector<2x512xf32>, vector<512x3xf32>, vector<2x3xf32> -> vector<2x3xf32>
    %c0_70 = arith.constant 0 : index
    %c0_71 = arith.constant 0 : index
    %696 = vector.load %arg8[%c0_70, %c0_71] : memref<1x3xf32, #tpu.memory_space<vmem>>, vector<1x3xf32>
    %697 = vector.broadcast %696 : vector<1x3xf32> to vector<2x3xf32>
    %698 = arith.addf %695, %697 : vector<2x3xf32>
    %c0_72 = arith.constant 0 : index
    %c0_73 = arith.constant 0 : index
    %699 = vector.load %arg9[%c0_72, %c0_73] : memref<2x3xf32, #tpu.memory_space<vmem>>, vector<2x3xf32>
    tpu.vector_store %arg9[%c0_72, %c0_73], %698 {strides = array<i32>} : memref<2x3xf32, #tpu.memory_space<vmem>>, vector<2x3xf32>,
    return
  }
}

</mosaic_0001>

<bundles_post_ra>
// kernel: lstm_model_forward.1
= control target key start
LH: loop header
LB: loop body
LE: loop exit
PB: predicated region body
PF: predicated region fallthrough
CT: control target
= control target key end

     0   :  { %14 = vsyncpa [#allocation7], 0  ;;  %s13249_s0 = inlined_call_operand.vmem [shape: bf16[16,256], index: 0, kind: input, shape index: {}]   ;;  %s13250_s1 = inlined_call_operand.hbm [shape: bf16[256,1024], index: 1, kind: input, shape index: {}]   ;;  %s13251_s2 = inlined_call_operand.vmem [shape: f32[1,1024], index: 2, kind: input, shape index: {}]   ;;  %s13252_s3 = inlined_call_operand.vmem [shape: bf16[128,1024], index: 3, kind: input, shape index: {}]   ;;  %s13253_s4 = inlined_call_operand.hbm [shape: bf16[256,1024], index: 4, kind: input, shape index: {}]   ;;  %s13254_s5 = inlined_call_operand.hbm [shape: bf16[128,1024], index: 5, kind: input, shape index: {}]   ;;  %s13255_s6 = inlined_call_operand.vmem [shape: f32[1,1024], index: 6, kind: input, shape index: {}]   ;;  %s13256_s7 = inlined_call_operand.vmem [shape: f32[512,3], index: 7, kind: input, shape index: {}]   ;;  %s13257_s8 = inlined_call_operand.vmem [shape: f32[1,3], index: 8, kind: input, shape index: {}]   ;;  %s13258_s9 = inlined_call_operand.hbm [shape: f32[2,3], index: 9, kind: output, shape index: {}]  }
   0x1   :  { %15 = vsyncpa [#allocation8], 0  ;;  %s22_s11 = sshll.u32 %s13250_s1, 4  ;;  %s10162_s12 = smov [#allocation6]   ;;  %s23_s11 = int_to_ptr.hbm [resolvable:$true] %s22_s11 }
   0x2   :  { %s24_s13 = sshll.u32 %s10162_s12, 4  ;;  %s10163_s14 = smov 512   ;;  %s25_s13 = int_to_ptr.vmem [resolvable:$true] %s24_s13 }
   0x3   :  { %s10164_s15 = smov 32  }
   0x4   :  { %30 = dma.hbm_to_vmem [thread:$0]  %s23_s11, 16384, %s25_s13, [#allocation7], %s10163_s14, %s10163_s14, %s10164_s15  }
   0x5   :  { %10152 = dma.done.wait [#allocation7], 16384  }
   0x6   :  { %10153 = vsyncadd [#allocation7], 4294950912  ;;  %v53_v0 = vld [vmem:[%s13252_s3] sm:$0xff]  ;;  %v55_v1 = vld [vmem:[%s13252_s3 + $0x8] sm:$0xff] }
   0x7   :  { %v57_v2 = vld [vmem:[%s13252_s3 + $0x10] sm:$0xff]  ;;  %54 = vst [vmem:[#allocation2] sm:$0xff] %v53_v0  ;;  %v59_v3 = vld [vmem:[%s13252_s3 + $0x18] sm:$0xff]  ;;  %v61_v4 = vld [vmem:[%s13252_s3 + $0x20] sm:$0xff] }
   0x8   :  { %56 = vst [vmem:[#allocation2 + $0x8] sm:$0xff] %v55_v1  ;;  %v63_v5 = vld [vmem:[%s13252_s3 + $0x28] sm:$0xff]  ;;  %v65_v6 = vld [vmem:[%s13252_s3 + $0x30] sm:$0xff]  ;;  %v67_v7 = vld [vmem:[%s13252_s3 + $0x38] sm:$0xff] }
   0x9   :  { %58 = vst [vmem:[#allocation2 + $0x10] sm:$0xff] %v57_v2  ;;  %v69_v8 = vld [vmem:[%s13252_s3 + $0x40] sm:$0xff]  ;;  %v71_v9 = vld [vmem:[%s13252_s3 + $0x48] sm:$0xff]  ;;  %v73_v10 = vld [vmem:[%s13252_s3 + $0x50] sm:$0xff] }
   0xa   :  { %60 = vst [vmem:[#allocation2 + $0x18] sm:$0xff] %v59_v3  ;;  %v75_v11 = vld [vmem:[%s13252_s3 + $0x58] sm:$0xff]  ;;  %v77_v12 = vld [vmem:[%s13252_s3 + $0x60] sm:$0xff]  ;;  %v79_v13 = vld [vmem:[%s13252_s3 + $0x68] sm:$0xff] }
   0xb   :  { %62 = vst [vmem:[#allocation2 + $0x20] sm:$0xff] %v61_v4  ;;  %v81_v14 = vld [vmem:[%s13252_s3 + $0x70] sm:$0xff]  ;;  %v83_v15 = vld [vmem:[%s13252_s3 + $0x78] sm:$0xff]  ;;  %v85_v16 = vld [vmem:[%s13252_s3 + $0x80] sm:$0xff] }
   0xc   :  { %64 = vst [vmem:[#allocation2 + $0x28] sm:$0xff] %v63_v5  ;;  %v87_v17 = vld [vmem:[%s13252_s3 + $0x88] sm:$0xff]  ;;  %v89_v18 = vld [vmem:[%s13252_s3 + $0x90] sm:$0xff]  ;;  %v91_v19 = vld [vmem:[%s13252_s3 + $0x98] sm:$0xff] }
   0xd   :  { %66 = vst [vmem:[#allocation2 + $0x30] sm:$0xff] %v65_v6  ;;  %v93_v20 = vld [vmem:[%s13252_s3 + $0xa0] sm:$0xff]  ;;  %v95_v21 = vld [vmem:[%s13252_s3 + $0xa8] sm:$0xff]  ;;  %v97_v22 = vld [vmem:[%s13252_s3 + $0xb0] sm:$0xff] }
   0xe   :  { %68 = vst [vmem:[#allocation2 + $0x38] sm:$0xff] %v67_v7  ;;  %v99_v23 = vld [vmem:[%s13252_s3 + $0xb8] sm:$0xff]  ;;  %v101_v24 = vld [vmem:[%s13252_s3 + $0xc0] sm:$0xff]  ;;  %v103_v25 = vld [vmem:[%s13252_s3 + $0xc8] sm:$0xff] }
   0xf   :  { %70 = vst [vmem:[#allocation2 + $0x40] sm:$0xff] %v69_v8  ;;  %v105_v26 = vld [vmem:[%s13252_s3 + $0xd0] sm:$0xff]  ;;  %v107_v27 = vld [vmem:[%s13252_s3 + $0xd8] sm:$0xff]  ;;  %v109_v28 = vld [vmem:[%s13252_s3 + $0xe0] sm:$0xff] }
  0x10   :  { %72 = vst [vmem:[#allocation2 + $0x48] sm:$0xff] %v71_v9  ;;  %v111_v29 = vld [vmem:[%s13252_s3 + $0xe8] sm:$0xff]  ;;  %v113_v30 = vld [vmem:[%s13252_s3 + $0xf0] sm:$0xff]  ;;  %v115_v31 = vld [vmem:[%s13252_s3 + $0xf8] sm:$0xff] }
  0x11   :  { %74 = vst [vmem:[#allocation2 + $0x50] sm:$0xff] %v73_v10  ;;  %v117_v32 = vld [vmem:[%s13252_s3 + $0x100] sm:$0xff]  ;;  %v119_v33 = vld [vmem:[%s13252_s3 + $0x108] sm:$0xff]  ;;  %v121_v34 = vld [vmem:[%s13252_s3 + $0x110] sm:$0xff] }
  0x12   :  { %76 = vst [vmem:[#allocation2 + $0x58] sm:$0xff] %v75_v11  ;;  %v123_v35 = vld [vmem:[%s13252_s3 + $0x118] sm:$0xff]  ;;  %v125_v36 = vld [vmem:[%s13252_s3 + $0x120] sm:$0xff]  ;;  %v127_v37 = vld [vmem:[%s13252_s3 + $0x128] sm:$0xff] }
  0x13   :  { %78 = vst [vmem:[#allocation2 + $0x60] sm:$0xff] %v77_v12  ;;  %v129_v38 = vld [vmem:[%s13252_s3 + $0x130] sm:$0xff]  ;;  %v131_v39 = vld [vmem:[%s13252_s3 + $0x138] sm:$0xff]  ;;  %v133_v40 = vld [vmem:[%s13252_s3 + $0x140] sm:$0xff] }
  0x14   :  { %80 = vst [vmem:[#allocation2 + $0x68] sm:$0xff] %v79_v13  ;;  %v135_v41 = vld [vmem:[%s13252_s3 + $0x148] sm:$0xff]  ;;  %v137_v42 = vld [vmem:[%s13252_s3 + $0x150] sm:$0xff]  ;;  %v139_v43 = vld [vmem:[%s13252_s3 + $0x158] sm:$0xff] }
  0x15   :  { %82 = vst [vmem:[#allocation2 + $0x70] sm:$0xff] %v81_v14  ;;  %v141_v44 = vld [vmem:[%s13252_s3 + $0x160] sm:$0xff]  ;;  %v143_v45 = vld [vmem:[%s13252_s3 + $0x168] sm:$0xff]  ;;  %v145_v46 = vld [vmem:[%s13252_s3 + $0x170] sm:$0xff] }
  0x16   :  { %84 = vst [vmem:[#allocation2 + $0x78] sm:$0xff] %v83_v15  ;;  %v147_v47 = vld [vmem:[%s13252_s3 + $0x178] sm:$0xff]  ;;  %v149_v48 = vld [vmem:[%s13252_s3 + $0x180] sm:$0xff]  ;;  %v151_v49 = vld [vmem:[%s13252_s3 + $0x188] sm:$0xff] }
  0x17   :  { %86 = vst [vmem:[#allocation2 + $0x80] sm:$0xff] %v85_v16  ;;  %v153_v50 = vld [vmem:[%s13252_s3 + $0x190] sm:$0xff]  ;;  %v155_v51 = vld [vmem:[%s13252_s3 + $0x198] sm:$0xff]  ;;  %v157_v52 = vld [vmem:[%s13252_s3 + $0x1a0] sm:$0xff] }
  0x18   :  { %88 = vst [vmem:[#allocation2 + $0x88] sm:$0xff] %v87_v17  ;;  %v159_v53 = vld [vmem:[%s13252_s3 + $0x1a8] sm:$0xff]  ;;  %v161_v54 = vld [vmem:[%s13252_s3 + $0x1b0] sm:$0xff]  ;;  %v163_v55 = vld [vmem:[%s13252_s3 + $0x1b8] sm:$0xff] }
  0x19   :  { %90 = vst [vmem:[#allocation2 + $0x90] sm:$0xff] %v89_v18  ;;  %v165_v56 = vld [vmem:[%s13252_s3 + $0x1c0] sm:$0xff]  ;;  %v167_v57 = vld [vmem:[%s13252_s3 + $0x1c8] sm:$0xff]  ;;  %v169_v58 = vld [vmem:[%s13252_s3 + $0x1d0] sm:$0xff] }
  0x1a   :  { %92 = vst [vmem:[#allocation2 + $0x98] sm:$0xff] %v91_v19  ;;  %v171_v59 = vld [vmem:[%s13252_s3 + $0x1d8] sm:$0xff]  ;;  %v173_v60 = vld [vmem:[%s13252_s3 + $0x1e0] sm:$0xff]  ;;  %v175_v61 = vld [vmem:[%s13252_s3 + $0x1e8] sm:$0xff] }
  0x1b   :  { %94 = vst [vmem:[#allocation2 + $0xa0] sm:$0xff] %v93_v20  ;;  %v177_v62 = vld [vmem:[%s13252_s3 + $0x1f0] sm:$0xff]  ;;  %v179_v63 = vld [vmem:[%s13252_s3 + $0x1f8] sm:$0xff]  ;;  %v7741_v0 = vld [vmem:[#allocation6 + $0x1c0] sm:$0xf] }
  0x1c   :  { %96 = vst [vmem:[#allocation2 + $0xa8] sm:$0xff] %v95_v21  ;;  %v9212_v1 = vld [vmem:[#allocation6 + $0x1dc] sm:$0xf0]  ;;  %v9208_v5 = vld [vmem:[#allocation6 + $0x1c4] sm:$0xf] }
  0x1d   :  { %98 = vst [vmem:[#allocation2 + $0xb0] sm:$0xff] %v97_v22  ;;  %v7997_v2 = vld [vmem:[#allocation6 + $0x3c0] sm:$0xf]  ;;  %v7742_v3 = vor.u32 %v9212_v1, %v7741_v0  ;;  %v7743_v6 = vld [vmem:[#allocation6 + $0x1e0] sm:$0xf0] }
  0x1e   :  { %100 = vst [vmem:[#allocation2 + $0xb8] sm:$0xff] %v99_v23  ;;  %v9276_v4 = vld [vmem:[#allocation6 + $0x3dc] sm:$0xf0]  ;;  %v7746_v8 = vor.u32 %v9208_v5, %v7743_v6  ;;  %v9272_v9 = vld [vmem:[#allocation6 + $0x3c4] sm:$0xf] }
  0x1f   :  { %102 = vst [vmem:[#allocation2 + $0xc0] sm:$0xff] %v101_v24  ;;  %v7998_v7 = vor.u32 %v9276_v4, %v7997_v2  ;;  %v7999_v10 = vld [vmem:[#allocation6 + $0x3e0] sm:$0xf0]  ;;  %v7709_v11 = vld [vmem:[#allocation6 + $0x180] sm:$0xf]  ;;  %1013 = vmatpush.bf16.msra.mxu0 %v7742_v3 }
  0x20   :  { %104 = vst [vmem:[#allocation2 + $0xc8] sm:$0xff] %v103_v25  ;;  %v8002_v12 = vor.u32 %v9272_v9, %v7999_v10  ;;  %v9204_v13 = vld [vmem:[#allocation6 + $0x19c] sm:$0xf0]  ;;  %1041 = vmatpush.bf16.msra.mxu2 %v7746_v8  ;;  %v9200_v18 = vld [vmem:[#allocation6 + $0x184] sm:$0xf] }
  0x21   :  { %106 = vst [vmem:[#allocation2 + $0xd0] sm:$0xff] %v105_v26  ;;  %v7965_v14 = vld [vmem:[#allocation6 + $0x380] sm:$0xf]  ;;  %1027 = vmatpush.bf16.msra.mxu1 %v7998_v7  ;;  %v7710_v16 = vor.u32 %v9204_v13, %v7709_v11  ;;  %v7711_v19 = vld [vmem:[#allocation6 + $0x1a0] sm:$0xf0] }
  0x22   :  { %108 = vst [vmem:[#allocation2 + $0xd8] sm:$0xff] %v107_v27  ;;  %v9268_v15 = vld [vmem:[#allocation6 + $0x39c] sm:$0xf0]  ;;  %v9264_v20 = vld [vmem:[#allocation6 + $0x384] sm:$0xf]  ;;  %1055 = vmatpush.bf16.msra.mxu3 %v8002_v12  ;;  %v7714_v21 = vor.u32 %v9200_v18, %v7711_v19 }
  0x23   :  { %110 = vst [vmem:[#allocation2 + $0xe0] sm:$0xff] %v109_v28  ;;  %v7966_v17 = vor.u32 %v9268_v15, %v7965_v14  ;;  %v7967_v22 = vld [vmem:[#allocation6 + $0x3a0] sm:$0xf0]  ;;  %v7677_v23 = vld [vmem:[#allocation6 + $0x140] sm:$0xf]  ;;  %1014 = vmatpush.bf16.msra.mxu0 %v7710_v16 }
  0x24   :  { %112 = vst [vmem:[#allocation2 + $0xe8] sm:$0xff] %v111_v29  ;;  %v9196_v24 = vld [vmem:[#allocation6 + $0x15c] sm:$0xf0]  ;;  %v7970_v25 = vor.u32 %v9264_v20, %v7967_v22  ;;  %v9192_v28 = vld [vmem:[#allocation6 + $0x144] sm:$0xf]  ;;  %1042 = vmatpush.bf16.msra.mxu2 %v7714_v21 }
  0x25   :  { %114 = vst [vmem:[#allocation2 + $0xf0] sm:$0xff] %v113_v30  ;;  %v7933_v26 = vld [vmem:[#allocation6 + $0x340] sm:$0xf]  ;;  %v7678_v29 = vor.u32 %v9196_v24, %v7677_v23  ;;  %v7679_v30 = vld [vmem:[#allocation6 + $0x160] sm:$0xf0]  ;;  %1028 = vmatpush.bf16.msra.mxu1 %v7966_v17 }
  0x26   :  { %116 = vst [vmem:[#allocation2 + $0xf8] sm:$0xff] %v115_v31  ;;  %v9260_v27 = vld [vmem:[#allocation6 + $0x35c] sm:$0xf0]  ;;  %v9256_v31 = vld [vmem:[#allocation6 + $0x344] sm:$0xf]  ;;  %1056 = vmatpush.bf16.msra.mxu3 %v7970_v25 }
  0x27   :  { %118 = vst [vmem:[#allocation2 + $0x100] sm:$0xff] %v117_v32  ;;  %v7935_v32 = vld [vmem:[#allocation6 + $0x360] sm:$0xf0]  ;;  %1015 = vmatpush.bf16.msra.mxu0 %v7678_v29  ;;  %v7549_v7 = vld [vmem:[#allocation6 + $0x40] sm:$0xf] }
  0x28   :  { %120 = vst [vmem:[#allocation2 + $0x108] sm:$0xff] %v119_v33  ;;  %v7934_v33 = vor.u32 %v9260_v27, %v7933_v26  ;;  %v9168_v0 = vld [vmem:[#allocation6 + $0x84] sm:$0xf]  ;;  %v9164_v8 = vld [vmem:[#allocation6 + $0x5c] sm:$0xf0] }
  0x29   :  { %122 = vst [vmem:[#allocation2 + $0x110] sm:$0xff] %v121_v34  ;;  %v7682_v34 = vor.u32 %v9192_v28, %v7679_v30  ;;  %v7583_v1 = vld [vmem:[#allocation6 + $0xa0] sm:$0xf0]  ;;  %v7805_v9 = vld [vmem:[#allocation6 + $0x240] sm:$0xf]  ;;  %v7550_v16 = vor.u32 %v9164_v8, %v7549_v7 }
  0x2a   :  { %124 = vst [vmem:[#allocation2 + $0x118] sm:$0xff] %v123_v35  ;;  %v7645_v35 = vld [vmem:[#allocation6 + $0x100] sm:$0xf]  ;;  %1029 = vmatpush.bf16.msra.mxu1 %v7934_v33  ;;  %v9232_v2 = vld [vmem:[#allocation6 + $0x284] sm:$0xf]  ;;  %v7586_v6 = vor.u32 %v9168_v0, %v7583_v1 }
  0x2b   :  { %126 = vst [vmem:[#allocation2 + $0x120] sm:$0xff] %v125_v36  ;;  %v9188_v36 = vld [vmem:[#allocation6 + $0x11c] sm:$0xf0]  ;;  %1043 = vmatpush.bf16.msra.mxu2 %v7682_v34  ;;  %v7839_v3 = vld [vmem:[#allocation6 + $0x2a0] sm:$0xf0] }
  0x2c   :  { %128 = vst [vmem:[#allocation2 + $0x128] sm:$0xff] %v127_v37  ;;  %v7901_v37 = vld [vmem:[#allocation6 + $0x300] sm:$0xf]  ;;  %v7842_v10 = vor.u32 %v9232_v2, %v7839_v3  ;;  %v9160_v12 = vld [vmem:[#allocation6 + $0x44] sm:$0xf] }
  0x2d   :  { %130 = vst [vmem:[#allocation2 + $0x130] sm:$0xff] %v129_v38  ;;  %v7938_v38 = vor.u32 %v9256_v31, %v7935_v32  ;;  %v9228_v11 = vld [vmem:[#allocation6 + $0x25c] sm:$0xf0]  ;;  %v7551_v13 = vld [vmem:[#allocation6 + $0x60] sm:$0xf0] }
  0x2e   :  { %132 = vst [vmem:[#allocation2 + $0x138] sm:$0xff] %v131_v39  ;;  %v9252_v39 = vld [vmem:[#allocation6 + $0x31c] sm:$0xf0]  ;;  %v9224_v14 = vld [vmem:[#allocation6 + $0x244] sm:$0xf]  ;;  %v7806_v19 = vor.u32 %v9228_v11, %v7805_v9  ;;  %v7554_v20 = vor.u32 %v9160_v12, %v7551_v13 }
  0x2f   :  { %134 = vst [vmem:[#allocation2 + $0x140] sm:$0xff] %v133_v40  ;;  %v9184_v40 = vld [vmem:[#allocation6 + $0x104] sm:$0xf]  ;;  %1057 = vmatpush.bf16.msra.mxu3 %v7938_v38  ;;  %v7517_v17 = vld [vmem:[#allocation6] sm:$0xf] }
  0x30   :  { %136 = vst [vmem:[#allocation2 + $0x148] sm:$0xff] %v135_v41  ;;  %v7647_v41 = vld [vmem:[#allocation6 + $0x120] sm:$0xf0]  ;;  %v9156_v18 = vld [vmem:[#allocation6 + $0x1c] sm:$0xf0] }
  0x31   :  { %138 = vst [vmem:[#allocation2 + $0x150] sm:$0xff] %v137_v42  ;;  %v9248_v42 = vld [vmem:[#allocation6 + $0x304] sm:$0xf]  ;;  %v7773_v21 = vld [vmem:[#allocation6 + $0x200] sm:$0xf]  ;;  %v7518_v31 = vor.u32 %v9156_v18, %v7517_v17 }
  0x32   :  { %140 = vst [vmem:[#allocation2 + $0x158] sm:$0xff] %v139_v43  ;;  %v7903_v43 = vld [vmem:[#allocation6 + $0x320] sm:$0xf0]  ;;  %v9220_v22 = vld [vmem:[#allocation6 + $0x21c] sm:$0xf0] }
  0x33   :  { %142 = vst [vmem:[#allocation2 + $0x160] sm:$0xff] %v141_v44  ;;  %v7646_v44 = vor.u32 %v9188_v36, %v7645_v35  ;;  %v7807_v15 = vld [vmem:[#allocation6 + $0x260] sm:$0xf0]  ;;  %v7749_v28 = vld [vmem:[#allocation6 + $0x1c8] sm:$0xf]  ;;  %v7774_v35 = vor.u32 %v9220_v22, %v7773_v21 }
  0x34   :  { %144 = vst [vmem:[#allocation2 + $0x168] sm:$0xff] %v143_v45  ;;  %v7902_v45 = vor.u32 %v9252_v39, %v7901_v37  ;;  %v9152_v23 = vld [vmem:[#allocation6 + $0x4] sm:$0xf]  ;;  %v7810_v24 = vor.u32 %v9224_v14, %v7807_v15  ;;  %v9213_v29 = vld [vmem:[#allocation6 + $0x1e4] sm:$0xf0] }
  0x35   :  { %146 = vst [vmem:[#allocation2 + $0x170] sm:$0xff] %v145_v46  ;;  %v7650_v46 = vor.u32 %v9184_v40, %v7647_v41  ;;  %1016 = vmatpush.bf16.msra.mxu0 %v7646_v44  ;;  %v7519_v25 = vld [vmem:[#allocation6 + $0x20] sm:$0xf0]  ;;  %v8005_v30 = vld [vmem:[#allocation6 + $0x3c8] sm:$0xf]  ;;  %v7750_v40 = vor.u32 %v9213_v29, %v7749_v28 }
  0x36   :  { %148 = vst [vmem:[#allocation2 + $0x178] sm:$0xff] %v147_v47  ;;  %v7613_v47 = vld [vmem:[#allocation6 + $0xc0] sm:$0xf]  ;;  %1030 = vmatpush.bf16.msra.mxu1 %v7902_v45  ;;  %v9216_v26 = vld [vmem:[#allocation6 + $0x204] sm:$0xf]  ;;  %v7522_v36 = vor.u32 %v9152_v23, %v7519_v25 }
  0x37   :  { %150 = vst [vmem:[#allocation2 + $0x180] sm:$0xff] %v149_v48  ;;  %v9180_v48 = vld [vmem:[#allocation6 + $0xdc] sm:$0xf0]  ;;  %1044 = vmatpush.bf16.msra.mxu2 %v7650_v46  ;;  %v7775_v27 = vld [vmem:[#allocation6 + $0x220] sm:$0xf0] }
  0x38   :  { %152 = vst [vmem:[#allocation2 + $0x188] sm:$0xff] %v151_v49  ;;  %v7869_v49 = vld [vmem:[#allocation6 + $0x2c0] sm:$0xf]  ;;  %v9277_v32 = vld [vmem:[#allocation6 + $0x3e4] sm:$0xf0]  ;;  %v7778_v39 = vor.u32 %v9216_v26, %v7775_v27 }
  0x39   :  { %154 = vst [vmem:[#allocation2 + $0x190] sm:$0xff] %v153_v50  ;;  %v7906_v50 = vor.u32 %v9248_v42, %v7903_v43  ;;  %v9209_v33 = vld [vmem:[#allocation6 + $0x1cc] sm:$0xf]  ;;  %v8006_v41 = vor.u32 %v9277_v32, %v8005_v30  ;;  %v7717_v43 = vld [vmem:[#allocation6 + $0x188] sm:$0xf] }
  0x3a   :  { %156 = vst [vmem:[#allocation2 + $0x198] sm:$0xff] %v155_v51  ;;  %v9244_v51 = vld [vmem:[#allocation6 + $0x2dc] sm:$0xf0]  ;;  %v7751_v34 = vld [vmem:[#allocation6 + $0x1e8] sm:$0xf0] }
  0x3b   :  { %158 = vst [vmem:[#allocation2 + $0x1a0] sm:$0xff] %v157_v52  ;;  %v9176_v52 = vld [vmem:[#allocation6 + $0xc4] sm:$0xf]  ;;  %1058 = vmatpush.bf16.msra.mxu3 %v7906_v50  ;;  %v9273_v37 = vld [vmem:[#allocation6 + $0x3cc] sm:$0xf]  ;;  %v7754_v42 = vor.u32 %v9209_v33, %v7751_v34 }
  0x3c   :  { %160 = vst [vmem:[#allocation2 + $0x1a8] sm:$0xff] %v159_v53  ;;  %v7615_v53 = vld [vmem:[#allocation6 + $0xe0] sm:$0xf0]  ;;  %v8007_v38 = vld [vmem:[#allocation6 + $0x3e8] sm:$0xf0] }
  0x3d   :  { %162 = vst [vmem:[#allocation2 + $0x1b0] sm:$0xff] %v161_v54  ;;  %v9240_v54 = vld [vmem:[#allocation6 + $0x2c4] sm:$0xf]  ;;  %v9205_v44 = vld [vmem:[#allocation6 + $0x1a4] sm:$0xf0]  ;;  %v8010_v46 = vor.u32 %v9273_v37, %v8007_v38 }
  0x3e   :  { %164 = vst [vmem:[#allocation2 + $0x1b8] sm:$0xff] %v163_v55  ;;  %v7871_v55 = vld [vmem:[#allocation6 + $0x2e0] sm:$0xf0]  ;;  %v7973_v45 = vld [vmem:[#allocation6 + $0x388] sm:$0xf] }
  0x3f   :  { %166 = vst [vmem:[#allocation2 + $0x1c0] sm:$0xff] %v165_v56  ;;  %v7614_v56 = vor.u32 %v9180_v48, %v7613_v47  ;;  %v9269_v47 = vld [vmem:[#allocation6 + $0x3a4] sm:$0xf0]  ;;  %v9201_v48 = vld [vmem:[#allocation6 + $0x18c] sm:$0xf] }
  0x40   :  { %168 = vst [vmem:[#allocation2 + $0x1c8] sm:$0xff] %v167_v57  ;;  %v7870_v57 = vor.u32 %v9244_v51, %v7869_v49  ;;  %v7719_v49 = vld [vmem:[#allocation6 + $0x1a8] sm:$0xf0]  ;;  %v7653_v0 = vld [vmem:[#allocation6 + $0x108] sm:$0xf] }
  0x41   :  { %170 = vst [vmem:[#allocation2 + $0x1d0] sm:$0xff] %v169_v58  ;;  %v7618_v58 = vor.u32 %v9176_v52, %v7615_v53  ;;  %1017 = vmatpush.bf16.msra.mxu0 %v7614_v56  ;;  %v9265_v50 = vld [vmem:[#allocation6 + $0x38c] sm:$0xf]  ;;  %v7718_v52 = vor.u32 %v9205_v44, %v7717_v43  ;;  %v7974_v53 = vor.u32 %v9269_v47, %v7973_v45  ;;  %v9197_v56 = vld [vmem:[#allocation6 + $0x164] sm:$0xf0] }
  0x42   :  { %172 = vst [vmem:[#allocation2 + $0x1d8] sm:$0xff] %v171_v59  ;;  %v7581_v59 = vld [vmem:[#allocation6 + $0x80] sm:$0xf]  ;;  %1031 = vmatpush.bf16.msra.mxu1 %v7870_v57  ;;  %v7975_v51 = vld [vmem:[#allocation6 + $0x3a8] sm:$0xf0] }
  0x43   :  { %174 = vst [vmem:[#allocation2 + $0x1e0] sm:$0xff] %v173_v60  ;;  %v9172_v60 = vld [vmem:[#allocation6 + $0x9c] sm:$0xf0]  ;;  %1045 = vmatpush.bf16.msra.mxu2 %v7618_v58  ;;  %v7941_v57 = vld [vmem:[#allocation6 + $0x348] sm:$0xf]  ;;  %v7978_v58 = vor.u32 %v9265_v50, %v7975_v51 }
  0x44   :  { %176 = vst [vmem:[#allocation2 + $0x1e8] sm:$0xff] %v175_v61  ;;  %v7837_v61 = vld [vmem:[#allocation6 + $0x280] sm:$0xf]  ;;  %v7582_v4 = vor.u32 %v9172_v60, %v7581_v59  ;;  %v9261_v59 = vld [vmem:[#allocation6 + $0x364] sm:$0xf0] }
  0x45   :  { %178 = vst [vmem:[#allocation2 + $0x1f0] sm:$0xff] %v177_v62  ;;  %v7874_v62 = vor.u32 %v9240_v54, %v7871_v55  ;;  %v7722_v54 = vor.u32 %v9201_v48, %v7719_v49  ;;  %v7685_v55 = vld [vmem:[#allocation6 + $0x148] sm:$0xf]  ;;  %v9193_v60 = vld [vmem:[#allocation6 + $0x14c] sm:$0xf] }
  0x46   :  { %180 = vst [vmem:[#allocation2 + $0x1f8] sm:$0xff] %v179_v63  ;;  %v9236_v63 = vld [vmem:[#allocation6 + $0x29c] sm:$0xf0]  ;;  %1018 = vmatpush.bf16.msra.mxu0 %v7582_v4  ;;  %v7686_v1 = vor.u32 %v9197_v56, %v7685_v55  ;;  %v9189_v2 = vld [vmem:[#allocation6 + $0x124] sm:$0xf0] }
  0x47   :  { %v7838_v5 = vor.u32 %v9236_v63, %v7837_v61  ;;  %1059 = vmatpush.bf16.msra.mxu3 %v7874_v62  ;;  %1046 = vmatpush.bf16.msra.mxu2 %v7586_v6  ;;  %v7687_v61 = vld [vmem:[#allocation6 + $0x168] sm:$0xf0]  ;;  %v7509_v3 = vld [vmem:[%s13249_s0] sm:$0xf]  ;;  %v9151_v4 = vld [vmem:[%s13249_s0 + $0x4] sm:$0xf0]  ;;  %v7654_v18 = vor.u32 %v9189_v2, %v7653_v0 }
  0x48   :  { %v9257_v62 = vld [vmem:[#allocation6 + $0x34c] sm:$0xf]  ;;  %v7690_v6 = vor.u32 %v9193_v60, %v7687_v61  ;;  %v7909_v7 = vld [vmem:[#allocation6 + $0x308] sm:$0xf]  ;;  %v10420_v8 = vor.u32 %v9151_v4, %v7509_v3  ;;  %v9150_v9 = vld [vmem:[%s13249_s0 + $0x4] sm:$0xf] }
  0x49   :  { %1032 = vmatpush.bf16.msra.mxu1 %v7838_v5  ;;  %v7943_v63 = vld [vmem:[#allocation6 + $0x368] sm:$0xf0]  ;;  %v7942_v5 = vor.u32 %v9261_v59, %v7941_v57  ;;  %v9253_v12 = vld [vmem:[#allocation6 + $0x324] sm:$0xf0]  ;;  %v7757_v2 = vld [vmem:[#allocation6 + $0x1d0] sm:$0xf] }
  0x4a   :  { %1019 = vmatpush.bf16.msra.mxu0 %v7550_v16  ;;  %v7946_v11 = vor.u32 %v9257_v62, %v7943_v63  ;;  %v9185_v13 = vld [vmem:[#allocation6 + $0x10c] sm:$0xf]  ;;  %v7621_v21 = vld [vmem:[#allocation6 + $0xc8] sm:$0xf]  ;;  %v9214_v3 = vld [vmem:[#allocation6 + $0x1ec] sm:$0xf0] }
  0x4b   :  { %1060 = vmatpush.bf16.msra.mxu3 %v7842_v10  ;;  %1047 = vmatpush.bf16.msra.mxu2 %v7554_v20  ;;  %v7511_v10 = vld [vmem:[%s13249_s0 + $0x8] sm:$0xf0]  ;;  %v9181_v22 = vld [vmem:[#allocation6 + $0xe4] sm:$0xf0]  ;;  %v8013_v4 = vld [vmem:[#allocation6 + $0x3d0] sm:$0xf] }
  0x4c   :  { %v7655_v14 = vld [vmem:[#allocation6 + $0x128] sm:$0xf0]  ;;  %v10428_v15 = vor.u32 %v9150_v9, %v7511_v10  ;;  %v7877_v23 = vld [vmem:[#allocation6 + $0x2c8] sm:$0xf]  ;;  %v7622_v30 = vor.u32 %v9181_v22, %v7621_v21  ;;  %v7759_v9 = vld [vmem:[#allocation6 + $0x1f0] sm:$0xf0] }
  0x4d   :  { %1033 = vmatpush.bf16.msra.mxu1 %v7806_v19  ;;  %v9249_v16 = vld [vmem:[#allocation6 + $0x30c] sm:$0xf]  ;;  %v7910_v19 = vor.u32 %v9253_v12, %v7909_v7  ;;  %v7658_v20 = vor.u32 %v9185_v13, %v7655_v14  ;;  %v9245_v25 = vld [vmem:[#allocation6 + $0x2e4] sm:$0xf0]  ;;  %v9210_v7 = vld [vmem:[#allocation6 + $0x1d4] sm:$0xf] }
  0x4e   :  { %1020 = vmatpush.bf16.msra.mxu0 %v7518_v31  ;;  %v7911_v17 = vld [vmem:[#allocation6 + $0x328] sm:$0xf0]  ;;  %v7878_v31 = vor.u32 %v9245_v25, %v7877_v23  ;;  %v7589_v33 = vld [vmem:[#allocation6 + $0x88] sm:$0xf]  ;;  %v9274_v12 = vld [vmem:[#allocation6 + $0x3d4] sm:$0xf] }
  0x4f   :  { %1061 = vmatpush.bf16.msra.mxu3 %v7810_v24  ;;  %1048 = vmatpush.bf16.msra.mxu2 %v7522_v36  ;;  %v7914_v24 = vor.u32 %v9249_v16, %v7911_v17  ;;  %v9177_v26 = vld [vmem:[#allocation6 + $0xcc] sm:$0xf]  ;;  %v9173_v34 = vld [vmem:[#allocation6 + $0xa4] sm:$0xf0]  ;;  %v8015_v13 = vld [vmem:[#allocation6 + $0x3f0] sm:$0xf0]  ;;  %v7758_v16 = vor.u32 %v9214_v3, %v7757_v2 }
  0x50   :  { %v7623_v27 = vld [vmem:[#allocation6 + $0xe8] sm:$0xf0]  ;;  %v9237_v37 = vld [vmem:[#allocation6 + $0x2a4] sm:$0xf0]  ;;  %v7981_v21 = vld [vmem:[#allocation6 + $0x390] sm:$0xf]  ;;  %v8018_v22 = vor.u32 %v9274_v12, %v8015_v13 }
  0x51   :  { %1034 = vmatpush.bf16.msra.mxu1 %v7774_v35  ;;  %1021 = vmatmul.bf16.vlgmr.msra.gmra.mxu0 %v10420_v8  ;;  %v9241_v28 = vld [vmem:[#allocation6 + $0x2cc] sm:$0xf]  ;;  %v7626_v32 = vor.u32 %v9177_v26, %v7623_v27  ;;  %v7845_v35 = vld [vmem:[#allocation6 + $0x288] sm:$0xf]  ;;  %v9270_v23 = vld [vmem:[#allocation6 + $0x3ac] sm:$0xf0] }
  0x52   :  { %1069 = vmatpush.bf16.msrb.mxu0 %v7750_v40  ;;  %1049 = vmatmul.bf16.vlgmr.msra.gmra.mxu2 %v10420_v8  ;;  %v7879_v29 = vld [vmem:[#allocation6 + $0x2e8] sm:$0xf0]  ;;  %v7846_v43 = vor.u32 %v9237_v37, %v7845_v35  ;;  %v7557_v45 = vld [vmem:[#allocation6 + $0x48] sm:$0xf]  ;;  %v7727_v25 = vld [vmem:[#allocation6 + $0x1b0] sm:$0xf0] }
  0x53   :  { %1062 = vmatpush.bf16.msra.mxu3 %v7778_v39  ;;  %1097 = vmatpush.bf16.msrb.mxu2 %v7754_v42  ;;  %v7882_v36 = vor.u32 %v9241_v28, %v7879_v29  ;;  %v9169_v38 = vld [vmem:[#allocation6 + $0x8c] sm:$0xf]  ;;  %v7590_v42 = vor.u32 %v9173_v34, %v7589_v33  ;;  %v7813_v47 = vld [vmem:[#allocation6 + $0x248] sm:$0xf]  ;;  %v9266_v26 = vld [vmem:[#allocation6 + $0x394] sm:$0xf]  ;;  %v7982_v29 = vor.u32 %v9270_v23, %v7981_v21 }
  0x54   :  { %1035 = vmatmul.bf16.vlgmr.msra.gmra.mxu1 %v10428_v15  ;;  %v7591_v39 = vld [vmem:[#allocation6 + $0xa8] sm:$0xf0]  ;;  %v9229_v49 = vld [vmem:[#allocation6 + $0x264] sm:$0xf0]  ;;  %v7983_v27 = vld [vmem:[#allocation6 + $0x3b0] sm:$0xf0] }
  0x55   :  { %1083 = vmatpush.bf16.msrb.mxu1 %v8006_v41  ;;  %v9233_v40 = vld [vmem:[#allocation6 + $0x28c] sm:$0xf]  ;;  %v7594_v44 = vor.u32 %v9169_v38, %v7591_v39  ;;  %v7525_v55 = vld [vmem:[#allocation6 + $0x8] sm:$0xf]  ;;  %v7814_v57 = vor.u32 %v9229_v49, %v7813_v47  ;;  %v7949_v33 = vld [vmem:[#allocation6 + $0x350] sm:$0xf]  ;;  %v7986_v34 = vor.u32 %v9266_v26, %v7983_v27 }
  0x56   :  { %1070 = vmatpush.bf16.msrb.mxu0 %v7718_v52  ;;  %1063 = vmatmul.bf16.vlgmr.msra.gmra.mxu3 %v10428_v15  ;;  %v7847_v41 = vld [vmem:[#allocation6 + $0x2a8] sm:$0xf0]  ;;  %v9157_v56 = vld [vmem:[#allocation6 + $0x24] sm:$0xf0]  ;;  %v9262_v35 = vld [vmem:[#allocation6 + $0x36c] sm:$0xf0] }
  0x57   :  { %1111 = vmatpush.bf16.msrb.mxu3 %v8010_v46  ;;  %1098 = vmatpush.bf16.msrb.mxu2 %v7722_v54  ;;  %v9165_v46 = vld [vmem:[#allocation6 + $0x64] sm:$0xf0]  ;;  %v7850_v48 = vor.u32 %v9233_v40, %v7847_v41  ;;  %v9161_v50 = vld [vmem:[#allocation6 + $0x4c] sm:$0xf]  ;;  %v7695_v37 = vld [vmem:[#allocation6 + $0x170] sm:$0xf0]  ;;  %v7950_v41 = vor.u32 %v9262_v35, %v7949_v33 }
  0x58   :  { %v7559_v51 = vld [vmem:[#allocation6 + $0x68] sm:$0xf0]  ;;  %v7558_v54 = vor.u32 %v9165_v46, %v7557_v45  ;;  %v7781_v59 = vld [vmem:[#allocation6 + $0x208] sm:$0xf]  ;;  %v9258_v38 = vld [vmem:[#allocation6 + $0x354] sm:$0xf] }
  0x59   :  { %1084 = vmatpush.bf16.msrb.mxu1 %v7974_v53  ;;  %v9225_v52 = vld [vmem:[#allocation6 + $0x24c] sm:$0xf]  ;;  %v9221_v60 = vld [vmem:[#allocation6 + $0x224] sm:$0xf0]  ;;  %v7951_v39 = vld [vmem:[#allocation6 + $0x370] sm:$0xf0] }
  0x5a   :  { %1071 = vmatpush.bf16.msrb.mxu0 %v7686_v1  ;;  %v7815_v53 = vld [vmem:[#allocation6 + $0x268] sm:$0xf0]  ;;  %v7782_v10 = vor.u32 %v9221_v60, %v7781_v59  ;;  %v7917_v45 = vld [vmem:[#allocation6 + $0x310] sm:$0xf]  ;;  %v7954_v46 = vor.u32 %v9258_v38, %v7951_v39  ;;  %v7663_v49 = vld [vmem:[#allocation6 + $0x130] sm:$0xf0] }
  0x5b   :  { %1112 = vmatpush.bf16.msrb.mxu3 %v7978_v58  ;;  %1099 = vmatpush.bf16.msrb.mxu2 %v7690_v6  ;;  %v7562_v58 = vor.u32 %v9161_v50, %v7559_v51  ;;  %v9153_v61 = vld [vmem:[#allocation6 + $0xc] sm:$0xf]  ;;  %v7818_v62 = vor.u32 %v9225_v52, %v7815_v53  ;;  %v9278_v6 = vld [vmem:[#allocation6 + $0x3ec] sm:$0xf0]  ;;  %v9250_v50 = vld [vmem:[#allocation6 + $0x314] sm:$0xf] }
  0x5c   :  { %v7527_v63 = vld [vmem:[#allocation6 + $0x28] sm:$0xf0]  ;;  %v8014_v17 = vor.u32 %v9278_v6, %v8013_v4  ;;  %v9254_v47 = vld [vmem:[#allocation6 + $0x32c] sm:$0xf0]  ;;  %v7919_v51 = vld [vmem:[#allocation6 + $0x330] sm:$0xf0] }
  0x5d   :  { %1085 = vmatpush.bf16.msrb.mxu1 %v7942_v5  ;;  %v9217_v0 = vld [vmem:[#allocation6 + $0x20c] sm:$0xf]  ;;  %v7526_v5 = vor.u32 %v9157_v56, %v7525_v55  ;;  %v7918_v53 = vor.u32 %v9254_v47, %v7917_v45  ;;  %v7629_v55 = vld [vmem:[#allocation6 + $0xd0] sm:$0xf]  ;;  %v9178_v60 = vld [vmem:[#allocation6 + $0xd4] sm:$0xf] }
  0x5e   :  { %1072 = vmatpush.bf16.msrb.mxu0 %v7654_v18  ;;  %v7783_v1 = vld [vmem:[#allocation6 + $0x228] sm:$0xf0]  ;;  %v7762_v18 = vor.u32 %v9210_v7, %v7759_v9  ;;  %v9182_v56 = vld [vmem:[#allocation6 + $0xec] sm:$0xf0]  ;;  %v9170_v9 = vld [vmem:[#allocation6 + $0x94] sm:$0xf] }
  0x5f   :  { %1113 = vmatpush.bf16.msrb.mxu3 %v7946_v11  ;;  %1100 = vmatpush.bf16.msrb.mxu2 %v7658_v20  ;;  %v7530_v11 = vor.u32 %v9153_v61, %v7527_v63  ;;  %v7786_v14 = vor.u32 %v9217_v0, %v7783_v1  ;;  %v9206_v20 = vld [vmem:[#allocation6 + $0x1ac] sm:$0xf0]  ;;  %v7631_v61 = vld [vmem:[#allocation6 + $0xf0] sm:$0xf0]  ;;  %v7630_v0 = vor.u32 %v9182_v56, %v7629_v55 }
  0x60   :  { %v9246_v59 = vld [vmem:[#allocation6 + $0x2ec] sm:$0xf0]  ;;  %v7887_v63 = vld [vmem:[#allocation6 + $0x2f0] sm:$0xf0]  ;;  %v7634_v2 = vor.u32 %v9178_v60, %v7631_v61 }
  0x61   :  { %1086 = vmatpush.bf16.msrb.mxu1 %v7910_v19  ;;  %v7725_v19 = vld [vmem:[#allocation6 + $0x190] sm:$0xf]  ;;  %v7855_v12 = vld [vmem:[#allocation6 + $0x2b0] sm:$0xf0] }
  0x62   :  { %1073 = vmatpush.bf16.msrb.mxu0 %v7622_v30  ;;  %v7726_v28 = vor.u32 %v9206_v20, %v7725_v19  ;;  %v7597_v3 = vld [vmem:[#allocation6 + $0x90] sm:$0xf] }
  0x63   :  { %1114 = vmatpush.bf16.msrb.mxu3 %v7914_v24  ;;  %1101 = vmatpush.bf16.msrb.mxu2 %v7626_v32  ;;  %v9202_v24 = vld [vmem:[#allocation6 + $0x194] sm:$0xf]  ;;  %v9198_v32 = vld [vmem:[#allocation6 + $0x16c] sm:$0xf0] }
  0x64   :  { %v7730_v30 = vor.u32 %v9202_v24, %v7727_v25  ;;  %v9174_v4 = vld [vmem:[#allocation6 + $0xac] sm:$0xf0] }
  0x65   :  { %1087 = vmatpush.bf16.msrb.mxu1 %v7878_v31  ;;  %v7693_v31 = vld [vmem:[#allocation6 + $0x150] sm:$0xf] }
  0x66   :  { %1074 = vmatpush.bf16.msrb.mxu0 %v7590_v42  ;;  %v7694_v40 = vor.u32 %v9198_v32, %v7693_v31  ;;  %v9238_v7 = vld [vmem:[#allocation6 + $0x2ac] sm:$0xf0] }
  0x67   :  { %1115 = vmatpush.bf16.msrb.mxu3 %v7882_v36  ;;  %1102 = vmatpush.bf16.msrb.mxu2 %v7594_v44  ;;  %v9194_v36 = vld [vmem:[#allocation6 + $0x154] sm:$0xf]  ;;  %v9190_v44 = vld [vmem:[#allocation6 + $0x12c] sm:$0xf0] }
  0x68   :  { %v7698_v42 = vor.u32 %v9194_v36, %v7695_v37 }
  0x69   :  { %1088 = vmatpush.bf16.msrb.mxu1 %v7846_v43  ;;  %v7661_v43 = vld [vmem:[#allocation6 + $0x110] sm:$0xf] }
  0x6a   :  { %1075 = vmatpush.bf16.msrb.mxu0 %v7558_v54  ;;  %v7662_v52 = vor.u32 %v9190_v44, %v7661_v43 }
  0x6b   :  { %1116 = vmatpush.bf16.msrb.mxu3 %v7850_v48  ;;  %1103 = vmatpush.bf16.msrb.mxu2 %v7562_v58  ;;  %v9186_v48 = vld [vmem:[#allocation6 + $0x114] sm:$0xf]  ;;  %v7922_v58 = vor.u32 %v9250_v50, %v7919_v51 }
  0x6c   :  { %v7666_v54 = vor.u32 %v9186_v48, %v7663_v49 }
  0x6d   :  { %1089 = vmatpush.bf16.msrb.mxu1 %v7814_v57  ;;  %v7885_v57 = vld [vmem:[#allocation6 + $0x2d0] sm:$0xf] }
  0x6e   :  { %1076 = vmatpush.bf16.msrb.mxu0 %v7526_v5  ;;  %v7886_v1 = vor.u32 %v9246_v59, %v7885_v57  ;;  %v7853_v5 = vld [vmem:[#allocation6 + $0x290] sm:$0xf] }
  0x6f   :  { %1117 = vmatpush.bf16.msrb.mxu3 %v7818_v62  ;;  %1104 = vmatpush.bf16.msrb.mxu2 %v7530_v11  ;;  %v9242_v62 = vld [vmem:[#allocation6 + $0x2d4] sm:$0xf] }
  0x70   :  { %v7890_v6 = vor.u32 %v9242_v62, %v7887_v63  ;;  %v9234_v11 = vld [vmem:[#allocation6 + $0x294] sm:$0xf] }
  0x71   :  { %1090 = vmatpush.bf16.msrb.mxu1 %v7782_v10  ;;  %1077 = vmatmul.bf16.vlgmr.msrb.gmra.mxu0 %v10420_v8  ;;  %v7599_v10 = vld [vmem:[#allocation6 + $0xb0] sm:$0xf0] }
  0x72   :  { %1125 = vmatpush.bf16.msra.mxu0 %v7758_v16  ;;  %1105 = vmatmul.bf16.vlgmr.msrb.gmra.mxu2 %v10420_v8 }
  0x73   :  { %1118 = vmatpush.bf16.msrb.mxu3 %v7786_v14  ;;  %1153 = vmatpush.bf16.msra.mxu2 %v7762_v18 }
  0x74   :  { %1091 = vmatmul.bf16.vlgmr.msrb.gmra.mxu1 %v10428_v15 }
  0x75   :  { %1139 = vmatpush.bf16.msra.mxu1 %v8014_v17 }
  0x76   :  { %1119 = vmatmul.bf16.vlgmr.msrb.gmra.mxu3 %v10428_v15  ;;  %1126 = vmatpush.bf16.msra.mxu0 %v7726_v28 }
  0x77   :  { %1167 = vmatpush.bf16.msra.mxu3 %v8018_v22  ;;  %1154 = vmatpush.bf16.msra.mxu2 %v7730_v30 }
  0x79   :  { %1140 = vmatpush.bf16.msra.mxu1 %v7982_v29 }
  0x7a   :  { %1127 = vmatpush.bf16.msra.mxu0 %v7694_v40 }
  0x7b   :  { %1168 = vmatpush.bf16.msra.mxu3 %v7986_v34  ;;  %1155 = vmatpush.bf16.msra.mxu2 %v7698_v42 }
  0x7d   :  { %1141 = vmatpush.bf16.msra.mxu1 %v7950_v41 }
  0x7e   :  { %1128 = vmatpush.bf16.msra.mxu0 %v7662_v52 }
  0x7f   :  { %1169 = vmatpush.bf16.msra.mxu3 %v7954_v46  ;;  %1156 = vmatpush.bf16.msra.mxu2 %v7666_v54 }
  0x81   :  { %1142 = vmatpush.bf16.msra.mxu1 %v7918_v53 }
  0x83   :  { %1170 = vmatpush.bf16.msra.mxu3 %v7922_v58 }
  0x84   :  { %186 = vsyncadd [#allocation5], 8192  ;;  %1129 = vmatpush.bf16.msra.mxu0 %v7630_v0  ;;  %v7598_v13 = vor.u32 %v9174_v4, %v7597_v3  ;;  %1157 = vmatpush.bf16.msra.mxu2 %v7634_v2  ;;  %v7854_v14 = vor.u32 %v9238_v7, %v7853_v5  ;;  %v7602_v16 = vor.u32 %v9170_v9, %v7599_v10  ;;  %v7565_v17 = vld [vmem:[#allocation6 + $0x50] sm:$0xf]  ;;  %v9162_v22 = vld [vmem:[#allocation6 + $0x54] sm:$0xf] }
  0x85   :  { %1143 = vmatpush.bf16.msra.mxu1 %v7886_v1  ;;  %v9166_v18 = vld [vmem:[#allocation6 + $0x6c] sm:$0xf0]  ;;  %v7858_v20 = vor.u32 %v9234_v11, %v7855_v12  ;;  %v7567_v23 = vld [vmem:[#allocation6 + $0x70] sm:$0xf0]  ;;  %v7765_v38 = vld [vmem:[#allocation6 + $0x1d8] sm:$0xf] }
  0x86   :  { %v7821_v19 = vld [vmem:[#allocation6 + $0x250] sm:$0xf]  ;;  %v9226_v24 = vld [vmem:[#allocation6 + $0x254] sm:$0xf]  ;;  %v7566_v26 = vor.u32 %v9166_v18, %v7565_v17  ;;  %v7570_v30 = vor.u32 %v9162_v22, %v7567_v23  ;;  %v9215_v39 = vld [vmem:[#allocation6 + $0x1f4] sm:$0xf0] }
  0x87   :  { %1171 = vmatpush.bf16.msra.mxu3 %v7890_v6  ;;  %v9230_v21 = vld [vmem:[#allocation6 + $0x26c] sm:$0xf0]  ;;  %v7823_v25 = vld [vmem:[#allocation6 + $0x270] sm:$0xf0]  ;;  %v8021_v40 = vld [vmem:[#allocation6 + $0x3d8] sm:$0xf]  ;;  %v7766_v50 = vor.u32 %v9215_v39, %v7765_v38 }
  0x88   :  { %1130 = vmatpush.bf16.msra.mxu0 %v7598_v13  ;;  %v7533_v27 = vld [vmem:[#allocation6 + $0x10] sm:$0xf]  ;;  %1158 = vmatpush.bf16.msra.mxu2 %v7602_v16  ;;  %v7822_v29 = vor.u32 %v9230_v21, %v7821_v19  ;;  %v9154_v33 = vld [vmem:[#allocation6 + $0x14] sm:$0xf]  ;;  %v7826_v34 = vor.u32 %v9226_v24, %v7823_v25  ;;  %v9279_v42 = vld [vmem:[#allocation6 + $0x3f4] sm:$0xf0] }
  0x89   :  { %v9158_v28 = vld [vmem:[#allocation6 + $0x2c] sm:$0xf0]  ;;  %1144 = vmatpush.bf16.msra.mxu1 %v7854_v14  ;;  %v7535_v35 = vld [vmem:[#allocation6 + $0x30] sm:$0xf0]  ;;  %v9211_v43 = vld [vmem:[#allocation6 + $0x1dc] sm:$0xf]  ;;  %v8022_v51 = vor.u32 %v9279_v42, %v8021_v40 }
  0x8a   :  { %v7789_v31 = vld [vmem:[#allocation6 + $0x210] sm:$0xf]  ;;  %v9218_v36 = vld [vmem:[#allocation6 + $0x214] sm:$0xf]  ;;  %v7534_v41 = vor.u32 %v9158_v28, %v7533_v27  ;;  %v7767_v44 = vld [vmem:[#allocation6 + $0x1f8] sm:$0xf0]  ;;  %v7538_v46 = vor.u32 %v9154_v33, %v7535_v35 }
  0x8b   :  { %v9222_v32 = vld [vmem:[#allocation6 + $0x22c] sm:$0xf0]  ;;  %1172 = vmatpush.bf16.msra.mxu3 %v7858_v20  ;;  %v7791_v37 = vld [vmem:[#allocation6 + $0x230] sm:$0xf0]  ;;  %v9275_v47 = vld [vmem:[#allocation6 + $0x3dc] sm:$0xf]  ;;  %v7770_v52 = vor.u32 %v9211_v43, %v7767_v44 }
  0x8c   :  { %1131 = vmatpush.bf16.msra.mxu0 %v7566_v26  ;;  %1159 = vmatpush.bf16.msra.mxu2 %v7570_v30  ;;  %v7790_v45 = vor.u32 %v9222_v32, %v7789_v31  ;;  %v8023_v48 = vld [vmem:[#allocation6 + $0x3f8] sm:$0xf0]  ;;  %v7794_v49 = vor.u32 %v9218_v36, %v7791_v37  ;;  %v7733_v53 = vld [vmem:[#allocation6 + $0x198] sm:$0xf]  ;;  %s195_s20 = sshll.u32 %s13253_s4, 4  ;;  %s10165_s21 = smov [#allocation3]   ;;  %s196_s20 = int_to_ptr.hbm [resolvable:$true] %s195_s20 }
  0x8d   :  { %1145 = vmatpush.bf16.msra.mxu1 %v7822_v29  ;;  %v9207_v54 = vld [vmem:[#allocation6 + $0x1b4] sm:$0xf0]  ;;  %v8026_v56 = vor.u32 %v9275_v47, %v8023_v48  ;;  %v9203_v58 = vld [vmem:[#allocation6 + $0x19c] sm:$0xf]  ;;  %s197_s1 = sshll.u32 %s10165_s21, 4  ;;  %s209_s24 = sshll.u32 %s13254_s5, 4  ;;  %s198_s1 = int_to_ptr.vmem [resolvable:$true] %s197_s1  ;;  %s210_s24 = int_to_ptr.hbm [resolvable:$true] %s209_s24 }
  0x8e   :  { %v7989_v55 = vld [vmem:[#allocation6 + $0x398] sm:$0xf]  ;;  %v7735_v59 = vld [vmem:[#allocation6 + $0x1b8] sm:$0xf0]  ;;  %v7734_v62 = vor.u32 %v9207_v54, %v7733_v53  ;;  %200 = dma.hbm_to_vmem [thread:$0]  %s196_s20, 16384, %s198_s1, [#allocation5 + $0x1] }
  0x8f   :  { %1173 = vmatpush.bf16.msra.mxu3 %v7826_v34  ;;  %v9271_v57 = vld [vmem:[#allocation6 + $0x3b4] sm:$0xf0]  ;;  %v9267_v60 = vld [vmem:[#allocation6 + $0x39c] sm:$0xf]  ;;  %v7738_v0 = vor.u32 %v9203_v58, %v7735_v59  ;;  %s10166_s25 = smov [#allocation4]  }
  0x90   :  { %1132 = vmatpush.bf16.msra.mxu0 %v7534_v41  ;;  %1160 = vmatpush.bf16.msra.mxu2 %v7538_v46  ;;  %v7991_v61 = vld [vmem:[#allocation6 + $0x3b8] sm:$0xf0]  ;;  %v7990_v63 = vor.u32 %v9271_v57, %v7989_v55  ;;  %v7701_v1 = vld [vmem:[#allocation6 + $0x158] sm:$0xf]  ;;  %s211_s26 = sshll.u32 %s10166_s25, 4  ;;  %s212_s26 = int_to_ptr.vmem [resolvable:$true] %s211_s26 }
  0x91   :  { %1146 = vmatpush.bf16.msra.mxu1 %v7790_v45  ;;  %v9199_v2 = vld [vmem:[#allocation6 + $0x174] sm:$0xf0]  ;;  %v7994_v4 = vor.u32 %v9267_v60, %v7991_v61  ;;  %v9195_v6 = vld [vmem:[#allocation6 + $0x15c] sm:$0xf]  ;;  %214 = dma.hbm_to_vmem [thread:$0]  %s210_s24, 8192, %s212_s26, [#allocation5 + $0x2] }
  0x92   :  { %v7957_v3 = vld [vmem:[#allocation6 + $0x358] sm:$0xf]  ;;  %v7703_v7 = vld [vmem:[#allocation6 + $0x178] sm:$0xf0]  ;;  %v7702_v11 = vor.u32 %v9199_v2, %v7701_v1 }
  0x93   :  { %1174 = vmatpush.bf16.msra.mxu3 %v7794_v49  ;;  %1161 = vmatmul.bf16.vlgmr.msra.gmra.mxu2 %v10420_v8  ;;  %v9263_v5 = vld [vmem:[#allocation6 + $0x374] sm:$0xf0]  ;;  %v9259_v9 = vld [vmem:[#allocation6 + $0x35c] sm:$0xf]  ;;  %v7706_v13 = vor.u32 %v9195_v6, %v7703_v7 }
  0x94   :  { %1181 = vmatpush.bf16.msrb.mxu0 %v7766_v50  ;;  %1209 = vmatpush.bf16.msrb.mxu2 %v7770_v52  ;;  %v7959_v10 = vld [vmem:[#allocation6 + $0x378] sm:$0xf0]  ;;  %v7958_v12 = vor.u32 %v9263_v5, %v7957_v3  ;;  %v7669_v14 = vld [vmem:[#allocation6 + $0x118] sm:$0xf] }
  0x95   :  { %1195 = vmatpush.bf16.msrb.mxu1 %v8022_v51  ;;  %1133 = vmatmul.bf16.vlgmr.msra.gmra.mxu0 %v10420_v8  ;;  %v9191_v16 = vld [vmem:[#allocation6 + $0x134] sm:$0xf0]  ;;  %v7962_v18 = vor.u32 %v9259_v9, %v7959_v10  ;;  %v9187_v20 = vld [vmem:[#allocation6 + $0x11c] sm:$0xf] }
  0x96   :  { %1175 = vmatmul.bf16.vlgmr.msra.gmra.mxu3 %v10428_v15  ;;  %1147 = vmatmul.bf16.vlgmr.msra.gmra.mxu1 %v10428_v15  ;;  %v7925_v17 = vld [vmem:[#allocation6 + $0x318] sm:$0xf]  ;;  %v7671_v21 = vld [vmem:[#allocation6 + $0x138] sm:$0xf0]  ;;  %v7670_v24 = vor.u32 %v9191_v16, %v7669_v14 }
  0x97   :  { %1223 = vmatpush.bf16.msrb.mxu3 %v8026_v56  ;;  %v9255_v19 = vld [vmem:[#allocation6 + $0x334] sm:$0xf0]  ;;  %v9251_v22 = vld [vmem:[#allocation6 + $0x31c] sm:$0xf]  ;;  %v7674_v26 = vor.u32 %v9187_v20, %v7671_v21 }
  0x98   :  { %1182 = vmatpush.bf16.msrb.mxu0 %v7734_v62  ;;  %1210 = vmatpush.bf16.msrb.mxu2 %v7738_v0  ;;  %v7927_v23 = vld [vmem:[#allocation6 + $0x338] sm:$0xf0]  ;;  %v7926_v25 = vor.u32 %v9255_v19, %v7925_v17  ;;  %v7637_v27 = vld [vmem:[#allocation6 + $0xd8] sm:$0xf] }
  0x99   :  { %1196 = vmatpush.bf16.msrb.mxu1 %v7990_v63  ;;  %v9183_v28 = vld [vmem:[#allocation6 + $0xf4] sm:$0xf0]  ;;  %v7930_v30 = vor.u32 %v9251_v22, %v7927_v23  ;;  %v9179_v32 = vld [vmem:[#allocation6 + $0xdc] sm:$0xf] }
  0x9a   :  { %v7893_v29 = vld [vmem:[#allocation6 + $0x2d8] sm:$0xf]  ;;  %v7639_v33 = vld [vmem:[#allocation6 + $0xf8] sm:$0xf0]  ;;  %v7638_v36 = vor.u32 %v9183_v28, %v7637_v27 }
  0x9b   :  { %1224 = vmatpush.bf16.msrb.mxu3 %v7994_v4  ;;  %v9247_v31 = vld [vmem:[#allocation6 + $0x2f4] sm:$0xf0]  ;;  %v9243_v34 = vld [vmem:[#allocation6 + $0x2dc] sm:$0xf]  ;;  %v7642_v38 = vor.u32 %v9179_v32, %v7639_v33 }
  0x9c   :  { %1183 = vmatpush.bf16.msrb.mxu0 %v7702_v11  ;;  %1211 = vmatpush.bf16.msrb.mxu2 %v7706_v13  ;;  %v7895_v35 = vld [vmem:[#allocation6 + $0x2f8] sm:$0xf0]  ;;  %v7894_v37 = vor.u32 %v9247_v31, %v7893_v29  ;;  %v7605_v39 = vld [vmem:[#allocation6 + $0x98] sm:$0xf] }
  0x9d   :  { %1197 = vmatpush.bf16.msrb.mxu1 %v7958_v12  ;;  %v9175_v40 = vld [vmem:[#allocation6 + $0xb4] sm:$0xf0]  ;;  %v7898_v42 = vor.u32 %v9243_v34, %v7895_v35  ;;  %v9171_v44 = vld [vmem:[#allocation6 + $0x9c] sm:$0xf] }
  0x9e   :  { %v7861_v41 = vld [vmem:[#allocation6 + $0x298] sm:$0xf]  ;;  %v7607_v45 = vld [vmem:[#allocation6 + $0xb8] sm:$0xf0]  ;;  %v7606_v48 = vor.u32 %v9175_v40, %v7605_v39 }
  0x9f   :  { %1225 = vmatpush.bf16.msrb.mxu3 %v7962_v18  ;;  %v9239_v43 = vld [vmem:[#allocation6 + $0x2b4] sm:$0xf0]  ;;  %v9235_v46 = vld [vmem:[#allocation6 + $0x29c] sm:$0xf]  ;;  %v7610_v50 = vor.u32 %v9171_v44, %v7607_v45 }
  0xa0   :  { %1184 = vmatpush.bf16.msrb.mxu0 %v7670_v24  ;;  %1212 = vmatpush.bf16.msrb.mxu2 %v7674_v26  ;;  %v7863_v47 = vld [vmem:[#allocation6 + $0x2b8] sm:$0xf0]  ;;  %v7862_v49 = vor.u32 %v9239_v43, %v7861_v41  ;;  %v7573_v51 = vld [vmem:[#allocation6 + $0x58] sm:$0xf] }
  0xa1   :  { %1198 = vmatpush.bf16.msrb.mxu1 %v7926_v25  ;;  %v9167_v52 = vld [vmem:[#allocation6 + $0x74] sm:$0xf0]  ;;  %v7866_v54 = vor.u32 %v9235_v46, %v7863_v47  ;;  %v9163_v56 = vld [vmem:[#allocation6 + $0x5c] sm:$0xf] }
  0xa2   :  { %v7829_v53 = vld [vmem:[#allocation6 + $0x258] sm:$0xf]  ;;  %v7575_v57 = vld [vmem:[#allocation6 + $0x78] sm:$0xf0]  ;;  %v7574_v60 = vor.u32 %v9167_v52, %v7573_v51 }
  0xa3   :  { %1226 = vmatpush.bf16.msrb.mxu3 %v7930_v30  ;;  %v9231_v55 = vld [vmem:[#allocation6 + $0x274] sm:$0xf0]  ;;  %v9227_v58 = vld [vmem:[#allocation6 + $0x25c] sm:$0xf]  ;;  %v7578_v62 = vor.u32 %v9163_v56, %v7575_v57 }
  0xa4   :  { %1185 = vmatpush.bf16.msrb.mxu0 %v7638_v36  ;;  %1213 = vmatpush.bf16.msrb.mxu2 %v7642_v38  ;;  %v7831_v59 = vld [vmem:[#allocation6 + $0x278] sm:$0xf0]  ;;  %v7830_v61 = vor.u32 %v9231_v55, %v7829_v53  ;;  %v7541_v63 = vld [vmem:[#allocation6 + $0x18] sm:$0xf] }
  0xa5   :  { %1199 = vmatpush.bf16.msrb.mxu1 %v7894_v37  ;;  %v9159_v0 = vld [vmem:[#allocation6 + $0x34] sm:$0xf0]  ;;  %v7834_v2 = vor.u32 %v9227_v58, %v7831_v59  ;;  %v9155_v4 = vld [vmem:[#allocation6 + $0x1c] sm:$0xf] }
  0xa6   :  { %v7797_v1 = vld [vmem:[#allocation6 + $0x218] sm:$0xf]  ;;  %v7543_v5 = vld [vmem:[#allocation6 + $0x38] sm:$0xf0]  ;;  %v7542_v9 = vor.u32 %v9159_v0, %v7541_v63 }
  0xa7   :  { %1227 = vmatpush.bf16.msrb.mxu3 %v7898_v42  ;;  %v9223_v3 = vld [vmem:[#allocation6 + $0x234] sm:$0xf0]  ;;  %v9219_v6 = vld [vmem:[#allocation6 + $0x21c] sm:$0xf]  ;;  %v7546_v11 = vor.u32 %v9155_v4, %v7543_v5 }
  0xa8   :  { %1186 = vmatpush.bf16.msrb.mxu0 %v7606_v48  ;;  %1214 = vmatpush.bf16.msrb.mxu2 %v7610_v50  ;;  %v7799_v7 = vld [vmem:[#allocation6 + $0x238] sm:$0xf0]  ;;  %v7798_v10 = vor.u32 %v9223_v3, %v7797_v1 }
  0xa9   :  { %1200 = vmatpush.bf16.msrb.mxu1 %v7862_v49  ;;  %v7802_v12 = vor.u32 %v9219_v6, %v7799_v7 }
  0xab   :  { %1228 = vmatpush.bf16.msrb.mxu3 %v7866_v54 }
  0xac   :  { %1187 = vmatpush.bf16.msrb.mxu0 %v7574_v60  ;;  %1215 = vmatpush.bf16.msrb.mxu2 %v7578_v62 }
  0xad   :  { %1201 = vmatpush.bf16.msrb.mxu1 %v7830_v61 }
  0xaf   :  { %1229 = vmatpush.bf16.msrb.mxu3 %v7834_v2 }
  0xb0   :  { %1188 = vmatpush.bf16.msrb.mxu0 %v7542_v9  ;;  %1216 = vmatpush.bf16.msrb.mxu2 %v7546_v11 }
  0xb1   :  { %1202 = vmatpush.bf16.msrb.mxu1 %v7798_v10 }
  0xb3   :  { %1230 = vmatpush.bf16.msrb.mxu3 %v7802_v12  ;;  %1189 = vmatmul.bf16.vlgmr.msrb.gmra.mxu0 %v10420_v8 }
  0xb4   :  { %1203 = vmatmul.bf16.vlgmr.msrb.gmra.mxu1 %v10428_v15  ;;  %1217 = vmatmul.bf16.vlgmr.msrb.gmra.mxu2 %v10420_v8  ;;  %v10455_v8 = vld [vmem:[%s13251_s2] sm:$0xff] }
  0xb5   :  { %v348_v16 = vperm.slane %v10455_v8, 1  ;;  %v349_v31 = vperm.slane %v10455_v8, 2  ;;  %v350_v35 = vperm.slane %v10455_v8, 3  ;;  %v351_v49 = vperm.slane %v10455_v8, 4 }
  0xb6   :  { %1231 = vmatmul.bf16.vlgmr.msrb.gmra.mxu3 %v10428_v15  ;;  %v347_v15 = vperm.slane %v10455_v8, 0  ;;  %v352_v53 = vperm.slane %v10455_v8, 5  ;;  %v353_v3 = vperm.slane %v10455_v8, 6  ;;  %v354_v9 = vperm.slane %v10455_v8, 7 }
  0xce   :  { %v1022_v13 = vpop.f32.mrf.mxu0 }
  0xcf   :  { %v1023_v14 = vadd.f32 %v1022_v13, %v347_v15 }
  0xd1   :  { %v1036_v17 = vpop.f32.mrf.mxu1 }
  0xd2   :  { %v10459_v18 = vadd.f32 %v1036_v17, %v1023_v14 }
  0xd4   :  { %13455 = vst [vmem:[#allocation22_spill] sm:$0xff] %v10459_v18 }
  0xd5   :  { %v1050_v19 = vpop.f32.mrf.mxu2 }
  0xd6   :  { %v1051_v20 = vadd.f32 %v1050_v19, %v348_v16  ;;  %v1024_v22 = vpop.f32.mrf.mxu0 }
  0xd7   :  { %v1025_v24 = vadd.f32 %v1024_v22, %v347_v15 }
  0xd9   :  { %v1064_v21 = vpop.f32.mrf.mxu3  ;;  %v1038_v25 = vpop.f32.mrf.mxu1 }
  0xda   :  { %v10461_v23 = vadd.f32 %v1064_v21, %v1051_v20  ;;  %v10463_v26 = vadd.f32 %v1038_v25, %v1025_v24 }
  0xdc   :  { %13456 = vst [vmem:[#allocation23_spill] sm:$0xff] %v10461_v23 }
  0xdd   :  { %13457 = vst [vmem:[#allocation24_spill] sm:$0xff] %v10463_v26  ;;  %v1052_v27 = vpop.f32.mrf.mxu2 }
  0xde   :  { %v1053_v28 = vadd.f32 %v1052_v27, %v348_v16 }
  0xe1   :  { %v1066_v29 = vpop.f32.mrf.mxu3 }
  0xe2   :  { %v10465_v30 = vadd.f32 %v1066_v29, %v1053_v28 }
  0xe4   :  { %13458 = vst [vmem:[#allocation25_spill] sm:$0xff] %v10465_v30 }
  0xee   :  { %v1078_v32 = vpop.f32.mrf.mxu0 }
  0xef   :  { %v1079_v33 = vadd.f32 %v1078_v32, %v349_v31 }
  0xf1   :  { %v1092_v34 = vpop.f32.mrf.mxu1 }
  0xf2   :  { %v10469_v36 = vadd.f32 %v1092_v34, %v1079_v33 }
  0xf4   :  { %13459 = vst [vmem:[#allocation26_spill] sm:$0xff] %v10469_v36 }
  0xf5   :  { %v1106_v37 = vpop.f32.mrf.mxu2 }
  0xf6   :  { %v1107_v38 = vadd.f32 %v1106_v37, %v350_v35  ;;  %v1080_v41 = vpop.f32.mrf.mxu0 }
  0xf7   :  { %v1081_v42 = vadd.f32 %v1080_v41, %v349_v31 }
  0xf9   :  { %v1120_v39 = vpop.f32.mrf.mxu3  ;;  %v1094_v43 = vpop.f32.mrf.mxu1 }
  0xfa   :  { %v10471_v40 = vadd.f32 %v1120_v39, %v1107_v38  ;;  %v10473_v44 = vadd.f32 %v1094_v43, %v1081_v42 }
  0xfc   :  { %13460 = vst [vmem:[#allocation27_spill] sm:$0xff] %v10471_v40 }
  0xfd   :  { %13461 = vst [vmem:[#allocation28_spill] sm:$0xff] %v10473_v44  ;;  %v1108_v45 = vpop.f32.mrf.mxu2 }
  0xfe   :  { %v1109_v46 = vadd.f32 %v1108_v45, %v350_v35 }
 0x101   :  { %v1122_v47 = vpop.f32.mrf.mxu3 }
 0x102   :  { %v10475_v48 = vadd.f32 %v1122_v47, %v1109_v46 }
 0x104   :  { %13462 = vst [vmem:[#allocation29_spill] sm:$0xff] %v10475_v48 }
 0x112   :  { %v1134_v50 = vpop.f32.mrf.mxu0 }
 0x113   :  { %v1135_v51 = vadd.f32 %v1134_v50, %v351_v49  ;;  %v1148_v52 = vpop.f32.mrf.mxu1 }
 0x115   :  { %v10479_v54 = vadd.f32 %v1148_v52, %v1135_v51 }
 0x116   :  { %v1162_v55 = vpop.f32.mrf.mxu2 }
 0x117   :  { %13463 = vst [vmem:[#allocation30_spill] sm:$0xff] %v10479_v54  ;;  %v1163_v56 = vadd.f32 %v1162_v55, %v352_v53 }
 0x119   :  { %v1176_v57 = vpop.f32.mrf.mxu3 }
 0x11a   :  { %v10481_v58 = vadd.f32 %v1176_v57, %v1163_v56  ;;  %v1136_v59 = vpop.f32.mrf.mxu0 }
 0x11b   :  { %v1137_v60 = vadd.f32 %v1136_v59, %v351_v49  ;;  %v1150_v61 = vpop.f32.mrf.mxu1 }
 0x11c   :  { %13464 = vst [vmem:[#allocation31_spill] sm:$0xff] %v10481_v58 }
 0x11d   :  { %v10483_v62 = vadd.f32 %v1150_v61, %v1137_v60 }
 0x11e   :  { %v1164_v63 = vpop.f32.mrf.mxu2 }
 0x11f   :  { %13465 = vst [vmem:[#allocation32_spill] sm:$0xff] %v10483_v62  ;;  %v1165_v0 = vadd.f32 %v1164_v63, %v352_v53 }
 0x121   :  { %v1178_v1 = vpop.f32.mrf.mxu3 }
 0x122   :  { %v10485_v2 = vadd.f32 %v1178_v1, %v1165_v0 }
 0x124   :  { %13466 = vst [vmem:[#allocation33_spill] sm:$0xff] %v10485_v2 }
 0x130   :  { %v1190_v4 = vpop.f32.mrf.mxu0 }
 0x131   :  { %v1191_v5 = vadd.f32 %v1190_v4, %v353_v3  ;;  %v1204_v6 = vpop.f32.mrf.mxu1 }
 0x133   :  { %v10488_v7 = vadd.f32 %v1204_v6, %v1191_v5 }
 0x135   :  { %13467 = vst [vmem:[#allocation34_spill] sm:$0xff] %v10488_v7 }
 0x137   :  { %v1218_v10 = vpop.f32.mrf.mxu2 }
 0x138   :  { %v1219_v11 = vadd.f32 %v1218_v10, %v354_v9  ;;  %v1192_v15 = vpop.f32.mrf.mxu0 }
 0x139   :  { %v1232_v12 = vpop.f32.mrf.mxu3  ;;  %v1193_v13 = vadd.f32 %v1192_v15, %v353_v3  ;;  %v1206_v16 = vpop.f32.mrf.mxu1 }
 0x13a   :  { %v10491_v14 = vadd.f32 %v1232_v12, %v1219_v11 }
 0x13b   :  { %v10493_v17 = vadd.f32 %v1206_v16, %v1193_v13 }
 0x13c   :  { %13468 = vst [vmem:[#allocation35_spill] sm:$0xff] %v10491_v14 }
 0x13d   :  { %13469 = vst [vmem:[#allocation36_spill] sm:$0xff] %v10493_v17 }
 0x13f   :  { %v1220_v19 = vpop.f32.mrf.mxu2 }
 0x140   :  { %v1221_v20 = vadd.f32 %v1220_v19, %v354_v9 }
 0x141   :  { %v1234_v21 = vpop.f32.mrf.mxu3 }
 0x142   :  { %v10495_v22 = vadd.f32 %v1234_v21, %v1221_v20 }
 0x144   :  { %13470 = vst [vmem:[#allocation37_spill] sm:$0xff] %v10495_v22 }
 0x145   :  { %10154 = dma.done.wait [#allocation5], 8192 }
 0x146   :  { %10155 = vsyncadd [#allocation5], 4294959104  ;;  %v8253_v24 = vld [vmem:[#allocation2 + $0x1c0] sm:$0xf]  ;;  %v9336_v8 = vld [vmem:[#allocation2 + $0x1c4] sm:$0xf] }
 0x147   :  { %v9340_v25 = vld [vmem:[#allocation2 + $0x1dc] sm:$0xf0]  ;;  %v8255_v28 = vld [vmem:[#allocation2 + $0x1e0] sm:$0xf0]  ;;  %v8261_v29 = vld [vmem:[#allocation2 + $0x1c8] sm:$0xf] }
 0x148   :  { %v10497_v27 = vor.u32 %v9340_v25, %v8253_v24  ;;  %v9341_v31 = vld [vmem:[#allocation2 + $0x1e4] sm:$0xf0]  ;;  %v10499_v32 = vor.u32 %v9336_v8, %v8255_v28  ;;  %v8221_v34 = vld [vmem:[#allocation2 + $0x180] sm:$0xf]  ;;  %v9328_v37 = vld [vmem:[#allocation2 + $0x184] sm:$0xf] }
 0x149   :  { %v10501_v33 = vor.u32 %v9341_v31, %v8261_v29  ;;  %v9332_v35 = vld [vmem:[#allocation2 + $0x19c] sm:$0xf0]  ;;  %v8223_v39 = vld [vmem:[#allocation2 + $0x1a0] sm:$0xf0]  ;;  %v8229_v41 = vld [vmem:[#allocation2 + $0x188] sm:$0xf] }
 0x14a   :  { %1626 = vmatpush.bf16.msra.mxu0 %v10497_v27  ;;  %v10504_v38 = vor.u32 %v9332_v35, %v8221_v34  ;;  %v9333_v42 = vld [vmem:[#allocation2 + $0x1a4] sm:$0xf0]  ;;  %1639 = vmatpush.bf16.msra.mxu1 %v10499_v32  ;;  %v10508_v43 = vor.u32 %v9328_v37, %v8223_v39  ;;  %v9337_v46 = vld [vmem:[#allocation2 + $0x1cc] sm:$0xf]  ;;  %v8189_v49 = vld [vmem:[#allocation2 + $0x140] sm:$0xf] }
 0x14b   :  { %1652 = vmatpush.bf16.msra.mxu2 %v10501_v33  ;;  %v10510_v45 = vor.u32 %v9333_v42, %v8229_v41  ;;  %v8263_v47 = vld [vmem:[#allocation2 + $0x1e8] sm:$0xf0]  ;;  %v9324_v51 = vld [vmem:[#allocation2 + $0x15c] sm:$0xf0]  ;;  %v9320_v52 = vld [vmem:[#allocation2 + $0x144] sm:$0xf] }
 0x14c   :  { %v10512_v50 = vor.u32 %v9337_v46, %v8263_v47  ;;  %v8191_v53 = vld [vmem:[#allocation2 + $0x160] sm:$0xf0]  ;;  %v8197_v55 = vld [vmem:[#allocation2 + $0x148] sm:$0xf]  ;;  %v9329_v57 = vld [vmem:[#allocation2 + $0x18c] sm:$0xf]  ;;  %v10516_v59 = vor.u32 %v9324_v51, %v8189_v49 }
 0x14d   :  { %v9325_v56 = vld [vmem:[#allocation2 + $0x164] sm:$0xf0]  ;;  %v8231_v60 = vld [vmem:[#allocation2 + $0x1a8] sm:$0xf0]  ;;  %v8157_v61 = vld [vmem:[#allocation2 + $0x100] sm:$0xf]  ;;  %v10520_v0 = vor.u32 %v9320_v52, %v8191_v53 }
 0x14e   :  { %1627 = vmatpush.bf16.msra.mxu0 %v10504_v38  ;;  %1665 = vmatpush.bf16.msra.mxu3 %v10512_v50  ;;  %v9316_v63 = vld [vmem:[#allocation2 + $0x11c] sm:$0xf0]  ;;  %v10522_v1 = vor.u32 %v9325_v56, %v8197_v55  ;;  %v10524_v3 = vor.u32 %v9329_v57, %v8231_v60  ;;  %v9312_v4 = vld [vmem:[#allocation2 + $0x104] sm:$0xf]  ;;  %v8165_v6 = vld [vmem:[#allocation2 + $0x108] sm:$0xf] }
 0x14f   :  { %1640 = vmatpush.bf16.msra.mxu1 %v10508_v43  ;;  %1653 = vmatpush.bf16.msra.mxu2 %v10510_v45  ;;  %v8159_v5 = vld [vmem:[#allocation2 + $0x120] sm:$0xf0]  ;;  %v9317_v9 = vld [vmem:[#allocation2 + $0x124] sm:$0xf0]  ;;  %v9321_v10 = vld [vmem:[#allocation2 + $0x14c] sm:$0xf]  ;;  %v10528_v12 = vor.u32 %v9316_v63, %v8157_v61 }
 0x150   :  { %v8199_v11 = vld [vmem:[#allocation2 + $0x168] sm:$0xf0]  ;;  %v8125_v13 = vld [vmem:[#allocation2 + $0xc0] sm:$0xf]  ;;  %v10534_v19 = vor.u32 %v9312_v4, %v8159_v5  ;;  %v10536_v20 = vor.u32 %v9317_v9, %v8165_v6  ;;  %v9304_v21 = vld [vmem:[#allocation2 + $0xc4] sm:$0xf] }
 0x151   :  { %v10530_v15 = vor.u32 %v9321_v10, %v8199_v11  ;;  %v9308_v16 = vld [vmem:[#allocation2 + $0xdc] sm:$0xf0]  ;;  %v9313_v24 = vld [vmem:[#allocation2 + $0x10c] sm:$0xf]  ;;  %v8127_v8 = vld [vmem:[#allocation2 + $0xe0] sm:$0xf0] }
 0x152   :  { %1628 = vmatpush.bf16.msra.mxu0 %v10516_v59  ;;  %1666 = vmatpush.bf16.msra.mxu3 %v10524_v3  ;;  %v8167_v25 = vld [vmem:[#allocation2 + $0x128] sm:$0xf0]  ;;  %v8133_v28 = vld [vmem:[#allocation2 + $0xc8] sm:$0xf]  ;;  %v10540_v31 = vor.u32 %v9308_v16, %v8125_v13  ;;  %v8093_v35 = vld [vmem:[#allocation2 + $0x80] sm:$0xf]  ;;  %v10546_v39 = vor.u32 %v9304_v21, %v8127_v8 }
 0x153   :  { %1641 = vmatpush.bf16.msra.mxu1 %v10520_v0  ;;  %1654 = vmatpush.bf16.msra.mxu2 %v10522_v1  ;;  %v9309_v29 = vld [vmem:[#allocation2 + $0xe4] sm:$0xf0]  ;;  %v10542_v34 = vor.u32 %v9313_v24, %v8167_v25  ;;  %v9300_v37 = vld [vmem:[#allocation2 + $0x9c] sm:$0xf0]  ;;  %v9296_v42 = vld [vmem:[#allocation2 + $0x84] sm:$0xf] }
 0x154   :  { %v10548_v41 = vor.u32 %v9309_v29, %v8133_v28  ;;  %v9305_v46 = vld [vmem:[#allocation2 + $0xcc] sm:$0xf]  ;;  %v8095_v49 = vld [vmem:[#allocation2 + $0xa0] sm:$0xf0]  ;;  %v8101_v51 = vld [vmem:[#allocation2 + $0x88] sm:$0xf]  ;;  %v10552_v53 = vor.u32 %v9300_v37, %v8093_v35 }
 0x155   :  { %v8135_v47 = vld [vmem:[#allocation2 + $0xe8] sm:$0xf0]  ;;  %v9301_v52 = vld [vmem:[#allocation2 + $0xa4] sm:$0xf0]  ;;  %v8061_v56 = vld [vmem:[#allocation2 + $0x40] sm:$0xf]  ;;  %v10558_v60 = vor.u32 %v9296_v42, %v8095_v49 }
 0x156   :  { %1629 = vmatpush.bf16.msra.mxu0 %v10528_v12  ;;  %1667 = vmatpush.bf16.msra.mxu3 %v10530_v15  ;;  %v10554_v55 = vor.u32 %v9305_v46, %v8135_v47  ;;  %v9292_v57 = vld [vmem:[#allocation2 + $0x5c] sm:$0xf0]  ;;  %v10560_v61 = vor.u32 %v9301_v52, %v8101_v51  ;;  %v9288_v63 = vld [vmem:[#allocation2 + $0x44] sm:$0xf]  ;;  %v9297_v4 = vld [vmem:[#allocation2 + $0x8c] sm:$0xf] }
 0x157   :  { %1642 = vmatpush.bf16.msra.mxu1 %v10534_v19  ;;  %1655 = vmatpush.bf16.msra.mxu2 %v10536_v20  ;;  %v8103_v5 = vld [vmem:[#allocation2 + $0xa8] sm:$0xf0]  ;;  %v8063_v6 = vld [vmem:[#allocation2 + $0x60] sm:$0xf0]  ;;  %v8069_v9 = vld [vmem:[#allocation2 + $0x48] sm:$0xf]  ;;  %v10564_v11 = vor.u32 %v9292_v57, %v8061_v56 }
 0x158   :  { %v9293_v10 = vld [vmem:[#allocation2 + $0x64] sm:$0xf0]  ;;  %v10566_v13 = vor.u32 %v9297_v4, %v8103_v5  ;;  %v8029_v16 = vld [vmem:[#allocation2] sm:$0xf]  ;;  %v9280_v24 = vld [vmem:[#allocation2 + $0x4] sm:$0xf]  ;;  %v10570_v25 = vor.u32 %v9288_v63, %v8063_v6 }
 0x159   :  { %v9284_v21 = vld [vmem:[#allocation2 + $0x1c] sm:$0xf0]  ;;  %v10572_v8 = vor.u32 %v9293_v10, %v8069_v9  ;;  %v8031_v28 = vld [vmem:[#allocation2 + $0x20] sm:$0xf0]  ;;  %v9289_v29 = vld [vmem:[#allocation2 + $0x4c] sm:$0xf] }
 0x15a   :  { %1630 = vmatpush.bf16.msra.mxu0 %v10540_v31  ;;  %1668 = vmatpush.bf16.msra.mxu3 %v10542_v34  ;;  %v8071_v35 = vld [vmem:[#allocation2 + $0x68] sm:$0xf0]  ;;  %v8037_v37 = vld [vmem:[#allocation2 + $0x8] sm:$0xf]  ;;  %v8269_v46 = vld [vmem:[#allocation2 + $0x1d0] sm:$0xf]  ;;  %v10576_v52 = vor.u32 %v9284_v21, %v8029_v16  ;;  %v10582_v4 = vor.u32 %v9280_v24, %v8031_v28 }
 0x15b   :  { %1643 = vmatpush.bf16.msra.mxu1 %v10546_v39  ;;  %1656 = vmatpush.bf16.msra.mxu2 %v10548_v41  ;;  %v9285_v42 = vld [vmem:[#allocation2 + $0x24] sm:$0xf0]  ;;  %v9342_v47 = vld [vmem:[#allocation2 + $0x1ec] sm:$0xf0]  ;;  %v9338_v49 = vld [vmem:[#allocation2 + $0x1d4] sm:$0xf]  ;;  %v10578_v63 = vor.u32 %v9289_v29, %v8071_v35 }
 0x15c   :  { %v8271_v51 = vld [vmem:[#allocation2 + $0x1f0] sm:$0xf0]  ;;  %v8277_v56 = vld [vmem:[#allocation2 + $0x1d8] sm:$0xf]  ;;  %v10584_v5 = vor.u32 %v9285_v42, %v8037_v37  ;;  %v9281_v6 = vld [vmem:[#allocation2 + $0xc] sm:$0xf]  ;;  %v10586_v10 = vor.u32 %v9342_v47, %v8269_v46 }
 0x15d   :  { %v9343_v57 = vld [vmem:[#allocation2 + $0x1f4] sm:$0xf0]  ;;  %v8039_v9 = vld [vmem:[#allocation2 + $0x28] sm:$0xf0]  ;;  %v10588_v14 = vor.u32 %v9338_v49, %v8271_v51  ;;  %v8237_v16 = vld [vmem:[#allocation2 + $0x190] sm:$0xf] }
 0x15e   :  { %1631 = vmatpush.bf16.msra.mxu0 %v10552_v53  ;;  %1669 = vmatpush.bf16.msra.mxu3 %v10554_v55  ;;  %13471 = vst [vmem:[#allocation38_spill] sm:$0xff] %v10584_v5  ;;  %v9339_v21 = vld [vmem:[#allocation2 + $0x1dc] sm:$0xf]  ;;  %v10590_v7 = vor.u32 %v9343_v57, %v8277_v56  ;;  %v9334_v29 = vld [vmem:[#allocation2 + $0x1ac] sm:$0xf0]  ;;  %v10594_v37 = vor.u32 %v9281_v6, %v8039_v9  ;;  %v13266_v57 = vmov 0.0|0.0  }
 0x15f   :  { %1644 = vmatpush.bf16.msra.mxu1 %v10558_v60  ;;  %1657 = vmatpush.bf16.msra.mxu2 %v10560_v61  ;;  %13472 = vst [vmem:[#allocation39_spill] sm:$0xff] %v10586_v10  ;;  %v8279_v48 = vld [vmem:[#allocation2 + $0x1f8] sm:$0xf0]  ;;  %v9330_v35 = vld [vmem:[#allocation2 + $0x194] sm:$0xf]  ;;  %v10602_v46 = vor.u32 %v9334_v29, %v8237_v16 }
 0x160   :  { %13473 = vst [vmem:[#allocation40_spill] sm:$0xff] %v10588_v14  ;;  %v8239_v58 = vld [vmem:[#allocation2 + $0x1b0] sm:$0xf0]  ;;  %v8245_v24 = vld [vmem:[#allocation2 + $0x198] sm:$0xf]  ;;  %v10598_v42 = vor.u32 %v9339_v21, %v8279_v48 }
 0x161   :  { %13474 = vst [vmem:[#allocation41_spill] sm:$0xff] %v10590_v7  ;;  %v9335_v28 = vld [vmem:[#allocation2 + $0x1b4] sm:$0xf0]  ;;  %v10604_v47 = vor.u32 %v9330_v35, %v8239_v58  ;;  %v8205_v49 = vld [vmem:[#allocation2 + $0x150] sm:$0xf] }
 0x162   :  { %1632 = vmatpush.bf16.msra.mxu0 %v10564_v11  ;;  %1670 = vmatpush.bf16.msra.mxu3 %v10566_v13  ;;  %13475 = vst [vmem:[#allocation42_spill] sm:$0xff] %v10594_v37  ;;  %v9331_v51 = vld [vmem:[#allocation2 + $0x19c] sm:$0xf]  ;;  %v10608_v6 = vor.u32 %v9335_v28, %v8245_v24  ;;  %v9326_v48 = vld [vmem:[#allocation2 + $0x16c] sm:$0xf0] }
 0x163   :  { %1645 = vmatpush.bf16.msra.mxu1 %v10570_v25  ;;  %1658 = vmatpush.bf16.msra.mxu2 %v10572_v8  ;;  %13476 = vst [vmem:[#allocation43_spill] sm:$0xff] %v10598_v42  ;;  %v8247_v56 = vld [vmem:[#allocation2 + $0x1b8] sm:$0xf0]  ;;  %v9322_v9 = vld [vmem:[#allocation2 + $0x154] sm:$0xf]  ;;  %v10618_v35 = vor.u32 %v9326_v48, %v8205_v49 }
 0x164   :  { %13477 = vst [vmem:[#allocation44_spill] sm:$0xff] %v10602_v46  ;;  %v8207_v21 = vld [vmem:[#allocation2 + $0x170] sm:$0xf0]  ;;  %v8213_v16 = vld [vmem:[#allocation2 + $0x158] sm:$0xf]  ;;  %v10614_v29 = vor.u32 %v9331_v51, %v8247_v56  ;;  %v13484_v51 = vmov 0.0|0.0  }
 0x165   :  { %13478 = vst [vmem:[#allocation45_spill] sm:$0xff] %v10604_v47  ;;  %v9327_v58 = vld [vmem:[#allocation2 + $0x174] sm:$0xf0]  ;;  %v10620_v24 = vor.u32 %v9322_v9, %v8207_v21  ;;  %v8173_v28 = vld [vmem:[#allocation2 + $0x110] sm:$0xf] }
 0x166   :  { %1633 = vmatpush.bf16.msra.mxu0 %v10576_v52  ;;  %1671 = vmatpush.bf16.msra.mxu3 %v10578_v63  ;;  %13479 = vst [vmem:[#allocation46_spill] sm:$0xff] %v10608_v6  ;;  %v9323_v54 = vld [vmem:[#allocation2 + $0x15c] sm:$0xf]  ;;  %v10623_v30 = vor.u32 %v9327_v58, %v8213_v16  ;;  %v9314_v26 = vld [vmem:[#allocation2 + $0x114] sm:$0xf] }
 0x167   :  { %1646 = vmatpush.bf16.msra.mxu1 %v10582_v4  ;;  %1659 = vmatpush.bf16.msra.mxu2 %v10584_v5  ;;  %13480 = vst [vmem:[#allocation47_spill] sm:$0xff] %v10614_v29  ;;  %v8215_v44 = vld [vmem:[#allocation2 + $0x178] sm:$0xf0]  ;;  %v8175_v22 = vld [vmem:[#allocation2 + $0x130] sm:$0xf0] }
 0x168   :  { %13481 = vst [vmem:[#allocation48_spill] sm:$0xff] %v10618_v35  ;;  %v8181_v56 = vld [vmem:[#allocation2 + $0x118] sm:$0xf]  ;;  %v10627_v49 = vor.u32 %v9323_v54, %v8215_v44  ;;  %v10633_v9 = vor.u32 %v9314_v26, %v8175_v22  ;;  %v8141_v21 = vld [vmem:[#allocation2 + $0xd0] sm:$0xf] }
 0x169   :  { %1634 = vmatmul.bf16.vlgmr.msra.gmra.mxu0 %v13266_v57  ;;  %13482 = vst [vmem:[#allocation49_spill] sm:$0xff] %v10620_v24  ;;  %v9319_v40 = vld [vmem:[#allocation2 + $0x134] sm:$0xf0]  ;;  %v9315_v16 = vld [vmem:[#allocation2 + $0x11c] sm:$0xf] }
 0x16a   :  { %1678 = vmatpush.bf16.msrb.mxu0 %v10586_v10  ;;  %1647 = vmatmul.bf16.vlgmr.msra.gmra.mxu1 %v13266_v57  ;;  %13483 = vst [vmem:[#allocation50_spill] sm:$0xff] %v10623_v30  ;;  %v8183_v58 = vld [vmem:[#allocation2 + $0x138] sm:$0xf0]  ;;  %v10636_v17 = vor.u32 %v9319_v40, %v8181_v56  ;;  %v9310_v2 = vld [vmem:[#allocation2 + $0xec] sm:$0xf0] }
 0x16b   :  { %1691 = vmatpush.bf16.msrb.mxu1 %v10588_v14  ;;  %1704 = vmatpush.bf16.msrb.mxu2 %v10590_v7  ;;  %13485 = vst [vmem:[#allocation51_spill] sm:$0xff] %v10627_v49  ;;  %v9306_v62 = vld [vmem:[#allocation2 + $0xd4] sm:$0xf]  ;;  %v8149_v44 = vld [vmem:[#allocation2 + $0xd8] sm:$0xf]  ;;  %v10639_v23 = vor.u32 %v9315_v16, %v8183_v58  ;;  %v10643_v26 = vor.u32 %v9310_v2, %v8141_v21 }
 0x16c   :  { %1672 = vmatpush.bf16.msra.mxu3 %v10594_v37  ;;  %1660 = vmatmul.bf16.vlgmr.msra.gmra.mxu2 %v13266_v57  ;;  %v9318_v57 = vld [vmem:[#allocation2 + $0x12c] sm:$0xf0]  ;;  %13487 = vst [vmem:[#allocation53_spill] sm:$0xff] %v10633_v9  ;;  %v8143_v36 = vld [vmem:[#allocation2 + $0xf0] sm:$0xf0] }
 0x16d   :  { %v10631_v48 = vor.u32 %v9318_v57, %v8173_v28  ;;  %13488 = vst [vmem:[#allocation54_spill] sm:$0xff] %v10636_v17  ;;  %v9311_v54 = vld [vmem:[#allocation2 + $0xf4] sm:$0xf0]  ;;  %v10645_v22 = vor.u32 %v9306_v62, %v8143_v36  ;;  %v8109_v57 = vld [vmem:[#allocation2 + $0x90] sm:$0xf] }
 0x16e   :  { %1679 = vmatpush.bf16.msrb.mxu0 %v10602_v46  ;;  %13489 = vst [vmem:[#allocation55_spill] sm:$0xff] %v10639_v23  ;;  %v9307_v40 = vld [vmem:[#allocation2 + $0xdc] sm:$0xf]  ;;  %v10648_v56 = vor.u32 %v9311_v54, %v8149_v44  ;;  %v9302_v18 = vld [vmem:[#allocation2 + $0xac] sm:$0xf0] }
 0x16f   :  { %1692 = vmatpush.bf16.msrb.mxu1 %v10604_v47  ;;  %1705 = vmatpush.bf16.msrb.mxu2 %v10608_v6  ;;  %13486 = vst [vmem:[#allocation52_spill] sm:$0xff] %v10631_v48  ;;  %v8151_v28 = vld [vmem:[#allocation2 + $0xf8] sm:$0xf0]  ;;  %v8117_v16 = vld [vmem:[#allocation2 + $0x98] sm:$0xf]  ;;  %v10655_v36 = vor.u32 %v9302_v18, %v8109_v57 }
 0x170   :  { %1717 = vmatpush.bf16.msrb.mxu3 %v10598_v42  ;;  %13490 = vst [vmem:[#allocation56_spill] sm:$0xff] %v10643_v26  ;;  %v9303_v58 = vld [vmem:[#allocation2 + $0xb4] sm:$0xf0]  ;;  %v8077_v2 = vld [vmem:[#allocation2 + $0x50] sm:$0xf] }
 0x171   :  { %1673 = vmatmul.bf16.vlgmr.msra.gmra.mxu3 %v13484_v51  ;;  %13491 = vst [vmem:[#allocation57_spill] sm:$0xff] %v10645_v22  ;;  %v9299_v21 = vld [vmem:[#allocation2 + $0x9c] sm:$0xf]  ;;  %v10660_v54 = vor.u32 %v9303_v58, %v8117_v16 }
 0x172   :  { %1680 = vmatpush.bf16.msrb.mxu0 %v10618_v35  ;;  %13492 = vst [vmem:[#allocation58_spill] sm:$0xff] %v10648_v56  ;;  %v8119_v44 = vld [vmem:[#allocation2 + $0xb8] sm:$0xf0] }
 0x173   :  { %1693 = vmatpush.bf16.msrb.mxu1 %v10620_v24  ;;  %1706 = vmatpush.bf16.msrb.mxu2 %v10623_v30  ;;  %v9298_v30 = vld [vmem:[#allocation2 + $0x94] sm:$0xf]  ;;  %13494 = vst [vmem:[#allocation60_spill] sm:$0xff] %v10655_v36  ;;  %v9291_v57 = vld [vmem:[#allocation2 + $0x5c] sm:$0xf] }
 0x174   :  { %1718 = vmatpush.bf16.msrb.mxu3 %v10614_v29  ;;  %13496 = vst [vmem:[#allocation62_spill] sm:$0xff] %v10660_v54  ;;  %v8087_v16 = vld [vmem:[#allocation2 + $0x78] sm:$0xf0] }
 0x176   :  { %1681 = vmatpush.bf16.msrb.mxu0 %v10631_v48  ;;  %v10651_v48 = vor.u32 %v9307_v40, %v8151_v28  ;;  %v8085_v40 = vld [vmem:[#allocation2 + $0x58] sm:$0xf] }
 0x177   :  { %1694 = vmatpush.bf16.msrb.mxu1 %v10633_v9  ;;  %1707 = vmatpush.bf16.msrb.mxu2 %v10636_v17  ;;  %v9294_v17 = vld [vmem:[#allocation2 + $0x6c] sm:$0xf0]  ;;  %v9290_v9 = vld [vmem:[#allocation2 + $0x54] sm:$0xf]  ;;  %v9295_v28 = vld [vmem:[#allocation2 + $0x74] sm:$0xf0] }
 0x178   :  { %1719 = vmatpush.bf16.msrb.mxu3 %v10627_v49  ;;  %v8111_v49 = vld [vmem:[#allocation2 + $0xb0] sm:$0xf0]  ;;  %13493 = vst [vmem:[#allocation59_spill] sm:$0xff] %v10651_v48  ;;  %v10667_v18 = vor.u32 %v9294_v17, %v8077_v2  ;;  %v10672_v58 = vor.u32 %v9295_v28, %v8085_v40  ;;  %v9283_v2 = vld [vmem:[#allocation2 + $0x1c] sm:$0xf] }
 0x179   :  { %v10657_v62 = vor.u32 %v9298_v30, %v8111_v49  ;;  %v8045_v49 = vld [vmem:[#allocation2 + $0x10] sm:$0xf]  ;;  %v8055_v40 = vld [vmem:[#allocation2 + $0x38] sm:$0xf0] }
 0x17a   :  { %1682 = vmatpush.bf16.msrb.mxu0 %v10643_v26  ;;  %v10663_v26 = vor.u32 %v9299_v21, %v8119_v44  ;;  %13498 = vst [vmem:[#allocation64_spill] sm:$0xff] %v10667_v18  ;;  %v8053_v21 = vld [vmem:[#allocation2 + $0x18] sm:$0xf]  ;;  %v10689_v28 = vor.u32 %v9283_v2, %v8055_v40  ;;  %v13514_v2 = vld [vmem:[#allocation58_spill] sm:$0xff] }
 0x17b   :  { %1695 = vmatpush.bf16.msrb.mxu1 %v10645_v22  ;;  %13495 = vst [vmem:[#allocation61_spill] sm:$0xff] %v10657_v62  ;;  %1708 = vmatpush.bf16.msrb.mxu2 %v10648_v56  ;;  %v9286_v56 = vld [vmem:[#allocation2 + $0x2c] sm:$0xf0]  ;;  %v9282_v22 = vld [vmem:[#allocation2 + $0x14] sm:$0xf] }
 0x17c   :  { %1720 = vmatpush.bf16.msrb.mxu3 %v10639_v23  ;;  %v8079_v23 = vld [vmem:[#allocation2 + $0x70] sm:$0xf0]  ;;  %13497 = vst [vmem:[#allocation63_spill] sm:$0xff] %v10663_v26  ;;  %v9287_v44 = vld [vmem:[#allocation2 + $0x34] sm:$0xf0] }
 0x17d   :  { %v10669_v30 = vor.u32 %v9290_v9, %v8079_v23  ;;  %13500 = vst [vmem:[#allocation66_spill] sm:$0xff] %v10672_v58  ;;  %v10679_v23 = vor.u32 %v9286_v56, %v8045_v49  ;;  %v10684_v9 = vor.u32 %v9287_v44, %v8053_v21  ;;  %v13508_v56 = vld [vmem:[#allocation52_spill] sm:$0xff]  ;;  %v13509_v49 = vld [vmem:[#allocation53_spill] sm:$0xff] }
 0x17e   :  { %1683 = vmatpush.bf16.msrb.mxu0 %v10655_v36  ;;  %v10675_v36 = vor.u32 %v9291_v57, %v8087_v16  ;;  %13505 = vst [vmem:[#allocation71_spill] sm:$0xff] %v10689_v28  ;;  %v13510_v57 = vld [vmem:[#allocation54_spill] sm:$0xff]  ;;  %v13511_v16 = vld [vmem:[#allocation55_spill] sm:$0xff]  ;;  %v13512_v21 = vld [vmem:[#allocation56_spill] sm:$0xff] }
 0x17f   :  { %1696 = vmatpush.bf16.msrb.mxu1 %v10657_v62  ;;  %13499 = vst [vmem:[#allocation65_spill] sm:$0xff] %v10669_v30  ;;  %1709 = vmatpush.bf16.msrb.mxu2 %v10660_v54  ;;  %v13513_v44 = vld [vmem:[#allocation57_spill] sm:$0xff]  ;;  %v13515_v40 = vld [vmem:[#allocation59_spill] sm:$0xff] }
 0x180   :  { %1721 = vmatpush.bf16.msrb.mxu3 %v10651_v48  ;;  %v8047_v48 = vld [vmem:[#allocation2 + $0x30] sm:$0xf0]  ;;  %13501 = vst [vmem:[#allocation67_spill] sm:$0xff] %v10675_v36 }
 0x181   :  { %13502 = vst [vmem:[#allocation68_spill] sm:$0xff] %v10679_v23  ;;  %v10681_v17 = vor.u32 %v9282_v22, %v8047_v48  ;;  %v13506_v48 = vld [vmem:[#allocation50_spill] sm:$0xff]  ;;  %v13507_v22 = vld [vmem:[#allocation51_spill] sm:$0xff] }
 0x182   :  { %1684 = vmatpush.bf16.msrb.mxu0 %v10667_v18  ;;  %13504 = vst [vmem:[#allocation70_spill] sm:$0xff] %v10684_v9 }
 0x183   :  { %1697 = vmatpush.bf16.msrb.mxu1 %v10669_v30  ;;  %13503 = vst [vmem:[#allocation69_spill] sm:$0xff] %v10681_v17  ;;  %1710 = vmatpush.bf16.msrb.mxu2 %v10672_v58 }
 0x184   :  { %1722 = vmatpush.bf16.msrb.mxu3 %v10663_v26 }
 0x186   :  { %1685 = vmatpush.bf16.msrb.mxu0 %v10679_v23 }
 0x187   :  { %1698 = vmatpush.bf16.msrb.mxu1 %v10681_v17  ;;  %1711 = vmatpush.bf16.msrb.mxu2 %v10684_v9 }
 0x188   :  { %1723 = vmatpush.bf16.msrb.mxu3 %v10675_v36 }
 0x189   :  { %1686 = vmatmul.bf16.vlgmr.msrb.gmra.mxu0 %v13484_v51 }
 0x18a   :  { %1882 = vmatpush.bf16.msra.mxu0 %v10497_v27  ;;  %1699 = vmatmul.bf16.vlgmr.msrb.gmra.mxu1 %v13484_v51 }
 0x18b   :  { %1895 = vmatpush.bf16.msra.mxu1 %v10499_v32  ;;  %1908 = vmatpush.bf16.msra.mxu2 %v10501_v33 }
 0x18c   :  { %1712 = vmatmul.bf16.vlgmr.msrb.gmra.mxu2 %v13484_v51  ;;  %1724 = vmatpush.bf16.msrb.mxu3 %v10689_v28 }
 0x18e   :  { %1883 = vmatpush.bf16.msra.mxu0 %v10504_v38 }
 0x18f   :  { %1896 = vmatpush.bf16.msra.mxu1 %v10508_v43  ;;  %1909 = vmatpush.bf16.msra.mxu2 %v10510_v45 }
 0x190   :  { %1921 = vmatpush.bf16.msra.mxu3 %v10512_v50 }
 0x191   :  { %1725 = vmatmul.bf16.vlgmr.msrb.gmra.mxu3 %v13484_v51  ;;  %v13516_v51 = vld [vmem:[#allocation60_spill] sm:$0xff] }
 0x192   :  { %1884 = vmatpush.bf16.msra.mxu0 %v10516_v59 }
 0x193   :  { %1897 = vmatpush.bf16.msra.mxu1 %v10520_v0  ;;  %1910 = vmatpush.bf16.msra.mxu2 %v10522_v1 }
 0x194   :  { %1922 = vmatpush.bf16.msra.mxu3 %v10524_v3 }
 0x196   :  { %1885 = vmatpush.bf16.msra.mxu0 %v10528_v12 }
 0x197   :  { %1898 = vmatpush.bf16.msra.mxu1 %v10534_v19  ;;  %1911 = vmatpush.bf16.msra.mxu2 %v10536_v20 }
 0x198   :  { %1923 = vmatpush.bf16.msra.mxu3 %v10530_v15 }
 0x19a   :  { %1886 = vmatpush.bf16.msra.mxu0 %v10540_v31 }
 0x19b   :  { %1899 = vmatpush.bf16.msra.mxu1 %v10546_v39  ;;  %1912 = vmatpush.bf16.msra.mxu2 %v10548_v41 }
 0x19c   :  { %1924 = vmatpush.bf16.msra.mxu3 %v10542_v34 }
 0x19e   :  { %1887 = vmatpush.bf16.msra.mxu0 %v10552_v53 }
 0x19f   :  { %1900 = vmatpush.bf16.msra.mxu1 %v10558_v60  ;;  %1913 = vmatpush.bf16.msra.mxu2 %v10560_v61 }
 0x1a0   :  { %1925 = vmatpush.bf16.msra.mxu3 %v10554_v55 }
 0x1a2   :  { %1888 = vmatpush.bf16.msra.mxu0 %v10564_v11 }
 0x1a3   :  { %1901 = vmatpush.bf16.msra.mxu1 %v10570_v25  ;;  %1914 = vmatpush.bf16.msra.mxu2 %v10572_v8 }
 0x1a4   :  { %1926 = vmatpush.bf16.msra.mxu3 %v10566_v13 }
 0x1a6   :  { %1889 = vmatpush.bf16.msra.mxu0 %v10576_v52 }
 0x1a7   :  { %1902 = vmatpush.bf16.msra.mxu1 %v10582_v4  ;;  %1915 = vmatpush.bf16.msra.mxu2 %v10584_v5 }
 0x1a8   :  { %1927 = vmatpush.bf16.msra.mxu3 %v10578_v63 }
 0x1aa   :  { %1934 = vmatpush.bf16.msrb.mxu0 %v10586_v10 }
 0x1ab   :  { %1947 = vmatpush.bf16.msrb.mxu1 %v10588_v14  ;;  %1960 = vmatpush.bf16.msrb.mxu2 %v10590_v7 }
 0x1ac   :  { %1928 = vmatpush.bf16.msra.mxu3 %v10594_v37 }
 0x1ae   :  { %1935 = vmatpush.bf16.msrb.mxu0 %v10602_v46 }
 0x1af   :  { %1948 = vmatpush.bf16.msrb.mxu1 %v10604_v47  ;;  %1961 = vmatpush.bf16.msrb.mxu2 %v10608_v6 }
 0x1b0   :  { %1973 = vmatpush.bf16.msrb.mxu3 %v10598_v42 }
 0x1b2   :  { %1936 = vmatpush.bf16.msrb.mxu0 %v10618_v35  ;;  %v13523_v35 = vld [vmem:[#allocation27_spill] sm:$0xff] }
 0x1b3   :  { %1949 = vmatpush.bf16.msrb.mxu1 %v10620_v24  ;;  %1962 = vmatpush.bf16.msrb.mxu2 %v13506_v48 }
 0x1b4   :  { %1974 = vmatpush.bf16.msrb.mxu3 %v10614_v29 }
 0x1b6   :  { %1937 = vmatpush.bf16.msrb.mxu0 %v13508_v56 }
 0x1b7   :  { %1950 = vmatpush.bf16.msrb.mxu1 %v13509_v49  ;;  %1963 = vmatpush.bf16.msrb.mxu2 %v13510_v57  ;;  %v13519_v49 = vld [vmem:[#allocation26_spill] sm:$0xff] }
 0x1b8   :  { %1975 = vmatpush.bf16.msrb.mxu3 %v13507_v22 }
 0x1ba   :  { %1938 = vmatpush.bf16.msrb.mxu0 %v13512_v21 }
 0x1bb   :  { %1951 = vmatpush.bf16.msrb.mxu1 %v13513_v44  ;;  %1964 = vmatpush.bf16.msrb.mxu2 %v13514_v2 }
 0x1bc   :  { %1976 = vmatpush.bf16.msrb.mxu3 %v13511_v16 }
 0x1be   :  { %1939 = vmatpush.bf16.msrb.mxu0 %v13516_v51  ;;  %v13517_v51 = vld [vmem:[#allocation22_spill] sm:$0xff] }
 0x1bf   :  { %1952 = vmatpush.bf16.msrb.mxu1 %v10657_v62  ;;  %1965 = vmatpush.bf16.msrb.mxu2 %v10660_v54 }
 0x1c0   :  { %1977 = vmatpush.bf16.msrb.mxu3 %v13515_v40  ;;  %v13518_v40 = vld [vmem:[#allocation23_spill] sm:$0xff] }
 0x1c2   :  { %1940 = vmatpush.bf16.msrb.mxu0 %v10667_v18 }
 0x1c3   :  { %1953 = vmatpush.bf16.msrb.mxu1 %v10669_v30  ;;  %1966 = vmatpush.bf16.msrb.mxu2 %v10672_v58 }
 0x1c4   :  { %1978 = vmatpush.bf16.msrb.mxu3 %v10663_v26 }
 0x1c6   :  { %1941 = vmatpush.bf16.msrb.mxu0 %v10679_v23 }
 0x1c7   :  { %1954 = vmatpush.bf16.msrb.mxu1 %v10681_v17  ;;  %1967 = vmatpush.bf16.msrb.mxu2 %v10684_v9 }
 0x1c8   :  { %1979 = vmatpush.bf16.msrb.mxu3 %v10675_v36 }
 0x1cc   :  { %1980 = vmatpush.bf16.msrb.mxu3 %v10689_v28 }
 0x1e6   :  { %v1635_v62 = vpop.f32.mrf.mxu0 }
 0x1e7   :  { %v1648_v54 = vpop.f32.mrf.mxu1  ;;  %v1730_v26 = vadd.f32 %v1635_v62, %v13517_v51 }
 0x1e8   :  { %v1731_v18 = vadd.f32 %v1648_v54, %v13518_v40 }
 0x1e9   :  { %v8283_v58 = vmul.f32 -1.442695, %v1730_v26 }
 0x1ea   :  { %v8284_v36 = vmul.f32 -1.442695, %v1731_v18 }
 0x1eb   :  { %9543 = vpow2.f32 %v8283_v58 }
 0x1ec   :  { %9545 = vpow2.f32 %v8284_v36 }
 0x1ee   :  { %v1637_v30 = vpop.f32.mrf.mxu0 }
 0x1ef   :  { %v1661_v2 = vpop.f32.mrf.mxu2  ;;  %v1650_v44 = vpop.f32.mrf.mxu1 }
 0x1f0   :  { %v1732_v62 = vadd.f32 %v1661_v2, %v13519_v49 }
 0x1f1   :  { %v9544_v16 = vpop.eup %9543 }
 0x1f2   :  { %v9546_v9 = vpop.eup %9545  ;;  %v10763_v57 = vadd.f32 1.0, %v9544_v16  ;;  %v8285_v54 = vmul.f32 -1.442695, %v1732_v62 }
 0x1f3   :  { %v10765_v28 = vadd.f32 1.0, %v9546_v9  ;;  %v13521_v9 = vld [vmem:[#allocation33_spill] sm:$0xff] }
 0x1f4   :  { %v1674_v21 = vpop.f32.mrf.mxu3  ;;  %9547 = vrcp.f32 %v10763_v57  ;;  %vm1767_vm0 = vweird.f32 %v10763_v57 }
 0x1f5   :  { %9549 = vrcp.f32 %v10765_v28  ;;  %v1733_v29 = vadd.f32 %v1674_v21, %v13523_v35  ;;  %vm1782_vm2 = vweird.f32 %v10765_v28  ;;  %v1788_v21 = vand.u32 2147483648, %v10765_v28 }
 0x1f6   :  { %9551 = vpow2.f32 %v8285_v54 }
 0x1f7   :  { %v1663_v23 = vpop.f32.mrf.mxu2 }
 0x1f8   :  { %v13520_v23 = vld [vmem:[#allocation32_spill] sm:$0xff] }
 0x1fa   :  { %v10770_v58 = vpop.eup %9547 }
 0x1fb   :  { %v10773_v16 = vpop.eup %9549  ;;  %v1763_v49 = vmul.f32 %v10770_v58, %v10763_v57  ;;  %vm1768_vm1 = vweird.f32 %v10770_v58 }
 0x1fc   :  { %v1676_v17 = vpop.f32.mrf.mxu3  ;;  %v1778_v62 = vmul.f32 %v10773_v16, %v10765_v28  ;;  %v9552_v54 = vpop.eup %9551  ;;  %vm1783_vm3 = vweird.f32 %v10773_v16  ;;  %vm10802_vm4 = vmor %vm1767_vm0, %vm1768_vm1 }
 0x1fd   :  { %v1764_v48 = vsub.f32 1.0, %v1763_v49  ;;  %vm10807_vm5 = vmor %vm1782_vm2, %vm1783_vm3 }
 0x206   :  { %v1687_v26 = vpop.f32.mrf.mxu0 }
 0x207   :  { %v1700_v30 = vpop.f32.mrf.mxu1  ;;  %v1738_v18 = vrot.slane %v1687_v26, 4 }
 0x208   :  { %v1739_v36 = vrot.slane %v1700_v30, 4 }
 0x209   :  { %v1746_v17 = vadd.f32 %v1738_v18, %v13520_v23  ;;  %v13522_v18 = vld [vmem:[#allocation36_spill] sm:$0xff] }
 0x20a   :  { %v1747_v44 = vadd.f32 %v1739_v36, %v13521_v9  ;;  %v1779_v36 = vsub.f32 1.0, %v1778_v62 }
 0x20b   :  { %v8286_v40 = vmul.f32 -1.442695, %v1746_v17  ;;  %v10781_v17 = vadd.f32 1.0, %v9552_v54 }
 0x20c   :  { %v8287_v2 = vmul.f32 -1.442695, %v1747_v44 }
 0x20d   :  { %9553 = vpow2.f32 %v8286_v40  ;;  %v1780_v40 = vmul.f32 %v10773_v16, %v1779_v36  ;;  %v13528_v36 = vld [vmem:[#allocation37_spill] sm:$0xff]  ;;  %vm1797_vm0 = vweird.f32 %v10781_v17 }
 0x20e   :  { %9555 = vpow2.f32 %v8287_v2  ;;  %v1689_v51 = vpop.f32.mrf.mxu0 }
 0x20f   :  { %v1713_v26 = vpop.f32.mrf.mxu2  ;;  %v1702_v56 = vpop.f32.mrf.mxu1  ;;  %v1765_v51 = vmul.f32 %v10770_v58, %v1764_v48  ;;  %v1771_v48 = vand.u32 2147483647, %v10763_v57 }
 0x210   :  { %v1740_v30 = vrot.slane %v1713_v26, 4 }
 0x211   :  { %v1766_v62 = vadd.f32 %v10770_v58, %v1765_v51  ;;  %v1789_v51 = vor.u32 1.1754944e-38, %v1788_v21  ;;  %vm1772_vm6 = vcmp.eq.f32.partialorder %v1771_v48, 8.507059e+37 }
 0x212   :  { %v1748_v23 = vadd.f32 %v1740_v30, %v13522_v18 }
 0x213   :  { %v9554_v9 = vpop.eup %9553 }
 0x214   :  { %v1726_v22 = vpop.f32.mrf.mxu3  ;;  %v8288_v44 = vmul.f32 -1.442695, %v1748_v23  ;;  %v9556_v24 = vpop.eup %9555  ;;  %v10784_v6 = vadd.f32 1.0, %v9554_v9  ;;  %v1786_v9 = vand.u32 2147483647, %v10765_v28 }
 0x215   :  { %v10789_v56 = vadd.f32 1.0, %v9556_v24  ;;  %v1741_v23 = vrot.slane %v1726_v22, 4  ;;  %v1773_v24 = vand.u32 2147483648, %v10763_v57  ;;  %v1781_v22 = vadd.f32 %v10773_v16, %v1780_v40 }
 0x216   :  { %9557 = vpow2.f32 %v8288_v44  ;;  %vm1787_vm7 = vcmp.eq.f32.partialorder %v1786_v9, 8.507059e+37  ;;  %v1770_v40 = vsel %vm10802_vm4, %v10770_v58, %v1766_v62  ;;  %v1836_v58 = vand.u32 2147483648, %v10784_v6 }
 0x217   :  { %9559 = vrcp.f32 %v10781_v17  ;;  %v1715_v49 = vpop.f32.mrf.mxu2  ;;  %v1749_v44 = vadd.f32 %v1741_v23, %v13528_v36  ;;  %v1851_v62 = vand.u32 2147483648, %v10789_v56  ;;  %v1849_v47 = vand.u32 2147483647, %v10789_v56 }
 0x218   :  { %9561 = vrcp.f32 %v10784_v6  ;;  %vm1830_vm10 = vweird.f32 %v10784_v6  ;;  %vm1845_vm11 = vweird.f32 %v10789_v56 }
 0x219   :  { %9563 = vrcp.f32 %v10789_v56  ;;  %vm1850_vm15 = vcmp.eq.f32.partialorder %v1849_v47, 8.507059e+37 }
 0x21a   :  { %9565 = vtanh.f32 %v1733_v29  ;;  %v1785_v29 = vsel %vm10807_vm5, %v10773_v16, %v1781_v22  ;;  %v1834_v22 = vand.u32 2147483647, %v10784_v6 }
 0x21b   :  { %v1790_v36 = vsel %vm1787_vm7, %v1789_v51, %v1785_v29 }
 0x21c   :  { %v1728_v2 = vpop.f32.mrf.mxu3  ;;  %v9558_v54 = vpop.eup %9557  ;;  %vm1835_vm13 = vcmp.eq.f32.partialorder %v1834_v22, 8.507059e+37 }
 0x21d   :  { %v10812_v57 = vpop.eup %9559  ;;  %v10814_v28 = vadd.f32 1.0, %v9558_v54  ;;  %v1774_v2 = vor.u32 1.1754944e-38, %v1773_v24 }
 0x21e   :  { %v9562_v49 = vpop.eup %9561  ;;  %v1793_v54 = vmul.f32 %v10812_v57, %v10781_v17  ;;  %vm1798_vm1 = vweird.f32 %v10812_v57 }
 0x21f   :  { %v9564_v35 = vpop.eup %9563  ;;  %v1826_v23 = vmul.f32 %v9562_v49, %v10784_v6  ;;  %9567 = vrcp.f32 %v10814_v28  ;;  %v1775_v9 = vsel %vm1772_vm6, %v1774_v2, %v1770_v40  ;;  %vm1831_vm8 = vweird.f32 %v9562_v49  ;;  %vm1799_vm3 = vmor %vm1797_vm0, %vm1798_vm1 }
 0x220   :  { %v1841_v21 = vmul.f32 %v9564_v35, %v10789_v56  ;;  %9569 = vtanh.f32 %v1749_v44  ;;  %v9566_v24 = vpop.eup %9565  ;;  %v1794_v30 = vsub.f32 1.0, %v1793_v54  ;;  %vm1846_vm9 = vweird.f32 %v9564_v35  ;;  %vm1832_vm12 = vmor %vm1830_vm10, %vm1831_vm8 }
 0x221   :  { %v1827_v48 = vsub.f32 1.0, %v1826_v23  ;;  %v1808_v44 = vmul.f32 0.0, %v1790_v36  ;;  %v1809_v23 = vmul.f32 %v9566_v24, %v1775_v9  ;;  %v1837_v40 = vor.u32 1.1754944e-38, %v1836_v58  ;;  %vm1847_vm14 = vmor %vm1845_vm11, %vm1846_vm9 }
 0x222   :  { %v1842_v26 = vsub.f32 1.0, %v1841_v21  ;;  %v1852_v21 = vor.u32 1.1754944e-38, %v1851_v62  ;;  %v1795_v24 = vmul.f32 %v10812_v57, %v1794_v30  ;;  %v1866_v58 = vand.u32 2147483648, %v10814_v28 }
 0x223   :  { %v1828_v16 = vmul.f32 %v9562_v49, %v1827_v48  ;;  %v10836_v6 = vadd.f32 %v1809_v23, %v1808_v44  ;;  %vm1860_vm4 = vweird.f32 %v10814_v28  ;;  %v1864_v62 = vand.u32 2147483647, %v10814_v28 }
 0x224   :  { %v1843_v18 = vmul.f32 %v9564_v35, %v1842_v26  ;;  %v1796_v47 = vadd.f32 %v10812_v57, %v1795_v24  ;;  %v1867_v30 = vor.u32 1.1754944e-38, %v1866_v58  ;;  %vm1879_vm8 = vcmask 1041408   ;;  %v13536_v24 = vld [vmem:[#allocation47_spill] sm:$0xff] }
 0x225   :  { %v9568_v46 = vpop.eup %9567  ;;  %v1829_v42 = vadd.f32 %v9562_v49, %v1828_v16  ;;  %9571 = vtanh.f32 %v10836_v6  ;;  %vm1865_vm7 = vcmp.eq.f32.partialorder %v1864_v62, 8.507059e+37  ;;  %v13544_v58 = vld [vmem:[#allocation55_spill] sm:$0xff]  ;;  %v13545_v62 = vld [vmem:[#allocation56_spill] sm:$0xff] }
 0x226   :  { %v9570_v51 = vpop.eup %9569  ;;  %v1856_v2 = vmul.f32 %v9568_v46, %v10814_v28  ;;  %v1844_v29 = vadd.f32 %v9564_v35, %v1843_v18  ;;  %v1803_v18 = vand.u32 2147483648, %v10781_v17  ;;  %vm1861_vm2 = vweird.f32 %v9568_v46 }
 0x227   :  { %v1833_v54 = vsel %vm1832_vm12, %v9562_v49, %v1829_v42  ;;  %v1801_v42 = vand.u32 2147483647, %v10781_v17  ;;  %vm1862_vm5 = vmor %vm1860_vm4, %vm1861_vm2 }
 0x228   :  { %v1857_v48 = vsub.f32 1.0, %v1856_v2  ;;  %v1838_v26 = vsel %vm1835_vm13, %v1837_v40, %v1833_v54  ;;  %v1848_v36 = vsel %vm1847_vm14, %v9564_v35, %v1844_v29  ;;  %v1804_v22 = vor.u32 1.1754944e-38, %v1803_v18  ;;  %v13541_v18 = vld [vmem:[#allocation52_spill] sm:$0xff] }
 0x229   :  { %v1853_v9 = vsel %vm1850_vm15, %v1852_v21, %v1848_v36  ;;  %v1872_v56 = vmul.f32 %v9570_v51, %v1838_v26  ;;  %vm1802_vm6 = vcmp.eq.f32.partialorder %v1801_v42, 8.507059e+37  ;;  %v13534_v26 = vld [vmem:[#allocation45_spill] sm:$0xff]  ;;  %v13535_v36 = vld [vmem:[#allocation46_spill] sm:$0xff]  ;;  %v13540_v42 = vld [vmem:[#allocation51_spill] sm:$0xff] }
 0x22a   :  { %v1858_v16 = vmul.f32 %v9568_v46, %v1857_v48  ;;  %v1871_v7 = vmul.f32 0.0, %v1853_v9  ;;  %v13533_v48 = vld [vmem:[#allocation44_spill] sm:$0xff] }
 0x22b   :  { %v9572_v44 = vpop.eup %9571  ;;  %v13537_v9 = vld [vmem:[#allocation48_spill] sm:$0xff] }
 0x22c   :  { %v10842_v49 = vadd.f32 %v1872_v56, %v1871_v7  ;;  %v1859_v35 = vadd.f32 %v9568_v46, %v1858_v16  ;;  %v1800_v7 = vsel %vm1799_vm3, %v10812_v57, %v1796_v47  ;;  %v13532_v57 = vld [vmem:[#allocation43_spill] sm:$0xff]  ;;  %v13538_v56 = vld [vmem:[#allocation49_spill] sm:$0xff]  ;;  %v13539_v16 = vld [vmem:[#allocation50_spill] sm:$0xff] }
 0x22d   :  { %v1805_v51 = vsel %vm1802_vm6, %v1804_v22, %v1800_v7  ;;  %v13542_v47 = vld [vmem:[#allocation53_spill] sm:$0xff]  ;;  %v13547_v7 = vld [vmem:[#allocation58_spill] sm:$0xff] }
 0x22e   :  { %9573 = vtanh.f32 %v10842_v49  ;;  %v1863_v17 = vsel %vm1862_vm5, %v9568_v46, %v1859_v35  ;;  %v10853_v29 = vmul.f32 %v9572_v44, %v1805_v51  ;;  %v13531_v46 = vld [vmem:[#allocation41_spill] sm:$0xff]  ;;  %v13543_v35 = vld [vmem:[#allocation54_spill] sm:$0xff]  ;;  %v13552_v51 = vld [vmem:[#allocation63_spill] sm:$0xff] }
 0x22f   :  { %v1868_v2 = vsel %vm1865_vm7, %v1867_v30, %v1863_v17  ;;  %v13546_v22 = vld [vmem:[#allocation57_spill] sm:$0xff]  ;;  %v13548_v17 = vld [vmem:[#allocation59_spill] sm:$0xff]  ;;  %v13549_v30 = vld [vmem:[#allocation60_spill] sm:$0xff] }
 0x230   :  { %13530 = vst [vmem:[#allocation73_spill] sm:$0xff] %v10853_v29  ;;  %v13550_v44 = vld [vmem:[#allocation61_spill] sm:$0xff] }
 0x234   :  { %v9574_v23 = vpop.eup %9573 }
 0x235   :  { %v10851_v40 = vmul.f32 %v9574_v23, %v1868_v2  ;;  %v13551_v23 = vld [vmem:[#allocation62_spill] sm:$0xff]  ;;  %v13553_v2 = vld [vmem:[#allocation64_spill] sm:$0xff] }
 0x237   :  { %13529 = vst [vmem:[#allocation72_spill] sm:$0xff] %v10851_v40  ;;  %v1877_v21 = vrot.slane %v10851_v40, 4  ;;  %v13557_v40 = vld [vmem:[#allocation68_spill] sm:$0xff] }
 0x239   :  { %v1880_v28 = vsel %vm1879_vm8, %v10853_v29, %v1877_v21  ;;  %v13554_v21 = vld [vmem:[#allocation65_spill] sm:$0xff] }
 0x23a   :  { %v1881_v54 = vpack.c.bf16 %v1880_v28, %v1880_v28  ;;  %v13555_v28 = vld [vmem:[#allocation66_spill] sm:$0xff]  ;;  %v13558_v29 = vld [vmem:[#allocation69_spill] sm:$0xff] }
 0x23c   :  { %1890 = vmatmul.bf16.vlgmr.msra.gmra.mxu0 %v1881_v54  ;;  %1903 = vmatmul.bf16.vlgmr.msra.gmra.mxu1 %v1881_v54 }
 0x23d   :  { %1916 = vmatmul.bf16.vlgmr.msra.gmra.mxu2 %v1881_v54  ;;  %1929 = vmatmul.bf16.vlgmr.msra.gmra.mxu3 %v1881_v54 }
 0x23e   :  { %2158 = vmatpush.bf16.msra.mxu0 %v10497_v27  ;;  %2171 = vmatpush.bf16.msra.mxu1 %v10499_v32 }
 0x23f   :  { %2184 = vmatpush.bf16.msra.mxu2 %v10501_v33  ;;  %2197 = vmatpush.bf16.msra.mxu3 %v10512_v50 }
 0x242   :  { %2159 = vmatpush.bf16.msra.mxu0 %v10504_v38  ;;  %2172 = vmatpush.bf16.msra.mxu1 %v10508_v43 }
 0x243   :  { %2185 = vmatpush.bf16.msra.mxu2 %v10510_v45  ;;  %2198 = vmatpush.bf16.msra.mxu3 %v10524_v3 }
 0x246   :  { %2160 = vmatpush.bf16.msra.mxu0 %v10516_v59  ;;  %2173 = vmatpush.bf16.msra.mxu1 %v10520_v0 }
 0x247   :  { %2186 = vmatpush.bf16.msra.mxu2 %v10522_v1  ;;  %2199 = vmatpush.bf16.msra.mxu3 %v10530_v15 }
 0x24a   :  { %2161 = vmatpush.bf16.msra.mxu0 %v10528_v12  ;;  %2174 = vmatpush.bf16.msra.mxu1 %v10534_v19 }
 0x24b   :  { %2187 = vmatpush.bf16.msra.mxu2 %v10536_v20  ;;  %2200 = vmatpush.bf16.msra.mxu3 %v10542_v34 }
 0x24c   :  { %1942 = vmatmul.bf16.vlgmr.msrb.gmra.mxu0 %v1881_v54  ;;  %1955 = vmatmul.bf16.vlgmr.msrb.gmra.mxu1 %v1881_v54 }
 0x24d   :  { %1968 = vmatmul.bf16.vlgmr.msrb.gmra.mxu2 %v1881_v54  ;;  %1981 = vmatmul.bf16.vlgmr.msrb.gmra.mxu3 %v1881_v54  ;;  %v13556_v54 = vld [vmem:[#allocation67_spill] sm:$0xff] }
 0x24e   :  { %2162 = vmatpush.bf16.msra.mxu0 %v10540_v31  ;;  %2175 = vmatpush.bf16.msra.mxu1 %v10546_v39 }
 0x24f   :  { %2188 = vmatpush.bf16.msra.mxu2 %v10548_v41  ;;  %2201 = vmatpush.bf16.msra.mxu3 %v10554_v55 }
 0x252   :  { %2163 = vmatpush.bf16.msra.mxu0 %v10552_v53  ;;  %2176 = vmatpush.bf16.msra.mxu1 %v10558_v60 }
 0x253   :  { %2189 = vmatpush.bf16.msra.mxu2 %v10560_v61  ;;  %2202 = vmatpush.bf16.msra.mxu3 %v10566_v13 }
 0x256   :  { %2164 = vmatpush.bf16.msra.mxu0 %v10564_v11  ;;  %2177 = vmatpush.bf16.msra.mxu1 %v10570_v25 }
 0x257   :  { %2190 = vmatpush.bf16.msra.mxu2 %v10572_v8  ;;  %2203 = vmatpush.bf16.msra.mxu3 %v10578_v63 }
 0x25a   :  { %2165 = vmatpush.bf16.msra.mxu0 %v10576_v52  ;;  %2178 = vmatpush.bf16.msra.mxu1 %v10582_v4 }
 0x25b   :  { %2191 = vmatpush.bf16.msra.mxu2 %v10584_v5  ;;  %2204 = vmatpush.bf16.msra.mxu3 %v10594_v37 }
 0x25e   :  { %2210 = vmatpush.bf16.msrb.mxu0 %v10586_v10  ;;  %2223 = vmatpush.bf16.msrb.mxu1 %v10588_v14 }
 0x25f   :  { %2236 = vmatpush.bf16.msrb.mxu2 %v13531_v46  ;;  %2249 = vmatpush.bf16.msrb.mxu3 %v13532_v57 }
 0x262   :  { %2211 = vmatpush.bf16.msrb.mxu0 %v13533_v48  ;;  %2224 = vmatpush.bf16.msrb.mxu1 %v13534_v26 }
 0x263   :  { %2237 = vmatpush.bf16.msrb.mxu2 %v13535_v36  ;;  %2250 = vmatpush.bf16.msrb.mxu3 %v13536_v24 }
 0x266   :  { %2212 = vmatpush.bf16.msrb.mxu0 %v13537_v9  ;;  %2225 = vmatpush.bf16.msrb.mxu1 %v13538_v56 }
 0x267   :  { %2238 = vmatpush.bf16.msrb.mxu2 %v13539_v16  ;;  %2251 = vmatpush.bf16.msrb.mxu3 %v13540_v42 }
 0x26a   :  { %2213 = vmatpush.bf16.msrb.mxu0 %v13541_v18  ;;  %2226 = vmatpush.bf16.msrb.mxu1 %v13542_v47 }
 0x26b   :  { %2239 = vmatpush.bf16.msrb.mxu2 %v13543_v35  ;;  %2252 = vmatpush.bf16.msrb.mxu3 %v13544_v58 }
 0x26e   :  { %2214 = vmatpush.bf16.msrb.mxu0 %v13545_v62  ;;  %2227 = vmatpush.bf16.msrb.mxu1 %v13546_v22  ;;  %v13561_v22 = vld [vmem:[#allocation22_spill] sm:$0xff]  ;;  %v13562_v62 = vld [vmem:[#allocation23_spill] sm:$0xff] }
 0x26f   :  { %2240 = vmatpush.bf16.msrb.mxu2 %v13547_v7  ;;  %2253 = vmatpush.bf16.msrb.mxu3 %v13548_v17  ;;  %v13559_v17 = vld [vmem:[#allocation70_spill] sm:$0xff] }
 0x272   :  { %2215 = vmatpush.bf16.msrb.mxu0 %v13549_v30  ;;  %2228 = vmatpush.bf16.msrb.mxu1 %v13550_v44  ;;  %v13560_v30 = vld [vmem:[#allocation71_spill] sm:$0xff] }
 0x273   :  { %2241 = vmatpush.bf16.msrb.mxu2 %v13551_v23  ;;  %2254 = vmatpush.bf16.msrb.mxu3 %v13552_v51 }
 0x276   :  { %2216 = vmatpush.bf16.msrb.mxu0 %v13553_v2  ;;  %2229 = vmatpush.bf16.msrb.mxu1 %v13554_v21 }
 0x277   :  { %2242 = vmatpush.bf16.msrb.mxu2 %v13555_v28  ;;  %2255 = vmatpush.bf16.msrb.mxu3 %v13556_v54 }
 0x27a   :  { %2217 = vmatpush.bf16.msrb.mxu0 %v13557_v40  ;;  %2230 = vmatpush.bf16.msrb.mxu1 %v13558_v29 }
 0x27b   :  { %2243 = vmatpush.bf16.msrb.mxu2 %v13559_v17  ;;  %2256 = vmatpush.bf16.msrb.mxu3 %v13560_v30  ;;  %v13563_v17 = vld [vmem:[#allocation26_spill] sm:$0xff] }
 0x2b9   :  { %v1891_v44 = vpop.f32.mrf.mxu0  ;;  %v1904_v23 = vpop.f32.mrf.mxu1 }
 0x2ba   :  { %v1990_v7 = vrot.slane %v1891_v44, 6  ;;  %v1991_v51 = vrot.slane %v1904_v23, 6 }
 0x2bc   :  { %v1998_v2 = vadd.f32 %v1990_v7, %v13561_v22  ;;  %v1999_v21 = vadd.f32 %v1991_v51, %v13562_v62 }
 0x2be   :  { %v8289_v58 = vmul.f32 -1.442695, %v1998_v2  ;;  %v8290_v28 = vmul.f32 -1.442695, %v1999_v21  ;;  %v13564_v21 = vld [vmem:[#allocation32_spill] sm:$0xff] }
 0x2c0   :  { %9575 = vpow2.f32 %v8289_v58  ;;  %v1917_v54 = vpop.f32.mrf.mxu2  ;;  %v1930_v35 = vpop.f32.mrf.mxu3 }
 0x2c1   :  { %9577 = vpow2.f32 %v8290_v28  ;;  %v1992_v40 = vrot.slane %v1917_v54, 6  ;;  %v1893_v29 = vpop.f32.mrf.mxu0  ;;  %v1906_v47 = vpop.f32.mrf.mxu1 }
 0x2c3   :  { %v2000_v18 = vadd.f32 %v1992_v40, %v13563_v17 }
 0x2c5   :  { %v8291_v30 = vmul.f32 -1.442695, %v2000_v18  ;;  %v13565_v18 = vld [vmem:[#allocation33_spill] sm:$0xff] }
 0x2c6   :  { %v9576_v42 = vpop.eup %9575 }
 0x2c7   :  { %v9578_v16 = vpop.eup %9577  ;;  %v10925_v44 = vadd.f32 1.0, %v9576_v42  ;;  %9579 = vpow2.f32 %v8291_v30 }
 0x2c8   :  { %v10927_v23 = vadd.f32 1.0, %v9578_v16  ;;  %v1919_v7 = vpop.f32.mrf.mxu2  ;;  %v1932_v51 = vpop.f32.mrf.mxu3 }
 0x2c9   :  { %9581 = vrcp.f32 %v10925_v44  ;;  %v1943_v58 = vpop.f32.mrf.mxu0  ;;  %v1956_v2 = vpop.f32.mrf.mxu1  ;;  %vm2035_vm13 = vweird.f32 %v10925_v44 }
 0x2ca   :  { %9583 = vrcp.f32 %v10927_v23  ;;  %v2006_v29 = vrot.slane %v1943_v58, 6  ;;  %v2007_v47 = vrot.slane %v1956_v2, 6  ;;  %vm2050_vm11 = vweird.f32 %v10927_v23 }
 0x2cc   :  { %v2014_v40 = vadd.f32 %v2006_v29, %v13564_v21  ;;  %v2015_v28 = vadd.f32 %v2007_v47, %v13565_v18  ;;  %v13566_v47 = vld [vmem:[#allocation36_spill] sm:$0xff] }
 0x2cd   :  { %v9580_v54 = vpop.eup %9579 }
 0x2ce   :  { %v8292_v17 = vmul.f32 -1.442695, %v2014_v40  ;;  %v8293_v16 = vmul.f32 -1.442695, %v2015_v28  ;;  %v10935_v29 = vadd.f32 1.0, %v9580_v54  ;;  %v1993_v40 = vrot.slane %v1930_v35, 6 }
 0x2cf   :  { %v9582_v42 = vpop.eup %9581 }
 0x2d0   :  { %v9584_v62 = vpop.eup %9583  ;;  %v2031_v30 = vmul.f32 %v9582_v42, %v10925_v44  ;;  %v1969_v7 = vpop.f32.mrf.mxu2  ;;  %9585 = vpow2.f32 %v8292_v17  ;;  %vm2036_vm10 = vweird.f32 %v9582_v42 }
 0x2d1   :  { %v1982_v51 = vpop.f32.mrf.mxu3  ;;  %v2046_v22 = vmul.f32 %v9584_v62, %v10927_v23  ;;  %v1945_v56 = vpop.f32.mrf.mxu0  ;;  %v2008_v58 = vrot.slane %v1969_v7, 6  ;;  %9587 = vpow2.f32 %v8293_v16  ;;  %vm2051_vm9 = vweird.f32 %v9584_v62  ;;  %vm2037_vm14 = vmor %vm2035_vm13, %vm2036_vm10 }
 0x2d2   :  { %v1958_v9 = vpop.f32.mrf.mxu1  ;;  %v2032_v2 = vsub.f32 1.0, %v2031_v30  ;;  %9589 = vrcp.f32 %v10935_v29  ;;  %v2041_v16 = vand.u32 2147483648, %v10925_v44  ;;  %vm10951_vm12 = vmor %vm2050_vm11, %vm2051_vm9  ;;  %vm2065_vm11 = vweird.f32 %v10935_v29 }
 0x2d3   :  { %v2047_v24 = vsub.f32 1.0, %v2046_v22  ;;  %v2016_v18 = vadd.f32 %v2008_v58, %v13566_v47  ;;  %v13567_v22 = vld [vmem:[#allocation27_spill] sm:$0xff] }
 0x2d4   :  { %v2033_v36 = vmul.f32 %v9582_v42, %v2032_v2  ;;  %v2001_v54 = vadd.f32 %v1993_v40, %v13567_v22 }
 0x2d5   :  { %v8294_v28 = vmul.f32 -1.442695, %v2016_v18  ;;  %v2048_v21 = vmul.f32 %v9584_v62, %v2047_v24 }
 0x2d6   :  { %v9586_v26 = vpop.eup %9585  ;;  %v2034_v35 = vadd.f32 %v9582_v42, %v2033_v36  ;;  %v2039_v36 = vand.u32 2147483647, %v10925_v44 }
 0x2d7   :  { %9591 = vpow2.f32 %v8294_v28  ;;  %v9588_v9 = vpop.eup %9587  ;;  %v10939_v17 = vadd.f32 1.0, %v9586_v26  ;;  %v2049_v24 = vadd.f32 %v9584_v62, %v2048_v21  ;;  %v2009_v26 = vrot.slane %v1982_v51, 6 }
 0x2d8   :  { %v1971_v48 = vpop.f32.mrf.mxu2  ;;  %v10943_v30 = vadd.f32 1.0, %v9588_v9  ;;  %v10949_v18 = vpop.eup %9589  ;;  %v2054_v21 = vand.u32 2147483647, %v10927_v23  ;;  %v2038_v2 = vsel %vm2037_vm14, %v9582_v42, %v2034_v35  ;;  %v13570_v9 = vld [vmem:[#allocation37_spill] sm:$0xff]  ;;  %vm2040_vm15 = vcmp.eq.f32.partialorder %v2039_v36, 8.507059e+37 }
 0x2d9   :  { %v1984_v56 = vpop.f32.mrf.mxu3  ;;  %9593 = vrcp.f32 %v10939_v17  ;;  %v2056_v48 = vand.u32 2147483648, %v10927_v23  ;;  %v2053_v40 = vsel %vm10951_vm12, %v9584_v62, %v2049_v24  ;;  %v2017_v47 = vadd.f32 %v2009_v26, %v13570_v9 }
 0x2da   :  { %9595 = vrcp.f32 %v10943_v30  ;;  %v2042_v56 = vor.u32 1.1754944e-38, %v2041_v16  ;;  %v2061_v57 = vmul.f32 %v10949_v18, %v10935_v29  ;;  %vm2055_vm0 = vcmp.eq.f32.partialorder %v2054_v21, 8.507059e+37 }
 0x2db   :  { %9597 = vtanh.f32 %v2001_v54  ;;  %v2057_v28 = vor.u32 1.1754944e-38, %v2056_v48  ;;  %v2077_v62 = vrot.slane %v10836_v6, 6  ;;  %v2122_v36 = vand.u32 2147483648, %v10943_v30 }
 0x2dc   :  { %v2043_v23 = vsel %vm2040_vm15, %v2042_v56, %v2038_v2  ;;  %v2062_v48 = vsub.f32 1.0, %v2061_v57  ;;  %v2107_v2 = vand.u32 2147483648, %v10939_v17  ;;  %v2105_v6 = vand.u32 2147483647, %v10939_v17 }
 0x2dd   :  { %v9592_v58 = vpop.eup %9591  ;;  %v2058_v42 = vsel %vm2055_vm0, %v2057_v28, %v2053_v40  ;;  %v2120_v56 = vand.u32 2147483647, %v10943_v30  ;;  %vm2101_vm3 = vweird.f32 %v10939_v17  ;;  %vm2116_vm4 = vweird.f32 %v10943_v30 }
 0x2de   :  { %v10960_v51 = vadd.f32 1.0, %v9592_v58  ;;  %v2079_v26 = vmul.f32 %v2077_v62, %v2058_v42  ;;  %vm2106_vm7 = vcmp.eq.f32.partialorder %v2105_v6, 8.507059e+37  ;;  %vm2066_vm10 = vweird.f32 %v10949_v18 }
 0x2df   :  { %v9594_v22 = vpop.eup %9593  ;;  %vm2121_vm9 = vcmp.eq.f32.partialorder %v2120_v56, 8.507059e+37  ;;  %vm2067_vm13 = vmor %vm2065_vm11, %vm2066_vm10 }
 0x2e0   :  { %9599 = vrcp.f32 %v10960_v51  ;;  %v9596_v44 = vpop.eup %9595  ;;  %v2097_v54 = vmul.f32 %v9594_v22, %v10939_v17  ;;  %vm2102_vm1 = vweird.f32 %v9594_v22  ;;  %vm2131_vm14 = vweird.f32 %v10960_v51 }
 0x2e1   :  { %v2112_v35 = vmul.f32 %v9596_v44, %v10943_v30  ;;  %v9598_v16 = vpop.eup %9597  ;;  %9601 = vtanh.f32 %v2017_v47  ;;  %vm2117_vm2 = vweird.f32 %v9596_v44  ;;  %vm2103_vm5 = vmor %vm2101_vm3, %vm2102_vm1 }
 0x2e2   :  { %v2098_v24 = vsub.f32 1.0, %v2097_v54  ;;  %v2080_v7 = vmul.f32 %v9598_v16, %v2043_v23  ;;  %v2143_v54 = vrot.slane %v10842_v49, 2  ;;  %vm2118_vm6 = vmor %vm2116_vm4, %vm2117_vm2  ;;  %v2123_v16 = vor.u32 1.1754944e-38, %v2122_v36 }
 0x2e3   :  { %v2113_v58 = vsub.f32 1.0, %v2112_v35  ;;  %v2063_v35 = vmul.f32 %v10949_v18, %v2062_v48  ;;  %v2071_v48 = vand.u32 2147483648, %v10935_v29 }
 0x2e4   :  { %v2099_v21 = vmul.f32 %v9594_v22, %v2098_v24  ;;  %v10976_v47 = vadd.f32 %v2080_v7, %v2079_v26 }
 0x2e5   :  { %v2114_v28 = vmul.f32 %v9596_v44, %v2113_v58  ;;  %v2108_v58 = vor.u32 1.1754944e-38, %v2107_v2  ;;  %v2072_v56 = vor.u32 1.1754944e-38, %v2071_v48  ;;  %v13581_v48 = vld [vmem:[#allocation51_spill] sm:$0xff] }
 0x2e6   :  { %v9600_v40 = vpop.eup %9599  ;;  %v2100_v23 = vadd.f32 %v9594_v22, %v2099_v21  ;;  %9603 = vtanh.f32 %v10976_v47  ;;  %v2064_v21 = vadd.f32 %v10949_v18, %v2063_v35 }
 0x2e7   :  { %v2127_v57 = vmul.f32 %v9600_v40, %v10960_v51  ;;  %v2115_v42 = vadd.f32 %v9596_v44, %v2114_v28  ;;  %v9602_v62 = vpop.eup %9601  ;;  %vm2132_vm12 = vweird.f32 %v9600_v40  ;;  %v2135_v28 = vand.u32 2147483647, %v10960_v51 }
 0x2e8   :  { %v2104_v9 = vsel %vm2103_vm5, %v9594_v22, %v2100_v23  ;;  %v2069_v22 = vand.u32 2147483647, %v10935_v29  ;;  %v2068_v2 = vsel %vm2067_vm13, %v10949_v18, %v2064_v21  ;;  %vm2133_vm15 = vmor %vm2131_vm14, %vm2132_vm12  ;;  %v13580_v21 = vld [vmem:[#allocation50_spill] sm:$0xff] }
 0x2e9   :  { %v2128_v24 = vsub.f32 1.0, %v2127_v57  ;;  %v2119_v49 = vsel %vm2118_vm6, %v9596_v44, %v2115_v42  ;;  %v2109_v17 = vsel %vm2106_vm7, %v2108_v58, %v2104_v9  ;;  %v2137_v9 = vand.u32 2147483648, %v10960_v51  ;;  %v13574_v58 = vld [vmem:[#allocation44_spill] sm:$0xff] }
 0x2ea   :  { %v2124_v26 = vsel %vm2121_vm9, %v2123_v16, %v2119_v49  ;;  %v2146_v7 = vmul.f32 %v9602_v62, %v2109_v17  ;;  %vm2070_vm0 = vcmp.eq.f32.partialorder %v2069_v22, 8.507059e+37  ;;  %vm2136_vm1 = vcmp.eq.f32.partialorder %v2135_v28, 8.507059e+37  ;;  %v13575_v49 = vld [vmem:[#allocation45_spill] sm:$0xff]  ;;  %v13576_v17 = vld [vmem:[#allocation46_spill] sm:$0xff]  ;;  %v13582_v22 = vld [vmem:[#allocation52_spill] sm:$0xff] }
 0x2eb   :  { %v2129_v46 = vmul.f32 %v9600_v40, %v2128_v24  ;;  %v2145_v30 = vmul.f32 %v2143_v54, %v2124_v26  ;;  %v2073_v57 = vsel %vm2070_vm0, %v2072_v56, %v2068_v2  ;;  %v2138_v29 = vor.u32 1.1754944e-38, %v2137_v9  ;;  %v13573_v24 = vld [vmem:[#allocation43_spill] sm:$0xff]  ;;  %v13584_v9 = vld [vmem:[#allocation54_spill] sm:$0xff]  ;;  %v13586_v28 = vld [vmem:[#allocation56_spill] sm:$0xff] }
 0x2ec   :  { %v9604_v6 = vpop.eup %9603  ;;  %v13577_v26 = vld [vmem:[#allocation47_spill] sm:$0xff]  ;;  %v13588_v56 = vld [vmem:[#allocation58_spill] sm:$0xff]  ;;  %vm3763_vm0 = vcmask 1043456  }
 0x2ed   :  { %v10984_v36 = vadd.f32 %v2146_v7, %v2145_v30  ;;  %v2130_v44 = vadd.f32 %v9600_v40, %v2129_v46  ;;  %v10993_v46 = vmul.f32 %v9604_v6, %v2073_v57  ;;  %v13578_v30 = vld [vmem:[#allocation48_spill] sm:$0xff]  ;;  %v13579_v7 = vld [vmem:[#allocation49_spill] sm:$0xff]  ;;  %v13585_v2 = vld [vmem:[#allocation55_spill] sm:$0xff] }
 0x2ee   :  { %v13587_v6 = vld [vmem:[#allocation57_spill] sm:$0xff]  ;;  %v13590_v57 = vld [vmem:[#allocation60_spill] sm:$0xff] }
 0x2ef   :  { %9605 = vtanh.f32 %v10984_v36  ;;  %v2134_v54 = vsel %vm2133_vm15, %v9600_v40, %v2130_v44  ;;  %v2151_v18 = vrot.slane %v10993_v46, 2  ;;  %v13572_v40 = vld [vmem:[#allocation41_spill] sm:$0xff] }
 0x2f0   :  { %v2139_v42 = vsel %vm2136_vm1, %v2138_v29, %v2134_v54  ;;  %v13583_v44 = vld [vmem:[#allocation53_spill] sm:$0xff]  ;;  %v13589_v54 = vld [vmem:[#allocation59_spill] sm:$0xff] }
 0x2f1   :  { %v13591_v29 = vld [vmem:[#allocation61_spill] sm:$0xff] }
 0x2f5   :  { %v9606_v23 = vpop.eup %9605 }
 0x2f6   :  { %v10995_v62 = vmul.f32 %v9606_v23, %v2139_v42  ;;  %v13592_v23 = vld [vmem:[#allocation62_spill] sm:$0xff]  ;;  %v13593_v42 = vld [vmem:[#allocation63_spill] sm:$0xff] }
 0x2f8   :  { %13571 = vst [vmem:[#allocation74_spill] sm:$0xff] %v10995_v62  ;;  %v2154_v35 = vrot.slane %v10995_v62, 2  ;;  %v13598_v62 = vld [vmem:[#allocation68_spill] sm:$0xff] }
 0x2fa   :  { %v2156_v51 = vsel %vm1879_vm8, %v2151_v18, %v2154_v35  ;;  %v13594_v18 = vld [vmem:[#allocation64_spill] sm:$0xff]  ;;  %v13595_v35 = vld [vmem:[#allocation65_spill] sm:$0xff] }
 0x2fb   :  { %v2157_v16 = vpack.c.bf16 %v2156_v51, %v2156_v51  ;;  %v13596_v51 = vld [vmem:[#allocation66_spill] sm:$0xff] }
 0x2fd   :  { %2166 = vmatmul.bf16.vlgmr.msra.gmra.mxu0 %v2157_v16  ;;  %2179 = vmatmul.bf16.vlgmr.msra.gmra.mxu1 %v2157_v16 }
 0x2fe   :  { %2192 = vmatmul.bf16.vlgmr.msra.gmra.mxu2 %v2157_v16  ;;  %2205 = vmatmul.bf16.vlgmr.msra.gmra.mxu3 %v2157_v16 }
 0x2ff   :  { %2419 = vmatpush.bf16.msra.mxu0 %v10497_v27  ;;  %2432 = vmatpush.bf16.msra.mxu1 %v10499_v32 }
 0x300   :  { %2445 = vmatpush.bf16.msra.mxu2 %v10501_v33  ;;  %2458 = vmatpush.bf16.msra.mxu3 %v10512_v50 }
 0x303   :  { %2420 = vmatpush.bf16.msra.mxu0 %v10504_v38  ;;  %2433 = vmatpush.bf16.msra.mxu1 %v10508_v43 }
 0x304   :  { %2446 = vmatpush.bf16.msra.mxu2 %v10510_v45  ;;  %2459 = vmatpush.bf16.msra.mxu3 %v10524_v3 }
 0x307   :  { %2421 = vmatpush.bf16.msra.mxu0 %v10516_v59  ;;  %2434 = vmatpush.bf16.msra.mxu1 %v10520_v0 }
 0x308   :  { %2447 = vmatpush.bf16.msra.mxu2 %v10522_v1  ;;  %2460 = vmatpush.bf16.msra.mxu3 %v10530_v15 }
 0x30b   :  { %2422 = vmatpush.bf16.msra.mxu0 %v10528_v12  ;;  %2435 = vmatpush.bf16.msra.mxu1 %v10534_v19 }
 0x30c   :  { %2448 = vmatpush.bf16.msra.mxu2 %v10536_v20  ;;  %2461 = vmatpush.bf16.msra.mxu3 %v10542_v34 }
 0x30d   :  { %2218 = vmatmul.bf16.vlgmr.msrb.gmra.mxu0 %v2157_v16  ;;  %2231 = vmatmul.bf16.vlgmr.msrb.gmra.mxu1 %v2157_v16 }
 0x30e   :  { %2244 = vmatmul.bf16.vlgmr.msrb.gmra.mxu2 %v2157_v16  ;;  %2257 = vmatmul.bf16.vlgmr.msrb.gmra.mxu3 %v2157_v16  ;;  %v13597_v16 = vld [vmem:[#allocation67_spill] sm:$0xff] }
 0x30f   :  { %2423 = vmatpush.bf16.msra.mxu0 %v10540_v31  ;;  %2436 = vmatpush.bf16.msra.mxu1 %v10546_v39 }
 0x310   :  { %2449 = vmatpush.bf16.msra.mxu2 %v10548_v41  ;;  %2462 = vmatpush.bf16.msra.mxu3 %v10554_v55 }
 0x313   :  { %2424 = vmatpush.bf16.msra.mxu0 %v10552_v53  ;;  %2437 = vmatpush.bf16.msra.mxu1 %v10558_v60 }
 0x314   :  { %2450 = vmatpush.bf16.msra.mxu2 %v10560_v61  ;;  %2463 = vmatpush.bf16.msra.mxu3 %v10566_v13 }
 0x317   :  { %2425 = vmatpush.bf16.msra.mxu0 %v10564_v11  ;;  %2438 = vmatpush.bf16.msra.mxu1 %v10570_v25 }
 0x318   :  { %2451 = vmatpush.bf16.msra.mxu2 %v10572_v8  ;;  %2464 = vmatpush.bf16.msra.mxu3 %v10578_v63 }
 0x31b   :  { %2426 = vmatpush.bf16.msra.mxu0 %v10576_v52  ;;  %2439 = vmatpush.bf16.msra.mxu1 %v10582_v4 }
 0x31c   :  { %2452 = vmatpush.bf16.msra.mxu2 %v10584_v5  ;;  %2465 = vmatpush.bf16.msra.mxu3 %v10594_v37 }
 0x31f   :  { %2471 = vmatpush.bf16.msrb.mxu0 %v10586_v10  ;;  %2484 = vmatpush.bf16.msrb.mxu1 %v10588_v14 }
 0x320   :  { %2497 = vmatpush.bf16.msrb.mxu2 %v13572_v40  ;;  %2510 = vmatpush.bf16.msrb.mxu3 %v13573_v24 }
 0x323   :  { %2472 = vmatpush.bf16.msrb.mxu0 %v13574_v58  ;;  %2485 = vmatpush.bf16.msrb.mxu1 %v13575_v49  ;;  %v2341_v58 = vrot.slane %v10976_v47, 6 }
 0x324   :  { %2498 = vmatpush.bf16.msrb.mxu2 %v13576_v17  ;;  %2511 = vmatpush.bf16.msrb.mxu3 %v13577_v26 }
 0x327   :  { %2473 = vmatpush.bf16.msrb.mxu0 %v13578_v30  ;;  %2486 = vmatpush.bf16.msrb.mxu1 %v13579_v7 }
 0x328   :  { %2499 = vmatpush.bf16.msrb.mxu2 %v13580_v21  ;;  %2512 = vmatpush.bf16.msrb.mxu3 %v13581_v48 }
 0x32b   :  { %2474 = vmatpush.bf16.msrb.mxu0 %v13582_v22  ;;  %2487 = vmatpush.bf16.msrb.mxu1 %v13583_v44 }
 0x32c   :  { %2500 = vmatpush.bf16.msrb.mxu2 %v13584_v9  ;;  %2513 = vmatpush.bf16.msrb.mxu3 %v13585_v2  ;;  %v13603_v2 = vld [vmem:[#allocation23_spill] sm:$0xff] }
 0x32f   :  { %2475 = vmatpush.bf16.msrb.mxu0 %v13586_v28  ;;  %2488 = vmatpush.bf16.msrb.mxu1 %v13587_v6  ;;  %v13602_v28 = vld [vmem:[#allocation22_spill] sm:$0xff] }
 0x330   :  { %2501 = vmatpush.bf16.msrb.mxu2 %v13588_v56  ;;  %2514 = vmatpush.bf16.msrb.mxu3 %v13589_v54  ;;  %v13599_v56 = vld [vmem:[#allocation69_spill] sm:$0xff]  ;;  %v13600_v54 = vld [vmem:[#allocation70_spill] sm:$0xff] }
 0x333   :  { %2476 = vmatpush.bf16.msrb.mxu0 %v13590_v57  ;;  %2489 = vmatpush.bf16.msrb.mxu1 %v13591_v29  ;;  %v13601_v57 = vld [vmem:[#allocation71_spill] sm:$0xff] }
 0x334   :  { %2502 = vmatpush.bf16.msrb.mxu2 %v13592_v23  ;;  %2515 = vmatpush.bf16.msrb.mxu3 %v13593_v42 }
 0x337   :  { %2477 = vmatpush.bf16.msrb.mxu0 %v13594_v18  ;;  %2490 = vmatpush.bf16.msrb.mxu1 %v13595_v35 }
 0x338   :  { %2503 = vmatpush.bf16.msrb.mxu2 %v13596_v51  ;;  %2516 = vmatpush.bf16.msrb.mxu3 %v13597_v16 }
 0x33b   :  { %2478 = vmatpush.bf16.msrb.mxu0 %v13598_v62  ;;  %2491 = vmatpush.bf16.msrb.mxu1 %v13599_v56 }
 0x33c   :  { %2504 = vmatpush.bf16.msrb.mxu2 %v13600_v54  ;;  %2517 = vmatpush.bf16.msrb.mxu3 %v13601_v57  ;;  %v13604_v54 = vld [vmem:[#allocation26_spill] sm:$0xff] }
 0x37a   :  { %v2167_v29 = vpop.f32.mrf.mxu0  ;;  %v2180_v23 = vpop.f32.mrf.mxu1 }
 0x37b   :  { %v2266_v6 = vrot.slane %v2167_v29, 4  ;;  %v2267_v42 = vrot.slane %v2180_v23, 4 }
 0x37d   :  { %v2274_v18 = vadd.f32 %v2266_v6, %v13602_v28  ;;  %v2275_v35 = vadd.f32 %v2267_v42, %v13603_v2  ;;  %v13607_v2 = vld [vmem:[#allocation27_spill] sm:$0xff] }
 0x37f   :  { %v8295_v9 = vmul.f32 -1.442695, %v2274_v18  ;;  %v8296_v51 = vmul.f32 -1.442695, %v2275_v35  ;;  %v13605_v35 = vld [vmem:[#allocation32_spill] sm:$0xff] }
 0x381   :  { %9607 = vpow2.f32 %v8295_v9  ;;  %v2193_v16 = vpop.f32.mrf.mxu2  ;;  %v2206_v44 = vpop.f32.mrf.mxu3 }
 0x382   :  { %9609 = vpow2.f32 %v8296_v51  ;;  %v2268_v62 = vrot.slane %v2193_v16, 4  ;;  %v2169_v56 = vpop.f32.mrf.mxu0  ;;  %v2182_v22 = vpop.f32.mrf.mxu1  ;;  %v2269_v42 = vrot.slane %v2206_v44, 4  ;;  %v13606_v16 = vld [vmem:[#allocation33_spill] sm:$0xff] }
 0x384   :  { %v2276_v48 = vadd.f32 %v2268_v62, %v13604_v54  ;;  %v2277_v62 = vadd.f32 %v2269_v42, %v13607_v2 }
 0x386   :  { %v8297_v57 = vmul.f32 -1.442695, %v2276_v48 }
 0x387   :  { %v9608_v21 = vpop.eup %9607 }
 0x388   :  { %v9610_v7 = vpop.eup %9609  ;;  %v2291_v29 = vadd.f32 1.0, %v9608_v21  ;;  %9611 = vpow2.f32 %v8297_v57 }
 0x389   :  { %v2292_v23 = vadd.f32 1.0, %v9610_v7  ;;  %v2195_v6 = vpop.f32.mrf.mxu2  ;;  %v2208_v28 = vpop.f32.mrf.mxu3 }
 0x38a   :  { %9613 = vrcp.f32 %v2291_v29  ;;  %v2219_v18 = vpop.f32.mrf.mxu0  ;;  %v2232_v9 = vpop.f32.mrf.mxu1  ;;  %v2303_v2 = vand.u32 2147483647, %v2291_v29  ;;  %vm2299_vm4 = vweird.f32 %v2291_v29 }
 0x38b   :  { %9615 = vrcp.f32 %v2292_v23  ;;  %v2278_v51 = vadd.f32 %v2219_v18, %v13605_v35  ;;  %v2279_v56 = vadd.f32 %v2232_v9, %v13606_v16  ;;  %v13608_v16 = vld [vmem:[#allocation36_spill] sm:$0xff]  ;;  %vm2314_vm5 = vweird.f32 %v2292_v23 }
 0x38c   :  { %vm2304_vm7 = vcmp.eq.f32.partialorder %v2303_v2, 8.507059e+37 }
 0x38d   :  { %v8298_v48 = vmul.f32 -1.442695, %v2278_v51  ;;  %v8299_v21 = vmul.f32 -1.442695, %v2279_v56  ;;  %v2305_v56 = vand.u32 2147483648, %v2291_v29 }
 0x38e   :  { %v9612_v22 = vpop.eup %9611 }
 0x38f   :  { %v11070_v54 = vadd.f32 1.0, %v9612_v22  ;;  %9617 = vpow2.f32 %v8298_v48  ;;  %v2320_v22 = vand.u32 2147483648, %v2292_v23  ;;  %v2318_v48 = vand.u32 2147483647, %v2292_v23 }
 0x390   :  { %v9614_v57 = vpop.eup %9613 }
 0x391   :  { %v9616_v7 = vpop.eup %9615  ;;  %v2295_v28 = vmul.f32 %v9614_v57, %v2291_v29  ;;  %9619 = vrcp.f32 %v11070_v54  ;;  %v2245_v44 = vpop.f32.mrf.mxu2  ;;  %vm2300_vm2 = vweird.f32 %v9614_v57  ;;  %v2321_v47 = vor.u32 1.1754944e-38, %v2320_v22 }
 0x392   :  { %v2258_v6 = vpop.f32.mrf.mxu3  ;;  %v2310_v30 = vmul.f32 %v9616_v7, %v2292_v23  ;;  %9621 = vtanh.f32 %v2277_v62  ;;  %v2221_v18 = vpop.f32.mrf.mxu0  ;;  %v2280_v42 = vadd.f32 %v2245_v44, %v13608_v16  ;;  %vm2315_vm3 = vweird.f32 %v9616_v7  ;;  %vm2301_vm6 = vmor %vm2299_vm4, %vm2300_vm2 }
 0x393   :  { %v2234_v35 = vpop.f32.mrf.mxu1  ;;  %v2296_v9 = vsub.f32 1.0, %v2295_v28  ;;  %9623 = vpow2.f32 %v8299_v21  ;;  %v2306_v44 = vor.u32 1.1754944e-38, %v2305_v56  ;;  %vm2316_vm9 = vmor %vm2314_vm5, %vm2315_vm3  ;;  %vm2319_vm10 = vcmp.eq.f32.partialorder %v2318_v48, 8.507059e+37 }
 0x394   :  { %v2311_v51 = vsub.f32 1.0, %v2310_v30  ;;  %v8300_v17 = vmul.f32 -1.442695, %v2280_v42  ;;  %v2335_v48 = vand.u32 2147483648, %v11070_v54  ;;  %vm2329_vm12 = vweird.f32 %v11070_v54 }
 0x395   :  { %v2297_v26 = vmul.f32 %v9614_v57, %v2296_v9  ;;  %v9618_v49 = vpop.eup %9617 }
 0x396   :  { %v2312_v24 = vmul.f32 %v9616_v7, %v2311_v51  ;;  %v11075_v21 = vadd.f32 1.0, %v9618_v49  ;;  %9625 = vpow2.f32 %v8300_v17 }
 0x397   :  { %v9620_v62 = vpop.eup %9619  ;;  %v2298_v35 = vadd.f32 %v9614_v57, %v2297_v26 }
 0x398   :  { %v9622_v30 = vpop.eup %9621  ;;  %v2325_v28 = vmul.f32 %v9620_v62, %v11070_v54  ;;  %v2313_v18 = vadd.f32 %v9616_v7, %v2312_v24  ;;  %9627 = vrcp.f32 %v11075_v21  ;;  %vm2330_vm11 = vweird.f32 %v9620_v62 }
 0x399   :  { %v9624_v9 = vpop.eup %9623  ;;  %v2302_v42 = vsel %vm2301_vm6, %v9614_v57, %v2298_v35  ;;  %v2247_v29 = vpop.f32.mrf.mxu2  ;;  %v13609_v35 = vld [vmem:[#allocation37_spill] sm:$0xff]  ;;  %vm11091_vm13 = vmor %vm2329_vm12, %vm2330_vm11  ;;  %vm2365_vm1 = vweird.f32 %v11075_v21 }
 0x39a   :  { %v2260_v26 = vpop.f32.mrf.mxu3  ;;  %v2326_v49 = vsub.f32 1.0, %v2325_v28  ;;  %v2307_v23 = vsel %vm2304_vm7, %v2306_v44, %v2302_v42  ;;  %v2317_v17 = vsel %vm2316_vm9, %v9616_v7, %v2313_v18  ;;  %v2358_v51 = vadd.f32 1.0, %v9624_v9 }
 0x39b   :  { %v2322_v16 = vsel %vm2319_vm10, %v2321_v47, %v2317_v17  ;;  %v2344_v40 = vmul.f32 %v9622_v30, %v2307_v23  ;;  %v2281_v28 = vadd.f32 %v2258_v6, %v13609_v35  ;;  %v2336_v44 = vor.u32 1.1754944e-38, %v2335_v48 }
 0x39c   :  { %v2327_v14 = vmul.f32 %v9620_v62, %v2326_v49  ;;  %v2343_v10 = vmul.f32 %v2341_v58, %v2322_v16  ;;  %9629 = vrcp.f32 %v2358_v51  ;;  %v9626_v2 = vpop.eup %9625  ;;  %v2333_v58 = vand.u32 2147483647, %v11070_v54 }
 0x39d   :  { %v11082_v56 = vadd.f32 1.0, %v9626_v2  ;;  %v2371_v16 = vand.u32 2147483648, %v11075_v21  ;;  %v2369_v9 = vand.u32 2147483647, %v11075_v21  ;;  %v2386_v29 = vand.u32 2147483648, %v2358_v51 }
 0x39e   :  { %v11080_v24 = vadd.f32 %v2344_v40, %v2343_v10  ;;  %v9628_v57 = vpop.eup %9627  ;;  %v2328_v22 = vadd.f32 %v9620_v62, %v2327_v14  ;;  %vm2334_vm15 = vcmp.eq.f32.partialorder %v2333_v58, 8.507059e+37  ;;  %v2384_v2 = vand.u32 2147483647, %v2358_v51 }
 0x39f   :  { %v2361_v7 = vmul.f32 %v9628_v57, %v11075_v21  ;;  %vm2366_vm14 = vweird.f32 %v9628_v57  ;;  %v2372_v49 = vor.u32 1.1754944e-38, %v2371_v16  ;;  %vm2370_vm4 = vcmp.eq.f32.partialorder %v2369_v9, 8.507059e+37 }
 0x3a0   :  { %9631 = vtanh.f32 %v11080_v24  ;;  %v2332_v30 = vsel %vm11091_vm13, %v9620_v62, %v2328_v22  ;;  %vm2367_vm3 = vmor %vm2365_vm1, %vm2366_vm14  ;;  %v13612_v22 = vld [vmem:[#allocation73_spill] sm:$0xff]  ;;  %vm2380_vm5 = vweird.f32 %v2358_v51  ;;  %v2387_v16 = vor.u32 1.1754944e-38, %v2386_v29 }
 0x3a1   :  { %9633 = vrcp.f32 %v11082_v56  ;;  %v2362_v14 = vsub.f32 1.0, %v2361_v7  ;;  %v2337_v42 = vsel %vm2334_vm15, %v2336_v44, %v2332_v30  ;;  %v3761_v48 = vsel %vm1879_vm8, %v13612_v22, %v10993_v46 }
 0x3a2   :  { %v9630_v10 = vpop.eup %9629  ;;  %9635 = vtanh.f32 %v2281_v28  ;;  %v2407_v44 = vrot.slane %v10984_v36, 2  ;;  %vm2385_vm7 = vcmp.eq.f32.partialorder %v2384_v2, 8.507059e+37  ;;  %vm2395_vm10 = vweird.f32 %v11082_v56 }
 0x3a3   :  { %v2376_v18 = vmul.f32 %v9630_v10, %v2358_v51  ;;  %v2363_v6 = vmul.f32 %v9628_v57, %v2362_v14  ;;  %vm2381_vm2 = vweird.f32 %v9630_v10  ;;  %v2401_v51 = vand.u32 2147483648, %v11082_v56 }
 0x3a4   :  { %vm2382_vm6 = vmor %vm2380_vm5, %vm2381_vm2 }
 0x3a5   :  { %v2377_v54 = vsub.f32 1.0, %v2376_v18  ;;  %v2364_v26 = vadd.f32 %v9628_v57, %v2363_v6 }
 0x3a6   :  { %v9632_v47 = vpop.eup %9631 }
 0x3a7   :  { %v9634_v23 = vpop.eup %9633  ;;  %v2347_v17 = vmul.f32 %v9632_v47, %v2337_v42  ;;  %v2378_v62 = vmul.f32 %v9630_v10, %v2377_v54  ;;  %v2368_v28 = vsel %vm2367_vm3, %v9628_v57, %v2364_v26  ;;  %v2399_v42 = vand.u32 2147483647, %v11082_v56 }
 0x3a8   :  { %v2391_v7 = vmul.f32 %v9634_v23, %v11082_v56  ;;  %v2373_v58 = vsel %vm2370_vm4, %v2372_v49, %v2368_v28  ;;  %v9636_v14 = vpop.eup %9635  ;;  %vm2396_vm9 = vweird.f32 %v9634_v23  ;;  %v13614_v56 = vld [vmem:[#allocation39_spill] sm:$0xff]  ;;  %v13619_v28 = vld [vmem:[#allocation45_spill] sm:$0xff] }
 0x3a9   :  { %v11106_v21 = vsel %vm3763_vm0, %v3761_v48, %v2347_v17  ;;  %v2379_v40 = vadd.f32 %v9630_v10, %v2378_v62  ;;  %v2410_v6 = vmul.f32 %v9636_v14, %v2373_v58  ;;  %vm2397_vm11 = vmor %vm2395_vm10, %vm2396_vm9  ;;  %vm2400_vm12 = vcmp.eq.f32.partialorder %v2399_v42, 8.507059e+37  ;;  %v13617_v48 = vld [vmem:[#allocation43_spill] sm:$0xff]  ;;  %v13620_v58 = vld [vmem:[#allocation46_spill] sm:$0xff] }
 0x3aa   :  { %v2392_v30 = vsub.f32 1.0, %v2391_v7  ;;  %v2415_v49 = vrot.slane %v2347_v17, 4  ;;  %v13616_v17 = vld [vmem:[#allocation41_spill] sm:$0xff]  ;;  %v13618_v7 = vld [vmem:[#allocation44_spill] sm:$0xff]  ;;  %v13633_v42 = vld [vmem:[#allocation59_spill] sm:$0xff] }
 0x3ab   :  { %v2383_v18 = vsel %vm2382_vm6, %v9630_v10, %v2379_v40  ;;  %v2402_v10 = vor.u32 1.1754944e-38, %v2401_v51  ;;  %v13621_v40 = vld [vmem:[#allocation47_spill] sm:$0xff]  ;;  %v13622_v14 = vld [vmem:[#allocation48_spill] sm:$0xff]  ;;  %v13632_v51 = vld [vmem:[#allocation58_spill] sm:$0xff] }
 0x3ac   :  { %v2393_v46 = vmul.f32 %v9634_v23, %v2392_v30  ;;  %v2388_v54 = vsel %vm2385_vm7, %v2387_v16, %v2383_v18  ;;  %v13623_v16 = vld [vmem:[#allocation49_spill] sm:$0xff]  ;;  %v13624_v30 = vld [vmem:[#allocation50_spill] sm:$0xff]  ;;  %v13626_v18 = vld [vmem:[#allocation52_spill] sm:$0xff] }
 0x3ad   :  { %v2409_v47 = vmul.f32 %v2407_v44, %v2388_v54  ;;  %v13625_v44 = vld [vmem:[#allocation51_spill] sm:$0xff] }
 0x3ae   :  { %v2394_v9 = vadd.f32 %v9634_v23, %v2393_v46  ;;  %v13628_v46 = vld [vmem:[#allocation54_spill] sm:$0xff]  ;;  %v13629_v54 = vld [vmem:[#allocation55_spill] sm:$0xff] }
 0x3af   :  { %v11109_v57 = vadd.f32 %v2410_v6, %v2409_v47  ;;  %v13627_v6 = vld [vmem:[#allocation53_spill] sm:$0xff]  ;;  %v13630_v47 = vld [vmem:[#allocation56_spill] sm:$0xff] }
 0x3b0   :  { %v2398_v36 = vsel %vm2397_vm11, %v9634_v23, %v2394_v9  ;;  %v13615_v23 = vld [vmem:[#allocation40_spill] sm:$0xff]  ;;  %v13631_v9 = vld [vmem:[#allocation57_spill] sm:$0xff]  ;;  %vm3766_vm11 = vcmask 1045504  }
 0x3b1   :  { %9637 = vtanh.f32 %v11109_v57  ;;  %v2403_v26 = vsel %vm2400_vm12, %v2402_v10, %v2398_v36  ;;  %v13634_v36 = vld [vmem:[#allocation60_spill] sm:$0xff]  ;;  %v13635_v10 = vld [vmem:[#allocation61_spill] sm:$0xff] }
 0x3b7   :  { %v9638_v29 = vpop.eup %9637 }
 0x3b8   :  { %v11115_v62 = vmul.f32 %v9638_v29, %v2403_v26  ;;  %v13636_v29 = vld [vmem:[#allocation62_spill] sm:$0xff]  ;;  %v13637_v26 = vld [vmem:[#allocation63_spill] sm:$0xff] }
 0x3ba   :  { %13613 = vst [vmem:[#allocation37_spill] sm:$0xff] %v11115_v62  ;;  %v2417_v2 = vsel %vm1879_vm8, %v2415_v49, %v11115_v62  ;;  %v13638_v49 = vld [vmem:[#allocation64_spill] sm:$0xff]  ;;  %v13641_v62 = vld [vmem:[#allocation67_spill] sm:$0xff] }
 0x3bb   :  { %v2418_v22 = vpack.c.bf16 %v2417_v2, %v2417_v2  ;;  %v13639_v2 = vld [vmem:[#allocation65_spill] sm:$0xff] }
 0x3bd   :  { %2427 = vmatmul.bf16.vlgmr.msra.gmra.mxu0 %v2418_v22  ;;  %2440 = vmatmul.bf16.vlgmr.msra.gmra.mxu1 %v2418_v22 }
 0x3be   :  { %2453 = vmatmul.bf16.vlgmr.msra.gmra.mxu2 %v2418_v22  ;;  %2466 = vmatmul.bf16.vlgmr.msra.gmra.mxu3 %v2418_v22 }
 0x3bf   :  { %2695 = vmatpush.bf16.msra.mxu0 %v10497_v27  ;;  %2708 = vmatpush.bf16.msra.mxu1 %v10499_v32 }
 0x3c0   :  { %2721 = vmatpush.bf16.msra.mxu2 %v10501_v33  ;;  %2734 = vmatpush.bf16.msra.mxu3 %v10512_v50 }
 0x3c3   :  { %2696 = vmatpush.bf16.msra.mxu0 %v10504_v38  ;;  %2709 = vmatpush.bf16.msra.mxu1 %v10508_v43 }
 0x3c4   :  { %2722 = vmatpush.bf16.msra.mxu2 %v10510_v45  ;;  %2735 = vmatpush.bf16.msra.mxu3 %v10524_v3 }
 0x3c7   :  { %2697 = vmatpush.bf16.msra.mxu0 %v10516_v59  ;;  %2710 = vmatpush.bf16.msra.mxu1 %v10520_v0 }
 0x3c8   :  { %2723 = vmatpush.bf16.msra.mxu2 %v10522_v1  ;;  %2736 = vmatpush.bf16.msra.mxu3 %v10530_v15 }
 0x3cb   :  { %2698 = vmatpush.bf16.msra.mxu0 %v10528_v12  ;;  %2711 = vmatpush.bf16.msra.mxu1 %v10534_v19 }
 0x3cc   :  { %2724 = vmatpush.bf16.msra.mxu2 %v10536_v20  ;;  %2737 = vmatpush.bf16.msra.mxu3 %v10542_v34 }
 0x3cd   :  { %2479 = vmatmul.bf16.vlgmr.msrb.gmra.mxu0 %v2418_v22  ;;  %2492 = vmatmul.bf16.vlgmr.msrb.gmra.mxu1 %v2418_v22 }
 0x3ce   :  { %2505 = vmatmul.bf16.vlgmr.msrb.gmra.mxu2 %v2418_v22  ;;  %2518 = vmatmul.bf16.vlgmr.msrb.gmra.mxu3 %v2418_v22  ;;  %v13640_v22 = vld [vmem:[#allocation66_spill] sm:$0xff] }
 0x3cf   :  { %2699 = vmatpush.bf16.msra.mxu0 %v10540_v31  ;;  %2712 = vmatpush.bf16.msra.mxu1 %v10546_v39 }
 0x3d0   :  { %2725 = vmatpush.bf16.msra.mxu2 %v10548_v41  ;;  %2738 = vmatpush.bf16.msra.mxu3 %v10554_v55 }
 0x3d3   :  { %2700 = vmatpush.bf16.msra.mxu0 %v10552_v53  ;;  %2713 = vmatpush.bf16.msra.mxu1 %v10558_v60 }
 0x3d4   :  { %2726 = vmatpush.bf16.msra.mxu2 %v10560_v61  ;;  %2739 = vmatpush.bf16.msra.mxu3 %v10566_v13 }
 0x3d7   :  { %2701 = vmatpush.bf16.msra.mxu0 %v10564_v11  ;;  %2714 = vmatpush.bf16.msra.mxu1 %v10570_v25 }
 0x3d8   :  { %2727 = vmatpush.bf16.msra.mxu2 %v10572_v8  ;;  %2740 = vmatpush.bf16.msra.mxu3 %v10578_v63 }
 0x3db   :  { %2702 = vmatpush.bf16.msra.mxu0 %v10576_v52  ;;  %2715 = vmatpush.bf16.msra.mxu1 %v10582_v4 }
 0x3dc   :  { %2728 = vmatpush.bf16.msra.mxu2 %v10584_v5  ;;  %2741 = vmatpush.bf16.msra.mxu3 %v10594_v37 }
 0x3df   :  { %2747 = vmatpush.bf16.msrb.mxu0 %v13614_v56  ;;  %2760 = vmatpush.bf16.msrb.mxu1 %v13615_v23 }
 0x3e0   :  { %2773 = vmatpush.bf16.msrb.mxu2 %v13616_v17  ;;  %2786 = vmatpush.bf16.msrb.mxu3 %v13617_v48  ;;  %v2614_v48 = vrot.slane %v11080_v24, 6 }
 0x3e3   :  { %2748 = vmatpush.bf16.msrb.mxu0 %v13618_v7  ;;  %2761 = vmatpush.bf16.msrb.mxu1 %v13619_v28  ;;  %v13652_v28 = vld [vmem:[#allocation36_spill] sm:$0xff] }
 0x3e4   :  { %2774 = vmatpush.bf16.msrb.mxu2 %v13620_v58  ;;  %2787 = vmatpush.bf16.msrb.mxu3 %v13621_v40 }
 0x3e7   :  { %2749 = vmatpush.bf16.msrb.mxu0 %v13622_v14  ;;  %2762 = vmatpush.bf16.msrb.mxu1 %v13623_v16 }
 0x3e8   :  { %2775 = vmatpush.bf16.msrb.mxu2 %v13624_v30  ;;  %2788 = vmatpush.bf16.msrb.mxu3 %v13625_v44 }
 0x3eb   :  { %2750 = vmatpush.bf16.msrb.mxu0 %v13626_v18  ;;  %2763 = vmatpush.bf16.msrb.mxu1 %v13627_v6 }
 0x3ec   :  { %2776 = vmatpush.bf16.msrb.mxu2 %v13628_v46  ;;  %2789 = vmatpush.bf16.msrb.mxu3 %v13629_v54  ;;  %v13646_v54 = vld [vmem:[#allocation22_spill] sm:$0xff]  ;;  %v13647_v46 = vld [vmem:[#allocation23_spill] sm:$0xff] }
 0x3ef   :  { %2751 = vmatpush.bf16.msrb.mxu0 %v13630_v47  ;;  %2764 = vmatpush.bf16.msrb.mxu1 %v13631_v9  ;;  %v13642_v9 = vld [vmem:[#allocation68_spill] sm:$0xff] }
 0x3f0   :  { %2777 = vmatpush.bf16.msrb.mxu2 %v13632_v51  ;;  %2790 = vmatpush.bf16.msrb.mxu3 %v13633_v42  ;;  %v13643_v51 = vld [vmem:[#allocation69_spill] sm:$0xff]  ;;  %v13644_v42 = vld [vmem:[#allocation70_spill] sm:$0xff] }
 0x3f3   :  { %2752 = vmatpush.bf16.msrb.mxu0 %v13634_v36  ;;  %2765 = vmatpush.bf16.msrb.mxu1 %v13635_v10  ;;  %v13645_v36 = vld [vmem:[#allocation71_spill] sm:$0xff] }
 0x3f4   :  { %2778 = vmatpush.bf16.msrb.mxu2 %v13636_v29  ;;  %2791 = vmatpush.bf16.msrb.mxu3 %v13637_v26 }
 0x3f7   :  { %2753 = vmatpush.bf16.msrb.mxu0 %v13638_v49  ;;  %2766 = vmatpush.bf16.msrb.mxu1 %v13639_v2 }
 0x3f8   :  { %2779 = vmatpush.bf16.msrb.mxu2 %v13640_v22  ;;  %2792 = vmatpush.bf16.msrb.mxu3 %v13641_v62 }
 0x3fb   :  { %2754 = vmatpush.bf16.msrb.mxu0 %v13642_v9  ;;  %2767 = vmatpush.bf16.msrb.mxu1 %v13643_v51 }
 0x3fc   :  { %2780 = vmatpush.bf16.msrb.mxu2 %v13644_v42  ;;  %2793 = vmatpush.bf16.msrb.mxu3 %v13645_v36  ;;  %v13648_v42 = vld [vmem:[#allocation26_spill] sm:$0xff] }
 0x43a   :  { %v2428_v10 = vpop.f32.mrf.mxu0  ;;  %v2441_v29 = vpop.f32.mrf.mxu1 }
 0x43b   :  { %v2527_v47 = vrot.slane %v2428_v10, 2  ;;  %v2528_v26 = vrot.slane %v2441_v29, 2 }
 0x43d   :  { %v2535_v49 = vadd.f32 %v2527_v47, %v13646_v54  ;;  %v2536_v2 = vadd.f32 %v2528_v26, %v13647_v46 }
 0x43f   :  { %v8301_v6 = vmul.f32 -1.442695, %v2535_v49  ;;  %v8302_v22 = vmul.f32 -1.442695, %v2536_v2 }
 0x441   :  { %9639 = vpow2.f32 %v8301_v6  ;;  %v2454_v62 = vpop.f32.mrf.mxu2  ;;  %v2467_v18 = vpop.f32.mrf.mxu3 }
 0x442   :  { %9641 = vpow2.f32 %v8302_v22  ;;  %v2529_v9 = vrot.slane %v2454_v62, 2  ;;  %v2430_v51 = vpop.f32.mrf.mxu0  ;;  %v2443_v44 = vpop.f32.mrf.mxu1  ;;  %v2530_v46 = vrot.slane %v2467_v18, 2  ;;  %v13650_v22 = vld [vmem:[#allocation32_spill] sm:$0xff] }
 0x443   :  { %v13649_v51 = vld [vmem:[#allocation27_spill] sm:$0xff] }
 0x444   :  { %v2537_v30 = vadd.f32 %v2529_v9, %v13648_v42  ;;  %v2538_v44 = vadd.f32 %v2530_v46, %v13649_v51 }
 0x446   :  { %v8303_v36 = vmul.f32 -1.442695, %v2537_v30  ;;  %v13651_v30 = vld [vmem:[#allocation33_spill] sm:$0xff] }
 0x447   :  { %v9640_v16 = vpop.eup %9639 }
 0x448   :  { %v9642_v14 = vpop.eup %9641  ;;  %v2564_v10 = vadd.f32 1.0, %v9640_v16  ;;  %9643 = vpow2.f32 %v8303_v36 }
 0x449   :  { %v2565_v29 = vadd.f32 1.0, %v9642_v14  ;;  %v2456_v54 = vpop.f32.mrf.mxu2  ;;  %v2469_v47 = vpop.f32.mrf.mxu3 }
 0x44a   :  { %9645 = vrcp.f32 %v2564_v10  ;;  %v2480_v26 = vpop.f32.mrf.mxu0  ;;  %v2493_v6 = vpop.f32.mrf.mxu1  ;;  %vm2572_vm1 = vweird.f32 %v2564_v10 }
 0x44b   :  { %9647 = vrcp.f32 %v2565_v29  ;;  %v2543_v49 = vrot.slane %v2480_v26, 2  ;;  %v2544_v2 = vrot.slane %v2493_v6, 2  ;;  %vm2587_vm15 = vweird.f32 %v2565_v29 }
 0x44d   :  { %v2551_v9 = vadd.f32 %v2543_v49, %v13650_v22  ;;  %v2552_v42 = vadd.f32 %v2544_v2, %v13651_v30  ;;  %v2576_v49 = vand.u32 2147483647, %v2564_v10  ;;  %v2593_v22 = vand.u32 2147483648, %v2565_v29 }
 0x44e   :  { %v9644_v62 = vpop.eup %9643  ;;  %v2578_v30 = vand.u32 2147483648, %v2564_v10 }
 0x44f   :  { %v11189_v40 = vadd.f32 1.0, %v9644_v62  ;;  %v8304_v14 = vmul.f32 -1.442695, %v2551_v9  ;;  %v8305_v36 = vmul.f32 -1.442695, %v2552_v42  ;;  %vm2577_vm3 = vcmp.eq.f32.partialorder %v2576_v49, 8.507059e+37 }
 0x450   :  { %v9646_v16 = vpop.eup %9645  ;;  %v2591_v42 = vand.u32 2147483647, %v2565_v29 }
 0x451   :  { %v9648_v54 = vpop.eup %9647  ;;  %v2568_v47 = vmul.f32 %v9646_v16, %v2564_v10  ;;  %9649 = vrcp.f32 %v11189_v40  ;;  %v2506_v18 = vpop.f32.mrf.mxu2  ;;  %vm2573_vm13 = vweird.f32 %v9646_v16  ;;  %vm2602_vm7 = vweird.f32 %v11189_v40 }
 0x452   :  { %v11192_v58 = vpop.f32.mrf.mxu3  ;;  %v2583_v26 = vmul.f32 %v9648_v54, %v2565_v29  ;;  %9651 = vtanh.f32 %v2538_v44  ;;  %v2482_v6 = vpop.f32.mrf.mxu0  ;;  %v2545_v2 = vrot.slane %v2506_v18, 2  ;;  %vm2588_vm14 = vweird.f32 %v9648_v54  ;;  %vm2574_vm2 = vmor %vm2572_vm1, %vm2573_vm13 }
 0x453   :  { %v2495_v46 = vpop.f32.mrf.mxu1  ;;  %v2569_v51 = vsub.f32 1.0, %v2568_v47  ;;  %9653 = vpow2.f32 %v8304_v14  ;;  %vm2589_vm4 = vmor %vm2587_vm15, %vm2588_vm14  ;;  %vm2592_vm5 = vcmp.eq.f32.partialorder %v2591_v42, 8.507059e+37  ;;  %v2608_v42 = vand.u32 2147483648, %v11189_v40 }
 0x454   :  { %v2584_v62 = vsub.f32 1.0, %v2583_v26  ;;  %9655 = vpow2.f32 %v8305_v36  ;;  %v2553_v7 = vadd.f32 %v2545_v2, %v13652_v28  ;;  %v2579_v36 = vor.u32 1.1754944e-38, %v2578_v30 }
 0x455   :  { %v2570_v9 = vmul.f32 %v9646_v16, %v2569_v51  ;;  %v2594_v51 = vor.u32 1.1754944e-38, %v2593_v22 }
 0x456   :  { %v2585_v17 = vmul.f32 %v9648_v54, %v2584_v62  ;;  %v8306_v47 = vmul.f32 -1.442695, %v2553_v7 }
 0x457   :  { %v9650_v44 = vpop.eup %9649  ;;  %v2571_v6 = vadd.f32 %v9646_v16, %v2570_v9 }
 0x458   :  { %v9652_v14 = vpop.eup %9651  ;;  %v2598_v18 = vmul.f32 %v9650_v44, %v11189_v40  ;;  %v2586_v26 = vadd.f32 %v9648_v54, %v2585_v17  ;;  %9657 = vpow2.f32 %v8306_v47  ;;  %vm2603_vm6 = vweird.f32 %v9650_v44 }
 0x459   :  { %v9654_v46 = vpop.eup %9653  ;;  %v2575_v28 = vsel %vm2574_vm2, %v9646_v16, %v2571_v6  ;;  %v2508_v24 = vpop.f32.mrf.mxu2  ;;  %v2546_v16 = vrot.slane %v11192_v58, 2  ;;  %v2606_v6 = vand.u32 2147483647, %v11189_v40  ;;  %vm2604_vm9 = vmor %vm2602_vm7, %vm2603_vm6 }
 0x45a   :  { %v2521_v2 = vpop.f32.mrf.mxu3  ;;  %v9656_v62 = vpop.eup %9655  ;;  %v2599_v29 = vsub.f32 1.0, %v2598_v18  ;;  %v2580_v9 = vsel %vm2577_vm3, %v2579_v36, %v2575_v28  ;;  %v2590_v10 = vsel %vm2589_vm4, %v9648_v54, %v2586_v26  ;;  %v2630_v7 = vadd.f32 1.0, %v9654_v46 }
 0x45b   :  { %v2595_v23 = vsel %vm2592_vm5, %v2594_v51, %v2590_v10  ;;  %v2617_v56 = vmul.f32 %v9652_v14, %v2580_v9  ;;  %v2631_v37 = vadd.f32 1.0, %v9656_v62  ;;  %v2609_v14 = vor.u32 1.1754944e-38, %v2608_v42 }
 0x45c   :  { %v2600_v5 = vmul.f32 %v9650_v44, %v2599_v29  ;;  %v2616_v49 = vmul.f32 %v2614_v48, %v2595_v23  ;;  %9659 = vrcp.f32 %v2630_v7  ;;  %vm2607_vm10 = vcmp.eq.f32.partialorder %v2606_v6, 8.507059e+37 }
 0x45d   :  { %9661 = vrcp.f32 %v2631_v37  ;;  %v2659_v51 = vand.u32 2147483648, %v2631_v37  ;;  %v2644_v24 = vand.u32 2147483648, %v2630_v7  ;;  %vm2638_vm14 = vweird.f32 %v2630_v7 }
 0x45e   :  { %v11197_v17 = vadd.f32 %v2617_v56, %v2616_v49  ;;  %v9658_v22 = vpop.eup %9657  ;;  %v2601_v30 = vadd.f32 %v9650_v44, %v2600_v5  ;;  %v2554_v56 = vadd.f32 %v2546_v16, %v13609_v35  ;;  %v2642_v35 = vand.u32 2147483647, %v2630_v7 }
 0x45f   :  { %v2632_v54 = vadd.f32 1.0, %v9658_v22  ;;  %vm2653_vm15 = vweird.f32 %v2631_v37  ;;  %v2680_v16 = vrot.slane %v11109_v57, 2  ;;  %v2660_v22 = vor.u32 1.1754944e-38, %v2659_v51 }
 0x460   :  { %9663 = vtanh.f32 %v11197_v17  ;;  %v2605_v48 = vsel %vm2604_vm9, %v9650_v44, %v2601_v30  ;;  %v2657_v44 = vand.u32 2147483647, %v2631_v37  ;;  %v2645_v42 = vor.u32 1.1754944e-38, %v2644_v24 }
 0x461   :  { %9665 = vrcp.f32 %v2632_v54  ;;  %v2610_v26 = vsel %vm2607_vm10, %v2609_v14, %v2605_v48  ;;  %vm2643_vm3 = vcmp.eq.f32.partialorder %v2642_v35, 8.507059e+37  ;;  %vm2668_vm6 = vweird.f32 %v2632_v54 }
 0x462   :  { %v9660_v47 = vpop.eup %9659  ;;  %9667 = vtanh.f32 %v2554_v56  ;;  %vm2658_vm4 = vcmp.eq.f32.partialorder %v2657_v44, 8.507059e+37  ;;  %v2672_v57 = vand.u32 2147483647, %v2632_v54  ;;  %v13658_v44 = vld [vmem:[#allocation40_spill] sm:$0xff] }
 0x463   :  { %v9662_v23 = vpop.eup %9661  ;;  %v2634_v58 = vmul.f32 %v9660_v47, %v2630_v7  ;;  %vm2639_vm12 = vweird.f32 %v9660_v47 }
 0x464   :  { %v2649_v5 = vmul.f32 %v9662_v23, %v2631_v37  ;;  %vm2654_vm13 = vweird.f32 %v9662_v23  ;;  %vm2640_vm1 = vmor %vm2638_vm14, %vm2639_vm12  ;;  %vm2673_vm9 = vcmp.eq.f32.partialorder %v2672_v57, 8.507059e+37  ;;  %v13676_v57 = vld [vmem:[#allocation59_spill] sm:$0xff] }
 0x465   :  { %v2635_v18 = vsub.f32 1.0, %v2634_v58  ;;  %vm2655_vm2 = vmor %vm2653_vm15, %vm2654_vm13 }
 0x466   :  { %v9664_v36 = vpop.eup %9663  ;;  %v2650_v46 = vsub.f32 1.0, %v2649_v5 }
 0x467   :  { %v2620_v28 = vmul.f32 %v9664_v36, %v2610_v26  ;;  %v2636_v40 = vmul.f32 %v9660_v47, %v2635_v18  ;;  %v9666_v2 = vpop.eup %9665  ;;  %v2674_v36 = vand.u32 2147483648, %v2632_v54 }
 0x468   :  { %v2651_v62 = vmul.f32 %v9662_v23, %v2650_v46  ;;  %v2664_v9 = vmul.f32 %v9666_v2, %v2632_v54  ;;  %v9668_v6 = vpop.eup %9667  ;;  %vm2669_vm5 = vweird.f32 %v9666_v2  ;;  %v13655_v54 = vld [vmem:[#allocation38_spill] sm:$0xff] }
 0x469   :  { %v11207_v29 = vsel %vm3766_vm11, %v11106_v21, %v2620_v28  ;;  %v2637_v10 = vadd.f32 %v9660_v47, %v2636_v40  ;;  %vm2670_vm7 = vmor %vm2668_vm6, %vm2669_vm5  ;;  %v2688_v40 = vrot.slane %v2620_v28, 6  ;;  %v13656_v28 = vld [vmem:[#allocation42_spill] sm:$0xff] }
 0x46a   :  { %13653 = vst [vmem:[#allocation73_spill] sm:$0xff] %v11207_v29  ;;  %v2652_v49 = vadd.f32 %v9662_v23, %v2651_v62  ;;  %v2665_v30 = vsub.f32 1.0, %v2664_v9  ;;  %v13659_v9 = vld [vmem:[#allocation41_spill] sm:$0xff] }
 0x46b   :  { %v2641_v56 = vsel %vm2640_vm1, %v9660_v47, %v2637_v10  ;;  %v2675_v47 = vor.u32 1.1754944e-38, %v2674_v36  ;;  %v13660_v10 = vld [vmem:[#allocation43_spill] sm:$0xff]  ;;  %v13675_v36 = vld [vmem:[#allocation58_spill] sm:$0xff]  ;;  %v13686_v29 = vld [vmem:[#allocation69_spill] sm:$0xff] }
 0x46c   :  { %v2656_v48 = vsel %vm2655_vm2, %v9662_v23, %v2652_v49  ;;  %v2666_v58 = vmul.f32 %v9666_v2, %v2665_v30  ;;  %v2646_v21 = vsel %vm2643_vm3, %v2645_v42, %v2641_v56  ;;  %v13661_v49 = vld [vmem:[#allocation44_spill] sm:$0xff]  ;;  %v13664_v30 = vld [vmem:[#allocation47_spill] sm:$0xff]  ;;  %v13667_v56 = vld [vmem:[#allocation50_spill] sm:$0xff] }
 0x46d   :  { %v2661_v14 = vsel %vm2658_vm4, %v2660_v22, %v2656_v48  ;;  %v2683_v7 = vmul.f32 %v9668_v6, %v2646_v21  ;;  %v13663_v22 = vld [vmem:[#allocation46_spill] sm:$0xff]  ;;  %v13665_v42 = vld [vmem:[#allocation48_spill] sm:$0xff]  ;;  %v13666_v6 = vld [vmem:[#allocation49_spill] sm:$0xff] }
 0x46e   :  { %v2682_v5 = vmul.f32 %v2680_v16, %v2661_v14  ;;  %v2667_v18 = vadd.f32 %v9666_v2, %v2666_v58  ;;  %v13662_v16 = vld [vmem:[#allocation45_spill] sm:$0xff]  ;;  %v13668_v48 = vld [vmem:[#allocation51_spill] sm:$0xff]  ;;  %v13669_v58 = vld [vmem:[#allocation52_spill] sm:$0xff] }
 0x46f   :  { %v13670_v21 = vld [vmem:[#allocation53_spill] sm:$0xff]  ;;  %v13671_v14 = vld [vmem:[#allocation54_spill] sm:$0xff] }
 0x470   :  { %v11210_v37 = vadd.f32 %v2683_v7, %v2682_v5  ;;  %v2671_v26 = vsel %vm2670_vm7, %v9666_v2, %v2667_v18  ;;  %v13657_v2 = vld [vmem:[#allocation39_spill] sm:$0xff]  ;;  %v13673_v7 = vld [vmem:[#allocation56_spill] sm:$0xff]  ;;  %v13674_v18 = vld [vmem:[#allocation57_spill] sm:$0xff] }
 0x471   :  { %v2676_v46 = vsel %vm2673_vm9, %v2675_v47, %v2671_v26  ;;  %v13672_v5 = vld [vmem:[#allocation55_spill] sm:$0xff]  ;;  %v13677_v26 = vld [vmem:[#allocation60_spill] sm:$0xff]  ;;  %v13678_v47 = vld [vmem:[#allocation61_spill] sm:$0xff] }
 0x472   :  { %9669 = vtanh.f32 %v11210_v37 }
 0x478   :  { %v9670_v23 = vpop.eup %9669 }
 0x479   :  { %v11213_v51 = vmul.f32 %v9670_v23, %v2676_v46  ;;  %v13679_v23 = vld [vmem:[#allocation62_spill] sm:$0xff]  ;;  %v13680_v46 = vld [vmem:[#allocation63_spill] sm:$0xff] }
 0x47b   :  { %13654 = vst [vmem:[#allocation22_spill] sm:$0xff] %v11213_v51  ;;  %v2691_v24 = vrot.slane %v11213_v51, 6  ;;  %v13685_v51 = vld [vmem:[#allocation68_spill] sm:$0xff] }
 0x47d   :  { %v2693_v62 = vsel %vm1879_vm8, %v2688_v40, %v2691_v24  ;;  %v13681_v40 = vld [vmem:[#allocation64_spill] sm:$0xff]  ;;  %v13682_v24 = vld [vmem:[#allocation65_spill] sm:$0xff] }
 0x47e   :  { %v2694_v35 = vpack.c.bf16 %v2693_v62, %v2693_v62  ;;  %v13683_v62 = vld [vmem:[#allocation66_spill] sm:$0xff] }
 0x480   :  { %2703 = vmatmul.bf16.vlgmr.msra.gmra.mxu0 %v2694_v35  ;;  %2716 = vmatmul.bf16.vlgmr.msra.gmra.mxu1 %v2694_v35 }
 0x481   :  { %2729 = vmatmul.bf16.vlgmr.msra.gmra.mxu2 %v2694_v35  ;;  %2742 = vmatmul.bf16.vlgmr.msra.gmra.mxu3 %v2694_v35 }
 0x482   :  { %2956 = vmatpush.bf16.msra.mxu0 %v10497_v27  ;;  %2969 = vmatpush.bf16.msra.mxu1 %v10499_v32 }
 0x483   :  { %2982 = vmatpush.bf16.msra.mxu2 %v10501_v33  ;;  %2995 = vmatpush.bf16.msra.mxu3 %v10512_v50 }
 0x486   :  { %2957 = vmatpush.bf16.msra.mxu0 %v10504_v38  ;;  %2970 = vmatpush.bf16.msra.mxu1 %v10508_v43 }
 0x487   :  { %2983 = vmatpush.bf16.msra.mxu2 %v10510_v45  ;;  %2996 = vmatpush.bf16.msra.mxu3 %v10524_v3 }
 0x48a   :  { %2958 = vmatpush.bf16.msra.mxu0 %v10516_v59  ;;  %2971 = vmatpush.bf16.msra.mxu1 %v10520_v0 }
 0x48b   :  { %2984 = vmatpush.bf16.msra.mxu2 %v10522_v1  ;;  %2997 = vmatpush.bf16.msra.mxu3 %v10530_v15 }
 0x48e   :  { %2959 = vmatpush.bf16.msra.mxu0 %v10528_v12  ;;  %2972 = vmatpush.bf16.msra.mxu1 %v10534_v19 }
 0x48f   :  { %2985 = vmatpush.bf16.msra.mxu2 %v10536_v20  ;;  %2998 = vmatpush.bf16.msra.mxu3 %v10542_v34 }
 0x490   :  { %2755 = vmatmul.bf16.vlgmr.msrb.gmra.mxu0 %v2694_v35  ;;  %2768 = vmatmul.bf16.vlgmr.msrb.gmra.mxu1 %v2694_v35 }
 0x491   :  { %2781 = vmatmul.bf16.vlgmr.msrb.gmra.mxu2 %v2694_v35  ;;  %2794 = vmatmul.bf16.vlgmr.msrb.gmra.mxu3 %v2694_v35  ;;  %v13684_v35 = vld [vmem:[#allocation67_spill] sm:$0xff] }
 0x492   :  { %2960 = vmatpush.bf16.msra.mxu0 %v10540_v31  ;;  %2973 = vmatpush.bf16.msra.mxu1 %v10546_v39 }
 0x493   :  { %2986 = vmatpush.bf16.msra.mxu2 %v10548_v41  ;;  %2999 = vmatpush.bf16.msra.mxu3 %v10554_v55 }
 0x496   :  { %2961 = vmatpush.bf16.msra.mxu0 %v10552_v53  ;;  %2974 = vmatpush.bf16.msra.mxu1 %v10558_v60 }
 0x497   :  { %2987 = vmatpush.bf16.msra.mxu2 %v10560_v61  ;;  %3000 = vmatpush.bf16.msra.mxu3 %v10566_v13 }
 0x49a   :  { %2962 = vmatpush.bf16.msra.mxu0 %v10564_v11  ;;  %2975 = vmatpush.bf16.msra.mxu1 %v10570_v25 }
 0x49b   :  { %2988 = vmatpush.bf16.msra.mxu2 %v10572_v8  ;;  %3001 = vmatpush.bf16.msra.mxu3 %v10578_v63 }
 0x49e   :  { %2963 = vmatpush.bf16.msra.mxu0 %v10576_v52  ;;  %2976 = vmatpush.bf16.msra.mxu1 %v10582_v4 }
 0x49f   :  { %2989 = vmatpush.bf16.msra.mxu2 %v13655_v54  ;;  %3002 = vmatpush.bf16.msra.mxu3 %v13656_v28 }
 0x4a2   :  { %3008 = vmatpush.bf16.msrb.mxu0 %v13657_v2  ;;  %3021 = vmatpush.bf16.msrb.mxu1 %v13658_v44  ;;  %v2944_v2 = vrot.slane %v11210_v37, 2 }
 0x4a3   :  { %3034 = vmatpush.bf16.msrb.mxu2 %v13659_v9  ;;  %3047 = vmatpush.bf16.msrb.mxu3 %v13660_v10 }
 0x4a6   :  { %3009 = vmatpush.bf16.msrb.mxu0 %v13661_v49  ;;  %3022 = vmatpush.bf16.msrb.mxu1 %v13662_v16 }
 0x4a7   :  { %3035 = vmatpush.bf16.msrb.mxu2 %v13663_v22  ;;  %3048 = vmatpush.bf16.msrb.mxu3 %v13664_v30 }
 0x4aa   :  { %3010 = vmatpush.bf16.msrb.mxu0 %v13665_v42  ;;  %3023 = vmatpush.bf16.msrb.mxu1 %v13666_v6 }
 0x4ab   :  { %3036 = vmatpush.bf16.msrb.mxu2 %v13667_v56  ;;  %3049 = vmatpush.bf16.msrb.mxu3 %v13668_v48 }
 0x4ae   :  { %3011 = vmatpush.bf16.msrb.mxu0 %v13669_v58  ;;  %3024 = vmatpush.bf16.msrb.mxu1 %v13670_v21 }
 0x4af   :  { %3037 = vmatpush.bf16.msrb.mxu2 %v13671_v14  ;;  %3050 = vmatpush.bf16.msrb.mxu3 %v13672_v5 }
 0x4b2   :  { %3012 = vmatpush.bf16.msrb.mxu0 %v13673_v7  ;;  %3025 = vmatpush.bf16.msrb.mxu1 %v13674_v18  ;;  %v13690_v18 = vld [vmem:[#allocation25_spill] sm:$0xff] }
 0x4b3   :  { %3038 = vmatpush.bf16.msrb.mxu2 %v13675_v36  ;;  %3051 = vmatpush.bf16.msrb.mxu3 %v13676_v57  ;;  %v13687_v57 = vld [vmem:[#allocation70_spill] sm:$0xff]  ;;  %v13689_v36 = vld [vmem:[#allocation24_spill] sm:$0xff] }
 0x4b6   :  { %3013 = vmatpush.bf16.msrb.mxu0 %v13677_v26  ;;  %3026 = vmatpush.bf16.msrb.mxu1 %v13678_v47  ;;  %v13688_v26 = vld [vmem:[#allocation71_spill] sm:$0xff] }
 0x4b7   :  { %3039 = vmatpush.bf16.msrb.mxu2 %v13679_v23  ;;  %3052 = vmatpush.bf16.msrb.mxu3 %v13680_v46 }
 0x4ba   :  { %3014 = vmatpush.bf16.msrb.mxu0 %v13681_v40  ;;  %3027 = vmatpush.bf16.msrb.mxu1 %v13682_v24 }
 0x4bb   :  { %3040 = vmatpush.bf16.msrb.mxu2 %v13683_v62  ;;  %3053 = vmatpush.bf16.msrb.mxu3 %v13684_v35 }
 0x4be   :  { %3015 = vmatpush.bf16.msrb.mxu0 %v13685_v51  ;;  %3028 = vmatpush.bf16.msrb.mxu1 %v13686_v29 }
 0x4bf   :  { %3041 = vmatpush.bf16.msrb.mxu2 %v13687_v57  ;;  %3054 = vmatpush.bf16.msrb.mxu3 %v13688_v26  ;;  %v13691_v57 = vld [vmem:[#allocation28_spill] sm:$0xff] }
 0x4fd   :  { %v2704_v47 = vpop.f32.mrf.mxu0  ;;  %v2717_v23 = vpop.f32.mrf.mxu1 }
 0x4fe   :  { %v2799_v46 = vadd.f32 %v2704_v47, %v13689_v36  ;;  %v2800_v40 = vadd.f32 %v2717_v23, %v13690_v18  ;;  %v13693_v36 = vld [vmem:[#allocation31_spill] sm:$0xff] }
 0x500   :  { %v8307_v7 = vmul.f32 -1.442695, %v2799_v46  ;;  %v8308_v24 = vmul.f32 -1.442695, %v2800_v40 }
 0x502   :  { %9671 = vpow2.f32 %v8307_v7 }
 0x503   :  { %9673 = vpow2.f32 %v8308_v24 }
 0x504   :  { %v2730_v62 = vpop.f32.mrf.mxu2  ;;  %v2743_v35 = vpop.f32.mrf.mxu3 }
 0x505   :  { %v2706_v5 = vpop.f32.mrf.mxu0  ;;  %v2719_v51 = vpop.f32.mrf.mxu1  ;;  %v2801_v26 = vadd.f32 %v2730_v62, %v13691_v57 }
 0x506   :  { %v13692_v51 = vld [vmem:[#allocation30_spill] sm:$0xff] }
 0x507   :  { %v8309_v7 = vmul.f32 -1.442695, %v2801_v26 }
 0x508   :  { %v9672_v14 = vpop.eup %9671 }
 0x509   :  { %v9674_v29 = vpop.eup %9673  ;;  %v11283_v21 = vadd.f32 1.0, %v9672_v14 }
 0x50a   :  { %v11286_v58 = vadd.f32 1.0, %v9674_v29 }
 0x50b   :  { %9675 = vrcp.f32 %v11283_v21  ;;  %vm2836_vm15 = vweird.f32 %v11283_v21 }
 0x50c   :  { %v2732_v47 = vpop.f32.mrf.mxu2  ;;  %v2745_v23 = vpop.f32.mrf.mxu3  ;;  %9677 = vrcp.f32 %v11286_v58  ;;  %vm2851_vm13 = vweird.f32 %v11286_v58 }
 0x50d   :  { %v2756_v46 = vpop.f32.mrf.mxu0  ;;  %v2769_v40 = vpop.f32.mrf.mxu1  ;;  %9679 = vpow2.f32 %v8309_v7  ;;  %v13694_v7 = vld [vmem:[#allocation34_spill] sm:$0xff] }
 0x50e   :  { %v2807_v24 = vrot.slane %v2756_v46, 4  ;;  %v2808_v5 = vrot.slane %v2769_v40, 4 }
 0x510   :  { %v2815_v18 = vadd.f32 %v2807_v24, %v13692_v51  ;;  %v2816_v14 = vadd.f32 %v2808_v5, %v13693_v36 }
 0x511   :  { %v11292_v48 = vpop.eup %9675 }
 0x512   :  { %v11294_v29 = vpop.eup %9677  ;;  %v8310_v62 = vmul.f32 -1.442695, %v2815_v18  ;;  %v8311_v57 = vmul.f32 -1.442695, %v2816_v14  ;;  %v2832_v46 = vmul.f32 %v11292_v48, %v11283_v21  ;;  %vm2837_vm12 = vweird.f32 %v11292_v48 }
 0x513   :  { %v2847_v40 = vmul.f32 %v11294_v29, %v11286_v58  ;;  %v9680_v24 = vpop.eup %9679  ;;  %vm2852_vm10 = vweird.f32 %v11294_v29  ;;  %vm11333_vm1 = vmor %vm2836_vm15, %vm2837_vm12 }
 0x514   :  { %v2782_v47 = vpop.f32.mrf.mxu2  ;;  %v2795_v23 = vpop.f32.mrf.mxu3  ;;  %9681 = vpow2.f32 %v8310_v62  ;;  %v2833_v51 = vsub.f32 1.0, %v2832_v46  ;;  %v11301_v14 = vadd.f32 1.0, %v9680_v24  ;;  %v13695_v46 = vld [vmem:[#allocation29_spill] sm:$0xff]  ;;  %vm11325_vm14 = vmor %vm2851_vm13, %vm2852_vm10 }
 0x515   :  { %v2809_v56 = vrot.slane %v2782_v47, 4  ;;  %v2758_v6 = vpop.f32.mrf.mxu0  ;;  %v2771_v26 = vpop.f32.mrf.mxu1  ;;  %9683 = vpow2.f32 %v8311_v57  ;;  %v2848_v18 = vsub.f32 1.0, %v2847_v40  ;;  %v2802_v40 = vadd.f32 %v2743_v35, %v13695_v46 }
 0x516   :  { %v2834_v57 = vmul.f32 %v11292_v48, %v2833_v51  ;;  %v2840_v51 = vand.u32 2147483647, %v11283_v21 }
 0x517   :  { %v2817_v5 = vadd.f32 %v2809_v56, %v13694_v7  ;;  %v2849_v22 = vmul.f32 %v11294_v29, %v2848_v18  ;;  %v2810_v56 = vrot.slane %v2795_v23, 4  ;;  %v2842_v23 = vand.u32 2147483648, %v11283_v21 }
 0x518   :  { %v2835_v24 = vadd.f32 %v11292_v48, %v2834_v57  ;;  %v2878_v7 = vrot.slane %v11197_v17, 6  ;;  %vm2841_vm2 = vcmp.eq.f32.partialorder %v2840_v51, 8.507059e+37 }
 0x519   :  { %v8312_v36 = vmul.f32 -1.442695, %v2817_v5  ;;  %v2850_v5 = vadd.f32 %v11294_v29, %v2849_v22  ;;  %v2855_v22 = vand.u32 2147483647, %v11286_v58 }
 0x51a   :  { %v9682_v47 = vpop.eup %9681  ;;  %v2839_v16 = vsel %vm11333_vm1, %v11292_v48, %v2835_v24 }
 0x51b   :  { %9685 = vpow2.f32 %v8312_v36  ;;  %v9684_v42 = vpop.eup %9683  ;;  %v11303_v30 = vadd.f32 1.0, %v9682_v47  ;;  %vm2856_vm3 = vcmp.eq.f32.partialorder %v2855_v22, 8.507059e+37 }
 0x51c   :  { %v2784_v6 = vpop.f32.mrf.mxu2  ;;  %v2797_v26 = vpop.f32.mrf.mxu3  ;;  %9687 = vrcp.f32 %v11301_v14  ;;  %v11308_v62 = vadd.f32 1.0, %v9684_v42  ;;  %v2857_v42 = vand.u32 2147483648, %v11286_v58  ;;  %v2854_v58 = vsel %vm11325_vm14, %v11294_v29, %v2850_v5 }
 0x51d   :  { %9689 = vrcp.f32 %v11303_v30  ;;  %v13698_v6 = vld [vmem:[#allocation35_spill] sm:$0xff]  ;;  %v2908_v24 = vand.u32 2147483648, %v11303_v30  ;;  %vm2902_vm6 = vweird.f32 %v11303_v30 }
 0x51e   :  { %9691 = vrcp.f32 %v11308_v62  ;;  %v2818_v26 = vadd.f32 %v2810_v56, %v13698_v6  ;;  %v2858_v56 = vor.u32 1.1754944e-38, %v2857_v42  ;;  %v2843_v6 = vor.u32 1.1754944e-38, %v2842_v23 }
 0x51f   :  { %v2923_v29 = vand.u32 2147483648, %v11308_v62  ;;  %v2906_v42 = vand.u32 2147483647, %v11303_v30  ;;  %v2921_v22 = vand.u32 2147483647, %v11308_v62  ;;  %vm2917_vm7 = vweird.f32 %v11308_v62 }
 0x520   :  { %v2844_v10 = vsel %vm2841_vm2, %v2843_v6, %v2839_v16 }
 0x521   :  { %v9686_v36 = vpop.eup %9685  ;;  %vm2907_vm12 = vcmp.eq.f32.partialorder %v2906_v42, 8.507059e+37  ;;  %vm2922_vm13 = vcmp.eq.f32.partialorder %v2921_v22, 8.507059e+37 }
 0x522   :  { %v11317_v18 = vadd.f32 1.0, %v9686_v36  ;;  %v11323_v47 = vpop.eup %9687  ;;  %v2859_v36 = vsel %vm2856_vm3, %v2858_v56, %v2854_v58  ;;  %v2909_v58 = vor.u32 1.1754944e-38, %v2908_v24  ;;  %vm2866_vm3 = vweird.f32 %v11301_v14 }
 0x523   :  { %v9690_v57 = vpop.eup %9689  ;;  %vm2867_vm15 = vweird.f32 %v11323_v47 }
 0x524   :  { %9693 = vrcp.f32 %v11317_v18  ;;  %v9692_v46 = vpop.eup %9691  ;;  %v2898_v21 = vmul.f32 %v9690_v57, %v11303_v30  ;;  %vm2903_vm4 = vweird.f32 %v9690_v57  ;;  %vm2932_vm1 = vweird.f32 %v11317_v18 }
 0x525   :  { %9695 = vtanh.f32 %v2802_v40  ;;  %v2913_v49 = vmul.f32 %v9692_v46, %v11308_v62  ;;  %v2862_v40 = vmul.f32 %v11323_v47, %v11301_v14  ;;  %vm2918_vm5 = vweird.f32 %v9692_v46  ;;  %vm2904_vm9 = vmor %vm2902_vm6, %vm2903_vm4 }
 0x526   :  { %v2899_v17 = vsub.f32 1.0, %v2898_v21  ;;  %9697 = vtanh.f32 %v2818_v26  ;;  %v2880_v26 = vmul.f32 %v2878_v7, %v2859_v36  ;;  %vm2919_vm10 = vmor %vm2917_vm7, %vm2918_vm5 }
 0x527   :  { %v2914_v48 = vsub.f32 1.0, %v2913_v49  ;;  %vm2868_vm4 = vmor %vm2866_vm3, %vm2867_vm15 }
 0x528   :  { %v2900_v5 = vmul.f32 %v9690_v57, %v2899_v17  ;;  %v2863_v17 = vsub.f32 1.0, %v2862_v40 }
 0x529   :  { %v2915_v23 = vmul.f32 %v9692_v46, %v2914_v48  ;;  %v2924_v48 = vor.u32 1.1754944e-38, %v2923_v29 }
 0x52a   :  { %v9694_v35 = vpop.eup %9693  ;;  %v2901_v6 = vadd.f32 %v9690_v57, %v2900_v5  ;;  %v2864_v24 = vmul.f32 %v11323_v47, %v2863_v17  ;;  %v13707_v17 = vld [vmem:[#allocation43_spill] sm:$0xff] }
 0x52b   :  { %v9696_v51 = vpop.eup %9695  ;;  %v2928_v9 = vmul.f32 %v9694_v35, %v11317_v18  ;;  %v2916_v21 = vadd.f32 %v9692_v46, %v2915_v23  ;;  %vm2933_vm14 = vweird.f32 %v9694_v35 }
 0x52c   :  { %v2881_v16 = vmul.f32 %v9696_v51, %v2844_v10  ;;  %v9698_v56 = vpop.eup %9697  ;;  %v2905_v44 = vsel %vm2904_vm9, %v9690_v57, %v2901_v6  ;;  %v2938_v57 = vand.u32 2147483648, %v11317_v18  ;;  %v2865_v37 = vadd.f32 %v11323_v47, %v2864_v24  ;;  %vm2934_vm2 = vmor %vm2932_vm1, %vm2933_vm14  ;;  %v13714_v24 = vld [vmem:[#allocation50_spill] sm:$0xff] }
 0x52d   :  { %v2929_v49 = vsub.f32 1.0, %v2928_v9  ;;  %v2910_v28 = vsel %vm2907_vm12, %v2909_v58, %v2905_v44  ;;  %v2920_v7 = vsel %vm2919_vm10, %v9692_v46, %v2916_v21  ;;  %v2870_v44 = vand.u32 2147483647, %v11301_v14  ;;  %v13704_v58 = vld [vmem:[#allocation39_spill] sm:$0xff]  ;;  %v13705_v21 = vld [vmem:[#allocation40_spill] sm:$0xff] }
 0x52e   :  { %v11356_v10 = vadd.f32 %v2881_v16, %v2880_v26  ;;  %v2925_v36 = vsel %vm2922_vm13, %v2924_v48, %v2920_v7  ;;  %v2947_v62 = vmul.f32 %v9698_v56, %v2910_v28  ;;  %v2936_v28 = vand.u32 2147483647, %v11317_v18  ;;  %v13706_v56 = vld [vmem:[#allocation41_spill] sm:$0xff]  ;;  %v13708_v48 = vld [vmem:[#allocation44_spill] sm:$0xff] }
 0x52f   :  { %v2930_v30 = vmul.f32 %v9694_v35, %v2929_v49  ;;  %v2946_v9 = vmul.f32 %v2944_v2, %v2925_v36  ;;  %v2872_v2 = vand.u32 2147483648, %v11301_v14  ;;  %v2939_v29 = vor.u32 1.1754944e-38, %v2938_v57  ;;  %v13709_v7 = vld [vmem:[#allocation45_spill] sm:$0xff]  ;;  %v13711_v36 = vld [vmem:[#allocation47_spill] sm:$0xff]  ;;  %v13716_v57 = vld [vmem:[#allocation52_spill] sm:$0xff] }
 0x530   :  { %9699 = vtanh.f32 %v11356_v10  ;;  %v2869_v51 = vsel %vm2868_vm4, %v11323_v47, %v2865_v37  ;;  %vm2937_vm5 = vcmp.eq.f32.partialorder %v2936_v28, 8.507059e+37  ;;  %vm2871_vm6 = vcmp.eq.f32.partialorder %v2870_v44, 8.507059e+37  ;;  %v13703_v47 = vld [vmem:[#allocation42_spill] sm:$0xff]  ;;  %v13717_v37 = vld [vmem:[#allocation53_spill] sm:$0xff]  ;;  %v13720_v44 = vld [vmem:[#allocation56_spill] sm:$0xff] }
 0x531   :  { %v11359_v5 = vadd.f32 %v2947_v62, %v2946_v9  ;;  %v2931_v40 = vadd.f32 %v9694_v35, %v2930_v30  ;;  %v2873_v22 = vor.u32 1.1754944e-38, %v2872_v2  ;;  %v13710_v30 = vld [vmem:[#allocation46_spill] sm:$0xff]  ;;  %v13712_v62 = vld [vmem:[#allocation48_spill] sm:$0xff]  ;;  %v13713_v9 = vld [vmem:[#allocation49_spill] sm:$0xff] }
 0x532   :  { %v13718_v28 = vld [vmem:[#allocation54_spill] sm:$0xff]  ;;  %v13719_v2 = vld [vmem:[#allocation55_spill] sm:$0xff] }
 0x533   :  { %9701 = vtanh.f32 %v11359_v5  ;;  %v2935_v46 = vsel %vm2934_vm2, %v9694_v35, %v2931_v40  ;;  %v2874_v18 = vsel %vm2871_vm6, %v2873_v22, %v2869_v51  ;;  %v13715_v40 = vld [vmem:[#allocation51_spill] sm:$0xff]  ;;  %v13724_v51 = vld [vmem:[#allocation60_spill] sm:$0xff]  ;;  %v13726_v22 = vld [vmem:[#allocation62_spill] sm:$0xff] }
 0x534   :  { %v2940_v26 = vsel %vm2937_vm5, %v2939_v29, %v2935_v46  ;;  %v13721_v46 = vld [vmem:[#allocation57_spill] sm:$0xff]  ;;  %v13722_v29 = vld [vmem:[#allocation58_spill] sm:$0xff] }
 0x536   :  { %v9700_v42 = vpop.eup %9699 }
 0x537   :  { %v11374_v6 = vmul.f32 %v9700_v42, %v2874_v18  ;;  %v13723_v42 = vld [vmem:[#allocation59_spill] sm:$0xff]  ;;  %v13728_v18 = vld [vmem:[#allocation64_spill] sm:$0xff] }
 0x539   :  { %v9702_v23 = vpop.eup %9701  ;;  %13702 = vst [vmem:[#allocation26_spill] sm:$0xff] %v11374_v6 }
 0x53a   :  { %v11372_v16 = vmul.f32 %v9702_v23, %v2940_v26  ;;  %v13725_v23 = vld [vmem:[#allocation61_spill] sm:$0xff]  ;;  %v13727_v26 = vld [vmem:[#allocation63_spill] sm:$0xff] }
 0x53c   :  { %13701 = vst [vmem:[#allocation23_spill] sm:$0xff] %v11372_v16  ;;  %v2952_v49 = vrot.slane %v11372_v16, 4  ;;  %v13732_v16 = vld [vmem:[#allocation68_spill] sm:$0xff] }
 0x53e   :  { %v2954_v14 = vsel %vm1879_vm8, %v11374_v6, %v2952_v49  ;;  %v13729_v49 = vld [vmem:[#allocation65_spill] sm:$0xff] }
 0x53f   :  { %v2955_v35 = vpack.c.bf16 %v2954_v14, %v2954_v14  ;;  %v13730_v14 = vld [vmem:[#allocation66_spill] sm:$0xff]  ;;  %v13733_v6 = vld [vmem:[#allocation69_spill] sm:$0xff] }
 0x541   :  { %2964 = vmatmul.bf16.vlgmr.msra.gmra.mxu0 %v2955_v35  ;;  %2977 = vmatmul.bf16.vlgmr.msra.gmra.mxu1 %v2955_v35 }
 0x542   :  { %2990 = vmatmul.bf16.vlgmr.msra.gmra.mxu2 %v2955_v35  ;;  %3003 = vmatmul.bf16.vlgmr.msra.gmra.mxu3 %v2955_v35 }
 0x543   :  { %3232 = vmatpush.bf16.msra.mxu0 %v10497_v27  ;;  %3245 = vmatpush.bf16.msra.mxu1 %v10499_v32 }
 0x544   :  { %3258 = vmatpush.bf16.msra.mxu2 %v10501_v33  ;;  %3271 = vmatpush.bf16.msra.mxu3 %v10512_v50 }
 0x547   :  { %3233 = vmatpush.bf16.msra.mxu0 %v10504_v38  ;;  %3246 = vmatpush.bf16.msra.mxu1 %v10508_v43 }
 0x548   :  { %3259 = vmatpush.bf16.msra.mxu2 %v10510_v45  ;;  %3272 = vmatpush.bf16.msra.mxu3 %v10524_v3 }
 0x54b   :  { %3234 = vmatpush.bf16.msra.mxu0 %v10516_v59  ;;  %3247 = vmatpush.bf16.msra.mxu1 %v10520_v0 }
 0x54c   :  { %3260 = vmatpush.bf16.msra.mxu2 %v10522_v1  ;;  %3273 = vmatpush.bf16.msra.mxu3 %v10530_v15 }
 0x54f   :  { %3235 = vmatpush.bf16.msra.mxu0 %v10528_v12  ;;  %3248 = vmatpush.bf16.msra.mxu1 %v10534_v19 }
 0x550   :  { %3261 = vmatpush.bf16.msra.mxu2 %v10536_v20  ;;  %3274 = vmatpush.bf16.msra.mxu3 %v10542_v34 }
 0x551   :  { %3016 = vmatmul.bf16.vlgmr.msrb.gmra.mxu0 %v2955_v35  ;;  %3029 = vmatmul.bf16.vlgmr.msrb.gmra.mxu1 %v2955_v35 }
 0x552   :  { %3042 = vmatmul.bf16.vlgmr.msrb.gmra.mxu2 %v2955_v35  ;;  %3055 = vmatmul.bf16.vlgmr.msrb.gmra.mxu3 %v2955_v35  ;;  %v13731_v35 = vld [vmem:[#allocation67_spill] sm:$0xff] }
 0x553   :  { %3236 = vmatpush.bf16.msra.mxu0 %v10540_v31  ;;  %3249 = vmatpush.bf16.msra.mxu1 %v10546_v39 }
 0x554   :  { %3262 = vmatpush.bf16.msra.mxu2 %v10548_v41  ;;  %3275 = vmatpush.bf16.msra.mxu3 %v10554_v55 }
 0x557   :  { %3237 = vmatpush.bf16.msra.mxu0 %v10552_v53  ;;  %3250 = vmatpush.bf16.msra.mxu1 %v10558_v60 }
 0x558   :  { %3263 = vmatpush.bf16.msra.mxu2 %v10560_v61  ;;  %3276 = vmatpush.bf16.msra.mxu3 %v10566_v13 }
 0x55b   :  { %3238 = vmatpush.bf16.msra.mxu0 %v10564_v11  ;;  %3251 = vmatpush.bf16.msra.mxu1 %v10570_v25 }
 0x55c   :  { %3264 = vmatpush.bf16.msra.mxu2 %v10572_v8  ;;  %3277 = vmatpush.bf16.msra.mxu3 %v10578_v63 }
 0x55f   :  { %3239 = vmatpush.bf16.msra.mxu0 %v10576_v52  ;;  %3252 = vmatpush.bf16.msra.mxu1 %v10582_v4 }
 0x560   :  { %3265 = vmatpush.bf16.msra.mxu2 %v13655_v54  ;;  %3278 = vmatpush.bf16.msra.mxu3 %v13703_v47 }
 0x563   :  { %3284 = vmatpush.bf16.msrb.mxu0 %v13704_v58  ;;  %3297 = vmatpush.bf16.msrb.mxu1 %v13705_v21 }
 0x564   :  { %3310 = vmatpush.bf16.msrb.mxu2 %v13706_v56  ;;  %3323 = vmatpush.bf16.msrb.mxu3 %v13707_v17 }
 0x567   :  { %3285 = vmatpush.bf16.msrb.mxu0 %v13708_v48  ;;  %3298 = vmatpush.bf16.msrb.mxu1 %v13709_v7 }
 0x568   :  { %3311 = vmatpush.bf16.msrb.mxu2 %v13710_v30  ;;  %3324 = vmatpush.bf16.msrb.mxu3 %v13711_v36 }
 0x56b   :  { %3286 = vmatpush.bf16.msrb.mxu0 %v13712_v62  ;;  %3299 = vmatpush.bf16.msrb.mxu1 %v13713_v9 }
 0x56c   :  { %3312 = vmatpush.bf16.msrb.mxu2 %v13714_v24  ;;  %3325 = vmatpush.bf16.msrb.mxu3 %v13715_v40 }
 0x56f   :  { %3287 = vmatpush.bf16.msrb.mxu0 %v13716_v57  ;;  %3300 = vmatpush.bf16.msrb.mxu1 %v13717_v37 }
 0x570   :  { %3313 = vmatpush.bf16.msrb.mxu2 %v13718_v28  ;;  %3326 = vmatpush.bf16.msrb.mxu3 %v13719_v2 }
 0x573   :  { %3288 = vmatpush.bf16.msrb.mxu0 %v13720_v44  ;;  %3301 = vmatpush.bf16.msrb.mxu1 %v13721_v46  ;;  %v13736_v46 = vld [vmem:[#allocation24_spill] sm:$0xff]  ;;  %v13737_v44 = vld [vmem:[#allocation25_spill] sm:$0xff] }
 0x574   :  { %3314 = vmatpush.bf16.msrb.mxu2 %v13722_v29  ;;  %3327 = vmatpush.bf16.msrb.mxu3 %v13723_v42  ;;  %v13734_v42 = vld [vmem:[#allocation70_spill] sm:$0xff] }
 0x577   :  { %3289 = vmatpush.bf16.msrb.mxu0 %v13724_v51  ;;  %3302 = vmatpush.bf16.msrb.mxu1 %v13725_v23  ;;  %v13735_v51 = vld [vmem:[#allocation71_spill] sm:$0xff] }
 0x578   :  { %3315 = vmatpush.bf16.msrb.mxu2 %v13726_v22  ;;  %3328 = vmatpush.bf16.msrb.mxu3 %v13727_v26 }
 0x57b   :  { %3290 = vmatpush.bf16.msrb.mxu0 %v13728_v18  ;;  %3303 = vmatpush.bf16.msrb.mxu1 %v13729_v49 }
 0x57c   :  { %3316 = vmatpush.bf16.msrb.mxu2 %v13730_v14  ;;  %3329 = vmatpush.bf16.msrb.mxu3 %v13731_v35 }
 0x57f   :  { %3291 = vmatpush.bf16.msrb.mxu0 %v13732_v16  ;;  %3304 = vmatpush.bf16.msrb.mxu1 %v13733_v6 }
 0x580   :  { %3317 = vmatpush.bf16.msrb.mxu2 %v13734_v42  ;;  %3330 = vmatpush.bf16.msrb.mxu3 %v13735_v51  ;;  %v13738_v42 = vld [vmem:[#allocation28_spill] sm:$0xff] }
 0x5be   :  { %v2965_v23 = vpop.f32.mrf.mxu0  ;;  %v2978_v22 = vpop.f32.mrf.mxu1 }
 0x5bf   :  { %v3064_v29 = vrot.slane %v2965_v23, 6  ;;  %v3065_v26 = vrot.slane %v2978_v22, 6 }
 0x5c1   :  { %v3072_v18 = vadd.f32 %v3064_v29, %v13736_v46  ;;  %v3073_v49 = vadd.f32 %v3065_v26, %v13737_v44 }
 0x5c3   :  { %v8313_v2 = vmul.f32 -1.442695, %v3072_v18  ;;  %v8314_v14 = vmul.f32 -1.442695, %v3073_v49  ;;  %v13739_v49 = vld [vmem:[#allocation30_spill] sm:$0xff] }
 0x5c5   :  { %9703 = vpow2.f32 %v8313_v2  ;;  %v2991_v35 = vpop.f32.mrf.mxu2  ;;  %v3004_v28 = vpop.f32.mrf.mxu3 }
 0x5c6   :  { %9705 = vpow2.f32 %v8314_v14  ;;  %v3066_v16 = vrot.slane %v2991_v35, 6  ;;  %v2967_v6 = vpop.f32.mrf.mxu0  ;;  %v2980_v37 = vpop.f32.mrf.mxu1 }
 0x5c8   :  { %v3074_v57 = vadd.f32 %v3066_v16, %v13738_v42 }
 0x5ca   :  { %v8315_v51 = vmul.f32 -1.442695, %v3074_v57  ;;  %v13740_v57 = vld [vmem:[#allocation31_spill] sm:$0xff] }
 0x5cb   :  { %v9704_v40 = vpop.eup %9703 }
 0x5cc   :  { %v9706_v24 = vpop.eup %9705  ;;  %v11446_v23 = vadd.f32 1.0, %v9704_v40  ;;  %9707 = vpow2.f32 %v8315_v51 }
 0x5cd   :  { %v11448_v22 = vadd.f32 1.0, %v9706_v24  ;;  %v2993_v29 = vpop.f32.mrf.mxu2  ;;  %v3006_v26 = vpop.f32.mrf.mxu3 }
 0x5ce   :  { %9709 = vrcp.f32 %v11446_v23  ;;  %v3017_v2 = vpop.f32.mrf.mxu0  ;;  %v3030_v18 = vpop.f32.mrf.mxu1  ;;  %vm3109_vm13 = vweird.f32 %v11446_v23 }
 0x5cf   :  { %9711 = vrcp.f32 %v11448_v22  ;;  %v3080_v6 = vrot.slane %v3017_v2, 6  ;;  %v3081_v37 = vrot.slane %v3030_v18, 6  ;;  %vm3124_vm10 = vweird.f32 %v11448_v22 }
 0x5d1   :  { %v3088_v16 = vadd.f32 %v3080_v6, %v13739_v49  ;;  %v3089_v14 = vadd.f32 %v3081_v37, %v13740_v57  ;;  %v13741_v37 = vld [vmem:[#allocation34_spill] sm:$0xff] }
 0x5d2   :  { %v9708_v35 = vpop.eup %9707 }
 0x5d3   :  { %v8316_v42 = vmul.f32 -1.442695, %v3088_v16  ;;  %v8317_v24 = vmul.f32 -1.442695, %v3089_v14  ;;  %v11456_v6 = vadd.f32 1.0, %v9708_v35  ;;  %v3067_v16 = vrot.slane %v3004_v28, 6 }
 0x5d4   :  { %v9710_v40 = vpop.eup %9709 }
 0x5d5   :  { %v9712_v44 = vpop.eup %9711  ;;  %v3105_v51 = vmul.f32 %v9710_v40, %v11446_v23  ;;  %v3043_v29 = vpop.f32.mrf.mxu2  ;;  %9713 = vpow2.f32 %v8316_v42  ;;  %vm3110_vm9 = vweird.f32 %v9710_v40 }
 0x5d6   :  { %v3056_v26 = vpop.f32.mrf.mxu3  ;;  %v3120_v46 = vmul.f32 %v9712_v44, %v11448_v22  ;;  %v3019_v9 = vpop.f32.mrf.mxu0  ;;  %v3082_v2 = vrot.slane %v3043_v29, 6  ;;  %9715 = vpow2.f32 %v8317_v24  ;;  %vm3125_vm7 = vweird.f32 %v9712_v44  ;;  %vm3111_vm14 = vmor %vm3109_vm13, %vm3110_vm9 }
 0x5d7   :  { %v3032_v62 = vpop.f32.mrf.mxu1  ;;  %v3106_v18 = vsub.f32 1.0, %v3105_v51  ;;  %9717 = vrcp.f32 %v11456_v6  ;;  %v3115_v24 = vand.u32 2147483648, %v11446_v23  ;;  %vm11472_vm12 = vmor %vm3124_vm10, %vm3125_vm7  ;;  %vm3139_vm13 = vweird.f32 %v11456_v6 }
 0x5d8   :  { %v3121_v36 = vsub.f32 1.0, %v3120_v46  ;;  %v3090_v57 = vadd.f32 %v3082_v2, %v13741_v37  ;;  %v13742_v46 = vld [vmem:[#allocation29_spill] sm:$0xff] }
 0x5d9   :  { %v3107_v30 = vmul.f32 %v9710_v40, %v3106_v18  ;;  %v3075_v35 = vadd.f32 %v3067_v16, %v13742_v46 }
 0x5da   :  { %v8318_v14 = vmul.f32 -1.442695, %v3090_v57  ;;  %v3122_v49 = vmul.f32 %v9712_v44, %v3121_v36 }
 0x5db   :  { %v9714_v7 = vpop.eup %9713  ;;  %v3108_v28 = vadd.f32 %v9710_v40, %v3107_v30  ;;  %v3113_v30 = vand.u32 2147483647, %v11446_v23 }
 0x5dc   :  { %9719 = vpow2.f32 %v8318_v14  ;;  %v9716_v62 = vpop.eup %9715  ;;  %v11460_v42 = vadd.f32 1.0, %v9714_v7  ;;  %v3123_v36 = vadd.f32 %v9712_v44, %v3122_v49  ;;  %v3083_v7 = vrot.slane %v3056_v26, 6 }
 0x5dd   :  { %v3045_v48 = vpop.f32.mrf.mxu2  ;;  %v11464_v51 = vadd.f32 1.0, %v9716_v62  ;;  %v11470_v57 = vpop.eup %9717  ;;  %v3128_v49 = vand.u32 2147483647, %v11448_v22  ;;  %v3112_v18 = vsel %vm3111_vm14, %v9710_v40, %v3108_v28  ;;  %v13745_v62 = vld [vmem:[#allocation35_spill] sm:$0xff]  ;;  %vm3114_vm15 = vcmp.eq.f32.partialorder %v3113_v30, 8.507059e+37 }
 0x5de   :  { %v3058_v9 = vpop.f32.mrf.mxu3  ;;  %9721 = vrcp.f32 %v11460_v42  ;;  %v3130_v48 = vand.u32 2147483648, %v11448_v22  ;;  %v3127_v16 = vsel %vm11472_vm12, %v9712_v44, %v3123_v36  ;;  %v3091_v37 = vadd.f32 %v3083_v7, %v13745_v62 }
 0x5df   :  { %9723 = vrcp.f32 %v11464_v51  ;;  %v3116_v9 = vor.u32 1.1754944e-38, %v3115_v24  ;;  %v3135_v17 = vmul.f32 %v11470_v57, %v11456_v6  ;;  %vm3129_vm1 = vcmp.eq.f32.partialorder %v3128_v49, 8.507059e+37 }
 0x5e0   :  { %9725 = vtanh.f32 %v3075_v35  ;;  %v3131_v14 = vor.u32 1.1754944e-38, %v3130_v48  ;;  %v3151_v44 = vrot.slane %v11356_v10, 6  ;;  %v3196_v30 = vand.u32 2147483648, %v11464_v51 }
 0x5e1   :  { %v3117_v22 = vsel %vm3114_vm15, %v3116_v9, %v3112_v18  ;;  %v3136_v48 = vsub.f32 1.0, %v3135_v17  ;;  %v3181_v18 = vand.u32 2147483648, %v11460_v42  ;;  %v3179_v10 = vand.u32 2147483647, %v11460_v42 }
 0x5e2   :  { %v9720_v2 = vpop.eup %9719  ;;  %v3132_v40 = vsel %vm3129_vm1, %v3131_v14, %v3127_v16  ;;  %v3194_v9 = vand.u32 2147483647, %v11464_v51  ;;  %vm3175_vm4 = vweird.f32 %v11460_v42  ;;  %vm3190_vm5 = vweird.f32 %v11464_v51 }
 0x5e3   :  { %v11481_v26 = vadd.f32 1.0, %v9720_v2  ;;  %v3153_v7 = vmul.f32 %v3151_v44, %v3132_v40  ;;  %vm3180_vm9 = vcmp.eq.f32.partialorder %v3179_v10, 8.507059e+37  ;;  %vm3140_vm12 = vweird.f32 %v11470_v57 }
 0x5e4   :  { %v9722_v46 = vpop.eup %9721  ;;  %vm3195_vm10 = vcmp.eq.f32.partialorder %v3194_v9, 8.507059e+37  ;;  %vm3141_vm15 = vmor %vm3139_vm13, %vm3140_vm12 }
 0x5e5   :  { %9727 = vrcp.f32 %v11481_v26  ;;  %v9724_v23 = vpop.eup %9723  ;;  %v3171_v35 = vmul.f32 %v9722_v46, %v11460_v42  ;;  %vm3176_vm2 = vweird.f32 %v9722_v46  ;;  %vm3205_vm1 = vweird.f32 %v11481_v26 }
 0x5e6   :  { %v3186_v28 = vmul.f32 %v9724_v23, %v11464_v51  ;;  %v9726_v24 = vpop.eup %9725  ;;  %9729 = vtanh.f32 %v3091_v37  ;;  %vm3191_vm3 = vweird.f32 %v9724_v23  ;;  %vm3177_vm6 = vmor %vm3175_vm4, %vm3176_vm2 }
 0x5e7   :  { %v3172_v36 = vsub.f32 1.0, %v3171_v35  ;;  %v3154_v29 = vmul.f32 %v9726_v24, %v3117_v22  ;;  %v3217_v35 = vrot.slane %v11359_v5, 2  ;;  %vm3192_vm7 = vmor %vm3190_vm5, %vm3191_vm3  ;;  %v3197_v24 = vor.u32 1.1754944e-38, %v3196_v30 }
 0x5e8   :  { %v3187_v2 = vsub.f32 1.0, %v3186_v28  ;;  %v3137_v28 = vmul.f32 %v11470_v57, %v3136_v48  ;;  %v3145_v48 = vand.u32 2147483648, %v11456_v6 }
 0x5e9   :  { %v3173_v49 = vmul.f32 %v9722_v46, %v3172_v36  ;;  %v11497_v37 = vadd.f32 %v3154_v29, %v3153_v7 }
 0x5ea   :  { %v3188_v14 = vmul.f32 %v9724_v23, %v3187_v2  ;;  %v3182_v2 = vor.u32 1.1754944e-38, %v3181_v18  ;;  %v3146_v9 = vor.u32 1.1754944e-38, %v3145_v48 }
 0x5eb   :  { %v9728_v16 = vpop.eup %9727  ;;  %v3174_v22 = vadd.f32 %v9722_v46, %v3173_v49  ;;  %9731 = vtanh.f32 %v11497_v37  ;;  %v3138_v49 = vadd.f32 %v11470_v57, %v3137_v28 }
 0x5ec   :  { %v3201_v17 = vmul.f32 %v9728_v16, %v11481_v26  ;;  %v3189_v40 = vadd.f32 %v9724_v23, %v3188_v14  ;;  %v9730_v44 = vpop.eup %9729  ;;  %vm3206_vm14 = vweird.f32 %v9728_v16  ;;  %v3209_v14 = vand.u32 2147483647, %v11481_v26 }
 0x5ed   :  { %v3178_v62 = vsel %vm3177_vm6, %v9722_v46, %v3174_v22  ;;  %v3143_v46 = vand.u32 2147483647, %v11456_v6  ;;  %v3142_v18 = vsel %vm3141_vm15, %v11470_v57, %v3138_v49  ;;  %vm3207_vm2 = vmor %vm3205_vm1, %vm3206_vm14 }
 0x5ee   :  { %v3202_v36 = vsub.f32 1.0, %v3201_v17  ;;  %v3193_v5 = vsel %vm3192_vm7, %v9724_v23, %v3189_v40  ;;  %v3183_v42 = vsel %vm3180_vm9, %v3182_v2, %v3178_v62  ;;  %v3211_v62 = vand.u32 2147483648, %v11481_v26  ;;  %v13777_v2 = vld [vmem:[#allocation25_spill] sm:$0xff] }
 0x5ef   :  { %v3198_v7 = vsel %vm3195_vm10, %v3197_v24, %v3193_v5  ;;  %v3220_v29 = vmul.f32 %v9730_v44, %v3183_v42  ;;  %vm3144_vm3 = vcmp.eq.f32.partialorder %v3143_v46, 8.507059e+37  ;;  %vm3210_vm4 = vcmp.eq.f32.partialorder %v3209_v14, 8.507059e+37 }
 0x5f0   :  { %v3203_v56 = vmul.f32 %v9728_v16, %v3202_v36  ;;  %v3219_v51 = vmul.f32 %v3217_v35, %v3198_v7  ;;  %v3147_v17 = vsel %vm3144_vm3, %v3146_v9, %v3142_v18  ;;  %v3212_v6 = vor.u32 1.1754944e-38, %v3211_v62 }
 0x5f1   :  { %v9732_v10 = vpop.eup %9731 }
 0x5f2   :  { %v11505_v30 = vadd.f32 %v3220_v29, %v3219_v51  ;;  %v3204_v23 = vadd.f32 %v9728_v16, %v3203_v56  ;;  %v11514_v56 = vmul.f32 %v9732_v10, %v3147_v17 }
 0x5f4   :  { %9733 = vtanh.f32 %v11505_v30  ;;  %v3208_v35 = vsel %vm3207_vm2, %v9728_v16, %v3204_v23  ;;  %v3225_v57 = vrot.slane %v11514_v56, 2  ;;  %v13776_v16 = vld [vmem:[#allocation24_spill] sm:$0xff] }
 0x5f5   :  { %v3213_v40 = vsel %vm3210_vm4, %v3212_v6, %v3208_v35  ;;  %v13778_v23 = vld [vmem:[#allocation28_spill] sm:$0xff] }
 0x5fa   :  { %v9734_v22 = vpop.eup %9733 }
 0x5fb   :  { %v11516_v44 = vmul.f32 %v9734_v22, %v3213_v40 }
 0x5fd   :  { %v3228_v28 = vrot.slane %v11516_v44, 2 }
 0x5ff   :  { %v3230_v26 = vsel %vm1879_vm8, %v3225_v57, %v3228_v28  ;;  %v13779_v28 = vld [vmem:[#allocation30_spill] sm:$0xff] }
 0x600   :  { %v3231_v24 = vpack.c.bf16 %v3230_v26, %v3230_v26 }
 0x602   :  { %3240 = vmatmul.bf16.vlgmr.msra.gmra.mxu0 %v3231_v24  ;;  %3253 = vmatmul.bf16.vlgmr.msra.gmra.mxu1 %v3231_v24 }
 0x603   :  { %3266 = vmatmul.bf16.vlgmr.msra.gmra.mxu2 %v3231_v24  ;;  %3279 = vmatmul.bf16.vlgmr.msra.gmra.mxu3 %v3231_v24 }
 0x604   :  { %3493 = vmatpush.bf16.msra.mxu0 %v10497_v27  ;;  %3506 = vmatpush.bf16.msra.mxu1 %v10499_v32  ;;  %v13746_v27 = vld [vmem:[#allocation41_spill] sm:$0xff]  ;;  %v13747_v32 = vld [vmem:[#allocation43_spill] sm:$0xff] }
 0x605   :  { %3519 = vmatpush.bf16.msra.mxu2 %v10501_v33  ;;  %3532 = vmatpush.bf16.msra.mxu3 %v10512_v50  ;;  %v13748_v33 = vld [vmem:[#allocation44_spill] sm:$0xff] }
 0x606   :  { %v13752_v50 = vld [vmem:[#allocation48_spill] sm:$0xff] }
 0x608   :  { %3494 = vmatpush.bf16.msra.mxu0 %v10504_v38  ;;  %3507 = vmatpush.bf16.msra.mxu1 %v10508_v43  ;;  %v13749_v38 = vld [vmem:[#allocation45_spill] sm:$0xff]  ;;  %v13750_v43 = vld [vmem:[#allocation46_spill] sm:$0xff] }
 0x609   :  { %3520 = vmatpush.bf16.msra.mxu2 %v10510_v45  ;;  %3533 = vmatpush.bf16.msra.mxu3 %v10524_v3  ;;  %v13751_v45 = vld [vmem:[#allocation47_spill] sm:$0xff]  ;;  %v13756_v3 = vld [vmem:[#allocation52_spill] sm:$0xff] }
 0x60c   :  { %3495 = vmatpush.bf16.msra.mxu0 %v10516_v59  ;;  %3508 = vmatpush.bf16.msra.mxu1 %v10520_v0  ;;  %v13753_v59 = vld [vmem:[#allocation49_spill] sm:$0xff]  ;;  %v13754_v0 = vld [vmem:[#allocation50_spill] sm:$0xff] }
 0x60d   :  { %3521 = vmatpush.bf16.msra.mxu2 %v10522_v1  ;;  %3534 = vmatpush.bf16.msra.mxu3 %v10530_v15  ;;  %v13755_v1 = vld [vmem:[#allocation51_spill] sm:$0xff]  ;;  %v13758_v15 = vld [vmem:[#allocation54_spill] sm:$0xff] }
 0x610   :  { %3496 = vmatpush.bf16.msra.mxu0 %v10528_v12  ;;  %3509 = vmatpush.bf16.msra.mxu1 %v10534_v19  ;;  %v13757_v12 = vld [vmem:[#allocation53_spill] sm:$0xff]  ;;  %v13759_v19 = vld [vmem:[#allocation55_spill] sm:$0xff] }
 0x611   :  { %3522 = vmatpush.bf16.msra.mxu2 %v10536_v20  ;;  %3535 = vmatpush.bf16.msra.mxu3 %v10542_v34  ;;  %v13760_v20 = vld [vmem:[#allocation56_spill] sm:$0xff]  ;;  %v13762_v34 = vld [vmem:[#allocation58_spill] sm:$0xff] }
 0x612   :  { %3292 = vmatmul.bf16.vlgmr.msrb.gmra.mxu0 %v3231_v24  ;;  %3305 = vmatmul.bf16.vlgmr.msrb.gmra.mxu1 %v3231_v24 }
 0x613   :  { %3318 = vmatmul.bf16.vlgmr.msrb.gmra.mxu2 %v3231_v24  ;;  %3331 = vmatmul.bf16.vlgmr.msrb.gmra.mxu3 %v3231_v24  ;;  %v13780_v24 = vld [vmem:[#allocation31_spill] sm:$0xff] }
 0x614   :  { %3497 = vmatpush.bf16.msra.mxu0 %v10540_v31  ;;  %3510 = vmatpush.bf16.msra.mxu1 %v10546_v39  ;;  %v13761_v31 = vld [vmem:[#allocation57_spill] sm:$0xff]  ;;  %v13763_v39 = vld [vmem:[#allocation59_spill] sm:$0xff] }
 0x615   :  { %3523 = vmatpush.bf16.msra.mxu2 %v10548_v41  ;;  %3536 = vmatpush.bf16.msra.mxu3 %v10554_v55  ;;  %v13764_v41 = vld [vmem:[#allocation60_spill] sm:$0xff]  ;;  %v13766_v55 = vld [vmem:[#allocation62_spill] sm:$0xff] }
 0x618   :  { %3498 = vmatpush.bf16.msra.mxu0 %v10552_v53  ;;  %3511 = vmatpush.bf16.msra.mxu1 %v10558_v60  ;;  %v13765_v53 = vld [vmem:[#allocation61_spill] sm:$0xff]  ;;  %v13767_v60 = vld [vmem:[#allocation63_spill] sm:$0xff] }
 0x619   :  { %3524 = vmatpush.bf16.msra.mxu2 %v10560_v61  ;;  %3537 = vmatpush.bf16.msra.mxu3 %v10566_v13  ;;  %v13768_v61 = vld [vmem:[#allocation64_spill] sm:$0xff]  ;;  %v13770_v13 = vld [vmem:[#allocation66_spill] sm:$0xff] }
 0x61c   :  { %3499 = vmatpush.bf16.msra.mxu0 %v10564_v11  ;;  %3512 = vmatpush.bf16.msra.mxu1 %v10570_v25  ;;  %v13769_v11 = vld [vmem:[#allocation65_spill] sm:$0xff]  ;;  %v13771_v25 = vld [vmem:[#allocation67_spill] sm:$0xff] }
 0x61d   :  { %3525 = vmatpush.bf16.msra.mxu2 %v10572_v8  ;;  %3538 = vmatpush.bf16.msra.mxu3 %v10578_v63  ;;  %v13772_v8 = vld [vmem:[#allocation68_spill] sm:$0xff]  ;;  %v13774_v63 = vld [vmem:[#allocation70_spill] sm:$0xff] }
 0x620   :  { %3500 = vmatpush.bf16.msra.mxu0 %v10576_v52  ;;  %3513 = vmatpush.bf16.msra.mxu1 %v10582_v4  ;;  %v13773_v52 = vld [vmem:[#allocation69_spill] sm:$0xff]  ;;  %v13775_v4 = vld [vmem:[#allocation71_spill] sm:$0xff] }
 0x621   :  { %3526 = vmatpush.bf16.msra.mxu2 %v13655_v54  ;;  %3539 = vmatpush.bf16.msra.mxu3 %v13703_v47 }
 0x624   :  { %3545 = vmatpush.bf16.msrb.mxu0 %v13704_v58  ;;  %3558 = vmatpush.bf16.msrb.mxu1 %v13705_v21 }
 0x625   :  { %3571 = vmatpush.bf16.msrb.mxu2 %v13746_v27  ;;  %3584 = vmatpush.bf16.msrb.mxu3 %v13747_v32 }
 0x628   :  { %3546 = vmatpush.bf16.msrb.mxu0 %v13748_v33  ;;  %3559 = vmatpush.bf16.msrb.mxu1 %v13749_v38  ;;  %v13781_v33 = vld [vmem:[#allocation29_spill] sm:$0xff] }
 0x629   :  { %3572 = vmatpush.bf16.msrb.mxu2 %v13750_v43  ;;  %3585 = vmatpush.bf16.msrb.mxu3 %v13751_v45 }
 0x62c   :  { %3547 = vmatpush.bf16.msrb.mxu0 %v13752_v50  ;;  %3560 = vmatpush.bf16.msrb.mxu1 %v13753_v59 }
 0x62d   :  { %3573 = vmatpush.bf16.msrb.mxu2 %v13754_v0  ;;  %3586 = vmatpush.bf16.msrb.mxu3 %v13755_v1 }
 0x630   :  { %3548 = vmatpush.bf16.msrb.mxu0 %v13756_v3  ;;  %3561 = vmatpush.bf16.msrb.mxu1 %v13757_v12 }
 0x631   :  { %3574 = vmatpush.bf16.msrb.mxu2 %v13758_v15  ;;  %3587 = vmatpush.bf16.msrb.mxu3 %v13759_v19 }
 0x634   :  { %3549 = vmatpush.bf16.msrb.mxu0 %v13760_v20  ;;  %3562 = vmatpush.bf16.msrb.mxu1 %v13761_v31 }
 0x635   :  { %3575 = vmatpush.bf16.msrb.mxu2 %v13762_v34  ;;  %3588 = vmatpush.bf16.msrb.mxu3 %v13763_v39  ;;  %v13782_v34 = vld [vmem:[#allocation34_spill] sm:$0xff] }
 0x638   :  { %3550 = vmatpush.bf16.msrb.mxu0 %v13764_v41  ;;  %3563 = vmatpush.bf16.msrb.mxu1 %v13765_v53 }
 0x639   :  { %3576 = vmatpush.bf16.msrb.mxu2 %v13766_v55  ;;  %3589 = vmatpush.bf16.msrb.mxu3 %v13767_v60 }
 0x63c   :  { %3551 = vmatpush.bf16.msrb.mxu0 %v13768_v61  ;;  %3564 = vmatpush.bf16.msrb.mxu1 %v13769_v11 }
 0x63d   :  { %3577 = vmatpush.bf16.msrb.mxu2 %v13770_v13  ;;  %3590 = vmatpush.bf16.msrb.mxu3 %v13771_v25 }
 0x640   :  { %3552 = vmatpush.bf16.msrb.mxu0 %v13772_v8  ;;  %3565 = vmatpush.bf16.msrb.mxu1 %v13773_v52  ;;  %v3415_v8 = vrot.slane %v11497_v37, 6 }
 0x641   :  { %3578 = vmatpush.bf16.msrb.mxu2 %v13774_v63  ;;  %3591 = vmatpush.bf16.msrb.mxu3 %v13775_v4 }
 0x67f   :  { %v3241_v54 = vpop.f32.mrf.mxu0  ;;  %v3254_v47 = vpop.f32.mrf.mxu1 }
 0x680   :  { %v3340_v58 = vrot.slane %v3241_v54, 4  ;;  %v3341_v21 = vrot.slane %v3254_v47, 4 }
 0x682   :  { %v3348_v36 = vadd.f32 %v3340_v58, %v13776_v16  ;;  %v3349_v5 = vadd.f32 %v3341_v21, %v13777_v2 }
 0x684   :  { %v8319_v42 = vmul.f32 -1.442695, %v3348_v36  ;;  %v8320_v7 = vmul.f32 -1.442695, %v3349_v5 }
 0x686   :  { %9735 = vpow2.f32 %v8319_v42  ;;  %v3267_v51 = vpop.f32.mrf.mxu2  ;;  %v3280_v29 = vpop.f32.mrf.mxu3 }
 0x687   :  { %9737 = vpow2.f32 %v8320_v7  ;;  %v3342_v49 = vrot.slane %v3267_v51, 4  ;;  %v3243_v48 = vpop.f32.mrf.mxu0  ;;  %v3256_v46 = vpop.f32.mrf.mxu1  ;;  %v3343_v22 = vrot.slane %v3280_v29, 4 }
 0x689   :  { %v3350_v62 = vadd.f32 %v3342_v49, %v13778_v23  ;;  %v3351_v38 = vadd.f32 %v3343_v22, %v13781_v33 }
 0x68b   :  { %v8321_v18 = vmul.f32 -1.442695, %v3350_v62 }
 0x68c   :  { %v9736_v14 = vpop.eup %9735 }
 0x68d   :  { %v9738_v10 = vpop.eup %9737  ;;  %v3365_v9 = vadd.f32 1.0, %v9736_v14  ;;  %9739 = vpow2.f32 %v8321_v18 }
 0x68e   :  { %v3366_v35 = vadd.f32 1.0, %v9738_v10  ;;  %v3269_v17 = vpop.f32.mrf.mxu2  ;;  %v3282_v6 = vpop.f32.mrf.mxu3 }
 0x68f   :  { %9741 = vrcp.f32 %v3365_v9  ;;  %v3293_v40 = vpop.f32.mrf.mxu0  ;;  %v3306_v57 = vpop.f32.mrf.mxu1  ;;  %v3377_v55 = vand.u32 2147483647, %v3365_v9  ;;  %v3379_v60 = vand.u32 2147483648, %v3365_v9  ;;  %vm3373_vm7 = vweird.f32 %v3365_v9 }
 0x690   :  { %9743 = vrcp.f32 %v3366_v35  ;;  %v3352_v26 = vadd.f32 %v3293_v40, %v13779_v28  ;;  %v3353_v27 = vadd.f32 %v3306_v57, %v13780_v24  ;;  %v3394_v53 = vand.u32 2147483648, %v3366_v35 }
 0x691   :  { %v3392_v11 = vand.u32 2147483647, %v3366_v35  ;;  %vm3388_vm9 = vweird.f32 %v3366_v35  ;;  %vm3378_vm12 = vcmp.eq.f32.partialorder %v3377_v55, 8.507059e+37  ;;  %v3380_v21 = vor.u32 1.1754944e-38, %v3379_v60 }
 0x692   :  { %v8322_v43 = vmul.f32 -1.442695, %v3352_v26  ;;  %v8323_v50 = vmul.f32 -1.442695, %v3353_v27  ;;  %v3395_v37 = vor.u32 1.1754944e-38, %v3394_v53  ;;  %v13783_v26 = vld [vmem:[#allocation35_spill] sm:$0xff] }
 0x693   :  { %v9740_v32 = vpop.eup %9739  ;;  %vm3393_vm14 = vcmp.eq.f32.partialorder %v3392_v11, 8.507059e+37 }
 0x694   :  { %v11591_v45 = vadd.f32 1.0, %v9740_v32  ;;  %9745 = vpow2.f32 %v8322_v43 }
 0x695   :  { %v9742_v59 = vpop.eup %9741 }
 0x696   :  { %v9744_v0 = vpop.eup %9743  ;;  %v3369_v1 = vmul.f32 %v9742_v59, %v3365_v9  ;;  %9747 = vrcp.f32 %v11591_v45  ;;  %v3319_v3 = vpop.f32.mrf.mxu2  ;;  %vm3374_vm5 = vweird.f32 %v9742_v59  ;;  %v3409_v40 = vand.u32 2147483648, %v11591_v45 }
 0x697   :  { %v3332_v12 = vpop.f32.mrf.mxu3  ;;  %v3384_v15 = vmul.f32 %v9744_v0, %v3366_v35  ;;  %9749 = vtanh.f32 %v3351_v38  ;;  %v3295_v19 = vpop.f32.mrf.mxu0  ;;  %v3354_v39 = vadd.f32 %v3319_v3, %v13782_v34  ;;  %vm3389_vm6 = vweird.f32 %v9744_v0  ;;  %vm3375_vm10 = vmor %vm3373_vm7, %vm3374_vm5 }
 0x698   :  { %v3308_v20 = vpop.f32.mrf.mxu1  ;;  %v3370_v31 = vsub.f32 1.0, %v3369_v1  ;;  %9751 = vpow2.f32 %v8323_v50  ;;  %vm3390_vm13 = vmor %vm3388_vm9, %vm3389_vm6  ;;  %v3355_v27 = vadd.f32 %v3332_v12, %v13783_v26  ;;  %vm3403_vm1 = vweird.f32 %v11591_v45 }
 0x699   :  { %v3385_v41 = vsub.f32 1.0, %v3384_v15  ;;  %v8324_v13 = vmul.f32 -1.442695, %v3354_v39  ;;  %v3407_v32 = vand.u32 2147483647, %v11591_v45 }
 0x69a   :  { %v3371_v61 = vmul.f32 %v9742_v59, %v3370_v31  ;;  %v9746_v25 = vpop.eup %9745 }
 0x69b   :  { %v3386_v52 = vmul.f32 %v9744_v0, %v3385_v41  ;;  %v11596_v54 = vadd.f32 1.0, %v9746_v25  ;;  %9753 = vpow2.f32 %v8324_v13  ;;  %vm3408_vm4 = vcmp.eq.f32.partialorder %v3407_v32, 8.507059e+37 }
 0x69c   :  { %v9748_v63 = vpop.eup %9747  ;;  %v3372_v4 = vadd.f32 %v9742_v59, %v3371_v61  ;;  %v13784_v61 = vld [vmem:[#allocation26_spill] sm:$0xff] }
 0x69d   :  { %v9750_v47 = vpop.eup %9749  ;;  %v3399_v58 = vmul.f32 %v9748_v63, %v11591_v45  ;;  %v3387_v36 = vadd.f32 %v9744_v0, %v3386_v52  ;;  %9755 = vrcp.f32 %v11596_v54  ;;  %vm3404_vm15 = vweird.f32 %v9748_v63 }
 0x69e   :  { %v9752_v5 = vpop.eup %9751  ;;  %v3376_v42 = vsel %vm3375_vm10, %v9742_v59, %v3372_v4  ;;  %v3321_v7 = vpop.f32.mrf.mxu2  ;;  %vm3405_vm2 = vmor %vm3403_vm1, %vm3404_vm15  ;;  %v3445_v50 = vand.u32 2147483648, %v11596_v54  ;;  %v3443_v15 = vand.u32 2147483647, %v11596_v54  ;;  %vm3439_vm5 = vweird.f32 %v11596_v54 }
 0x69f   :  { %v3334_v51 = vpop.f32.mrf.mxu3  ;;  %v3400_v29 = vsub.f32 1.0, %v3399_v58  ;;  %v3381_v49 = vsel %vm3378_vm12, %v3380_v21, %v3376_v42  ;;  %v3391_v48 = vsel %vm3390_vm13, %v9744_v0, %v3387_v36  ;;  %v3432_v46 = vadd.f32 1.0, %v9752_v5 }
 0x6a0   :  { %v3396_v62 = vsel %vm3393_vm14, %v3395_v37, %v3391_v48  ;;  %v3418_v18 = vmul.f32 %v9750_v47, %v3381_v49  ;;  %v3410_v0 = vor.u32 1.1754944e-38, %v3409_v40  ;;  %v3446_v39 = vor.u32 1.1754944e-38, %v3445_v50 }
 0x6a1   :  { %v3401_v14 = vmul.f32 %v9748_v63, %v3400_v29  ;;  %v3417_v10 = vmul.f32 %v3415_v8, %v3396_v62  ;;  %9757 = vrcp.f32 %v3432_v46  ;;  %v9754_v9 = vpop.eup %9753  ;;  %v3460_v20 = vand.u32 2147483648, %v3432_v46 }
 0x6a2   :  { %v11603_v17 = vadd.f32 1.0, %v9754_v9  ;;  %v3458_v60 = vand.u32 2147483647, %v3432_v46  ;;  %v3769_v11 = vsel %vm1879_vm8, %v13784_v61, %v11514_v56  ;;  %vm3444_vm9 = vcmp.eq.f32.partialorder %v3443_v15, 8.507059e+37 }
 0x6a3   :  { %v11601_v35 = vadd.f32 %v3418_v18, %v3417_v10  ;;  %v9756_v6 = vpop.eup %9755  ;;  %v3402_v22 = vadd.f32 %v9748_v63, %v3401_v14  ;;  %vm3454_vm10 = vweird.f32 %v3432_v46  ;;  %v3481_v58 = vrot.slane %v11505_v30, 2 }
 0x6a4   :  { %v3435_v57 = vmul.f32 %v9756_v6, %v11596_v54  ;;  %vm3440_vm3 = vweird.f32 %v9756_v6  ;;  %v3461_v54 = vor.u32 1.1754944e-38, %v3460_v20  ;;  %vm3459_vm13 = vcmp.eq.f32.partialorder %v3458_v60, 8.507059e+37 }
 0x6a5   :  { %9759 = vtanh.f32 %v11601_v35  ;;  %v3406_v59 = vsel %vm3405_vm2, %v9748_v63, %v3402_v22  ;;  %vm3441_vm7 = vmor %vm3439_vm5, %vm3440_vm3  ;;  %v3475_v51 = vand.u32 2147483648, %v11603_v17  ;;  %vm3469_vm15 = vweird.f32 %v11603_v17 }
 0x6a6   :  { %9761 = vrcp.f32 %v11603_v17  ;;  %v3436_v43 = vsub.f32 1.0, %v3435_v57  ;;  %v3411_v19 = vsel %vm3408_vm4, %v3410_v0, %v3406_v59  ;;  %v3473_v29 = vand.u32 2147483647, %v11603_v17 }
 0x6a7   :  { %v9758_v38 = vpop.eup %9757  ;;  %9763 = vtanh.f32 %v3355_v27  ;;  %v3476_v49 = vor.u32 1.1754944e-38, %v3475_v51 }
 0x6a8   :  { %v3450_v1 = vmul.f32 %v9758_v38, %v3432_v46  ;;  %v3437_v3 = vmul.f32 %v9756_v6, %v3436_v43  ;;  %vm3455_vm6 = vweird.f32 %v9758_v38  ;;  %vm3474_vm2 = vcmp.eq.f32.partialorder %v3473_v29, 8.507059e+37 }
 0x6a9   :  { %vm3456_vm12 = vmor %vm3454_vm10, %vm3455_vm6 }
 0x6aa   :  { %v3451_v12 = vsub.f32 1.0, %v3450_v1  ;;  %v3438_v31 = vadd.f32 %v9756_v6, %v3437_v3 }
 0x6ab   :  { %v9760_v45 = vpop.eup %9759 }
 0x6ac   :  { %v9762_v41 = vpop.eup %9761  ;;  %v3421_v53 = vmul.f32 %v9760_v45, %v3411_v19  ;;  %v3452_v55 = vmul.f32 %v9758_v38, %v3451_v12  ;;  %v3442_v25 = vsel %vm3441_vm7, %v9756_v6, %v3438_v31 }
 0x6ad   :  { %v3465_v13 = vmul.f32 %v9762_v41, %v11603_v17  ;;  %v3447_v52 = vsel %vm3444_vm9, %v3446_v39, %v3442_v25  ;;  %v9764_v4 = vpop.eup %9763  ;;  %vm3470_vm14 = vweird.f32 %v9762_v41 }
 0x6ae   :  { %v11621_v8 = vsel %vm3763_vm0, %v3769_v11, %v3421_v53  ;;  %v3453_v63 = vadd.f32 %v9758_v38, %v3452_v55  ;;  %v3484_v36 = vmul.f32 %v9764_v4, %v3447_v52  ;;  %vm3471_vm1 = vmor %vm3469_vm15, %vm3470_vm14  ;;  %v3489_v62 = vrot.slane %v3421_v53, 4 }
 0x6af   :  { %v3466_v47 = vsub.f32 1.0, %v3465_v13 }
 0x6b0   :  { %v3457_v21 = vsel %vm3456_vm12, %v9758_v38, %v3453_v63 }
 0x6b1   :  { %v3467_v56 = vmul.f32 %v9762_v41, %v3466_v47  ;;  %v3462_v5 = vsel %vm3459_vm13, %v3461_v54, %v3457_v21 }
 0x6b2   :  { %v3483_v37 = vmul.f32 %v3481_v58, %v3462_v5 }
 0x6b3   :  { %v3468_v7 = vadd.f32 %v9762_v41, %v3467_v56 }
 0x6b4   :  { %v11624_v42 = vadd.f32 %v3484_v36, %v3483_v37 }
 0x6b5   :  { %v3472_v30 = vsel %vm3471_vm1, %v9762_v41, %v3468_v7 }
 0x6b6   :  { %9765 = vtanh.f32 %v11624_v42  ;;  %v3477_v46 = vsel %vm3474_vm2, %v3476_v49, %v3472_v30  ;;  %v3688_v30 = vrot.slane %v11601_v35, 6 }
 0x6bc   :  { %v9766_v48 = vpop.eup %9765 }
 0x6bd   :  { %v11630_v18 = vmul.f32 %v9766_v48, %v3477_v46 }
 0x6bf   :  { %v3491_v14 = vsel %vm1879_vm8, %v3489_v62, %v11630_v18 }
 0x6c0   :  { %v3492_v10 = vpack.c.bf16 %v3491_v14, %v3491_v14 }
 0x6c2   :  { %3501 = vmatmul.bf16.vlgmr.msra.gmra.mxu0 %v3492_v10  ;;  %3514 = vmatmul.bf16.vlgmr.msra.gmra.mxu1 %v3492_v10 }
 0x6c3   :  { %3527 = vmatmul.bf16.vlgmr.msra.gmra.mxu2 %v3492_v10  ;;  %3540 = vmatmul.bf16.vlgmr.msra.gmra.mxu3 %v3492_v10 }
 0x6d2   :  { %3553 = vmatmul.bf16.vlgmr.msrb.gmra.mxu0 %v3492_v10  ;;  %3566 = vmatmul.bf16.vlgmr.msrb.gmra.mxu1 %v3492_v10 }
 0x6d3   :  { %3579 = vmatmul.bf16.vlgmr.msrb.gmra.mxu2 %v3492_v10  ;;  %3592 = vmatmul.bf16.vlgmr.msrb.gmra.mxu3 %v3492_v10 }
 0x73f   :  { %v3502_v9 = vpop.f32.mrf.mxu0  ;;  %v3515_v17 = vpop.f32.mrf.mxu1 }
 0x740   :  { %v3601_v6 = vrot.slane %v3502_v9, 2  ;;  %v3602_v22 = vrot.slane %v3515_v17, 2 }
 0x742   :  { %v3609_v40 = vadd.f32 %v3601_v6, %v13776_v16  ;;  %v3610_v57 = vadd.f32 %v3602_v22, %v13777_v2 }
 0x744   :  { %v8325_v27 = vmul.f32 -1.442695, %v3609_v40  ;;  %v8326_v32 = vmul.f32 -1.442695, %v3610_v57 }
 0x746   :  { %9767 = vpow2.f32 %v8325_v27  ;;  %v3528_v38 = vpop.f32.mrf.mxu2  ;;  %v3541_v43 = vpop.f32.mrf.mxu3 }
 0x747   :  { %9769 = vpow2.f32 %v8326_v32  ;;  %v3603_v50 = vrot.slane %v3528_v38, 2  ;;  %v3504_v59 = vpop.f32.mrf.mxu0  ;;  %v3517_v0 = vpop.f32.mrf.mxu1  ;;  %v3604_v2 = vrot.slane %v3541_v43, 2 }
 0x749   :  { %v3611_v1 = vadd.f32 %v3603_v50, %v13778_v23  ;;  %v3612_v60 = vadd.f32 %v3604_v2, %v13781_v33 }
 0x74b   :  { %v8327_v3 = vmul.f32 -1.442695, %v3611_v1 }
 0x74c   :  { %v9768_v15 = vpop.eup %9767 }
 0x74d   :  { %v9770_v12 = vpop.eup %9769  ;;  %v3638_v45 = vadd.f32 1.0, %v9768_v15  ;;  %9771 = vpow2.f32 %v8327_v3 }
 0x74e   :  { %v3639_v19 = vadd.f32 1.0, %v9770_v12  ;;  %v3530_v16 = vpop.f32.mrf.mxu2  ;;  %v3543_v20 = vpop.f32.mrf.mxu3 }
 0x74f   :  { %9773 = vrcp.f32 %v3638_v45  ;;  %v3554_v31 = vpop.f32.mrf.mxu0  ;;  %v3567_v39 = vpop.f32.mrf.mxu1  ;;  %v3650_v56 = vand.u32 2147483647, %v3638_v45  ;;  %v3652_v37 = vand.u32 2147483648, %v3638_v45  ;;  %vm3646_vm6 = vweird.f32 %v3638_v45 }
 0x750   :  { %9775 = vrcp.f32 %v3639_v19  ;;  %v3617_v41 = vrot.slane %v3554_v31, 2  ;;  %v3618_v53 = vrot.slane %v3567_v39, 2  ;;  %v3667_v5 = vand.u32 2147483648, %v3639_v19 }
 0x751   :  { %v3665_v51 = vand.u32 2147483647, %v3639_v19  ;;  %vm3661_vm5 = vweird.f32 %v3639_v19  ;;  %vm3651_vm9 = vcmp.eq.f32.partialorder %v3650_v56, 8.507059e+37  ;;  %v3653_v9 = vor.u32 1.1754944e-38, %v3652_v37 }
 0x752   :  { %v3625_v23 = vadd.f32 %v3617_v41, %v13779_v28  ;;  %v3626_v61 = vadd.f32 %v3618_v53, %v13780_v24  ;;  %v3668_v22 = vor.u32 1.1754944e-38, %v3667_v5 }
 0x753   :  { %v9772_v55 = vpop.eup %9771  ;;  %vm3666_vm12 = vcmp.eq.f32.partialorder %v3665_v51, 8.507059e+37 }
 0x754   :  { %v11640_v11 = vadd.f32 1.0, %v9772_v55  ;;  %v8328_v25 = vmul.f32 -1.442695, %v3625_v23  ;;  %v8329_v52 = vmul.f32 -1.442695, %v3626_v61 }
 0x755   :  { %v9774_v13 = vpop.eup %9773 }
 0x756   :  { %v9776_v63 = vpop.eup %9775  ;;  %v3642_v4 = vmul.f32 %v9774_v13, %v3638_v45  ;;  %9777 = vrcp.f32 %v11640_v11  ;;  %v3580_v54 = vpop.f32.mrf.mxu2  ;;  %vm3647_vm3 = vweird.f32 %v9774_v13  ;;  %v3682_v16 = vand.u32 2147483648, %v11640_v11 }
 0x757   :  { %v3593_v47 = vpop.f32.mrf.mxu3  ;;  %v3657_v58 = vmul.f32 %v9776_v63, %v3639_v19  ;;  %9779 = vtanh.f32 %v3612_v60  ;;  %v3556_v21 = vpop.f32.mrf.mxu0  ;;  %v3619_v28 = vrot.slane %v3580_v54, 2  ;;  %vm3662_vm4 = vweird.f32 %v9776_v63  ;;  %vm3648_vm7 = vmor %vm3646_vm6, %vm3647_vm3 }
 0x758   :  { %v3569_v36 = vpop.f32.mrf.mxu1  ;;  %v3643_v33 = vsub.f32 1.0, %v3642_v4  ;;  %9781 = vpow2.f32 %v8328_v25  ;;  %vm3663_vm10 = vmor %vm3661_vm5, %vm3662_vm4  ;;  %v3620_v15 = vrot.slane %v3593_v47, 2  ;;  %vm3676_vm14 = vweird.f32 %v11640_v11 }
 0x759   :  { %v3658_v24 = vsub.f32 1.0, %v3657_v58  ;;  %9783 = vpow2.f32 %v8329_v52  ;;  %v3627_v29 = vadd.f32 %v3619_v28, %v13782_v34  ;;  %v3680_v2 = vand.u32 2147483647, %v11640_v11  ;;  %v13785_v28 = vld [vmem:[#allocation73_spill] sm:$0xff] }
 0x75a   :  { %v3644_v7 = vmul.f32 %v9774_v13, %v3643_v33  ;;  %v3628_v31 = vadd.f32 %v3620_v15, %v13783_v26  ;;  %v3683_v60 = vor.u32 1.1754944e-38, %v3682_v16  ;;  %v13790_v15 = vld [vmem:[#allocation23_spill] sm:$0xff] }
 0x75b   :  { %v3659_v49 = vmul.f32 %v9776_v63, %v3658_v24  ;;  %v8330_v62 = vmul.f32 -1.442695, %v3627_v29  ;;  %vm3681_vm1 = vcmp.eq.f32.partialorder %v3680_v2, 8.507059e+37 }
 0x75c   :  { %v9778_v48 = vpop.eup %9777  ;;  %v3645_v46 = vadd.f32 %v9774_v13, %v3644_v7 }
 0x75d   :  { %v9780_v14 = vpop.eup %9779  ;;  %v3672_v10 = vmul.f32 %v9778_v48, %v11640_v11  ;;  %v3660_v17 = vadd.f32 %v9776_v63, %v3659_v49  ;;  %9785 = vpow2.f32 %v8330_v62  ;;  %vm3677_vm13 = vweird.f32 %v9778_v48 }
 0x75e   :  { %v9782_v6 = vpop.eup %9781  ;;  %v3649_v34 = vsel %vm3648_vm7, %v9774_v13, %v3645_v46  ;;  %v3582_v35 = vpop.f32.mrf.mxu2  ;;  %vm3678_vm15 = vmor %vm3676_vm14, %vm3677_vm13  ;;  %v3754_v49 = vrot.slane %v11624_v42, 2 }
 0x75f   :  { %v3595_v40 = vpop.f32.mrf.mxu3  ;;  %v9784_v57 = vpop.eup %9783  ;;  %v3673_v27 = vsub.f32 1.0, %v3672_v10  ;;  %v3654_v32 = vsel %vm3651_vm9, %v3653_v9, %v3649_v34  ;;  %v3664_v38 = vsel %vm3663_vm10, %v9776_v63, %v3660_v17  ;;  %v3704_v43 = vadd.f32 1.0, %v9782_v6  ;;  %v13786_v35 = vld [vmem:[#allocation37_spill] sm:$0xff] }
 0x760   :  { %v3669_v50 = vsel %vm3666_vm12, %v3668_v22, %v3664_v38  ;;  %v3691_v59 = vmul.f32 %v9780_v14, %v3654_v32  ;;  %v3705_v0 = vadd.f32 1.0, %v9784_v57  ;;  %v13787_v40 = vld [vmem:[#allocation22_spill] sm:$0xff] }
 0x761   :  { %v3674_v1 = vmul.f32 %v9778_v48, %v3673_v27  ;;  %v3690_v3 = vmul.f32 %v3688_v30, %v3669_v50  ;;  %9787 = vrcp.f32 %v3704_v43  ;;  %v3718_v4 = vand.u32 2147483648, %v3704_v43 }
 0x762   :  { %9789 = vrcp.f32 %v3705_v0  ;;  %v3733_v63 = vand.u32 2147483648, %v3705_v0  ;;  %v3716_v26 = vand.u32 2147483647, %v3704_v43  ;;  %v3731_v21 = vand.u32 2147483647, %v3705_v0 }
 0x763   :  { %v3692_v12 = vadd.f32 %v3691_v59, %v3690_v3  ;;  %v9786_v45 = vpop.eup %9785  ;;  %v3675_v19 = vadd.f32 %v9778_v48, %v3674_v1  ;;  %vm3712_vm4 = vweird.f32 %v3704_v43  ;;  %vm3727_vm5 = vweird.f32 %v3705_v0  ;;  %v13789_v1 = vld [vmem:[#allocation72_spill] sm:$0xff] }
 0x764   :  { %v11647_v20 = vadd.f32 1.0, %v9786_v45  ;;  %v3719_v5 = vor.u32 1.1754944e-38, %v3718_v4  ;;  %v3734_v51 = vor.u32 1.1754944e-38, %v3733_v63  ;;  %vm3717_vm9 = vcmp.eq.f32.partialorder %v3716_v26, 8.507059e+37 }
 0x765   :  { %9791 = vtanh.f32 %v3692_v12  ;;  %v3679_v53 = vsel %vm3678_vm15, %v9778_v48, %v3675_v19  ;;  %vm3732_vm10 = vcmp.eq.f32.partialorder %v3731_v21, 8.507059e+37  ;;  %v3770_v57 = vsel %vm1879_vm8, %v13787_v40, %v13786_v35 }
 0x766   :  { %9793 = vrcp.f32 %v11647_v20  ;;  %v3684_v25 = vsel %vm3681_vm1, %v3683_v60, %v3679_v53  ;;  %v3748_v6 = vand.u32 2147483648, %v11647_v20  ;;  %vm3742_vm13 = vweird.f32 %v11647_v20 }
 0x767   :  { %v9788_v39 = vpop.eup %9787  ;;  %9795 = vtanh.f32 %v3628_v31  ;;  %v3746_v22 = vand.u32 2147483647, %v11647_v20 }
 0x768   :  { %v9790_v41 = vpop.eup %9789  ;;  %v3708_v55 = vmul.f32 %v9788_v39, %v3704_v43  ;;  %vm3713_vm2 = vweird.f32 %v9788_v39  ;;  %v3749_v42 = vor.u32 1.1754944e-38, %v3748_v6  ;;  %v13788_v43 = vld [vmem:[#allocation74_spill] sm:$0xff] }
 0x769   :  { %v3723_v23 = vmul.f32 %v9790_v41, %v3705_v0  ;;  %vm3728_vm3 = vweird.f32 %v9790_v41  ;;  %vm3714_vm6 = vmor %vm3712_vm4, %vm3713_vm2  ;;  %vm3747_vm15 = vcmp.eq.f32.partialorder %v3746_v22, 8.507059e+37  ;;  %v3772_v50 = vsel %vm3763_vm0, %v3770_v57, %v13788_v43 }
 0x76a   :  { %v3709_v61 = vsub.f32 1.0, %v3708_v55  ;;  %vm3729_vm7 = vmor %vm3727_vm5, %vm3728_vm3  ;;  %v3774_v3 = vsel %vm3766_vm11, %v3772_v50, %v13789_v1 }
 0x76b   :  { %v9792_v13 = vpop.eup %9791  ;;  %v3724_v52 = vsub.f32 1.0, %v3723_v23 }
 0x76c   :  { %v3694_v11 = vmul.f32 %v9792_v13, %v3684_v25  ;;  %v3710_v54 = vmul.f32 %v9788_v39, %v3709_v61  ;;  %v9794_v47 = vpop.eup %9793 }
 0x76d   :  { %v3725_v58 = vmul.f32 %v9790_v41, %v3724_v52  ;;  %v3738_v33 = vmul.f32 %v9794_v47, %v11647_v20  ;;  %v9796_v7 = vpop.eup %9795  ;;  %vm3743_vm12 = vweird.f32 %v9794_v47 }
 0x76e   :  { %v3773_v36 = vsel %vm3766_vm11, %v11621_v8, %v3694_v11  ;;  %v3711_v56 = vadd.f32 %v9788_v39, %v3710_v54  ;;  %vm3744_vm14 = vmor %vm3742_vm13, %vm3743_vm12 }
 0x76f   :  { %v11657_v24 = vpack.c.bf16 %v3773_v36, %v13785_v28  ;;  %v3726_v37 = vadd.f32 %v9790_v41, %v3725_v58  ;;  %v3739_v29 = vsub.f32 1.0, %v3738_v33 }
 0x770   :  { %v3715_v30 = vsel %vm3714_vm6, %v9788_v39, %v3711_v56 }
 0x771   :  { %v3720_v8 = vsel %vm3717_vm9, %v3719_v5, %v3715_v30  ;;  %v3730_v48 = vsel %vm3729_vm7, %v9790_v41, %v3726_v37  ;;  %v3740_v46 = vmul.f32 %v9794_v47, %v3739_v29 }
 0x772   :  { %v3735_v62 = vsel %vm3732_vm10, %v3734_v51, %v3730_v48  ;;  %v3757_v14 = vmul.f32 %v9796_v7, %v3720_v8 }
 0x773   :  { %v3756_v10 = vmul.f32 %v3754_v49, %v3735_v62  ;;  %v3741_v17 = vadd.f32 %v9794_v47, %v3740_v46 }
 0x775   :  { %v3758_v9 = vadd.f32 %v3757_v14, %v3756_v10  ;;  %v3745_v34 = vsel %vm3744_vm14, %v9794_v47, %v3741_v17 }
 0x776   :  { %v3750_v32 = vsel %vm3747_vm15, %v3749_v42, %v3745_v34 }
 0x777   :  { %9797 = vtanh.f32 %v3758_v9 }
 0x77d   :  { %v9798_v27 = vpop.eup %9797 }
 0x77e   :  { %v3760_v38 = vmul.f32 %v9798_v27, %v3750_v32 }
 0x780   :  { %v3762_v59 = vsel %vm1879_vm8, %v3760_v38, %v11630_v18 }
 0x781   :  { %v3765_v0 = vsel %vm3763_vm0, %v3762_v59, %v11516_v44 }
 0x782   :  { %v3768_v12 = vsel %vm3766_vm11, %v3765_v0, %v13790_v15 }
 0x783   :  { %v11676_v45 = vpack.c.bf16 %v3774_v3, %v3768_v12 }
 0x784   :  { %10156 = dma.done.wait [#allocation5 + $0x1], 16384 }
 0x785   :  { %10157 = vsyncadd [#allocation5 + $0x1], 4294950912 }
 0x786   :  { %10158 = dma.done.wait [#allocation5 + $0x2], 8192 }
 0x787   :  { %10159 = vsyncadd [#allocation5 + $0x2], 4294959104  ;;  %v8557_v19 = vld [vmem:[#allocation3 + $0x1c0] sm:$0xf]  ;;  %v9400_v31 = vld [vmem:[#allocation3 + $0x1c4] sm:$0xf] }
 0x788   :  { %v9404_v16 = vld [vmem:[#allocation3 + $0x1dc] sm:$0xf0]  ;;  %v8559_v39 = vld [vmem:[#allocation3 + $0x1e0] sm:$0xf0]  ;;  %s10168_s21 = smov [#allocation9]   ;;  %s7473_s24 = sshll.u32 %s13258_s9, 4  ;;  %s7474_s24 = int_to_ptr.hbm [resolvable:$true] %s7473_s24 }
 0x789   :  { %v8813_v20 = vld [vmem:[#allocation3 + $0x3c0] sm:$0xf]  ;;  %v8558_v2 = vor.u32 %v9404_v16, %v8557_v19  ;;  %v8562_v41 = vor.u32 %v9400_v31, %v8559_v39  ;;  %v9464_v53 = vld [vmem:[#allocation3 + $0x3c4] sm:$0xf]  ;;  %s7471_s1 = sshll.u32 %s10168_s21, 4  ;;  %s7472_s1 = int_to_ptr.vmem [resolvable:$true] %s7471_s1 }
 0x78a   :  { %v9468_v18 = vld [vmem:[#allocation3 + $0x3dc] sm:$0xf0]  ;;  %v8815_v55 = vld [vmem:[#allocation3 + $0x3e0] sm:$0xf0] }
 0x78b   :  { %v8814_v44 = vor.u32 %v9468_v18, %v8813_v20  ;;  %v8525_v60 = vld [vmem:[#allocation3 + $0x180] sm:$0xf]  ;;  %4569 = vmatpush.bf16.msra.mxu0 %v8558_v2  ;;  %v8818_v23 = vor.u32 %v9464_v53, %v8815_v55  ;;  %4597 = vmatpush.bf16.msra.mxu2 %v8562_v41  ;;  %v9392_v4 = vld [vmem:[#allocation3 + $0x184] sm:$0xf] }
 0x78c   :  { %v9396_v61 = vld [vmem:[#allocation3 + $0x19c] sm:$0xf0]  ;;  %v8527_v11 = vld [vmem:[#allocation3 + $0x1a0] sm:$0xf0] }
 0x78d   :  { %v8781_v13 = vld [vmem:[#allocation3 + $0x380] sm:$0xf]  ;;  %4583 = vmatpush.bf16.msra.mxu1 %v8814_v44  ;;  %v8526_v52 = vor.u32 %v9396_v61, %v8525_v60  ;;  %v9456_v54 = vld [vmem:[#allocation3 + $0x384] sm:$0xf]  ;;  %4611 = vmatpush.bf16.msra.mxu3 %v8818_v23  ;;  %v8530_v26 = vor.u32 %v9392_v4, %v8527_v11 }
 0x78e   :  { %v9460_v25 = vld [vmem:[#allocation3 + $0x39c] sm:$0xf0]  ;;  %v8783_v47 = vld [vmem:[#allocation3 + $0x3a0] sm:$0xf0] }
 0x78f   :  { %v8782_v63 = vor.u32 %v9460_v25, %v8781_v13  ;;  %v8493_v58 = vld [vmem:[#allocation3 + $0x140] sm:$0xf]  ;;  %v8786_v36 = vor.u32 %v9456_v54, %v8783_v47  ;;  %v9384_v28 = vld [vmem:[#allocation3 + $0x144] sm:$0xf]  ;;  %4570 = vmatpush.bf16.msra.mxu0 %v8526_v52  ;;  %4598 = vmatpush.bf16.msra.mxu2 %v8530_v26 }
 0x790   :  { %v9388_v21 = vld [vmem:[#allocation3 + $0x15c] sm:$0xf0]  ;;  %v8495_v37 = vld [vmem:[#allocation3 + $0x160] sm:$0xf0] }
 0x791   :  { %v8749_v33 = vld [vmem:[#allocation3 + $0x340] sm:$0xf]  ;;  %v8494_v5 = vor.u32 %v9388_v21, %v8493_v58  ;;  %v9448_v7 = vld [vmem:[#allocation3 + $0x344] sm:$0xf]  ;;  %4584 = vmatpush.bf16.msra.mxu1 %v8782_v63  ;;  %v8498_v30 = vor.u32 %v9384_v28, %v8495_v37  ;;  %4612 = vmatpush.bf16.msra.mxu3 %v8786_v36  ;;  %v8565_v37 = vld [vmem:[#allocation3 + $0x1c8] sm:$0xf] }
 0x792   :  { %v9452_v56 = vld [vmem:[#allocation3 + $0x35c] sm:$0xf0]  ;;  %v8751_v51 = vld [vmem:[#allocation3 + $0x360] sm:$0xf0] }
 0x793   :  { %v8750_v29 = vor.u32 %v9452_v56, %v8749_v33  ;;  %v8461_v49 = vld [vmem:[#allocation3 + $0x100] sm:$0xf]  ;;  %v8754_v46 = vor.u32 %v9448_v7, %v8751_v51  ;;  %v9376_v14 = vld [vmem:[#allocation3 + $0x104] sm:$0xf]  ;;  %4571 = vmatpush.bf16.msra.mxu0 %v8494_v5  ;;  %4599 = vmatpush.bf16.msra.mxu2 %v8498_v30  ;;  %v9405_v7 = vld [vmem:[#allocation3 + $0x1e4] sm:$0xf0] }
 0x794   :  { %v9380_v8 = vld [vmem:[#allocation3 + $0x11c] sm:$0xf0]  ;;  %v8463_v10 = vld [vmem:[#allocation3 + $0x120] sm:$0xf0]  ;;  %v8821_v51 = vld [vmem:[#allocation3 + $0x3c8] sm:$0xf] }
 0x795   :  { %v8717_v48 = vld [vmem:[#allocation3 + $0x300] sm:$0xf]  ;;  %v9440_v9 = vld [vmem:[#allocation3 + $0x304] sm:$0xf]  ;;  %v8462_v6 = vor.u32 %v9380_v8, %v8461_v49  ;;  %4585 = vmatpush.bf16.msra.mxu1 %v8750_v29  ;;  %v8466_v34 = vor.u32 %v9376_v14, %v8463_v10  ;;  %4613 = vmatpush.bf16.msra.mxu3 %v8754_v46  ;;  %v9469_v30 = vld [vmem:[#allocation3 + $0x3e4] sm:$0xf0] }
 0x796   :  { %v9444_v62 = vld [vmem:[#allocation3 + $0x31c] sm:$0xf0]  ;;  %v8719_v17 = vld [vmem:[#allocation3 + $0x320] sm:$0xf0]  ;;  %v9401_v49 = vld [vmem:[#allocation3 + $0x1cc] sm:$0xf] }
 0x797   :  { %v8718_v22 = vor.u32 %v9444_v62, %v8717_v48  ;;  %v8429_v42 = vld [vmem:[#allocation3 + $0xc0] sm:$0xf]  ;;  %v8722_v57 = vor.u32 %v9440_v9, %v8719_v17  ;;  %v9368_v32 = vld [vmem:[#allocation3 + $0xc4] sm:$0xf]  ;;  %4572 = vmatpush.bf16.msra.mxu0 %v8462_v6  ;;  %4600 = vmatpush.bf16.msra.mxu2 %v8466_v34  ;;  %v8567_v8 = vld [vmem:[#allocation3 + $0x1e8] sm:$0xf0]  ;;  %v8566_v9 = vor.u32 %v9405_v7, %v8565_v37 }
 0x798   :  { %v9372_v35 = vld [vmem:[#allocation3 + $0xdc] sm:$0xf0]  ;;  %v8431_v38 = vld [vmem:[#allocation3 + $0xe0] sm:$0xf0]  ;;  %v9465_v62 = vld [vmem:[#allocation3 + $0x3cc] sm:$0xf]  ;;  %v8822_v17 = vor.u32 %v9469_v30, %v8821_v51  ;;  %v8570_v6 = vor.u32 %v9401_v49, %v8567_v8 }
 0x799   :  { %v8685_v40 = vld [vmem:[#allocation3 + $0x2c0] sm:$0xf]  ;;  %v9432_v43 = vld [vmem:[#allocation3 + $0x2c4] sm:$0xf]  ;;  %v8430_v59 = vor.u32 %v9372_v35, %v8429_v42  ;;  %4586 = vmatpush.bf16.msra.mxu1 %v8718_v22  ;;  %v8434_v1 = vor.u32 %v9368_v32, %v8431_v38  ;;  %4614 = vmatpush.bf16.msra.mxu3 %v8722_v57  ;;  %v8823_v14 = vld [vmem:[#allocation3 + $0x3e8] sm:$0xf0] }
 0x79a   :  { %v9436_v27 = vld [vmem:[#allocation3 + $0x2dc] sm:$0xf0]  ;;  %v8687_v50 = vld [vmem:[#allocation3 + $0x2e0] sm:$0xf0]  ;;  %v8533_v22 = vld [vmem:[#allocation3 + $0x188] sm:$0xf]  ;;  %v8826_v35 = vor.u32 %v9465_v62, %v8823_v14 }
 0x79b   :  { %v8686_v0 = vor.u32 %v9436_v27, %v8685_v40  ;;  %v8397_v3 = vld [vmem:[#allocation3 + $0x80] sm:$0xf]  ;;  %v8690_v19 = vor.u32 %v9432_v43, %v8687_v50  ;;  %v9360_v20 = vld [vmem:[#allocation3 + $0x84] sm:$0xf]  ;;  %4573 = vmatpush.bf16.msra.mxu0 %v8430_v59  ;;  %4601 = vmatpush.bf16.msra.mxu2 %v8434_v1  ;;  %v9397_v34 = vld [vmem:[#allocation3 + $0x1a4] sm:$0xf0] }
 0x79c   :  { %v9364_v15 = vld [vmem:[#allocation3 + $0x9c] sm:$0xf0]  ;;  %v8399_v2 = vld [vmem:[#allocation3 + $0xa0] sm:$0xf0]  ;;  %v8789_v42 = vld [vmem:[#allocation3 + $0x388] sm:$0xf]  ;;  %v8534_v43 = vor.u32 %v9397_v34, %v8533_v22 }
 0x79d   :  { %v8653_v12 = vld [vmem:[#allocation3 + $0x280] sm:$0xf]  ;;  %v9424_v18 = vld [vmem:[#allocation3 + $0x284] sm:$0xf]  ;;  %v8398_v39 = vor.u32 %v9364_v15, %v8397_v3  ;;  %4587 = vmatpush.bf16.msra.mxu1 %v8686_v0  ;;  %v8402_v41 = vor.u32 %v9360_v20, %v8399_v2  ;;  %4615 = vmatpush.bf16.msra.mxu3 %v8690_v19  ;;  %v9461_v40 = vld [vmem:[#allocation3 + $0x3a4] sm:$0xf0] }
 0x79e   :  { %v9428_v16 = vld [vmem:[#allocation3 + $0x29c] sm:$0xf0]  ;;  %v8655_v31 = vld [vmem:[#allocation3 + $0x2a0] sm:$0xf0]  ;;  %v9393_v57 = vld [vmem:[#allocation3 + $0x18c] sm:$0xf]  ;;  %v8790_v50 = vor.u32 %v9461_v40, %v8789_v42 }
 0x79f   :  { %v8654_v44 = vor.u32 %v9428_v16, %v8653_v12  ;;  %v8365_v53 = vld [vmem:[#allocation3 + $0x40] sm:$0xf]  ;;  %v8658_v23 = vor.u32 %v9424_v18, %v8655_v31  ;;  %v9352_v13 = vld [vmem:[#allocation3 + $0x44] sm:$0xf]  ;;  %4574 = vmatpush.bf16.msra.mxu0 %v8398_v39  ;;  %4602 = vmatpush.bf16.msra.mxu2 %v8402_v41  ;;  %v8535_v27 = vld [vmem:[#allocation3 + $0x1a8] sm:$0xf0] }
 0x7a0   :  { %v9356_v55 = vld [vmem:[#allocation3 + $0x5c] sm:$0xf0]  ;;  %v8367_v25 = vld [vmem:[#allocation3 + $0x60] sm:$0xf0]  ;;  %v9457_v32 = vld [vmem:[#allocation3 + $0x38c] sm:$0xf]  ;;  %v8538_v59 = vor.u32 %v9393_v57, %v8535_v27 }
 0x7a1   :  { %v8621_v60 = vld [vmem:[#allocation3 + $0x240] sm:$0xf]  ;;  %v9416_v52 = vld [vmem:[#allocation3 + $0x244] sm:$0xf]  ;;  %v8366_v4 = vor.u32 %v9356_v55, %v8365_v53  ;;  %4588 = vmatpush.bf16.msra.mxu1 %v8654_v44  ;;  %v8370_v47 = vor.u32 %v9352_v13, %v8367_v25  ;;  %4616 = vmatpush.bf16.msra.mxu3 %v8658_v23  ;;  %v8791_v38 = vld [vmem:[#allocation3 + $0x3a8] sm:$0xf0] }
 0x7a2   :  { %v9420_v61 = vld [vmem:[#allocation3 + $0x25c] sm:$0xf0]  ;;  %v8623_v63 = vld [vmem:[#allocation3 + $0x260] sm:$0xf0]  ;;  %v8501_v0 = vld [vmem:[#allocation3 + $0x148] sm:$0xf]  ;;  %v8794_v15 = vor.u32 %v9457_v32, %v8791_v38 }
 0x7a3   :  { %v8333_v11 = vld [vmem:[#allocation3] sm:$0xf]  ;;  %v8622_v26 = vor.u32 %v9420_v61, %v8621_v60  ;;  %v9344_v36 = vld [vmem:[#allocation3 + $0x4] sm:$0xf]  ;;  %v8626_v33 = vor.u32 %v9416_v52, %v8623_v63  ;;  %4575 = vmatpush.bf16.msra.mxu0 %v8366_v4  ;;  %4603 = vmatpush.bf16.msra.mxu2 %v8370_v47  ;;  %v9389_v1 = vld [vmem:[#allocation3 + $0x164] sm:$0xf0] }
 0x7a4   :  { %v9348_v54 = vld [vmem:[#allocation3 + $0x1c] sm:$0xf0]  ;;  %v8335_v56 = vld [vmem:[#allocation3 + $0x20] sm:$0xf0]  ;;  %v8757_v3 = vld [vmem:[#allocation3 + $0x348] sm:$0xf]  ;;  %v8502_v18 = vor.u32 %v9389_v1, %v8501_v0 }
 0x7a5   :  { %v8589_v58 = vld [vmem:[#allocation3 + $0x200] sm:$0xf]  ;;  %v9408_v28 = vld [vmem:[#allocation3 + $0x204] sm:$0xf]  ;;  %v8334_v29 = vor.u32 %v9348_v54, %v8333_v11  ;;  %4589 = vmatpush.bf16.msra.mxu1 %v8622_v26  ;;  %v8338_v46 = vor.u32 %v9344_v36, %v8335_v56  ;;  %4617 = vmatpush.bf16.msra.mxu3 %v8626_v33  ;;  %v9453_v12 = vld [vmem:[#allocation3 + $0x364] sm:$0xf0] }
 0x7a6   :  { %v9412_v21 = vld [vmem:[#allocation3 + $0x21c] sm:$0xf0]  ;;  %v8591_v5 = vld [vmem:[#allocation3 + $0x220] sm:$0xf0]  ;;  %v9385_v19 = vld [vmem:[#allocation3 + $0x14c] sm:$0xf]  ;;  %v8758_v31 = vor.u32 %v9453_v12, %v8757_v3 }
 0x7a7   :  { %v8590_v48 = vor.u32 %v9412_v21, %v8589_v58  ;;  %v8594_v10 = vor.u32 %v9408_v28, %v8591_v5  ;;  %4576 = vmatpush.bf16.msra.mxu0 %v8334_v29  ;;  %4604 = vmatpush.bf16.msra.mxu2 %v8338_v46  ;;  %v8503_v16 = vld [vmem:[#allocation3 + $0x168] sm:$0xf0]  ;;  %v8469_v44 = vld [vmem:[#allocation3 + $0x108] sm:$0xf] }
 0x7a8   :  { %v9449_v20 = vld [vmem:[#allocation3 + $0x34c] sm:$0xf]  ;;  %v8506_v39 = vor.u32 %v9385_v19, %v8503_v16  ;;  %v9381_v41 = vld [vmem:[#allocation3 + $0x124] sm:$0xf0] }
 0x7a9   :  { %4590 = vmatpush.bf16.msra.mxu1 %v8590_v48  ;;  %4618 = vmatpush.bf16.msra.mxu3 %v8594_v10  ;;  %v8759_v2 = vld [vmem:[#allocation3 + $0x368] sm:$0xf0]  ;;  %v8725_v53 = vld [vmem:[#allocation3 + $0x308] sm:$0xf]  ;;  %v8470_v52 = vor.u32 %v9381_v41, %v8469_v44  ;;  %v9402_v44 = vld [vmem:[#allocation3 + $0x1d4] sm:$0xf] }
 0x7aa   :  { %4577 = vmatmul.bf16.vlgmr.msra.gmra.mxu0 %v11657_v24  ;;  %4605 = vmatmul.bf16.vlgmr.msra.gmra.mxu2 %v11657_v24  ;;  %v8762_v55 = vor.u32 %v9449_v20, %v8759_v2  ;;  %v9445_v60 = vld [vmem:[#allocation3 + $0x324] sm:$0xf0]  ;;  %v9377_v23 = vld [vmem:[#allocation3 + $0x10c] sm:$0xf]  ;;  %v8573_v20 = vld [vmem:[#allocation3 + $0x1d0] sm:$0xf] }
 0x7ab   :  { %4625 = vmatpush.bf16.msrb.mxu0 %v8566_v9  ;;  %4653 = vmatpush.bf16.msrb.mxu2 %v8570_v6  ;;  %v8471_v61 = vld [vmem:[#allocation3 + $0x128] sm:$0xf0]  ;;  %v8726_v63 = vor.u32 %v9445_v60, %v8725_v53  ;;  %v8437_v11 = vld [vmem:[#allocation3 + $0xc8] sm:$0xf]  ;;  %v9406_v2 = vld [vmem:[#allocation3 + $0x1ec] sm:$0xf0] }
 0x7ac   :  { %4591 = vmatmul.bf16.vlgmr.msra.gmra.mxu1 %v11676_v45  ;;  %4619 = vmatmul.bf16.vlgmr.msra.gmra.mxu3 %v11676_v45  ;;  %v9441_v13 = vld [vmem:[#allocation3 + $0x30c] sm:$0xf]  ;;  %v8474_v4 = vor.u32 %v9377_v23, %v8471_v61  ;;  %v9373_v54 = vld [vmem:[#allocation3 + $0xe4] sm:$0xf0]  ;;  %v8575_v41 = vld [vmem:[#allocation3 + $0x1f0] sm:$0xf0] }
 0x7ad   :  { %4639 = vmatpush.bf16.msrb.mxu1 %v8822_v17  ;;  %4667 = vmatpush.bf16.msrb.mxu3 %v8826_v35  ;;  %v8727_v25 = vld [vmem:[#allocation3 + $0x328] sm:$0xf0]  ;;  %v8693_v26 = vld [vmem:[#allocation3 + $0x2c8] sm:$0xf]  ;;  %v8438_v28 = vor.u32 %v9373_v54, %v8437_v11  ;;  %v9466_v60 = vld [vmem:[#allocation3 + $0x3d4] sm:$0xf] }
 0x7ae   :  { %v8730_v47 = vor.u32 %v9441_v13, %v8727_v25  ;;  %v9437_v58 = vld [vmem:[#allocation3 + $0x2e4] sm:$0xf0]  ;;  %v9369_v21 = vld [vmem:[#allocation3 + $0xcc] sm:$0xf]  ;;  %v8831_v23 = vld [vmem:[#allocation3 + $0x3f0] sm:$0xf0]  ;;  %v8574_v13 = vor.u32 %v9406_v2, %v8573_v20 }
 0x7af   :  { %4626 = vmatpush.bf16.msrb.mxu0 %v8534_v43  ;;  %4654 = vmatpush.bf16.msrb.mxu2 %v8538_v59  ;;  %v8439_v36 = vld [vmem:[#allocation3 + $0xe8] sm:$0xf0]  ;;  %v8694_v5 = vor.u32 %v9437_v58, %v8693_v26  ;;  %v8405_v7 = vld [vmem:[#allocation3 + $0x88] sm:$0xf]  ;;  %v8797_v11 = vld [vmem:[#allocation3 + $0x390] sm:$0xf]  ;;  %v8834_v54 = vor.u32 %v9466_v60, %v8831_v23 }
 0x7b0   :  { %v9433_v33 = vld [vmem:[#allocation3 + $0x2cc] sm:$0xf]  ;;  %v8442_v37 = vor.u32 %v9369_v21, %v8439_v36  ;;  %v9365_v51 = vld [vmem:[#allocation3 + $0xa4] sm:$0xf0]  ;;  %v9462_v26 = vld [vmem:[#allocation3 + $0x3ac] sm:$0xf0] }
 0x7b1   :  { %4640 = vmatpush.bf16.msrb.mxu1 %v8790_v50  ;;  %4668 = vmatpush.bf16.msrb.mxu3 %v8794_v15  ;;  %v8695_v56 = vld [vmem:[#allocation3 + $0x2e8] sm:$0xf0]  ;;  %v8661_v29 = vld [vmem:[#allocation3 + $0x288] sm:$0xf]  ;;  %v8406_v14 = vor.u32 %v9365_v51, %v8405_v7  ;;  %v8543_v58 = vld [vmem:[#allocation3 + $0x1b0] sm:$0xf0] }
 0x7b2   :  { %v8698_v30 = vor.u32 %v9433_v33, %v8695_v56  ;;  %v9429_v49 = vld [vmem:[#allocation3 + $0x2a4] sm:$0xf0]  ;;  %v9361_v8 = vld [vmem:[#allocation3 + $0x8c] sm:$0xf]  ;;  %v9458_v21 = vld [vmem:[#allocation3 + $0x394] sm:$0xf]  ;;  %v8798_v56 = vor.u32 %v9462_v26, %v8797_v11 }
 0x7b3   :  { %4627 = vmatpush.bf16.msrb.mxu0 %v8502_v18  ;;  %4655 = vmatpush.bf16.msrb.mxu2 %v8506_v39  ;;  %v8407_v48 = vld [vmem:[#allocation3 + $0xa8] sm:$0xf0]  ;;  %v8662_v10 = vor.u32 %v9429_v49, %v8661_v29  ;;  %v8373_v17 = vld [vmem:[#allocation3 + $0x48] sm:$0xf]  ;;  %v8829_v18 = vld [vmem:[#allocation3 + $0x3d0] sm:$0xf] }
 0x7b4   :  { %v9425_v46 = vld [vmem:[#allocation3 + $0x28c] sm:$0xf]  ;;  %v8410_v9 = vor.u32 %v9361_v8, %v8407_v48  ;;  %v9357_v6 = vld [vmem:[#allocation3 + $0x64] sm:$0xf0]  ;;  %v9470_v39 = vld [vmem:[#allocation3 + $0x3ec] sm:$0xf0] }
 0x7b5   :  { %4641 = vmatpush.bf16.msrb.mxu1 %v8758_v31  ;;  %4669 = vmatpush.bf16.msrb.mxu3 %v8762_v55  ;;  %v8663_v62 = vld [vmem:[#allocation3 + $0x2a8] sm:$0xf0]  ;;  %v8629_v22 = vld [vmem:[#allocation3 + $0x248] sm:$0xf]  ;;  %v8374_v32 = vor.u32 %v9357_v6, %v8373_v17  ;;  %v8830_v25 = vor.u32 %v9470_v39, %v8829_v18  ;;  %v8799_v36 = vld [vmem:[#allocation3 + $0x3b0] sm:$0xf0] }
 0x7b6   :  { %v8666_v34 = vor.u32 %v9425_v46, %v8663_v62  ;;  %v9421_v42 = vld [vmem:[#allocation3 + $0x264] sm:$0xf0]  ;;  %v9353_v35 = vld [vmem:[#allocation3 + $0x4c] sm:$0xf]  ;;  %v8765_v7 = vld [vmem:[#allocation3 + $0x350] sm:$0xf]  ;;  %v8802_v51 = vor.u32 %v9458_v21, %v8799_v36 }
 0x7b7   :  { %4628 = vmatpush.bf16.msrb.mxu0 %v8470_v52  ;;  %4656 = vmatpush.bf16.msrb.mxu2 %v8474_v4  ;;  %v8375_v40 = vld [vmem:[#allocation3 + $0x68] sm:$0xf0]  ;;  %v8341_v38 = vld [vmem:[#allocation3 + $0x8] sm:$0xf]  ;;  %v8630_v50 = vor.u32 %v9421_v42, %v8629_v22  ;;  %v8578_v52 = vor.u32 %v9402_v44, %v8575_v41  ;;  %v9398_v4 = vld [vmem:[#allocation3 + $0x1ac] sm:$0xf0] }
 0x7b8   :  { %v9417_v57 = vld [vmem:[#allocation3 + $0x24c] sm:$0xf]  ;;  %v9349_v43 = vld [vmem:[#allocation3 + $0x24] sm:$0xf0]  ;;  %v8378_v59 = vor.u32 %v9353_v35, %v8375_v40  ;;  %v9454_v29 = vld [vmem:[#allocation3 + $0x36c] sm:$0xf0] }
 0x7b9   :  { %4642 = vmatpush.bf16.msrb.mxu1 %v8726_v63  ;;  %4670 = vmatpush.bf16.msrb.mxu3 %v8730_v47  ;;  %v8631_v27 = vld [vmem:[#allocation3 + $0x268] sm:$0xf0]  ;;  %v8597_v0 = vld [vmem:[#allocation3 + $0x208] sm:$0xf]  ;;  %v8342_v31 = vor.u32 %v9349_v43, %v8341_v38  ;;  %v8541_v63 = vld [vmem:[#allocation3 + $0x190] sm:$0xf]  ;;  %v8766_v62 = vor.u32 %v9454_v29, %v8765_v7 }
 0x7ba   :  { %v9413_v1 = vld [vmem:[#allocation3 + $0x224] sm:$0xf0]  ;;  %v9345_v3 = vld [vmem:[#allocation3 + $0xc] sm:$0xf]  ;;  %v8634_v15 = vor.u32 %v9417_v57, %v8631_v27  ;;  %v9394_v47 = vld [vmem:[#allocation3 + $0x194] sm:$0xf]  ;;  %v8542_v33 = vor.u32 %v9398_v4, %v8541_v63 }
 0x7bb   :  { %4629 = vmatpush.bf16.msrb.mxu0 %v8438_v28  ;;  %4657 = vmatpush.bf16.msrb.mxu2 %v8442_v37  ;;  %v8343_v12 = vld [vmem:[#allocation3 + $0x28] sm:$0xf0]  ;;  %v8598_v53 = vor.u32 %v9413_v1, %v8597_v0  ;;  %v8546_v28 = vor.u32 %v9394_v47, %v8543_v58  ;;  %v9390_v37 = vld [vmem:[#allocation3 + $0x16c] sm:$0xf0]  ;;  %v8511_v49 = vld [vmem:[#allocation3 + $0x170] sm:$0xf0] }
 0x7bc   :  { %v9409_v19 = vld [vmem:[#allocation3 + $0x20c] sm:$0xf]  ;;  %v8346_v55 = vor.u32 %v9345_v3, %v8343_v12  ;;  %v9450_v8 = vld [vmem:[#allocation3 + $0x354] sm:$0xf]  ;;  %v8733_v17 = vld [vmem:[#allocation3 + $0x310] sm:$0xf] }
 0x7bd   :  { %4643 = vmatpush.bf16.msrb.mxu1 %v8694_v5  ;;  %4671 = vmatpush.bf16.msrb.mxu3 %v8698_v30  ;;  %v8599_v16 = vld [vmem:[#allocation3 + $0x228] sm:$0xf0]  ;;  %v8509_v5 = vld [vmem:[#allocation3 + $0x150] sm:$0xf]  ;;  %v9386_v30 = vld [vmem:[#allocation3 + $0x154] sm:$0xf] }
 0x7be   :  { %v8602_v61 = vor.u32 %v9409_v19, %v8599_v16  ;;  %v8767_v48 = vld [vmem:[#allocation3 + $0x370] sm:$0xf0]  ;;  %v8510_v46 = vor.u32 %v9390_v37, %v8509_v5  ;;  %v9446_v22 = vld [vmem:[#allocation3 + $0x32c] sm:$0xf0] }
 0x7bf   :  { %4630 = vmatpush.bf16.msrb.mxu0 %v8406_v14  ;;  %4658 = vmatpush.bf16.msrb.mxu2 %v8410_v9  ;;  %v8514_v14 = vor.u32 %v9386_v30, %v8511_v49  ;;  %v9382_v9 = vld [vmem:[#allocation3 + $0x12c] sm:$0xf0]  ;;  %v8770_v6 = vor.u32 %v9450_v8, %v8767_v48  ;;  %v8479_v42 = vld [vmem:[#allocation3 + $0x130] sm:$0xf0]  ;;  %v8734_v27 = vor.u32 %v9446_v22, %v8733_v17  ;;  %v8581_v8 = vld [vmem:[#allocation3 + $0x1d8] sm:$0xf] }
 0x7c0   :  { %v9442_v35 = vld [vmem:[#allocation3 + $0x314] sm:$0xf]  ;;  %v8445_v38 = vld [vmem:[#allocation3 + $0xd0] sm:$0xf]  ;;  %v9407_v48 = vld [vmem:[#allocation3 + $0x1f4] sm:$0xf0] }
 0x7c1   :  { %4644 = vmatpush.bf16.msrb.mxu1 %v8662_v10  ;;  %4672 = vmatpush.bf16.msrb.mxu3 %v8666_v34  ;;  %v8477_v10 = vld [vmem:[#allocation3 + $0x110] sm:$0xf]  ;;  %v9378_v34 = vld [vmem:[#allocation3 + $0x114] sm:$0xf]  ;;  %v9467_v22 = vld [vmem:[#allocation3 + $0x3dc] sm:$0xf] }
 0x7c2   :  { %v8735_v40 = vld [vmem:[#allocation3 + $0x330] sm:$0xf0]  ;;  %v8478_v57 = vor.u32 %v9382_v9, %v8477_v10  ;;  %v9374_v43 = vld [vmem:[#allocation3 + $0xec] sm:$0xf0]  ;;  %v9403_v10 = vld [vmem:[#allocation3 + $0x1dc] sm:$0xf] }
 0x7c3   :  { %4631 = vmatpush.bf16.msrb.mxu0 %v8374_v32  ;;  %4659 = vmatpush.bf16.msrb.mxu2 %v8378_v59  ;;  %v8482_v32 = vor.u32 %v9378_v34, %v8479_v42  ;;  %v8738_v59 = vor.u32 %v9442_v35, %v8735_v40  ;;  %v9438_v0 = vld [vmem:[#allocation3 + $0x2ec] sm:$0xf0]  ;;  %v9370_v1 = vld [vmem:[#allocation3 + $0xd4] sm:$0xf]  ;;  %v8446_v19 = vor.u32 %v9374_v43, %v8445_v38  ;;  %v8583_v9 = vld [vmem:[#allocation3 + $0x1f8] sm:$0xf0] }
 0x7c4   :  { %v8447_v3 = vld [vmem:[#allocation3 + $0xf0] sm:$0xf0]  ;;  %v8413_v2 = vld [vmem:[#allocation3 + $0x90] sm:$0xf]  ;;  %v8839_v34 = vld [vmem:[#allocation3 + $0x3f8] sm:$0xf0]  ;;  %v8582_v35 = vor.u32 %v9407_v48, %v8581_v8 }
 0x7c5   :  { %4645 = vmatpush.bf16.msrb.mxu1 %v8630_v50  ;;  %4673 = vmatpush.bf16.msrb.mxu3 %v8634_v15  ;;  %v8701_v50 = vld [vmem:[#allocation3 + $0x2d0] sm:$0xf]  ;;  %v9434_v15 = vld [vmem:[#allocation3 + $0x2d4] sm:$0xf]  ;;  %v8450_v20 = vor.u32 %v9370_v1, %v8447_v3  ;;  %v8805_v38 = vld [vmem:[#allocation3 + $0x398] sm:$0xf]  ;;  %v8842_v43 = vor.u32 %v9467_v22, %v8839_v34 }
 0x7c6   :  { %v8703_v12 = vld [vmem:[#allocation3 + $0x2f0] sm:$0xf0]  ;;  %v8702_v16 = vor.u32 %v9438_v0, %v8701_v50  ;;  %v9366_v18 = vld [vmem:[#allocation3 + $0xac] sm:$0xf0]  ;;  %v9463_v50 = vld [vmem:[#allocation3 + $0x3b4] sm:$0xf0] }
 0x7c7   :  { %4632 = vmatpush.bf16.msrb.mxu0 %v8342_v31  ;;  %4660 = vmatpush.bf16.msrb.mxu2 %v8346_v55  ;;  %v8669_v31 = vld [vmem:[#allocation3 + $0x290] sm:$0xf]  ;;  %v8706_v39 = vor.u32 %v9434_v15, %v8703_v12  ;;  %v9362_v41 = vld [vmem:[#allocation3 + $0x94] sm:$0xf]  ;;  %v8414_v23 = vor.u32 %v9366_v18, %v8413_v2  ;;  %v8551_v0 = vld [vmem:[#allocation3 + $0x1b8] sm:$0xf0]  ;;  %v8806_v12 = vor.u32 %v9463_v50, %v8805_v38 }
 0x7c8   :  { %v9430_v44 = vld [vmem:[#allocation3 + $0x2ac] sm:$0xf0]  ;;  %v9426_v55 = vld [vmem:[#allocation3 + $0x294] sm:$0xf]  ;;  %v9459_v1 = vld [vmem:[#allocation3 + $0x39c] sm:$0xf] }
 0x7c9   :  { %4646 = vmatpush.bf16.msrb.mxu1 %v8598_v53  ;;  %4674 = vmatpush.bf16.msrb.mxu3 %v8602_v61  ;;  %v8415_v53 = vld [vmem:[#allocation3 + $0xb0] sm:$0xf0]  ;;  %v8670_v61 = vor.u32 %v9430_v44, %v8669_v31  ;;  %v8637_v63 = vld [vmem:[#allocation3 + $0x250] sm:$0xf]  ;;  %v8807_v3 = vld [vmem:[#allocation3 + $0x3b8] sm:$0xf0] }
 0x7ca   :  { %4633 = vmatmul.bf16.vlgmr.msrb.gmra.mxu0 %v11657_v24  ;;  %4661 = vmatmul.bf16.vlgmr.msrb.gmra.mxu2 %v11657_v24  ;;  %v8671_v60 = vld [vmem:[#allocation3 + $0x2b0] sm:$0xf0]  ;;  %v9422_v11 = vld [vmem:[#allocation3 + $0x26c] sm:$0xf0]  ;;  %v8773_v2 = vld [vmem:[#allocation3 + $0x358] sm:$0xf]  ;;  %v8810_v18 = vor.u32 %v9459_v1, %v8807_v3 }
 0x7cb   :  { %4681 = vmatpush.bf16.msra.mxu0 %v8574_v13  ;;  %4709 = vmatpush.bf16.msra.mxu2 %v8578_v52  ;;  %v8418_v13 = vor.u32 %v9362_v41, %v8415_v53  ;;  %v9358_v52 = vld [vmem:[#allocation3 + $0x6c] sm:$0xf0]  ;;  %v8674_v4 = vor.u32 %v9426_v55, %v8671_v60  ;;  %v8383_v26 = vld [vmem:[#allocation3 + $0x70] sm:$0xf0]  ;;  %v9455_v31 = vld [vmem:[#allocation3 + $0x374] sm:$0xf0] }
 0x7cc   :  { %4647 = vmatmul.bf16.vlgmr.msrb.gmra.mxu1 %v11676_v45  ;;  %4675 = vmatmul.bf16.vlgmr.msrb.gmra.mxu3 %v11676_v45  ;;  %v9418_v47 = vld [vmem:[#allocation3 + $0x254] sm:$0xf]  ;;  %v8349_v36 = vld [vmem:[#allocation3 + $0x10] sm:$0xf]  ;;  %v8519_v44 = vld [vmem:[#allocation3 + $0x178] sm:$0xf0]  ;;  %v8774_v60 = vor.u32 %v9455_v31, %v8773_v2 }
 0x7cd   :  { %4695 = vmatpush.bf16.msra.mxu1 %v8830_v25  ;;  %4723 = vmatpush.bf16.msra.mxu3 %v8834_v54  ;;  %v8381_v25 = vld [vmem:[#allocation3 + $0x50] sm:$0xf]  ;;  %v9354_v54 = vld [vmem:[#allocation3 + $0x54] sm:$0xf]  ;;  %v9451_v41 = vld [vmem:[#allocation3 + $0x35c] sm:$0xf] }
 0x7ce   :  { %v8639_v58 = vld [vmem:[#allocation3 + $0x270] sm:$0xf0]  ;;  %v8382_v21 = vor.u32 %v9358_v52, %v8381_v25  ;;  %v8605_v5 = vld [vmem:[#allocation3 + $0x210] sm:$0xf]  ;;  %v8775_v53 = vld [vmem:[#allocation3 + $0x378] sm:$0xf0] }
 0x7cf   :  { %4682 = vmatpush.bf16.msra.mxu0 %v8542_v33  ;;  %4710 = vmatpush.bf16.msra.mxu2 %v8546_v28  ;;  %v9350_v33 = vld [vmem:[#allocation3 + $0x2c] sm:$0xf0]  ;;  %v8386_v28 = vor.u32 %v9354_v54, %v8383_v26  ;;  %v9346_v7 = vld [vmem:[#allocation3 + $0x14] sm:$0xf]  ;;  %v8741_v25 = vld [vmem:[#allocation3 + $0x318] sm:$0xf]  ;;  %v8778_v52 = vor.u32 %v9451_v41, %v8775_v53 }
 0x7d0   :  { %v9414_v37 = vld [vmem:[#allocation3 + $0x22c] sm:$0xf0]  ;;  %v8351_v29 = vld [vmem:[#allocation3 + $0x30] sm:$0xf0]  ;;  %v9443_v54 = vld [vmem:[#allocation3 + $0x31c] sm:$0xf] }
 0x7d1   :  { %4696 = vmatpush.bf16.msra.mxu1 %v8798_v56  ;;  %4724 = vmatpush.bf16.msra.mxu3 %v8802_v51  ;;  %v8638_v56 = vor.u32 %v9422_v11, %v8637_v63  ;;  %v8642_v51 = vor.u32 %v9418_v47, %v8639_v58  ;;  %v9410_v30 = vld [vmem:[#allocation3 + $0x214] sm:$0xf]  ;;  %v8606_v17 = vor.u32 %v9414_v37, %v8605_v5  ;;  %v9447_v63 = vld [vmem:[#allocation3 + $0x334] sm:$0xf0]  ;;  %v8487_v11 = vld [vmem:[#allocation3 + $0x138] sm:$0xf0] }
 0x7d2   :  { %v8607_v49 = vld [vmem:[#allocation3 + $0x230] sm:$0xf0]  ;;  %v8743_v26 = vld [vmem:[#allocation3 + $0x338] sm:$0xf0]  ;;  %v8742_v58 = vor.u32 %v9447_v63, %v8741_v25  ;;  %v9439_v5 = vld [vmem:[#allocation3 + $0x2f4] sm:$0xf0] }
 0x7d3   :  { %4683 = vmatpush.bf16.msra.mxu0 %v8510_v46  ;;  %4711 = vmatpush.bf16.msra.mxu2 %v8514_v14  ;;  %v8837_v46 = vld [vmem:[#allocation3 + $0x3d8] sm:$0xf]  ;;  %v8610_v42 = vor.u32 %v9410_v30, %v8607_v49  ;;  %v9371_v37 = vld [vmem:[#allocation3 + $0xdc] sm:$0xf]  ;;  %v9069_v41 = vld [vmem:[#allocation4 + $0x1c0] sm:$0xf] }
 0x7d4   :  { %v9471_v14 = vld [vmem:[#allocation3 + $0x3f4] sm:$0xf0]  ;;  %v8679_v22 = vld [vmem:[#allocation3 + $0x2b8] sm:$0xf0]  ;;  %v9532_v53 = vld [vmem:[#allocation4 + $0x1dc] sm:$0xf0] }
 0x7d5   :  { %4697 = vmatpush.bf16.msra.mxu1 %v8766_v62  ;;  %4725 = vmatpush.bf16.msra.mxu3 %v8770_v6  ;;  %v8350_v62 = vor.u32 %v9350_v33, %v8349_v36  ;;  %v8354_v6 = vor.u32 %v9346_v7, %v8351_v29  ;;  %v8838_v40 = vor.u32 %v9471_v14, %v8837_v46  ;;  %v8453_v36 = vld [vmem:[#allocation3 + $0xd8] sm:$0xf]  ;;  %v8455_v7 = vld [vmem:[#allocation3 + $0xf8] sm:$0xf0]  ;;  %v9529_v63 = vld [vmem:[#allocation4 + $0x1cc] sm:$0xf] }
 0x7d6   :  { %v9375_v33 = vld [vmem:[#allocation3 + $0xf4] sm:$0xf0]  ;;  %v8711_v29 = vld [vmem:[#allocation3 + $0x2f8] sm:$0xf0]  ;;  %v8458_v8 = vor.u32 %v9371_v37, %v8455_v7  ;;  %v9521_v37 = vld [vmem:[#allocation4 + $0x18c] sm:$0xf] }
 0x7d7   :  { %4684 = vmatpush.bf16.msra.mxu0 %v8478_v57  ;;  %4712 = vmatpush.bf16.msra.mxu2 %v8482_v32  ;;  %v8586_v57 = vor.u32 %v9403_v10, %v8583_v9  ;;  %v9399_v32 = vld [vmem:[#allocation3 + $0x1b4] sm:$0xf0]  ;;  %v8454_v30 = vor.u32 %v9375_v33, %v8453_v36  ;;  %v9363_v9 = vld [vmem:[#allocation3 + $0x9c] sm:$0xf]  ;;  %v9520_v36 = vld [vmem:[#allocation4 + $0x184] sm:$0xf] }
 0x7d8   :  { %v8421_v48 = vld [vmem:[#allocation3 + $0x98] sm:$0xf]  ;;  %v8391_v50 = vld [vmem:[#allocation3 + $0x78] sm:$0xf0]  ;;  %v9047_v7 = vld [vmem:[#allocation4 + $0x1a8] sm:$0xf0] }
 0x7d9   :  { %4698 = vmatpush.bf16.msra.mxu1 %v8734_v27  ;;  %4726 = vmatpush.bf16.msra.mxu3 %v8738_v59  ;;  %v8549_v27 = vld [vmem:[#allocation3 + $0x198] sm:$0xf]  ;;  %v9395_v59 = vld [vmem:[#allocation3 + $0x19c] sm:$0xf] }
 0x7da   :  { %v8550_v15 = vor.u32 %v9399_v32, %v8549_v27  ;;  %v9367_v46 = vld [vmem:[#allocation3 + $0xb4] sm:$0xf0]  ;;  %v9347_v2 = vld [vmem:[#allocation3 + $0x1c] sm:$0xf] }
 0x7db   :  { %4685 = vmatpush.bf16.msra.mxu0 %v8446_v19  ;;  %4713 = vmatpush.bf16.msra.mxu2 %v8450_v20  ;;  %v8554_v19 = vor.u32 %v9395_v59, %v8551_v0  ;;  %v9391_v20 = vld [vmem:[#allocation3 + $0x174] sm:$0xf0]  ;;  %v8422_v34 = vor.u32 %v9367_v46, %v8421_v48  ;;  %v9419_v59 = vld [vmem:[#allocation3 + $0x25c] sm:$0xf]  ;;  %v9512_v48 = vld [vmem:[#allocation4 + $0x144] sm:$0xf]  ;;  %v11708_v46 = vor.u32 %v9521_v37, %v9047_v7 }
 0x7dc   :  { %v9431_v10 = vld [vmem:[#allocation3 + $0x2b4] sm:$0xf0]  ;;  %v8647_v0 = vld [vmem:[#allocation3 + $0x278] sm:$0xf0]  ;;  %v9481_v37 = vld [vmem:[#allocation4 + $0x4c] sm:$0xf] }
 0x7dd   :  { %4699 = vmatpush.bf16.msra.mxu1 %v8702_v16  ;;  %4727 = vmatpush.bf16.msra.mxu3 %v8706_v39  ;;  %v8517_v16 = vld [vmem:[#allocation3 + $0x158] sm:$0xf]  ;;  %v9387_v39 = vld [vmem:[#allocation3 + $0x15c] sm:$0xf]  ;;  %v8887_v7 = vld [vmem:[#allocation4 + $0x68] sm:$0xf0] }
 0x7de   :  { %v8518_v55 = vor.u32 %v9391_v20, %v8517_v16  ;;  %v8645_v27 = vld [vmem:[#allocation3 + $0x258] sm:$0xf]  ;;  %v8359_v31 = vld [vmem:[#allocation3 + $0x38] sm:$0xf0] }
 0x7df   :  { %4686 = vmatpush.bf16.msra.mxu0 %v8414_v23  ;;  %4714 = vmatpush.bf16.msra.mxu2 %v8418_v13  ;;  %v8522_v23 = vor.u32 %v9387_v39, %v8519_v44  ;;  %v9383_v13 = vld [vmem:[#allocation3 + $0x134] sm:$0xf0]  ;;  %v9411_v39 = vld [vmem:[#allocation3 + $0x21c] sm:$0xf] }
 0x7e0   :  { %v9423_v38 = vld [vmem:[#allocation3 + $0x274] sm:$0xf0]  ;;  %v8615_v44 = vld [vmem:[#allocation3 + $0x238] sm:$0xf0] }
 0x7e1   :  { %4700 = vmatpush.bf16.msra.mxu1 %v8670_v61  ;;  %4728 = vmatpush.bf16.msra.mxu3 %v8674_v4  ;;  %v8485_v61 = vld [vmem:[#allocation3 + $0x118] sm:$0xf]  ;;  %v9379_v4 = vld [vmem:[#allocation3 + $0x11c] sm:$0xf] }
 0x7e2   :  { %v8486_v47 = vor.u32 %v9383_v13, %v8485_v61  ;;  %v8357_v3 = vld [vmem:[#allocation3 + $0x18] sm:$0xf]  ;;  %v9077_v61 = vld [vmem:[#allocation4 + $0x1c8] sm:$0xf] }
 0x7e3   :  { %4687 = vmatpush.bf16.msra.mxu0 %v8382_v21  ;;  %4715 = vmatpush.bf16.msra.mxu2 %v8386_v28  ;;  %v8490_v21 = vor.u32 %v9379_v4, %v8487_v11  ;;  %v8746_v28 = vor.u32 %v9443_v54, %v8743_v26  ;;  %v8613_v16 = vld [vmem:[#allocation3 + $0x218] sm:$0xf]  ;;  %v9533_v13 = vld [vmem:[#allocation4 + $0x1e4] sm:$0xf0]  ;;  %v9079_v4 = vld [vmem:[#allocation4 + $0x1e8] sm:$0xf0]  ;;  %v8618_v11 = vor.u32 %v9411_v39, %v8615_v44 }
 0x7e4   :  { %v9415_v20 = vld [vmem:[#allocation3 + $0x234] sm:$0xf0]  ;;  %v11690_v54 = vor.u32 %v9532_v53, %v9069_v41  ;;  %v11696_v33 = vor.u32 %v9529_v63, %v9079_v4  ;;  %v8909_v44 = vld [vmem:[#allocation4 + $0x80] sm:$0xf]  ;;  %v9488_v53 = vld [vmem:[#allocation4 + $0x84] sm:$0xf] }
 0x7e5   :  { %4701 = vmatpush.bf16.msra.mxu1 %v8638_v56  ;;  %4729 = vmatpush.bf16.msra.mxu3 %v8642_v51  ;;  %v8709_v56 = vld [vmem:[#allocation3 + $0x2d8] sm:$0xf]  ;;  %v9435_v51 = vld [vmem:[#allocation3 + $0x2dc] sm:$0xf]  ;;  %v8614_v25 = vor.u32 %v9415_v20, %v8613_v16  ;;  %v9501_v16 = vld [vmem:[#allocation4 + $0xe4] sm:$0xf0] }
 0x7e6   :  { %v8710_v49 = vor.u32 %v9439_v5, %v8709_v56  ;;  %v8714_v14 = vor.u32 %v9435_v51, %v8711_v29  ;;  %v9039_v56 = vld [vmem:[#allocation4 + $0x1a0] sm:$0xf0]  ;;  %v9525_v5 = vld [vmem:[#allocation4 + $0x1a4] sm:$0xf0]  ;;  %v9497_v20 = vld [vmem:[#allocation4 + $0xcc] sm:$0xf] }
 0x7e7   :  { %4688 = vmatpush.bf16.msra.mxu0 %v8350_v62  ;;  %4716 = vmatpush.bf16.msra.mxu2 %v8354_v6  ;;  %v8677_v62 = vld [vmem:[#allocation3 + $0x298] sm:$0xf]  ;;  %v9427_v6 = vld [vmem:[#allocation3 + $0x29c] sm:$0xf]  ;;  %v11703_v29 = vor.u32 %v9520_v36, %v9039_v56  ;;  %v9492_v41 = vld [vmem:[#allocation4 + $0x9c] sm:$0xf0] }
 0x7e8   :  { %v8682_v32 = vor.u32 %v9427_v6, %v8679_v22  ;;  %v8879_v56 = vld [vmem:[#allocation4 + $0x60] sm:$0xf0] }
 0x7e9   :  { %4702 = vmatpush.bf16.msra.mxu1 %v8606_v17  ;;  %4730 = vmatpush.bf16.msra.mxu3 %v8610_v42  ;;  %v8423_v17 = vld [vmem:[#allocation3 + $0xb8] sm:$0xf0]  ;;  %v8678_v42 = vor.u32 %v9431_v10, %v8677_v62  ;;  %v9007_v62 = vld [vmem:[#allocation4 + $0x160] sm:$0xf0]  ;;  %v9517_v10 = vld [vmem:[#allocation4 + $0x164] sm:$0xf0] }
 0x7ea   :  { %4689 = vmatmul.bf16.vlgmr.msra.gmra.mxu0 %v11657_v24  ;;  %4717 = vmatmul.bf16.vlgmr.msra.gmra.mxu2 %v11657_v24  ;;  %v11719_v22 = vor.u32 %v9512_v48, %v9007_v62  ;;  %v9476_v48 = vld [vmem:[#allocation4 + $0x1c] sm:$0xf0] }
 0x7eb   :  { %4737 = vmatpush.bf16.msrb.mxu0 %v8582_v35  ;;  %4765 = vmatpush.bf16.msrb.mxu2 %v8586_v57  ;;  %v8426_v35 = vor.u32 %v9363_v9, %v8423_v17  ;;  %v9359_v57 = vld [vmem:[#allocation3 + $0x74] sm:$0xf0]  ;;  %v9513_v9 = vld [vmem:[#allocation4 + $0x14c] sm:$0xf] }
 0x7ec   :  { %4703 = vmatmul.bf16.vlgmr.msra.gmra.mxu1 %v11676_v45  ;;  %4731 = vmatmul.bf16.vlgmr.msra.gmra.mxu3 %v11676_v45  ;;  %v9015_v17 = vld [vmem:[#allocation4 + $0x168] sm:$0xf0] }
 0x7ed   :  { %4751 = vmatpush.bf16.msrb.mxu1 %v8838_v40  ;;  %4779 = vmatpush.bf16.msrb.mxu3 %v8842_v43  ;;  %v8389_v40 = vld [vmem:[#allocation3 + $0x58] sm:$0xf]  ;;  %v9355_v43 = vld [vmem:[#allocation3 + $0x5c] sm:$0xf] }
 0x7ee   :  { %v8390_v1 = vor.u32 %v9359_v57, %v8389_v40  ;;  %v9504_v40 = vld [vmem:[#allocation4 + $0x104] sm:$0xf] }
 0x7ef   :  { %4738 = vmatpush.bf16.msrb.mxu0 %v8550_v15  ;;  %4766 = vmatpush.bf16.msrb.mxu2 %v8554_v19  ;;  %v9351_v15 = vld [vmem:[#allocation3 + $0x34] sm:$0xf0]  ;;  %v8394_v19 = vor.u32 %v9355_v43, %v8391_v50  ;;  %v8975_v57 = vld [vmem:[#allocation4 + $0x120] sm:$0xf0] }
 0x7f0   :  { %v11731_v50 = vor.u32 %v9504_v40, %v8975_v57  ;;  %v9473_v40 = vld [vmem:[#allocation4 + $0xc] sm:$0xf] }
 0x7f1   :  { %4752 = vmatpush.bf16.msrb.mxu1 %v8806_v12  ;;  %4780 = vmatpush.bf16.msrb.mxu3 %v8810_v18  ;;  %v8646_v12 = vor.u32 %v9423_v38, %v8645_v27  ;;  %v8650_v18 = vor.u32 %v9419_v59, %v8647_v0  ;;  %v8981_v27 = vld [vmem:[#allocation4 + $0x108] sm:$0xf]  ;;  %v9505_v38 = vld [vmem:[#allocation4 + $0x10c] sm:$0xf]  ;;  %v8941_v0 = vld [vmem:[#allocation4 + $0xc0] sm:$0xf] }
 0x7f2   :  { %v8855_v57 = vld [vmem:[#allocation4 + $0x28] sm:$0xf0] }
 0x7f3   :  { %4739 = vmatpush.bf16.msrb.mxu0 %v8518_v55  ;;  %4767 = vmatpush.bf16.msrb.mxu2 %v8522_v23  ;;  %v9528_v55 = vld [vmem:[#allocation4 + $0x1c4] sm:$0xf] }
 0x7f4   :  { %v9071_v23 = vld [vmem:[#allocation4 + $0x1e0] sm:$0xf0] }
 0x7f5   :  { %4753 = vmatpush.bf16.msrb.mxu1 %v8774_v60  ;;  %4781 = vmatpush.bf16.msrb.mxu3 %v8778_v52  ;;  %v8358_v60 = vor.u32 %v9351_v15, %v8357_v3  ;;  %v8362_v52 = vor.u32 %v9347_v2, %v8359_v31  ;;  %v11692_v26 = vor.u32 %v9528_v55, %v9071_v23  ;;  %v9496_v3 = vld [vmem:[#allocation4 + $0xc4] sm:$0xf]  ;;  %v8951_v2 = vld [vmem:[#allocation4 + $0xe8] sm:$0xf0]  ;;  %v8917_v23 = vld [vmem:[#allocation4 + $0x88] sm:$0xf] }
 0x7f6   :  { %v11748_v55 = vor.u32 %v9497_v20, %v8951_v2  ;;  %v9095_v20 = vld [vmem:[#allocation4 + $0x1f8] sm:$0xf0]  ;;  %v11784_v2 = vor.u32 %v9473_v40, %v8855_v57  ;;  %v9029_v40 = vld [vmem:[#allocation4 + $0x158] sm:$0xf] }
 0x7f7   :  { %4740 = vmatpush.bf16.msrb.mxu0 %v8486_v47  ;;  %4768 = vmatpush.bf16.msrb.mxu2 %v8490_v21  ;;  %v11694_v47 = vor.u32 %v9533_v13, %v9077_v61  ;;  %v9524_v21 = vld [vmem:[#allocation4 + $0x19c] sm:$0xf0]  ;;  %v9493_v61 = vld [vmem:[#allocation4 + $0xa4] sm:$0xf0]  ;;  %v9489_v13 = vld [vmem:[#allocation4 + $0x8c] sm:$0xf] }
 0x7f8   :  { %v11757_v4 = vor.u32 %v9493_v61, %v8917_v23  ;;  %13791 = vst [vmem:[#allocation27_spill] sm:$0xff] %v11784_v2  ;;  %v9526_v23 = vld [vmem:[#allocation4 + $0x1ac] sm:$0xf0]  ;;  %v9522_v61 = vld [vmem:[#allocation4 + $0x194] sm:$0xf] }
 0x7f9   :  { %4754 = vmatpush.bf16.msrb.mxu1 %v8742_v58  ;;  %4782 = vmatpush.bf16.msrb.mxu3 %v8746_v28  ;;  %v9037_v58 = vld [vmem:[#allocation4 + $0x180] sm:$0xf]  ;;  %v9045_v28 = vld [vmem:[#allocation4 + $0x188] sm:$0xf]  ;;  %v9519_v57 = vld [vmem:[#allocation4 + $0x174] sm:$0xf0] }
 0x7fa   :  { %v11699_v51 = vor.u32 %v9524_v21, %v9037_v58  ;;  %v9484_v58 = vld [vmem:[#allocation4 + $0x5c] sm:$0xf0]  ;;  %v9480_v21 = vld [vmem:[#allocation4 + $0x44] sm:$0xf] }
 0x7fb   :  { %4741 = vmatpush.bf16.msrb.mxu0 %v8454_v30  ;;  %4769 = vmatpush.bf16.msrb.mxu2 %v8458_v8  ;;  %v11705_v30 = vor.u32 %v9525_v5, %v9045_v28  ;;  %v9516_v8 = vld [vmem:[#allocation4 + $0x15c] sm:$0xf0]  ;;  %v8885_v28 = vld [vmem:[#allocation4 + $0x48] sm:$0xf]  ;;  %v11767_v62 = vor.u32 %v9480_v21, %v8879_v56  ;;  %v9523_v21 = vld [vmem:[#allocation4 + $0x19c] sm:$0xf] }
 0x7fc   :  { %v9485_v5 = vld [vmem:[#allocation4 + $0x64] sm:$0xf0]  ;;  %v9063_v56 = vld [vmem:[#allocation4 + $0x1b8] sm:$0xf0] }
 0x7fd   :  { %4755 = vmatpush.bf16.msrb.mxu1 %v8710_v49  ;;  %4783 = vmatpush.bf16.msrb.mxu3 %v8714_v14  ;;  %v9005_v49 = vld [vmem:[#allocation4 + $0x140] sm:$0xf]  ;;  %v9013_v14 = vld [vmem:[#allocation4 + $0x148] sm:$0xf] }
 0x7fe   :  { %v11714_v6 = vor.u32 %v9516_v8, %v9005_v49  ;;  %v8845_v8 = vld [vmem:[#allocation4] sm:$0xf] }
 0x7ff   :  { %4742 = vmatpush.bf16.msrb.mxu0 %v8422_v34  ;;  %4770 = vmatpush.bf16.msrb.mxu2 %v8426_v35  ;;  %v11721_v34 = vor.u32 %v9517_v10, %v9013_v14  ;;  %v9508_v35 = vld [vmem:[#allocation4 + $0x11c] sm:$0xf0]  ;;  %v11769_v14 = vor.u32 %v9485_v5, %v8885_v28  ;;  %v9472_v10 = vld [vmem:[#allocation4 + $0x4] sm:$0xf]  ;;  %v9021_v5 = vld [vmem:[#allocation4 + $0x150] sm:$0xf] }
 0x801   :  { %4756 = vmatpush.bf16.msrb.mxu1 %v8678_v42  ;;  %4784 = vmatpush.bf16.msrb.mxu3 %v8682_v32  ;;  %v8973_v42 = vld [vmem:[#allocation4 + $0x100] sm:$0xf]  ;;  %v9509_v32 = vld [vmem:[#allocation4 + $0x124] sm:$0xf0] }
 0x802   :  { %v11727_v43 = vor.u32 %v9508_v35, %v8973_v42  ;;  %v11733_v59 = vor.u32 %v9509_v32, %v8981_v27  ;;  %v11772_v42 = vor.u32 %v9481_v37, %v8887_v7  ;;  %v9477_v35 = vld [vmem:[#allocation4 + $0x24] sm:$0xf0]  ;;  %v9085_v27 = vld [vmem:[#allocation4 + $0x1d0] sm:$0xf] }
 0x803   :  { %4743 = vmatpush.bf16.msrb.mxu0 %v8390_v1  ;;  %4771 = vmatpush.bf16.msrb.mxu2 %v8394_v19  ;;  %v9500_v1 = vld [vmem:[#allocation4 + $0xdc] sm:$0xf0]  ;;  %v8949_v19 = vld [vmem:[#allocation4 + $0xc8] sm:$0xf]  ;;  %v9534_v32 = vld [vmem:[#allocation4 + $0x1ec] sm:$0xf0] }
 0x804   :  { %v11745_v39 = vor.u32 %v9501_v16, %v8949_v19  ;;  %v9531_v16 = vld [vmem:[#allocation4 + $0x1dc] sm:$0xf] }
 0x805   :  { %4757 = vmatpush.bf16.msrb.mxu1 %v8646_v12  ;;  %4785 = vmatpush.bf16.msrb.mxu3 %v8650_v18  ;;  %v8943_v12 = vld [vmem:[#allocation4 + $0xe0] sm:$0xf0]  ;;  %v11739_v18 = vor.u32 %v9500_v1, %v8941_v0  ;;  %v9087_v0 = vld [vmem:[#allocation4 + $0x1f0] sm:$0xf0]  ;;  %v9093_v1 = vld [vmem:[#allocation4 + $0x1d8] sm:$0xf] }
 0x806   :  { %v11743_v31 = vor.u32 %v9496_v3, %v8943_v12  ;;  %v9535_v3 = vld [vmem:[#allocation4 + $0x1f4] sm:$0xf0] }
 0x807   :  { %4744 = vmatpush.bf16.msrb.mxu0 %v8358_v60  ;;  %4772 = vmatpush.bf16.msrb.mxu2 %v8362_v52  ;;  %v8911_v60 = vld [vmem:[#allocation4 + $0xa0] sm:$0xf0]  ;;  %v11751_v52 = vor.u32 %v9492_v41, %v8909_v44  ;;  %v11786_v44 = vor.u32 %v9534_v32, %v9085_v27  ;;  %v9515_v27 = vld [vmem:[#allocation4 + $0x15c] sm:$0xf] }
 0x808   :  { %v11755_v63 = vor.u32 %v9488_v53, %v8911_v60  ;;  %v11790_v53 = vor.u32 %v9535_v3, %v9093_v1  ;;  %v9053_v60 = vld [vmem:[#allocation4 + $0x190] sm:$0xf]  ;;  %v9031_v32 = vld [vmem:[#allocation4 + $0x178] sm:$0xf0]  ;;  %v11827_v3 = vor.u32 %v9519_v57, %v9029_v40 }
 0x809   :  { %4758 = vmatpush.bf16.msrb.mxu1 %v8614_v25  ;;  %4786 = vmatpush.bf16.msrb.mxu3 %v8618_v11  ;;  %v8919_v25 = vld [vmem:[#allocation4 + $0xa8] sm:$0xf0]  ;;  %v8877_v11 = vld [vmem:[#allocation4 + $0x40] sm:$0xf]  ;;  %13792 = vst [vmem:[#allocation32_spill] sm:$0xff] %v11786_v44  ;;  %v11799_v28 = vor.u32 %v9526_v23, %v9053_v60  ;;  %v11830_v23 = vor.u32 %v9515_v27, %v9031_v32 }
 0x80a   :  { %4745 = vmatmul.bf16.vlgmr.msrb.gmra.mxu0 %v11657_v24  ;;  %4773 = vmatmul.bf16.vlgmr.msrb.gmra.mxu2 %v11657_v24  ;;  %v11724_v24 = vor.u32 %v9513_v9, %v9015_v17  ;;  %v11760_v36 = vor.u32 %v9489_v13, %v8919_v25  ;;  %v11763_v49 = vor.u32 %v9484_v58, %v8877_v11  ;;  %v8847_v9 = vld [vmem:[#allocation4 + $0x20] sm:$0xf0]  ;;  %v8853_v17 = vld [vmem:[#allocation4 + $0x8] sm:$0xf]  ;;  %v9055_v25 = vld [vmem:[#allocation4 + $0x1b0] sm:$0xf0] }
 0x80b   :  { %5177 = vmatpush.bf16.msra.mxu0 %v11690_v54  ;;  %5203 = vmatpush.bf16.msra.mxu2 %v11694_v47  ;;  %v11779_v12 = vor.u32 %v9472_v10, %v8847_v9  ;;  %v11781_v19 = vor.u32 %v9477_v35, %v8853_v17  ;;  %13794 = vst [vmem:[#allocation36_spill] sm:$0xff] %v11790_v53  ;;  %v9061_v11 = vld [vmem:[#allocation4 + $0x198] sm:$0xf]  ;;  %v11810_v10 = vld [vmem:[%s13255_s6] sm:$0xff]  ;;  %v13800_v9 = vmov 0.0|0.0  }
 0x80c   :  { %4759 = vmatmul.bf16.vlgmr.msrb.gmra.mxu1 %v11676_v45  ;;  %4787 = vmatmul.bf16.vlgmr.msrb.gmra.mxu3 %v11676_v45  ;;  %v8983_v45 = vld [vmem:[#allocation4 + $0x128] sm:$0xf0]  ;;  %v11793_v13 = vor.u32 %v9531_v16, %v9095_v20  ;;  %v9527_v58 = vld [vmem:[#allocation4 + $0x1b4] sm:$0xf0]  ;;  %13796 = vst [vmem:[#allocation42_spill] sm:$0xff] %v11799_v28  ;;  %v11803_v37 = vor.u32 %v9522_v61, %v9055_v25 }
 0x80d   :  { %5190 = vmatpush.bf16.msra.mxu1 %v11692_v26  ;;  %5216 = vmatpush.bf16.msra.mxu3 %v11696_v33  ;;  %v11736_v15 = vor.u32 %v9505_v38, %v8983_v45  ;;  %v9530_v38 = vld [vmem:[#allocation4 + $0x1d4] sm:$0xf]  ;;  %v11775_v45 = vor.u32 %v9476_v48, %v8845_v8  ;;  %v11805_v7 = vor.u32 %v9527_v58, %v9061_v11  ;;  %v9518_v8 = vld [vmem:[#allocation4 + $0x16c] sm:$0xf0]  ;;  %v8997_v25 = vld [vmem:[#allocation4 + $0x118] sm:$0xf] }
 0x80e   :  { %v11788_v41 = vor.u32 %v9530_v38, %v9087_v0  ;;  %13795 = vst [vmem:[#allocation38_spill] sm:$0xff] %v11793_v13  ;;  %v9514_v48 = vld [vmem:[#allocation4 + $0x154] sm:$0xf]  ;;  %v11814_v17 = vor.u32 %v9523_v21, %v9063_v56  ;;  %v11820_v38 = vor.u32 %v9518_v8, %v9021_v5  ;;  %v13357_v0 = vperm.slane %v11810_v10, 0  ;;  %v8989_v16 = vld [vmem:[#allocation4 + $0x110] sm:$0xf] }
 0x80f   :  { %5178 = vmatpush.bf16.msra.mxu0 %v11699_v51  ;;  %5204 = vmatpush.bf16.msra.mxu2 %v11705_v30  ;;  %13797 = vst [vmem:[#allocation39_spill] sm:$0xff] %v11803_v37  ;;  %v9023_v35 = vld [vmem:[#allocation4 + $0x170] sm:$0xf0]  ;;  %v9510_v20 = vld [vmem:[#allocation4 + $0x12c] sm:$0xf0] }
 0x810   :  { %13793 = vst [vmem:[#allocation33_spill] sm:$0xff] %v11788_v41  ;;  %v11825_v1 = vor.u32 %v9514_v48, %v9023_v35  ;;  %v9506_v60 = vld [vmem:[#allocation4 + $0x114] sm:$0xf]  ;;  %v9511_v11 = vld [vmem:[#allocation4 + $0x134] sm:$0xf0]  ;;  %v11833_v5 = vor.u32 %v9510_v20, %v8989_v16 }
 0x811   :  { %5191 = vmatpush.bf16.msra.mxu1 %v11703_v29  ;;  %5217 = vmatpush.bf16.msra.mxu3 %v11708_v46  ;;  %13798 = vst [vmem:[#allocation40_spill] sm:$0xff] %v11805_v7  ;;  %v8991_v61 = vld [vmem:[#allocation4 + $0x130] sm:$0xf0]  ;;  %v9507_v58 = vld [vmem:[#allocation4 + $0x11c] sm:$0xf]  ;;  %v11841_v35 = vor.u32 %v9511_v11, %v8997_v25 }
 0x812   :  { %13799 = vst [vmem:[#allocation41_spill] sm:$0xff] %v11810_v10  ;;  %v8999_v21 = vld [vmem:[#allocation4 + $0x138] sm:$0xf0]  ;;  %v11839_v48 = vor.u32 %v9506_v60, %v8991_v61  ;;  %v8957_v40 = vld [vmem:[#allocation4 + $0xd0] sm:$0xf] }
 0x813   :  { %5179 = vmatpush.bf16.msra.mxu0 %v11714_v6  ;;  %5205 = vmatpush.bf16.msra.mxu2 %v11721_v34  ;;  %13801 = vst [vmem:[#allocation43_spill] sm:$0xff] %v11814_v17  ;;  %v9502_v57 = vld [vmem:[#allocation4 + $0xec] sm:$0xf0]  ;;  %v9498_v27 = vld [vmem:[#allocation4 + $0xd4] sm:$0xf] }
 0x814   :  { %13802 = vst [vmem:[#allocation44_spill] sm:$0xff] %v11820_v38  ;;  %v8959_v16 = vld [vmem:[#allocation4 + $0xf0] sm:$0xf0]  ;;  %v8965_v20 = vld [vmem:[#allocation4 + $0xd8] sm:$0xf]  ;;  %v11850_v61 = vor.u32 %v9502_v57, %v8957_v40 }
 0x815   :  { %5192 = vmatpush.bf16.msra.mxu1 %v11719_v22  ;;  %5218 = vmatpush.bf16.msra.mxu3 %v11724_v24  ;;  %13803 = vst [vmem:[#allocation45_spill] sm:$0xff] %v11825_v1  ;;  %v11854_v25 = vor.u32 %v9498_v27, %v8959_v16  ;;  %v8927_v60 = vld [vmem:[#allocation4 + $0xb0] sm:$0xf0]  ;;  %v9491_v57 = vld [vmem:[#allocation4 + $0x9c] sm:$0xf] }
 0x816   :  { %13804 = vst [vmem:[#allocation46_spill] sm:$0xff] %v11827_v3  ;;  %v8893_v16 = vld [vmem:[#allocation4 + $0x50] sm:$0xf] }
 0x817   :  { %5180 = vmatpush.bf16.msra.mxu0 %v11727_v43  ;;  %5206 = vmatpush.bf16.msra.mxu2 %v11733_v59  ;;  %13805 = vst [vmem:[#allocation47_spill] sm:$0xff] %v11830_v23 }
 0x818   :  { %13806 = vst [vmem:[#allocation48_spill] sm:$0xff] %v11833_v5 }
 0x819   :  { %5193 = vmatpush.bf16.msra.mxu1 %v11731_v50  ;;  %5219 = vmatpush.bf16.msra.mxu3 %v11736_v15  ;;  %13807 = vst [vmem:[#allocation49_spill] sm:$0xff] %v11839_v48 }
 0x81a   :  { %13808 = vst [vmem:[#allocation50_spill] sm:$0xff] %v11841_v35 }
 0x81b   :  { %5181 = vmatpush.bf16.msra.mxu0 %v11739_v18  ;;  %5207 = vmatpush.bf16.msra.mxu2 %v11745_v39  ;;  %13811 = vst [vmem:[#allocation53_spill] sm:$0xff] %v11850_v61 }
 0x81c   :  { %13812 = vst [vmem:[#allocation54_spill] sm:$0xff] %v11854_v25 }
 0x81d   :  { %5194 = vmatpush.bf16.msra.mxu1 %v11743_v31  ;;  %5220 = vmatpush.bf16.msra.mxu3 %v11748_v55 }
 0x81f   :  { %5182 = vmatpush.bf16.msra.mxu0 %v11751_v52  ;;  %5208 = vmatpush.bf16.msra.mxu2 %v11757_v4 }
 0x821   :  { %5195 = vmatpush.bf16.msra.mxu1 %v11755_v63  ;;  %5221 = vmatpush.bf16.msra.mxu3 %v11760_v36 }
 0x823   :  { %5183 = vmatpush.bf16.msra.mxu0 %v11763_v49  ;;  %5209 = vmatpush.bf16.msra.mxu2 %v11769_v14 }
 0x825   :  { %5196 = vmatpush.bf16.msra.mxu1 %v11767_v62  ;;  %5222 = vmatpush.bf16.msra.mxu3 %v11772_v42 }
 0x827   :  { %5184 = vmatpush.bf16.msra.mxu0 %v11775_v45  ;;  %5210 = vmatpush.bf16.msra.mxu2 %v11781_v19  ;;  %v4578_v56 = vpop.f32.mrf.mxu0 }
 0x828   :  { %v4579_v8 = vadd.f32 %v4578_v56, %v13357_v0  ;;  %v9499_v0 = vld [vmem:[#allocation4 + $0xdc] sm:$0xf] }
 0x829   :  { %5197 = vmatpush.bf16.msra.mxu1 %v11779_v12  ;;  %5223 = vmatpush.bf16.msra.mxu3 %v11784_v2  ;;  %v4592_v32 = vpop.f32.mrf.mxu1 }
 0x82a   :  { %5185 = vmatmul.bf16.vlgmr.msra.gmra.mxu0 %v13800_v9  ;;  %5211 = vmatmul.bf16.vlgmr.msra.gmra.mxu2 %v13800_v9  ;;  %v11846_v56 = vadd.f32 %v4592_v32, %v4579_v8  ;;  %v9490_v8 = vld [vmem:[#allocation4 + $0x94] sm:$0xf] }
 0x82b   :  { %5229 = vmatpush.bf16.msrb.mxu0 %v11786_v44  ;;  %5255 = vmatpush.bf16.msrb.mxu2 %v11790_v53 }
 0x82c   :  { %5198 = vmatmul.bf16.vlgmr.msra.gmra.mxu1 %v13800_v9  ;;  %5224 = vmatmul.bf16.vlgmr.msra.gmra.mxu3 %v13800_v9  ;;  %13810 = vst [vmem:[#allocation52_spill] sm:$0xff] %v11846_v56  ;;  %v8933_v56 = vld [vmem:[#allocation4 + $0x98] sm:$0xf] }
 0x82d   :  { %5242 = vmatpush.bf16.msrb.mxu1 %v11788_v41  ;;  %5268 = vmatpush.bf16.msrb.mxu3 %v11793_v13  ;;  %v4606_v40 = vpop.f32.mrf.mxu2 }
 0x82f   :  { %5230 = vmatpush.bf16.msrb.mxu0 %v11799_v28  ;;  %5256 = vmatpush.bf16.msrb.mxu2 %v11805_v7  ;;  %v4620_v27 = vpop.f32.mrf.mxu3 }
 0x831   :  { %5243 = vmatpush.bf16.msrb.mxu1 %v11803_v37  ;;  %5269 = vmatpush.bf16.msrb.mxu3 %v11814_v17  ;;  %v9503_v17 = vld [vmem:[#allocation4 + $0xf4] sm:$0xf0] }
 0x832   :  { %v11856_v11 = vor.u32 %v9503_v17, %v8965_v20  ;;  %v9486_v20 = vld [vmem:[#allocation4 + $0x6c] sm:$0xf0] }
 0x833   :  { %5231 = vmatpush.bf16.msrb.mxu0 %v11820_v38  ;;  %5257 = vmatpush.bf16.msrb.mxu2 %v11827_v3  ;;  %v11844_v38 = vor.u32 %v9507_v58, %v8999_v21  ;;  %v8925_v58 = vld [vmem:[#allocation4 + $0x90] sm:$0xf] }
 0x834   :  { %13813 = vst [vmem:[#allocation55_spill] sm:$0xff] %v11856_v11  ;;  %v9494_v21 = vld [vmem:[#allocation4 + $0xac] sm:$0xf0] }
 0x835   :  { %5244 = vmatpush.bf16.msrb.mxu1 %v11825_v1  ;;  %5270 = vmatpush.bf16.msrb.mxu3 %v11830_v23  ;;  %13809 = vst [vmem:[#allocation51_spill] sm:$0xff] %v11844_v38  ;;  %v8967_v1 = vld [vmem:[#allocation4 + $0xf8] sm:$0xf0]  ;;  %v11864_v17 = vor.u32 %v9494_v21, %v8925_v58  ;;  %v8895_v58 = vld [vmem:[#allocation4 + $0x70] sm:$0xf0] }
 0x836   :  { %v11859_v32 = vor.u32 %v9499_v0, %v8967_v1  ;;  %v8935_v23 = vld [vmem:[#allocation4 + $0xb8] sm:$0xf0]  ;;  %v11868_v0 = vor.u32 %v9490_v8, %v8927_v60  ;;  %v8901_v21 = vld [vmem:[#allocation4 + $0x58] sm:$0xf]  ;;  %v11878_v60 = vor.u32 %v9486_v20, %v8893_v16  ;;  %v9474_v8 = vld [vmem:[#allocation4 + $0x14] sm:$0xf] }
 0x837   :  { %5232 = vmatpush.bf16.msrb.mxu0 %v11833_v5  ;;  %5258 = vmatpush.bf16.msrb.mxu2 %v11841_v35  ;;  %v9495_v5 = vld [vmem:[#allocation4 + $0xb4] sm:$0xf0]  ;;  %13816 = vst [vmem:[#allocation57_spill] sm:$0xff] %v11864_v17  ;;  %v9475_v16 = vld [vmem:[#allocation4 + $0x1c] sm:$0xf] }
 0x838   :  { %13814 = vst [vmem:[#allocation56_spill] sm:$0xff] %v11859_v32  ;;  %v11870_v1 = vor.u32 %v9495_v5, %v8933_v56  ;;  %v8861_v56 = vld [vmem:[#allocation4 + $0x10] sm:$0xf]  ;;  %v8871_v20 = vld [vmem:[#allocation4 + $0x38] sm:$0xf0] }
 0x839   :  { %5245 = vmatpush.bf16.msrb.mxu1 %v11839_v48  ;;  %5271 = vmatpush.bf16.msrb.mxu3 %v11844_v38  ;;  %v13815_v48 = vperm.slane %v11810_v10, 1  ;;  %13817 = vst [vmem:[#allocation58_spill] sm:$0xff] %v11868_v0  ;;  %v9482_v38 = vld [vmem:[#allocation4 + $0x54] sm:$0xf] }
 0x83a   :  { %13818 = vst [vmem:[#allocation59_spill] sm:$0xff] %v11870_v1  ;;  %v11882_v5 = vor.u32 %v9482_v38, %v8895_v58 }
 0x83b   :  { %v4607_v35 = vadd.f32 %v4606_v40, %v13815_v48  ;;  %5233 = vmatpush.bf16.msrb.mxu0 %v11850_v61  ;;  %5259 = vmatpush.bf16.msrb.mxu2 %v11856_v11  ;;  %v11875_v48 = vor.u32 %v9491_v57, %v8935_v23  ;;  %v9487_v40 = vld [vmem:[#allocation4 + $0x74] sm:$0xf0]  ;;  %v9483_v61 = vld [vmem:[#allocation4 + $0x5c] sm:$0xf]  ;;  %13821 = vst [vmem:[#allocation62_spill] sm:$0xff] %v11878_v60 }
 0x83c   :  { %13822 = vst [vmem:[#allocation63_spill] sm:$0xff] %v11882_v5  ;;  %v9478_v23 = vld [vmem:[#allocation4 + $0x2c] sm:$0xf0] }
 0x83d   :  { %5246 = vmatpush.bf16.msrb.mxu1 %v11854_v25  ;;  %v11872_v3 = vadd.f32 %v4620_v27, %v4607_v35  ;;  %5272 = vmatpush.bf16.msrb.mxu3 %v11859_v32  ;;  %13820 = vst [vmem:[#allocation61_spill] sm:$0xff] %v11875_v48  ;;  %v8903_v25 = vld [vmem:[#allocation4 + $0x78] sm:$0xf0]  ;;  %v11884_v35 = vor.u32 %v9487_v40, %v8901_v21  ;;  %v8863_v27 = vld [vmem:[#allocation4 + $0x30] sm:$0xf0]  ;;  %v11920_v21 = vpop.f32.mrf.mxu2 }
 0x83e   :  { %v11887_v57 = vor.u32 %v9483_v61, %v8903_v25  ;;  %v11894_v38 = vor.u32 %v9474_v8, %v8863_v27  ;;  %v11899_v61 = vor.u32 %v9475_v16, %v8871_v20  ;;  %v11904_v25 = vpop.f32.mrf.mxu0  ;;  %13831 = vst [vmem:[#allocation24_spill] sm:$0xff] %v11920_v21  ;;  %v13382_v27 = vperm.slane %v11810_v10, 3 }
 0x83f   :  { %13819 = vst [vmem:[#allocation60_spill] sm:$0xff] %v11872_v3  ;;  %5234 = vmatpush.bf16.msrb.mxu0 %v11864_v17  ;;  %5260 = vmatpush.bf16.msrb.mxu2 %v11870_v1  ;;  %v8869_v3 = vld [vmem:[#allocation4 + $0x18] sm:$0xf] }
 0x840   :  { %13823 = vst [vmem:[#allocation64_spill] sm:$0xff] %v11884_v35  ;;  %v9479_v17 = vld [vmem:[#allocation4 + $0x34] sm:$0xf0] }
 0x841   :  { %5247 = vmatpush.bf16.msrb.mxu1 %v11868_v0  ;;  %5273 = vmatpush.bf16.msrb.mxu3 %v11875_v48  ;;  %13824 = vst [vmem:[#allocation65_spill] sm:$0xff] %v11887_v57  ;;  %v11890_v0 = vor.u32 %v9478_v23, %v8861_v56  ;;  %v11896_v58 = vor.u32 %v9479_v17, %v8869_v3  ;;  %v11909_v3 = vpop.f32.mrf.mxu1  ;;  %v13383_v17 = vperm.slane %v11810_v10, 2  ;;  %v11923_v56 = vpop.f32.mrf.mxu3 }
 0x842   :  { %13826 = vst [vmem:[#allocation67_spill] sm:$0xff] %v11894_v38 }
 0x843   :  { %5235 = vmatpush.bf16.msrb.mxu0 %v11878_v60  ;;  %13825 = vst [vmem:[#allocation66_spill] sm:$0xff] %v11890_v0  ;;  %5261 = vmatpush.bf16.msrb.mxu2 %v11884_v35 }
 0x844   :  { %13827 = vst [vmem:[#allocation68_spill] sm:$0xff] %v11896_v58 }
 0x845   :  { %5248 = vmatpush.bf16.msrb.mxu1 %v11882_v5  ;;  %5274 = vmatpush.bf16.msrb.mxu3 %v11887_v57  ;;  %13828 = vst [vmem:[#allocation69_spill] sm:$0xff] %v11899_v61 }
 0x846   :  { %13829 = vst [vmem:[#allocation70_spill] sm:$0xff] %v11904_v25 }
 0x847   :  { %5236 = vmatpush.bf16.msrb.mxu0 %v11890_v0  ;;  %5262 = vmatpush.bf16.msrb.mxu2 %v11896_v58  ;;  %13830 = vst [vmem:[#allocation71_spill] sm:$0xff] %v11909_v3  ;;  %v4634_v40 = vpop.f32.mrf.mxu0  ;;  %v13841_v3 = vld [vmem:[#allocation45_spill] sm:$0xff] }
 0x848   :  { %13832 = vst [vmem:[#allocation25_spill] sm:$0xff] %v11923_v56 }
 0x849   :  { %5249 = vmatpush.bf16.msrb.mxu1 %v11894_v38  ;;  %5275 = vmatpush.bf16.msrb.mxu3 %v11899_v61  ;;  %v4648_v23 = vpop.f32.mrf.mxu1 }
 0x84a   :  { %5237 = vmatmul.bf16.vlgmr.msrb.gmra.mxu0 %v13800_v9  ;;  %5263 = vmatmul.bf16.vlgmr.msrb.gmra.mxu2 %v13800_v9 }
 0x84b   :  { %5432 = vmatpush.bf16.msra.mxu0 %v11690_v54  ;;  %5458 = vmatpush.bf16.msra.mxu2 %v11694_v47 }
 0x84c   :  { %5250 = vmatmul.bf16.vlgmr.msrb.gmra.mxu1 %v13800_v9  ;;  %5276 = vmatmul.bf16.vlgmr.msrb.gmra.mxu3 %v13800_v9  ;;  %v4635_v9 = vadd.f32 %v4634_v40, %v13383_v17  ;;  %v13838_v17 = vld [vmem:[#allocation43_spill] sm:$0xff] }
 0x84d   :  { %5445 = vmatpush.bf16.msra.mxu1 %v11692_v26  ;;  %5471 = vmatpush.bf16.msra.mxu3 %v11696_v33  ;;  %v4662_v16 = vpop.f32.mrf.mxu2 }
 0x84e   :  { %v11930_v8 = vadd.f32 %v4648_v23, %v4635_v9  ;;  %v4663_v20 = vadd.f32 %v4662_v16, %v13382_v27 }
 0x84f   :  { %5433 = vmatpush.bf16.msra.mxu0 %v11699_v51  ;;  %5459 = vmatpush.bf16.msra.mxu2 %v11705_v30  ;;  %v4676_v40 = vpop.f32.mrf.mxu3  ;;  %v11956_v23 = vpop.f32.mrf.mxu0 }
 0x850   :  { %13833 = vst [vmem:[#allocation28_spill] sm:$0xff] %v11930_v8  ;;  %v11942_v9 = vadd.f32 %v4676_v40, %v4663_v20  ;;  %v13390_v20 = vperm.slane %v11810_v10, 4 }
 0x851   :  { %5446 = vmatpush.bf16.msra.mxu1 %v11703_v29  ;;  %5472 = vmatpush.bf16.msra.mxu3 %v11708_v46  ;;  %13835 = vst [vmem:[#allocation31_spill] sm:$0xff] %v11956_v23  ;;  %v11961_v16 = vpop.f32.mrf.mxu1 }
 0x852   :  { %13834 = vst [vmem:[#allocation30_spill] sm:$0xff] %v11942_v9 }
 0x853   :  { %5434 = vmatpush.bf16.msra.mxu0 %v11714_v6  ;;  %5460 = vmatpush.bf16.msra.mxu2 %v11721_v34  ;;  %13836 = vst [vmem:[#allocation29_spill] sm:$0xff] %v11961_v16  ;;  %v13839_v16 = vld [vmem:[#allocation44_spill] sm:$0xff] }
 0x855   :  { %5447 = vmatpush.bf16.msra.mxu1 %v11719_v22  ;;  %5473 = vmatpush.bf16.msra.mxu3 %v11724_v24  ;;  %v11970_v40 = vpop.f32.mrf.mxu2 }
 0x856   :  { %13837 = vst [vmem:[#allocation34_spill] sm:$0xff] %v11970_v40  ;;  %v13392_v40 = vperm.slane %v11810_v10, 5 }
 0x857   :  { %5435 = vmatpush.bf16.msra.mxu0 %v11727_v43  ;;  %5461 = vmatpush.bf16.msra.mxu2 %v11733_v59  ;;  %v11975_v23 = vpop.f32.mrf.mxu3 }
 0x858   :  { %13840 = vst [vmem:[#allocation35_spill] sm:$0xff] %v11975_v23  ;;  %v13847_v23 = vld [vmem:[#allocation50_spill] sm:$0xff] }
 0x859   :  { %5448 = vmatpush.bf16.msra.mxu1 %v11731_v50  ;;  %5474 = vmatpush.bf16.msra.mxu3 %v11736_v15 }
 0x85b   :  { %5436 = vmatpush.bf16.msra.mxu0 %v11739_v18  ;;  %5462 = vmatpush.bf16.msra.mxu2 %v11745_v39 }
 0x85d   :  { %5449 = vmatpush.bf16.msra.mxu1 %v11743_v31  ;;  %5475 = vmatpush.bf16.msra.mxu3 %v11748_v55 }
 0x85f   :  { %5437 = vmatpush.bf16.msra.mxu0 %v11751_v52  ;;  %5463 = vmatpush.bf16.msra.mxu2 %v11757_v4 }
 0x861   :  { %5450 = vmatpush.bf16.msra.mxu1 %v11755_v63  ;;  %5476 = vmatpush.bf16.msra.mxu3 %v11760_v36 }
 0x863   :  { %5438 = vmatpush.bf16.msra.mxu0 %v11763_v49  ;;  %5464 = vmatpush.bf16.msra.mxu2 %v11769_v14 }
 0x865   :  { %5451 = vmatpush.bf16.msra.mxu1 %v11767_v62  ;;  %5477 = vmatpush.bf16.msra.mxu3 %v11772_v42 }
 0x867   :  { %5439 = vmatpush.bf16.msra.mxu0 %v11775_v45  ;;  %5465 = vmatpush.bf16.msra.mxu2 %v11781_v19  ;;  %v4690_v27 = vpop.f32.mrf.mxu0 }
 0x868   :  { %v4691_v56 = vadd.f32 %v4690_v27, %v13390_v20  ;;  %v13848_v20 = vld [vmem:[#allocation51_spill] sm:$0xff] }
 0x869   :  { %5452 = vmatpush.bf16.msra.mxu1 %v11779_v12  ;;  %5478 = vmatpush.bf16.msra.mxu3 %v11784_v2  ;;  %v4704_v21 = vpop.f32.mrf.mxu1 }
 0x86a   :  { %v11980_v25 = vadd.f32 %v4704_v21, %v4691_v56  ;;  %v13849_v21 = vld [vmem:[#allocation53_spill] sm:$0xff] }
 0x86b   :  { %5484 = vmatpush.bf16.msrb.mxu0 %v11786_v44  ;;  %5510 = vmatpush.bf16.msrb.mxu2 %v11790_v53 }
 0x86c   :  { %13842 = vst [vmem:[#allocation26_spill] sm:$0xff] %v11980_v25  ;;  %v13850_v25 = vld [vmem:[#allocation54_spill] sm:$0xff] }
 0x86d   :  { %5497 = vmatpush.bf16.msrb.mxu1 %v11788_v41  ;;  %5523 = vmatpush.bf16.msrb.mxu3 %v11793_v13 }
 0x86f   :  { %5485 = vmatpush.bf16.msrb.mxu0 %v11799_v28  ;;  %5511 = vmatpush.bf16.msrb.mxu2 %v11805_v7  ;;  %v13844_v7 = vld [vmem:[#allocation47_spill] sm:$0xff]  ;;  %v13845_v28 = vld [vmem:[#allocation48_spill] sm:$0xff]  ;;  %v4732_v56 = vpop.f32.mrf.mxu3 }
 0x871   :  { %5498 = vmatpush.bf16.msrb.mxu1 %v11803_v37  ;;  %5524 = vmatpush.bf16.msrb.mxu3 %v13838_v17  ;;  %v13843_v37 = vld [vmem:[#allocation46_spill] sm:$0xff]  ;;  %v13846_v17 = vld [vmem:[#allocation49_spill] sm:$0xff] }
 0x873   :  { %5486 = vmatpush.bf16.msrb.mxu0 %v13839_v16  ;;  %5512 = vmatpush.bf16.msrb.mxu2 %v13843_v37  ;;  %v4718_v16 = vpop.f32.mrf.mxu2 }
 0x874   :  { %v4719_v27 = vadd.f32 %v4718_v16, %v13392_v40  ;;  %v4692_v16 = vpop.f32.mrf.mxu0 }
 0x875   :  { %5499 = vmatpush.bf16.msrb.mxu1 %v13841_v3  ;;  %5525 = vmatpush.bf16.msrb.mxu3 %v13844_v7 }
 0x876   :  { %v11993_v37 = vadd.f32 %v4732_v56, %v4719_v27  ;;  %v4706_v27 = vpop.f32.mrf.mxu1  ;;  %v3919_v56 = vperm.slane %v11810_v10, 6 }
 0x877   :  { %5487 = vmatpush.bf16.msrb.mxu0 %v13845_v28  ;;  %5513 = vmatpush.bf16.msrb.mxu2 %v13847_v23  ;;  %v13853_v28 = vld [vmem:[#allocation58_spill] sm:$0xff] }
 0x878   :  { %13851 = vst [vmem:[#allocation73_spill] sm:$0xff] %v11993_v37  ;;  %v4734_v37 = vpop.f32.mrf.mxu3 }
 0x879   :  { %5500 = vmatpush.bf16.msrb.mxu1 %v13846_v17  ;;  %5526 = vmatpush.bf16.msrb.mxu3 %v13848_v20  ;;  %v13852_v17 = vld [vmem:[#allocation57_spill] sm:$0xff] }
 0x87b   :  { %5488 = vmatpush.bf16.msrb.mxu0 %v13849_v21  ;;  %5514 = vmatpush.bf16.msrb.mxu2 %v11856_v11  ;;  %v4720_v40 = vpop.f32.mrf.mxu2 }
 0x87d   :  { %5501 = vmatpush.bf16.msrb.mxu1 %v13850_v25  ;;  %5527 = vmatpush.bf16.msrb.mxu3 %v11859_v32 }
 0x87f   :  { %5489 = vmatpush.bf16.msrb.mxu0 %v13852_v17  ;;  %5515 = vmatpush.bf16.msrb.mxu2 %v11870_v1 }
 0x881   :  { %5502 = vmatpush.bf16.msrb.mxu1 %v13853_v28  ;;  %5528 = vmatpush.bf16.msrb.mxu3 %v11875_v48 }
 0x883   :  { %5490 = vmatpush.bf16.msrb.mxu0 %v11878_v60  ;;  %5516 = vmatpush.bf16.msrb.mxu2 %v11884_v35 }
 0x885   :  { %5503 = vmatpush.bf16.msrb.mxu1 %v11882_v5  ;;  %5529 = vmatpush.bf16.msrb.mxu3 %v11887_v57  ;;  %v13419_v57 = vperm.slane %v11810_v10, 7 }
 0x887   :  { %5491 = vmatpush.bf16.msrb.mxu0 %v11890_v0  ;;  %5517 = vmatpush.bf16.msrb.mxu2 %v11896_v58  ;;  %v4746_v60 = vpop.f32.mrf.mxu0 }
 0x888   :  { %v4747_v5 = vadd.f32 %v4746_v60, %v3919_v56  ;;  %v13856_v60 = vld [vmem:[#allocation52_spill] sm:$0xff] }
 0x889   :  { %5504 = vmatpush.bf16.msrb.mxu1 %v11894_v38  ;;  %5530 = vmatpush.bf16.msrb.mxu3 %v11899_v61  ;;  %v4760_v48 = vpop.f32.mrf.mxu1 }
 0x88a   :  { %v12010_v35 = vadd.f32 %v4760_v48, %v4747_v5  ;;  %v13857_v48 = vld [vmem:[#allocation60_spill] sm:$0xff] }
 0x88c   :  { %13854 = vst [vmem:[#allocation37_spill] sm:$0xff] %v12010_v35 }
 0x88d   :  { %v4774_v0 = vpop.f32.mrf.mxu2 }
 0x88e   :  { %v4775_v38 = vadd.f32 %v4774_v0, %v13419_v57 }
 0x88f   :  { %v4788_v1 = vpop.f32.mrf.mxu3  ;;  %v4748_v28 = vpop.f32.mrf.mxu0 }
 0x890   :  { %v12015_v58 = vadd.f32 %v4788_v1, %v4775_v38 }
 0x891   :  { %v4762_v61 = vpop.f32.mrf.mxu1 }
 0x892   :  { %13855 = vst [vmem:[#allocation22_spill] sm:$0xff] %v12015_v58 }
 0x895   :  { %v4776_v17 = vpop.f32.mrf.mxu2 }
 0x897   :  { %v12017_v32 = vpop.f32.mrf.mxu3 }
 0x8a7   :  { %v5186_v11 = vpop.f32.mrf.mxu0 }
 0x8a8   :  { %v5281_v21 = vadd.f32 %v5186_v11, %v13856_v60 }
 0x8a9   :  { %v5199_v25 = vpop.f32.mrf.mxu1 }
 0x8aa   :  { %v5282_v5 = vadd.f32 %v5199_v25, %v13857_v48  ;;  %v9099_v3 = vmul.f32 -1.442695, %v5281_v21  ;;  %v13858_v25 = vperm.slane %v11810_v10, 4 }
 0x8ac   :  { %v9100_v0 = vmul.f32 -1.442695, %v5282_v5  ;;  %9800 = vpow2.f32 %v9099_v3  ;;  %v4693_v48 = vadd.f32 %v4692_v16, %v13858_v25 }
 0x8ad   :  { %v5212_v35 = vpop.f32.mrf.mxu2 }
 0x8ae   :  { %9802 = vpow2.f32 %v9100_v0  ;;  %v5283_v11 = vadd.f32 %v5212_v35, %v11930_v8  ;;  %v12032_v5 = vadd.f32 %v4706_v27, %v4693_v48 }
 0x8af   :  { %v5225_v20 = vpop.f32.mrf.mxu3  ;;  %v5188_v23 = vpop.f32.mrf.mxu0 }
 0x8b0   :  { %v13859_v23 = vperm.slane %v11810_v10, 5  ;;  %v9101_v3 = vmul.f32 -1.442695, %v5283_v11  ;;  %13860 = vst [vmem:[#allocation74_spill] sm:$0xff] %v12032_v5 }
 0x8b1   :  { %v5201_v7 = vpop.f32.mrf.mxu1 }
 0x8b2   :  { %v9801_v57 = vpop.eup %9800  ;;  %v4721_v7 = vadd.f32 %v4720_v40, %v13859_v23 }
 0x8b3   :  { %v12021_v13 = vadd.f32 1.0, %v9801_v57 }
 0x8b4   :  { %v9803_v58 = vpop.eup %9802 }
 0x8b5   :  { %v5214_v1 = vpop.f32.mrf.mxu2  ;;  %v12023_v53 = vadd.f32 1.0, %v9803_v58  ;;  %9804 = vrcp.f32 %v12021_v13  ;;  %v12034_v58 = vadd.f32 %v4734_v37, %v4721_v7  ;;  %vm5318_vm1 = vweird.f32 %v12021_v13 }
 0x8b7   :  { %v5227_v38 = vpop.f32.mrf.mxu3  ;;  %9806 = vrcp.f32 %v12023_v53  ;;  %13861 = vst [vmem:[#allocation72_spill] sm:$0xff] %v12034_v58  ;;  %vm5333_vm2 = vweird.f32 %v12023_v53 }
 0x8b8   :  { %9808 = vpow2.f32 %v9101_v3  ;;  %v4749_v38 = vadd.f32 %v4748_v28, %v3919_v56 }
 0x8bb   :  { %v12037_v16 = vpop.eup %9804 }
 0x8bc   :  { %v5314_v27 = vmul.f32 %v12037_v16, %v12021_v13  ;;  %vm5319_vm0 = vweird.f32 %v12037_v16 }
 0x8bd   :  { %v12040_v25 = vpop.eup %9806  ;;  %vm12079_vm3 = vmor %vm5318_vm1, %vm5319_vm0 }
 0x8be   :  { %v5329_v37 = vmul.f32 %v12040_v25, %v12023_v53  ;;  %v9809_v28 = vpop.eup %9808  ;;  %vm5334_vm11 = vweird.f32 %v12040_v25 }
 0x8bf   :  { %vm5335_vm4 = vmor %vm5333_vm2, %vm5334_vm11 }
 0x8c7   :  { %v5238_v21 = vpop.f32.mrf.mxu0 }
 0x8c8   :  { %v5289_v57 = vrot.slane %v5238_v21, 4  ;;  %v12044_v21 = vadd.f32 %v4762_v61, %v4749_v38 }
 0x8c9   :  { %v5251_v0 = vpop.f32.mrf.mxu1 }
 0x8ca   :  { %v5290_v1 = vrot.slane %v5251_v0, 4  ;;  %v5297_v35 = vadd.f32 %v5289_v57, %v12032_v5  ;;  %13862 = vst [vmem:[#allocation23_spill] sm:$0xff] %v12044_v21 }
 0x8cc   :  { %v5298_v40 = vadd.f32 %v5290_v1, %v12034_v58  ;;  %v9102_v23 = vmul.f32 -1.442695, %v5297_v35  ;;  %v5315_v1 = vsub.f32 1.0, %v5314_v27  ;;  %v5330_v35 = vsub.f32 1.0, %v5329_v37 }
 0x8cd   :  { %v5264_v48 = vpop.f32.mrf.mxu2 }
 0x8ce   :  { %v9103_v11 = vmul.f32 -1.442695, %v5298_v40  ;;  %9810 = vpow2.f32 %v9102_v23  ;;  %v5291_v7 = vrot.slane %v5264_v48, 4  ;;  %v12049_v40 = vadd.f32 1.0, %v9809_v28 }
 0x8cf   :  { %v5277_v3 = vpop.f32.mrf.mxu3  ;;  %v5240_v57 = vpop.f32.mrf.mxu0  ;;  %v5316_v38 = vmul.f32 %v12037_v16, %v5315_v1  ;;  %v13863_v48 = vperm.slane %v11810_v10, 7  ;;  %v5339_v1 = vand.u32 2147483648, %v12023_v53 }
 0x8d0   :  { %9812 = vpow2.f32 %v9103_v11  ;;  %v5299_v0 = vadd.f32 %v5291_v7, %v12044_v21  ;;  %v5331_v11 = vmul.f32 %v12040_v25, %v5330_v35  ;;  %v5292_v7 = vrot.slane %v5277_v3, 4 }
 0x8d1   :  { %v5253_v56 = vpop.f32.mrf.mxu1  ;;  %v4777_v57 = vadd.f32 %v4776_v17, %v13863_v48  ;;  %v5337_v3 = vand.u32 2147483647, %v12023_v53 }
 0x8d2   :  { %v9104_v58 = vmul.f32 -1.442695, %v5299_v0  ;;  %v5324_v56 = vand.u32 2147483648, %v12021_v13  ;;  %v5332_v0 = vadd.f32 %v12040_v25, %v5331_v11 }
 0x8d3   :  { %v12066_v17 = vadd.f32 %v12017_v32, %v4777_v57  ;;  %vm5338_vm6 = vcmp.eq.f32.partialorder %v5337_v3, 8.507059e+37 }
 0x8d4   :  { %v9811_v5 = vpop.eup %9810  ;;  %9814 = vpow2.f32 %v9104_v58  ;;  %v5284_v58 = vadd.f32 %v5225_v20, %v11942_v9  ;;  %v5322_v20 = vand.u32 2147483647, %v12021_v13  ;;  %v5325_v57 = vor.u32 1.1754944e-38, %v5324_v56 }
 0x8d5   :  { %v12052_v8 = vadd.f32 1.0, %v9811_v5  ;;  %v5266_v23 = vpop.f32.mrf.mxu2  ;;  %9816 = vrcp.f32 %v12049_v40  ;;  %v5317_v5 = vadd.f32 %v12037_v16, %v5316_v38  ;;  %13864 = vst [vmem:[#allocation75_spill] sm:$0xff] %v12066_v17  ;;  %v5300_v13 = vadd.f32 %v5292_v7, %v12066_v17 }
 0x8d6   :  { %v9813_v61 = vpop.eup %9812  ;;  %v5336_v11 = vsel %vm5335_vm4, %v12040_v25, %v5332_v0  ;;  %vm5323_vm5 = vcmp.eq.f32.partialorder %v5322_v20, 8.507059e+37  ;;  %vm5348_vm4 = vweird.f32 %v12049_v40 }
 0x8d7   :  { %v12058_v27 = vadd.f32 1.0, %v9813_v61  ;;  %v5279_v37 = vpop.f32.mrf.mxu3  ;;  %9818 = vrcp.f32 %v12052_v8  ;;  %v5321_v23 = vsel %vm12079_vm3, %v12037_v16, %v5317_v5  ;;  %v5387_v7 = vand.u32 2147483648, %v12052_v8 }
 0x8d8   :  { %v5326_v32 = vsel %vm5323_vm5, %v5325_v57, %v5321_v23  ;;  %vm5381_vm10 = vweird.f32 %v12052_v8 }
 0x8d9   :  { %9820 = vrcp.f32 %v12058_v27  ;;  %v5402_v25 = vand.u32 2147483648, %v12058_v27  ;;  %v5400_v23 = vand.u32 2147483647, %v12058_v27  ;;  %vm5396_vm12 = vweird.f32 %v12058_v27 }
 0x8da   :  { %v9815_v28 = vpop.eup %9814  ;;  %9822 = vtanh.f32 %v5284_v58 }
 0x8db   :  { %v12074_v35 = vadd.f32 1.0, %v9815_v28  ;;  %v12076_v61 = vpop.eup %9816  ;;  %v5340_v28 = vor.u32 1.1754944e-38, %v5339_v1  ;;  %v5385_v1 = vand.u32 2147483647, %v12052_v8  ;;  %vm5401_vm0 = vcmp.eq.f32.partialorder %v5400_v23, 8.507059e+37 }
 0x8dc   :  { %v5344_v58 = vmul.f32 %v12076_v61, %v12049_v40  ;;  %vm5349_vm1 = vweird.f32 %v12076_v61 }
 0x8dd   :  { %v9819_v38 = vpop.eup %9818  ;;  %9824 = vrcp.f32 %v12074_v35  ;;  %v5341_v5 = vsel %vm5338_vm6, %v5340_v28, %v5336_v11  ;;  %vm5386_vm14 = vcmp.eq.f32.partialorder %v5385_v1, 8.507059e+37  ;;  %vm5411_vm2 = vweird.f32 %v12074_v35  ;;  %vm5350_vm5 = vmor %vm5348_vm4, %vm5349_vm1 }
 0x8de   :  { %v5377_v37 = vmul.f32 %v9819_v38, %v12052_v8  ;;  %9826 = vtanh.f32 %v5300_v13  ;;  %vm5382_vm7 = vweird.f32 %v9819_v38  ;;  %v5359_v3 = vmul.f32 0.0, %v5341_v5 }
 0x8df   :  { %v9821_v48 = vpop.eup %9820  ;;  %v5345_v13 = vsub.f32 1.0, %v5344_v58  ;;  %vm5383_vm13 = vmor %vm5381_vm10, %vm5382_vm7 }
 0x8e0   :  { %v5392_v53 = vmul.f32 %v9821_v48, %v12058_v27  ;;  %v5378_v16 = vsub.f32 1.0, %v5377_v37  ;;  %v9823_v56 = vpop.eup %9822  ;;  %vm5397_vm9 = vweird.f32 %v9821_v48  ;;  %v5388_v37 = vor.u32 1.1754944e-38, %v5387_v7 }
 0x8e1   :  { %v5360_v17 = vmul.f32 %v9823_v56, %v5326_v32  ;;  %vm5398_vm15 = vmor %vm5396_vm12, %vm5397_vm9  ;;  %v5346_v27 = vmul.f32 %v12076_v61, %v5345_v13 }
 0x8e2   :  { %v5393_v10 = vsub.f32 1.0, %v5392_v53  ;;  %v5379_v0 = vmul.f32 %v9819_v38, %v5378_v16  ;;  %v5403_v53 = vor.u32 1.1754944e-38, %v5402_v25 }
 0x8e3   :  { %v9825_v20 = vpop.eup %9824  ;;  %v12102_v56 = vadd.f32 %v5360_v17, %v5359_v3  ;;  %v5415_v17 = vand.u32 2147483647, %v12074_v35 }
 0x8e4   :  { %v5394_v9 = vmul.f32 %v9821_v48, %v5393_v10  ;;  %v5407_v57 = vmul.f32 %v9825_v20, %v12074_v35  ;;  %v5380_v11 = vadd.f32 %v9819_v38, %v5379_v0  ;;  %v9827_v10 = vpop.eup %9826  ;;  %vm5412_vm11 = vweird.f32 %v9825_v20 }
 0x8e5   :  { %9828 = vtanh.f32 %v12102_v56  ;;  %vm5413_vm3 = vmor %vm5411_vm2, %vm5412_vm11  ;;  %vm5416_vm6 = vcmp.eq.f32.partialorder %v5415_v17, 8.507059e+37  ;;  %v13880_v17 = vld [vmem:[#allocation50_spill] sm:$0xff] }
 0x8e6   :  { %v5395_v28 = vadd.f32 %v9821_v48, %v5394_v9  ;;  %v5408_v16 = vsub.f32 1.0, %v5407_v57  ;;  %v5384_v21 = vsel %vm5383_vm13, %v9819_v38, %v5380_v11  ;;  %v5417_v38 = vand.u32 2147483648, %v12074_v35 }
 0x8e7   :  { %v5389_v32 = vsel %vm5386_vm14, %v5388_v37, %v5384_v21  ;;  %v5347_v21 = vadd.f32 %v12076_v61, %v5346_v27  ;;  %v13876_v27 = vld [vmem:[#allocation46_spill] sm:$0xff] }
 0x8e8   :  { %v5399_v5 = vsel %vm5398_vm15, %v9821_v48, %v5395_v28  ;;  %v5409_v0 = vmul.f32 %v9825_v20, %v5408_v16  ;;  %v5423_v58 = vmul.f32 %v9827_v10, %v5389_v32  ;;  %v5354_v48 = vand.u32 2147483648, %v12049_v40  ;;  %v13870_v10 = vld [vmem:[#allocation42_spill] sm:$0xff]  ;;  %v13871_v32 = vld [vmem:[#allocation39_spill] sm:$0xff] }
 0x8e9   :  { %v5404_v8 = vsel %vm5401_vm0, %v5403_v53, %v5399_v5  ;;  %v5418_v1 = vor.u32 1.1754944e-38, %v5417_v38  ;;  %v5351_v3 = vsel %vm5350_vm5, %v12076_v61, %v5347_v21  ;;  %v13868_v61 = vld [vmem:[#allocation36_spill] sm:$0xff]  ;;  %v13879_v21 = vld [vmem:[#allocation49_spill] sm:$0xff] }
 0x8ea   :  { %v5422_v60 = vmul.f32 0.0, %v5404_v8  ;;  %v5410_v9 = vadd.f32 %v9825_v20, %v5409_v0  ;;  %v5355_v11 = vor.u32 1.1754944e-38, %v5354_v48  ;;  %v13872_v5 = vld [vmem:[#allocation40_spill] sm:$0xff]  ;;  %v13873_v0 = vld [vmem:[#allocation43_spill] sm:$0xff] }
 0x8eb   :  { %v9829_v23 = vpop.eup %9828  ;;  %v13874_v8 = vld [vmem:[#allocation44_spill] sm:$0xff]  ;;  %v13881_v48 = vld [vmem:[#allocation51_spill] sm:$0xff] }
 0x8ec   :  { %v12105_v7 = vadd.f32 %v5423_v58, %v5422_v60  ;;  %v5352_v60 = vand.u32 2147483647, %v12049_v40  ;;  %v5414_v25 = vsel %vm5413_vm3, %v9825_v20, %v5410_v9  ;;  %v13869_v20 = vld [vmem:[#allocation38_spill] sm:$0xff]  ;;  %v13875_v58 = vld [vmem:[#allocation45_spill] sm:$0xff]  ;;  %v13877_v9 = vld [vmem:[#allocation47_spill] sm:$0xff] }
 0x8ed   :  { %v5419_v13 = vsel %vm5416_vm6, %v5418_v1, %v5414_v25  ;;  %v13878_v38 = vld [vmem:[#allocation48_spill] sm:$0xff]  ;;  %v13883_v25 = vld [vmem:[#allocation54_spill] sm:$0xff]  ;;  %v13884_v1 = vld [vmem:[#allocation55_spill] sm:$0xff] }
 0x8ee   :  { %9830 = vtanh.f32 %v12105_v7  ;;  %vm5353_vm7 = vcmp.eq.f32.partialorder %v5352_v60, 8.507059e+37  ;;  %v13882_v60 = vld [vmem:[#allocation53_spill] sm:$0xff] }
 0x8ef   :  { %v5356_v35 = vsel %vm5353_vm7, %v5355_v11, %v5351_v3  ;;  %v13886_v3 = vld [vmem:[#allocation57_spill] sm:$0xff]  ;;  %v13888_v11 = vld [vmem:[#allocation59_spill] sm:$0xff] }
 0x8f0   :  { %v5363_v28 = vmul.f32 %v9829_v23, %v5356_v35  ;;  %v13885_v23 = vld [vmem:[#allocation56_spill] sm:$0xff]  ;;  %v13890_v35 = vld [vmem:[#allocation62_spill] sm:$0xff] }
 0x8f4   :  { %v9831_v57 = vpop.eup %9830 }
 0x8f5   :  { %v12118_v37 = vmul.f32 %v9831_v57, %v5419_v13  ;;  %v13887_v57 = vld [vmem:[#allocation58_spill] sm:$0xff]  ;;  %v13889_v13 = vld [vmem:[#allocation61_spill] sm:$0xff] }
 0x8f7   :  { %13867 = vst [vmem:[#allocation76_spill] sm:$0xff] %v12118_v37  ;;  %v5428_v53 = vrot.slane %v12118_v37, 4  ;;  %v13895_v37 = vld [vmem:[#allocation67_spill] sm:$0xff] }
 0x8f9   :  { %v5430_v16 = vsel %vm1879_vm8, %v5363_v28, %v5428_v53  ;;  %v13891_v28 = vld [vmem:[#allocation63_spill] sm:$0xff]  ;;  %v13892_v53 = vld [vmem:[#allocation64_spill] sm:$0xff] }
 0x8fa   :  { %v5431_v40 = vpack.c.bf16 %v5430_v16, %v5430_v16  ;;  %v13893_v16 = vld [vmem:[#allocation65_spill] sm:$0xff] }
 0x8fc   :  { %5440 = vmatmul.bf16.vlgmr.msra.gmra.mxu0 %v5431_v40  ;;  %5453 = vmatmul.bf16.vlgmr.msra.gmra.mxu1 %v5431_v40 }
 0x8fd   :  { %5466 = vmatmul.bf16.vlgmr.msra.gmra.mxu2 %v5431_v40  ;;  %5479 = vmatmul.bf16.vlgmr.msra.gmra.mxu3 %v5431_v40 }
 0x8fe   :  { %5708 = vmatpush.bf16.msra.mxu0 %v11690_v54  ;;  %5721 = vmatpush.bf16.msra.mxu1 %v11692_v26 }
 0x8ff   :  { %5734 = vmatpush.bf16.msra.mxu2 %v11694_v47  ;;  %5747 = vmatpush.bf16.msra.mxu3 %v11696_v33 }
 0x902   :  { %5709 = vmatpush.bf16.msra.mxu0 %v11699_v51  ;;  %5722 = vmatpush.bf16.msra.mxu1 %v11703_v29 }
 0x903   :  { %5735 = vmatpush.bf16.msra.mxu2 %v11705_v30  ;;  %5748 = vmatpush.bf16.msra.mxu3 %v11708_v46 }
 0x906   :  { %5710 = vmatpush.bf16.msra.mxu0 %v11714_v6  ;;  %5723 = vmatpush.bf16.msra.mxu1 %v11719_v22 }
 0x907   :  { %5736 = vmatpush.bf16.msra.mxu2 %v11721_v34  ;;  %5749 = vmatpush.bf16.msra.mxu3 %v11724_v24 }
 0x90a   :  { %5711 = vmatpush.bf16.msra.mxu0 %v11727_v43  ;;  %5724 = vmatpush.bf16.msra.mxu1 %v11731_v50 }
 0x90b   :  { %5737 = vmatpush.bf16.msra.mxu2 %v11733_v59  ;;  %5750 = vmatpush.bf16.msra.mxu3 %v11736_v15 }
 0x90c   :  { %5492 = vmatmul.bf16.vlgmr.msrb.gmra.mxu0 %v5431_v40  ;;  %5505 = vmatmul.bf16.vlgmr.msrb.gmra.mxu1 %v5431_v40 }
 0x90d   :  { %5518 = vmatmul.bf16.vlgmr.msrb.gmra.mxu2 %v5431_v40  ;;  %5531 = vmatmul.bf16.vlgmr.msrb.gmra.mxu3 %v5431_v40  ;;  %v13894_v40 = vld [vmem:[#allocation66_spill] sm:$0xff] }
 0x90e   :  { %5712 = vmatpush.bf16.msra.mxu0 %v11739_v18  ;;  %5725 = vmatpush.bf16.msra.mxu1 %v11743_v31 }
 0x90f   :  { %5738 = vmatpush.bf16.msra.mxu2 %v11745_v39  ;;  %5751 = vmatpush.bf16.msra.mxu3 %v11748_v55 }
 0x912   :  { %5713 = vmatpush.bf16.msra.mxu0 %v11751_v52  ;;  %5726 = vmatpush.bf16.msra.mxu1 %v11755_v63 }
 0x913   :  { %5739 = vmatpush.bf16.msra.mxu2 %v11757_v4  ;;  %5752 = vmatpush.bf16.msra.mxu3 %v11760_v36 }
 0x916   :  { %5714 = vmatpush.bf16.msra.mxu0 %v11763_v49  ;;  %5727 = vmatpush.bf16.msra.mxu1 %v11767_v62 }
 0x917   :  { %5740 = vmatpush.bf16.msra.mxu2 %v11769_v14  ;;  %5753 = vmatpush.bf16.msra.mxu3 %v11772_v42 }
 0x91a   :  { %5715 = vmatpush.bf16.msra.mxu0 %v11775_v45  ;;  %5728 = vmatpush.bf16.msra.mxu1 %v11779_v12 }
 0x91b   :  { %5741 = vmatpush.bf16.msra.mxu2 %v11781_v19  ;;  %5754 = vmatpush.bf16.msra.mxu3 %v11784_v2 }
 0x91e   :  { %5760 = vmatpush.bf16.msrb.mxu0 %v11786_v44  ;;  %5773 = vmatpush.bf16.msrb.mxu1 %v11788_v41 }
 0x91f   :  { %5786 = vmatpush.bf16.msrb.mxu2 %v13868_v61  ;;  %5799 = vmatpush.bf16.msrb.mxu3 %v13869_v20 }
 0x922   :  { %5761 = vmatpush.bf16.msrb.mxu0 %v13870_v10  ;;  %5774 = vmatpush.bf16.msrb.mxu1 %v13871_v32 }
 0x923   :  { %5787 = vmatpush.bf16.msrb.mxu2 %v13872_v5  ;;  %5800 = vmatpush.bf16.msrb.mxu3 %v13873_v0 }
 0x926   :  { %5762 = vmatpush.bf16.msrb.mxu0 %v13874_v8  ;;  %5775 = vmatpush.bf16.msrb.mxu1 %v13875_v58 }
 0x927   :  { %5788 = vmatpush.bf16.msrb.mxu2 %v13876_v27  ;;  %5801 = vmatpush.bf16.msrb.mxu3 %v13877_v9 }
 0x92a   :  { %5763 = vmatpush.bf16.msrb.mxu0 %v13878_v38  ;;  %5776 = vmatpush.bf16.msrb.mxu1 %v13879_v21 }
 0x92b   :  { %5789 = vmatpush.bf16.msrb.mxu2 %v13880_v17  ;;  %5802 = vmatpush.bf16.msrb.mxu3 %v13881_v48 }
 0x92e   :  { %5764 = vmatpush.bf16.msrb.mxu0 %v13882_v60  ;;  %5777 = vmatpush.bf16.msrb.mxu1 %v13883_v25  ;;  %v13898_v25 = vld [vmem:[#allocation52_spill] sm:$0xff] }
 0x92f   :  { %5790 = vmatpush.bf16.msrb.mxu2 %v13884_v1  ;;  %5803 = vmatpush.bf16.msrb.mxu3 %v13885_v23  ;;  %v13896_v23 = vld [vmem:[#allocation68_spill] sm:$0xff] }
 0x930   :  { %v13899_v60 = vld [vmem:[#allocation60_spill] sm:$0xff] }
 0x932   :  { %5765 = vmatpush.bf16.msrb.mxu0 %v13886_v3  ;;  %5778 = vmatpush.bf16.msrb.mxu1 %v13887_v57  ;;  %v13897_v3 = vld [vmem:[#allocation69_spill] sm:$0xff] }
 0x933   :  { %5791 = vmatpush.bf16.msrb.mxu2 %v13888_v11  ;;  %5804 = vmatpush.bf16.msrb.mxu3 %v13889_v13 }
 0x936   :  { %5766 = vmatpush.bf16.msrb.mxu0 %v13890_v35  ;;  %5779 = vmatpush.bf16.msrb.mxu1 %v13891_v28 }
 0x937   :  { %5792 = vmatpush.bf16.msrb.mxu2 %v13892_v53  ;;  %5805 = vmatpush.bf16.msrb.mxu3 %v13893_v16 }
 0x93a   :  { %5767 = vmatpush.bf16.msrb.mxu0 %v13894_v40  ;;  %5780 = vmatpush.bf16.msrb.mxu1 %v13895_v37 }
 0x93b   :  { %5793 = vmatpush.bf16.msrb.mxu2 %v13896_v23  ;;  %5806 = vmatpush.bf16.msrb.mxu3 %v13897_v3  ;;  %v13900_v23 = vld [vmem:[#allocation28_spill] sm:$0xff] }
 0x979   :  { %v5441_v57 = vpop.f32.mrf.mxu0  ;;  %v5454_v11 = vpop.f32.mrf.mxu1 }
 0x97a   :  { %v5540_v1 = vrot.slane %v5441_v57, 6  ;;  %v5541_v13 = vrot.slane %v5454_v11, 6 }
 0x97c   :  { %v5548_v35 = vadd.f32 %v5540_v1, %v13898_v25  ;;  %v5549_v28 = vadd.f32 %v5541_v13, %v13899_v60 }
 0x97e   :  { %v9105_v48 = vmul.f32 -1.442695, %v5548_v35  ;;  %v9106_v53 = vmul.f32 -1.442695, %v5549_v28  ;;  %v13901_v28 = vld [vmem:[#allocation74_spill] sm:$0xff] }
 0x980   :  { %9832 = vpow2.f32 %v9105_v48  ;;  %v5467_v16 = vpop.f32.mrf.mxu2  ;;  %v5480_v17 = vpop.f32.mrf.mxu3 }
 0x981   :  { %9834 = vpow2.f32 %v9106_v53  ;;  %v5542_v40 = vrot.slane %v5467_v16, 6  ;;  %v5443_v37 = vpop.f32.mrf.mxu0  ;;  %v5456_v21 = vpop.f32.mrf.mxu1 }
 0x983   :  { %v5550_v38 = vadd.f32 %v5542_v40, %v13900_v23 }
 0x985   :  { %v9107_v3 = vmul.f32 -1.442695, %v5550_v38  ;;  %v13902_v38 = vld [vmem:[#allocation72_spill] sm:$0xff] }
 0x986   :  { %v9833_v9 = vpop.eup %9832 }
 0x987   :  { %v9835_v27 = vpop.eup %9834  ;;  %v12189_v57 = vadd.f32 1.0, %v9833_v9  ;;  %9836 = vpow2.f32 %v9107_v3 }
 0x988   :  { %v12191_v11 = vadd.f32 1.0, %v9835_v27  ;;  %v5469_v1 = vpop.f32.mrf.mxu2  ;;  %v5482_v13 = vpop.f32.mrf.mxu3 }
 0x989   :  { %9838 = vrcp.f32 %v12189_v57  ;;  %v5493_v48 = vpop.f32.mrf.mxu0  ;;  %v5506_v35 = vpop.f32.mrf.mxu1  ;;  %vm5585_vm14 = vweird.f32 %v12189_v57 }
 0x98a   :  { %9840 = vrcp.f32 %v12191_v11  ;;  %v5556_v37 = vrot.slane %v5493_v48, 6  ;;  %v5557_v21 = vrot.slane %v5506_v35, 6  ;;  %vm5600_vm12 = vweird.f32 %v12191_v11 }
 0x98c   :  { %v5564_v53 = vadd.f32 %v5556_v37, %v13901_v28  ;;  %v5565_v16 = vadd.f32 %v5557_v21, %v13902_v38  ;;  %v13903_v21 = vld [vmem:[#allocation23_spill] sm:$0xff] }
 0x98d   :  { %v9837_v40 = vpop.eup %9836 }
 0x98e   :  { %v9108_v23 = vmul.f32 -1.442695, %v5564_v53  ;;  %v9109_v27 = vmul.f32 -1.442695, %v5565_v16  ;;  %v12199_v37 = vadd.f32 1.0, %v9837_v40  ;;  %v5543_v53 = vrot.slane %v5480_v17, 6 }
 0x98f   :  { %v9839_v9 = vpop.eup %9838 }
 0x990   :  { %v9841_v60 = vpop.eup %9840  ;;  %v5581_v3 = vmul.f32 %v9839_v9, %v12189_v57  ;;  %v5519_v1 = vpop.f32.mrf.mxu2  ;;  %9842 = vpow2.f32 %v9108_v23  ;;  %vm5586_vm10 = vweird.f32 %v9839_v9 }
 0x991   :  { %v5532_v13 = vpop.f32.mrf.mxu3  ;;  %v5596_v25 = vmul.f32 %v9841_v60, %v12191_v11  ;;  %v5495_v58 = vpop.f32.mrf.mxu0  ;;  %v5558_v48 = vrot.slane %v5519_v1, 6  ;;  %9844 = vpow2.f32 %v9109_v27  ;;  %vm5601_vm9 = vweird.f32 %v9841_v60  ;;  %vm5587_vm15 = vmor %vm5585_vm14, %vm5586_vm10 }
 0x992   :  { %v5508_v8 = vpop.f32.mrf.mxu1  ;;  %v5582_v35 = vsub.f32 1.0, %v5581_v3  ;;  %9846 = vrcp.f32 %v12199_v37  ;;  %v5591_v27 = vand.u32 2147483648, %v12189_v57  ;;  %vm12215_vm13 = vmor %vm5600_vm12, %vm5601_vm9  ;;  %vm5615_vm12 = vweird.f32 %v12199_v37 }
 0x993   :  { %v5597_v0 = vsub.f32 1.0, %v5596_v25  ;;  %v5566_v38 = vadd.f32 %v5558_v48, %v13903_v21  ;;  %v13904_v25 = vld [vmem:[#allocation30_spill] sm:$0xff] }
 0x994   :  { %v5583_v5 = vmul.f32 %v9839_v9, %v5582_v35  ;;  %v5551_v40 = vadd.f32 %v5543_v53, %v13904_v25  ;;  %v13907_v25 = vld [vmem:[#allocation75_spill] sm:$0xff] }
 0x995   :  { %v9110_v16 = vmul.f32 -1.442695, %v5566_v38  ;;  %v5598_v28 = vmul.f32 %v9841_v60, %v5597_v0 }
 0x996   :  { %v9843_v32 = vpop.eup %9842  ;;  %v5584_v17 = vadd.f32 %v9839_v9, %v5583_v5  ;;  %v5589_v5 = vand.u32 2147483647, %v12189_v57 }
 0x997   :  { %9848 = vpow2.f32 %v9110_v16  ;;  %v9845_v8 = vpop.eup %9844  ;;  %v12203_v23 = vadd.f32 1.0, %v9843_v32  ;;  %v5599_v0 = vadd.f32 %v9841_v60, %v5598_v28  ;;  %v5559_v32 = vrot.slane %v5532_v13, 6 }
 0x998   :  { %v5521_v10 = vpop.f32.mrf.mxu2  ;;  %v12207_v3 = vadd.f32 1.0, %v9845_v8  ;;  %v12213_v38 = vpop.eup %9846  ;;  %v5604_v28 = vand.u32 2147483647, %v12191_v11  ;;  %v5588_v35 = vsel %vm5587_vm15, %v9839_v9, %v5584_v17  ;;  %v5592_v8 = vor.u32 1.1754944e-38, %v5591_v27 }
 0x999   :  { %v5534_v58 = vpop.f32.mrf.mxu3  ;;  %9850 = vrcp.f32 %v12203_v23  ;;  %v5606_v10 = vand.u32 2147483648, %v12191_v11  ;;  %v5603_v53 = vsel %vm12215_vm13, %v9841_v60, %v5599_v0  ;;  %v5567_v21 = vadd.f32 %v5559_v32, %v13907_v25 }
 0x99a   :  { %9852 = vrcp.f32 %v12207_v3  ;;  %v5611_v58 = vmul.f32 %v12213_v38, %v12199_v37  ;;  %vm5590_vm0 = vcmp.eq.f32.partialorder %v5589_v5, 8.507059e+37  ;;  %vm5605_vm11 = vcmp.eq.f32.partialorder %v5604_v28, 8.507059e+37 }
 0x99b   :  { %9854 = vtanh.f32 %v5551_v40  ;;  %v5607_v16 = vor.u32 1.1754944e-38, %v5606_v10  ;;  %v5593_v11 = vsel %vm5590_vm0, %v5592_v8, %v5588_v35  ;;  %v5627_v60 = vrot.slane %v12102_v56, 6 }
 0x99c   :  { %v5612_v10 = vsub.f32 1.0, %v5611_v58  ;;  %v5657_v5 = vand.u32 2147483648, %v12203_v23  ;;  %v5672_v28 = vand.u32 2147483648, %v12207_v3  ;;  %v5655_v35 = vand.u32 2147483647, %v12203_v23 }
 0x99d   :  { %v9849_v48 = vpop.eup %9848  ;;  %v5608_v9 = vsel %vm5605_vm11, %v5607_v16, %v5603_v53  ;;  %v5670_v56 = vand.u32 2147483647, %v12207_v3  ;;  %vm5651_vm3 = vweird.f32 %v12203_v23  ;;  %vm5666_vm4 = vweird.f32 %v12207_v3 }
 0x99e   :  { %v12224_v13 = vadd.f32 1.0, %v9849_v48  ;;  %v5629_v27 = vmul.f32 %v5627_v60, %v5608_v9  ;;  %v5613_v58 = vmul.f32 %v12213_v38, %v5612_v10  ;;  %v5658_v9 = vor.u32 1.1754944e-38, %v5657_v5 }
 0x99f   :  { %v9851_v20 = vpop.eup %9850  ;;  %vm5656_vm7 = vcmp.eq.f32.partialorder %v5655_v35, 8.507059e+37  ;;  %v5693_v10 = vrot.slane %v12105_v7, 2  ;;  %vm5671_vm9 = vcmp.eq.f32.partialorder %v5670_v56, 8.507059e+37  ;;  %vm5616_vm10 = vweird.f32 %v12213_v38 }
 0x9a0   :  { %9856 = vrcp.f32 %v12224_v13  ;;  %v9853_v57 = vpop.eup %9852  ;;  %v5647_v40 = vmul.f32 %v9851_v20, %v12203_v23  ;;  %vm5652_vm1 = vweird.f32 %v9851_v20  ;;  %v5621_v5 = vand.u32 2147483648, %v12199_v37  ;;  %vm5617_vm14 = vmor %vm5615_vm12, %vm5616_vm10 }
 0x9a1   :  { %v5662_v17 = vmul.f32 %v9853_v57, %v12207_v3  ;;  %v9855_v0 = vpop.eup %9854  ;;  %9858 = vtanh.f32 %v5567_v21  ;;  %vm5667_vm2 = vweird.f32 %v9853_v57  ;;  %vm5653_vm5 = vmor %vm5651_vm3, %vm5652_vm1  ;;  %v5619_v7 = vand.u32 2147483647, %v12199_v37 }
 0x9a2   :  { %v5648_v1 = vsub.f32 1.0, %v5647_v40  ;;  %v5630_v32 = vmul.f32 %v9855_v0, %v5593_v11  ;;  %vm5668_vm6 = vmor %vm5666_vm4, %vm5667_vm2  ;;  %vm5681_vm15 = vweird.f32 %v12224_v13  ;;  %v5685_v35 = vand.u32 2147483647, %v12224_v13 }
 0x9a3   :  { %v5663_v48 = vsub.f32 1.0, %v5662_v17  ;;  %v5673_v17 = vor.u32 1.1754944e-38, %v5672_v28  ;;  %v5622_v56 = vor.u32 1.1754944e-38, %v5621_v5  ;;  %vm5620_vm11 = vcmp.eq.f32.partialorder %v5619_v7, 8.507059e+37  ;;  %v13917_v5 = vld [vmem:[#allocation47_spill] sm:$0xff]  ;;  %v13918_v7 = vld [vmem:[#allocation48_spill] sm:$0xff] }
 0x9a4   :  { %v5649_v25 = vmul.f32 %v9851_v20, %v5648_v1  ;;  %v12240_v11 = vadd.f32 %v5630_v32, %v5629_v27  ;;  %v5614_v32 = vadd.f32 %v12213_v38, %v5613_v58  ;;  %vm5686_vm1 = vcmp.eq.f32.partialorder %v5685_v35, 8.507059e+37  ;;  %v13922_v35 = vld [vmem:[#allocation53_spill] sm:$0xff] }
 0x9a5   :  { %v5664_v16 = vmul.f32 %v9853_v57, %v5663_v48 }
 0x9a6   :  { %v9857_v53 = vpop.eup %9856  ;;  %v5650_v8 = vadd.f32 %v9851_v20, %v5649_v25  ;;  %9860 = vtanh.f32 %v12240_v11 }
 0x9a7   :  { %v5677_v21 = vmul.f32 %v9857_v53, %v12224_v13  ;;  %v5665_v40 = vadd.f32 %v9853_v57, %v5664_v16  ;;  %v9859_v60 = vpop.eup %9858  ;;  %vm5682_vm13 = vweird.f32 %v9857_v53 }
 0x9a8   :  { %v5654_v1 = vsel %vm5653_vm5, %v9851_v20, %v5650_v8  ;;  %vm5683_vm0 = vmor %vm5681_vm15, %vm5682_vm13 }
 0x9a9   :  { %v5678_v0 = vsub.f32 1.0, %v5677_v21  ;;  %v5659_v48 = vsel %vm5656_vm7, %v5658_v9, %v5654_v1  ;;  %v5669_v61 = vsel %vm5668_vm6, %v9853_v57, %v5665_v40  ;;  %v5618_v57 = vsel %vm5617_vm14, %v12213_v38, %v5614_v32  ;;  %v13916_v32 = vld [vmem:[#allocation46_spill] sm:$0xff] }
 0x9aa   :  { %v5674_v23 = vsel %vm5671_vm9, %v5673_v17, %v5669_v61  ;;  %v5696_v27 = vmul.f32 %v9859_v60, %v5659_v48  ;;  %v5687_v61 = vand.u32 2147483648, %v12224_v13  ;;  %v5623_v21 = vsel %vm5620_vm11, %v5622_v56, %v5618_v57  ;;  %v13908_v13 = vld [vmem:[#allocation36_spill] sm:$0xff]  ;;  %v13911_v48 = vld [vmem:[#allocation39_spill] sm:$0xff] }
 0x9ab   :  { %v5679_v25 = vmul.f32 %v9857_v53, %v5678_v0  ;;  %v5695_v3 = vmul.f32 %v5693_v10, %v5674_v23  ;;  %v13910_v10 = vld [vmem:[#allocation42_spill] sm:$0xff]  ;;  %v13913_v23 = vld [vmem:[#allocation43_spill] sm:$0xff] }
 0x9ac   :  { %v9861_v16 = vpop.eup %9860  ;;  %v5688_v37 = vor.u32 1.1754944e-38, %v5687_v61  ;;  %v13920_v61 = vld [vmem:[#allocation50_spill] sm:$0xff]  ;;  %v13921_v57 = vld [vmem:[#allocation51_spill] sm:$0xff] }
 0x9ad   :  { %v12248_v28 = vadd.f32 %v5696_v27, %v5695_v3  ;;  %v5680_v20 = vadd.f32 %v9857_v53, %v5679_v25  ;;  %v5633_v8 = vmul.f32 %v9861_v16, %v5623_v21  ;;  %v13912_v25 = vld [vmem:[#allocation40_spill] sm:$0xff]  ;;  %v13915_v3 = vld [vmem:[#allocation45_spill] sm:$0xff]  ;;  %v13923_v16 = vld [vmem:[#allocation54_spill] sm:$0xff] }
 0x9ae   :  { %v13914_v27 = vld [vmem:[#allocation44_spill] sm:$0xff]  ;;  %v13924_v56 = vld [vmem:[#allocation55_spill] sm:$0xff]  ;;  %v13926_v21 = vld [vmem:[#allocation57_spill] sm:$0xff] }
 0x9af   :  { %9862 = vtanh.f32 %v12248_v28  ;;  %v5684_v58 = vsel %vm5683_vm0, %v9857_v53, %v5680_v20  ;;  %v5701_v17 = vrot.slane %v5633_v8, 2  ;;  %v13909_v53 = vld [vmem:[#allocation38_spill] sm:$0xff]  ;;  %v13919_v20 = vld [vmem:[#allocation49_spill] sm:$0xff]  ;;  %v13928_v8 = vld [vmem:[#allocation59_spill] sm:$0xff] }
 0x9b0   :  { %v5689_v40 = vsel %vm5686_vm1, %v5688_v37, %v5684_v58  ;;  %v13925_v58 = vld [vmem:[#allocation56_spill] sm:$0xff]  ;;  %v13927_v37 = vld [vmem:[#allocation58_spill] sm:$0xff] }
 0x9b5   :  { %v9863_v9 = vpop.eup %9862 }
 0x9b6   :  { %v5699_v60 = vmul.f32 %v9863_v9, %v5689_v40  ;;  %v13929_v9 = vld [vmem:[#allocation61_spill] sm:$0xff]  ;;  %v13930_v40 = vld [vmem:[#allocation62_spill] sm:$0xff] }
 0x9b8   :  { %v5704_v0 = vrot.slane %v5699_v60, 2  ;;  %v13931_v60 = vld [vmem:[#allocation63_spill] sm:$0xff] }
 0x9ba   :  { %v5706_v38 = vsel %vm1879_vm8, %v5701_v17, %v5704_v0  ;;  %v13932_v17 = vld [vmem:[#allocation64_spill] sm:$0xff]  ;;  %v13933_v0 = vld [vmem:[#allocation65_spill] sm:$0xff] }
 0x9bb   :  { %v5707_v1 = vpack.c.bf16 %v5706_v38, %v5706_v38  ;;  %v13934_v38 = vld [vmem:[#allocation66_spill] sm:$0xff] }
 0x9bd   :  { %5716 = vmatmul.bf16.vlgmr.msra.gmra.mxu0 %v5707_v1  ;;  %5729 = vmatmul.bf16.vlgmr.msra.gmra.mxu1 %v5707_v1 }
 0x9be   :  { %5742 = vmatmul.bf16.vlgmr.msra.gmra.mxu2 %v5707_v1  ;;  %5755 = vmatmul.bf16.vlgmr.msra.gmra.mxu3 %v5707_v1 }
 0x9bf   :  { %5969 = vmatpush.bf16.msra.mxu0 %v11690_v54  ;;  %5982 = vmatpush.bf16.msra.mxu1 %v11692_v26 }
 0x9c0   :  { %5995 = vmatpush.bf16.msra.mxu2 %v11694_v47  ;;  %6008 = vmatpush.bf16.msra.mxu3 %v11696_v33 }
 0x9c3   :  { %5970 = vmatpush.bf16.msra.mxu0 %v11699_v51  ;;  %5983 = vmatpush.bf16.msra.mxu1 %v11703_v29 }
 0x9c4   :  { %5996 = vmatpush.bf16.msra.mxu2 %v11705_v30  ;;  %6009 = vmatpush.bf16.msra.mxu3 %v11708_v46 }
 0x9c7   :  { %5971 = vmatpush.bf16.msra.mxu0 %v11714_v6  ;;  %5984 = vmatpush.bf16.msra.mxu1 %v11719_v22 }
 0x9c8   :  { %5997 = vmatpush.bf16.msra.mxu2 %v11721_v34  ;;  %6010 = vmatpush.bf16.msra.mxu3 %v11724_v24 }
 0x9cb   :  { %5972 = vmatpush.bf16.msra.mxu0 %v11727_v43  ;;  %5985 = vmatpush.bf16.msra.mxu1 %v11731_v50 }
 0x9cc   :  { %5998 = vmatpush.bf16.msra.mxu2 %v11733_v59  ;;  %6011 = vmatpush.bf16.msra.mxu3 %v11736_v15 }
 0x9cd   :  { %5768 = vmatmul.bf16.vlgmr.msrb.gmra.mxu0 %v5707_v1  ;;  %5781 = vmatmul.bf16.vlgmr.msrb.gmra.mxu1 %v5707_v1 }
 0x9ce   :  { %5794 = vmatmul.bf16.vlgmr.msrb.gmra.mxu2 %v5707_v1  ;;  %5807 = vmatmul.bf16.vlgmr.msrb.gmra.mxu3 %v5707_v1  ;;  %v13935_v1 = vld [vmem:[#allocation67_spill] sm:$0xff] }
 0x9cf   :  { %5973 = vmatpush.bf16.msra.mxu0 %v11739_v18  ;;  %5986 = vmatpush.bf16.msra.mxu1 %v11743_v31 }
 0x9d0   :  { %5999 = vmatpush.bf16.msra.mxu2 %v11745_v39  ;;  %6012 = vmatpush.bf16.msra.mxu3 %v11748_v55 }
 0x9d3   :  { %5974 = vmatpush.bf16.msra.mxu0 %v11751_v52  ;;  %5987 = vmatpush.bf16.msra.mxu1 %v11755_v63 }
 0x9d4   :  { %6000 = vmatpush.bf16.msra.mxu2 %v11757_v4  ;;  %6013 = vmatpush.bf16.msra.mxu3 %v11760_v36 }
 0x9d7   :  { %5975 = vmatpush.bf16.msra.mxu0 %v11763_v49  ;;  %5988 = vmatpush.bf16.msra.mxu1 %v11767_v62 }
 0x9d8   :  { %6001 = vmatpush.bf16.msra.mxu2 %v11769_v14  ;;  %6014 = vmatpush.bf16.msra.mxu3 %v11772_v42 }
 0x9db   :  { %5976 = vmatpush.bf16.msra.mxu0 %v11775_v45  ;;  %5989 = vmatpush.bf16.msra.mxu1 %v11779_v12 }
 0x9dc   :  { %6002 = vmatpush.bf16.msra.mxu2 %v11781_v19  ;;  %6015 = vmatpush.bf16.msra.mxu3 %v11784_v2 }
 0x9df   :  { %6021 = vmatpush.bf16.msrb.mxu0 %v11786_v44  ;;  %6034 = vmatpush.bf16.msrb.mxu1 %v11788_v41 }
 0x9e0   :  { %6047 = vmatpush.bf16.msrb.mxu2 %v13908_v13  ;;  %6060 = vmatpush.bf16.msrb.mxu3 %v13909_v53 }
 0x9e3   :  { %6022 = vmatpush.bf16.msrb.mxu0 %v13910_v10  ;;  %6035 = vmatpush.bf16.msrb.mxu1 %v13911_v48 }
 0x9e4   :  { %6048 = vmatpush.bf16.msrb.mxu2 %v13912_v25  ;;  %6061 = vmatpush.bf16.msrb.mxu3 %v13913_v23  ;;  %v13944_v25 = vld [vmem:[#allocation30_spill] sm:$0xff] }
 0x9e7   :  { %6023 = vmatpush.bf16.msrb.mxu0 %v13914_v27  ;;  %6036 = vmatpush.bf16.msrb.mxu1 %v13915_v3 }
 0x9e8   :  { %6049 = vmatpush.bf16.msrb.mxu2 %v13916_v32  ;;  %6062 = vmatpush.bf16.msrb.mxu3 %v13917_v5 }
 0x9eb   :  { %6024 = vmatpush.bf16.msrb.mxu0 %v13918_v7  ;;  %6037 = vmatpush.bf16.msrb.mxu1 %v13919_v20 }
 0x9ec   :  { %6050 = vmatpush.bf16.msrb.mxu2 %v13920_v61  ;;  %6063 = vmatpush.bf16.msrb.mxu3 %v13921_v57 }
 0x9ef   :  { %6025 = vmatpush.bf16.msrb.mxu0 %v13922_v35  ;;  %6038 = vmatpush.bf16.msrb.mxu1 %v13923_v16  ;;  %v13938_v16 = vld [vmem:[#allocation52_spill] sm:$0xff] }
 0x9f0   :  { %6051 = vmatpush.bf16.msrb.mxu2 %v13924_v56  ;;  %6064 = vmatpush.bf16.msrb.mxu3 %v13925_v58  ;;  %v13936_v58 = vld [vmem:[#allocation68_spill] sm:$0xff] }
 0x9f1   :  { %v13939_v35 = vld [vmem:[#allocation60_spill] sm:$0xff] }
 0x9f3   :  { %6026 = vmatpush.bf16.msrb.mxu0 %v13926_v21  ;;  %6039 = vmatpush.bf16.msrb.mxu1 %v13927_v37  ;;  %v13937_v21 = vld [vmem:[#allocation69_spill] sm:$0xff] }
 0x9f4   :  { %6052 = vmatpush.bf16.msrb.mxu2 %v13928_v8  ;;  %6065 = vmatpush.bf16.msrb.mxu3 %v13929_v9 }
 0x9f7   :  { %6027 = vmatpush.bf16.msrb.mxu0 %v13930_v40  ;;  %6040 = vmatpush.bf16.msrb.mxu1 %v13931_v60 }
 0x9f8   :  { %6053 = vmatpush.bf16.msrb.mxu2 %v13932_v17  ;;  %6066 = vmatpush.bf16.msrb.mxu3 %v13933_v0 }
 0x9fb   :  { %6028 = vmatpush.bf16.msrb.mxu0 %v13934_v38  ;;  %6041 = vmatpush.bf16.msrb.mxu1 %v13935_v1 }
 0x9fc   :  { %6054 = vmatpush.bf16.msrb.mxu2 %v13936_v58  ;;  %6067 = vmatpush.bf16.msrb.mxu3 %v13937_v21  ;;  %v13940_v58 = vld [vmem:[#allocation28_spill] sm:$0xff] }
 0xa3a   :  { %v5717_v37 = vpop.f32.mrf.mxu0  ;;  %v5730_v8 = vpop.f32.mrf.mxu1 }
 0xa3b   :  { %v5816_v56 = vrot.slane %v5717_v37, 4  ;;  %v5817_v9 = vrot.slane %v5730_v8, 4 }
 0xa3d   :  { %v5824_v40 = vadd.f32 %v5816_v56, %v13938_v16  ;;  %v5825_v60 = vadd.f32 %v5817_v9, %v13939_v35 }
 0xa3f   :  { %v9111_v57 = vmul.f32 -1.442695, %v5824_v40  ;;  %v9112_v17 = vmul.f32 -1.442695, %v5825_v60  ;;  %v13941_v60 = vld [vmem:[#allocation74_spill] sm:$0xff] }
 0xa41   :  { %9864 = vpow2.f32 %v9111_v57  ;;  %v5743_v0 = vpop.f32.mrf.mxu2  ;;  %v5756_v61 = vpop.f32.mrf.mxu3 }
 0xa42   :  { %9866 = vpow2.f32 %v9112_v17  ;;  %v5818_v38 = vrot.slane %v5743_v0, 4  ;;  %v5719_v1 = vpop.f32.mrf.mxu0  ;;  %v5732_v20 = vpop.f32.mrf.mxu1  ;;  %v13942_v17 = vld [vmem:[#allocation72_spill] sm:$0xff] }
 0xa44   :  { %v5826_v7 = vadd.f32 %v5818_v38, %v13940_v58 }
 0xa46   :  { %v9113_v21 = vmul.f32 -1.442695, %v5826_v7 }
 0xa47   :  { %v9865_v5 = vpop.eup %9864 }
 0xa48   :  { %v9867_v32 = vpop.eup %9866  ;;  %v12325_v37 = vadd.f32 1.0, %v9865_v5  ;;  %9868 = vpow2.f32 %v9113_v21 }
 0xa49   :  { %v12327_v8 = vadd.f32 1.0, %v9867_v32  ;;  %v5745_v56 = vpop.f32.mrf.mxu2  ;;  %v5758_v9 = vpop.f32.mrf.mxu3 }
 0xa4a   :  { %9870 = vrcp.f32 %v12325_v37  ;;  %v5769_v57 = vpop.f32.mrf.mxu0  ;;  %v5782_v40 = vpop.f32.mrf.mxu1  ;;  %vm5849_vm6 = vweird.f32 %v12325_v37 }
 0xa4b   :  { %9872 = vrcp.f32 %v12327_v8  ;;  %v5828_v20 = vadd.f32 %v5769_v57, %v13941_v60  ;;  %v5829_v0 = vadd.f32 %v5782_v40, %v13942_v17  ;;  %v5819_v57 = vrot.slane %v5756_v61, 4  ;;  %v13943_v40 = vld [vmem:[#allocation23_spill] sm:$0xff] }
 0xa4c   :  { %vm5864_vm4 = vweird.f32 %v12327_v8 }
 0xa4d   :  { %v9114_v7 = vmul.f32 -1.442695, %v5828_v20  ;;  %v9115_v1 = vmul.f32 -1.442695, %v5829_v0  ;;  %v5827_v48 = vadd.f32 %v5819_v57, %v13944_v25 }
 0xa4e   :  { %v9869_v38 = vpop.eup %9868 }
 0xa4f   :  { %9874 = vpow2.f32 %v9114_v7  ;;  %v12335_v35 = vadd.f32 1.0, %v9869_v38 }
 0xa50   :  { %v9871_v5 = vpop.eup %9870  ;;  %9876 = vpow2.f32 %v9115_v1 }
 0xa51   :  { %v9873_v32 = vpop.eup %9872  ;;  %v5845_v21 = vmul.f32 %v9871_v5, %v12325_v37  ;;  %v5795_v56 = vpop.f32.mrf.mxu2  ;;  %9878 = vrcp.f32 %v12335_v35  ;;  %vm5850_vm3 = vweird.f32 %v9871_v5 }
 0xa52   :  { %v5808_v9 = vpop.f32.mrf.mxu3  ;;  %v5860_v58 = vmul.f32 %v9873_v32, %v12327_v8  ;;  %v5771_v16 = vpop.f32.mrf.mxu0  ;;  %v5830_v20 = vadd.f32 %v5795_v56, %v13943_v40  ;;  %vm5865_vm2 = vweird.f32 %v9873_v32  ;;  %vm5851_vm7 = vmor %vm5849_vm6, %vm5850_vm3 }
 0xa53   :  { %v5784_v3 = vpop.f32.mrf.mxu1  ;;  %v5846_v27 = vsub.f32 1.0, %v5845_v21  ;;  %vm12348_vm5 = vmor %vm5864_vm4, %vm5865_vm2  ;;  %vm5879_vm4 = vweird.f32 %v12335_v35 }
 0xa54   :  { %v5861_v17 = vsub.f32 1.0, %v5860_v58  ;;  %v9116_v60 = vmul.f32 -1.442695, %v5830_v20 }
 0xa55   :  { %v5847_v0 = vmul.f32 %v9871_v5, %v5846_v27  ;;  %v9875_v7 = vpop.eup %9874  ;;  %v5870_v27 = vand.u32 2147483648, %v12327_v8 }
 0xa56   :  { %v5862_v23 = vmul.f32 %v9873_v32, %v5861_v17  ;;  %v12340_v10 = vadd.f32 1.0, %v9875_v7  ;;  %9880 = vpow2.f32 %v9116_v60  ;;  %v9877_v16 = vpop.eup %9876  ;;  %v5855_v17 = vand.u32 2147483648, %v12325_v37 }
 0xa57   :  { %v5848_v3 = vadd.f32 %v9871_v5, %v5847_v0  ;;  %v12346_v1 = vadd.f32 1.0, %v9877_v16  ;;  %v5868_v60 = vand.u32 2147483647, %v12327_v8  ;;  %v12355_v56 = vpop.eup %9878  ;;  %v5871_v7 = vor.u32 1.1754944e-38, %v5870_v27 }
 0xa58   :  { %v5863_v61 = vadd.f32 %v9873_v32, %v5862_v23  ;;  %9882 = vrcp.f32 %v12340_v10  ;;  %v5853_v23 = vand.u32 2147483647, %v12325_v37  ;;  %v5856_v16 = vor.u32 1.1754944e-38, %v5855_v17  ;;  %v13947_v37 = vld [vmem:[#allocation75_spill] sm:$0xff] }
 0xa59   :  { %v5797_v38 = vpop.f32.mrf.mxu2  ;;  %9884 = vtanh.f32 %v5827_v48  ;;  %v5852_v20 = vsel %vm5851_vm7, %v9871_v5, %v5848_v3  ;;  %vm5869_vm10 = vcmp.eq.f32.partialorder %v5868_v60, 8.507059e+37  ;;  %v5831_v48 = vadd.f32 %v5808_v9, %v13947_v37 }
 0xa5a   :  { %v5810_v58 = vpop.f32.mrf.mxu3  ;;  %9886 = vrcp.f32 %v12346_v1  ;;  %v5867_v0 = vsel %vm12348_vm5, %v9873_v32, %v5863_v61  ;;  %vm5854_vm9 = vcmp.eq.f32.partialorder %v5853_v23, 8.507059e+37  ;;  %v5875_v8 = vmul.f32 %v12355_v56, %v12335_v35 }
 0xa5b   :  { %v5857_v25 = vsel %vm5854_vm9, %v5856_v16, %v5852_v20  ;;  %v5872_v40 = vsel %vm5869_vm10, %v5871_v7, %v5867_v0  ;;  %v5891_v3 = vrot.slane %v12240_v11, 6  ;;  %v5921_v27 = vand.u32 2147483648, %v12340_v10 }
 0xa5c   :  { %v9881_v57 = vpop.eup %9880  ;;  %v5876_v23 = vsub.f32 1.0, %v5875_v8  ;;  %v5936_v0 = vand.u32 2147483648, %v12346_v1  ;;  %vm5915_vm13 = vweird.f32 %v12340_v10  ;;  %vm5930_vm11 = vweird.f32 %v12346_v1 }
 0xa5d   :  { %v12361_v38 = vadd.f32 1.0, %v9881_v57  ;;  %v5893_v17 = vmul.f32 %v5891_v3, %v5872_v40  ;;  %v5919_v57 = vand.u32 2147483647, %v12340_v10  ;;  %v5922_v7 = vor.u32 1.1754944e-38, %v5921_v27 }
 0xa5e   :  { %v9883_v58 = vpop.eup %9882  ;;  %v5937_v27 = vor.u32 1.1754944e-38, %v5936_v0  ;;  %vm5880_vm3 = vweird.f32 %v12355_v56  ;;  %v5883_v0 = vand.u32 2147483647, %v12335_v35 }
 0xa5f   :  { %v5911_v53 = vmul.f32 %v9883_v58, %v12340_v10  ;;  %v9885_v5 = vpop.eup %9884  ;;  %9888 = vrcp.f32 %v12361_v38  ;;  %vm5916_vm12 = vweird.f32 %v9883_v58  ;;  %vm5920_vm0 = vcmp.eq.f32.partialorder %v5919_v57, 8.507059e+37  ;;  %vm5881_vm5 = vmor %vm5879_vm4, %vm5880_vm3 }
 0xa60   :  { %v9887_v32 = vpop.eup %9886  ;;  %v5894_v21 = vmul.f32 %v9885_v5, %v5857_v25  ;;  %9890 = vtanh.f32 %v5831_v48  ;;  %vm5917_vm15 = vmor %vm5915_vm13, %vm5916_vm12  ;;  %v5934_v25 = vand.u32 2147483647, %v12346_v1  ;;  %v5877_v48 = vmul.f32 %v12355_v56, %v5876_v23 }
 0xa61   :  { %v5912_v61 = vsub.f32 1.0, %v5911_v53  ;;  %v5926_v9 = vmul.f32 %v9887_v32, %v12346_v1  ;;  %vm5931_vm14 = vweird.f32 %v9887_v32  ;;  %v5885_v1 = vand.u32 2147483648, %v12335_v35 }
 0xa62   :  { %v12374_v16 = vadd.f32 %v5894_v21, %v5893_v17  ;;  %vm5932_vm1 = vmor %vm5930_vm11, %vm5931_vm14  ;;  %v5957_v21 = vrot.slane %v12248_v28, 2  ;;  %vm5935_vm2 = vcmp.eq.f32.partialorder %v5934_v25, 8.507059e+37  ;;  %v5878_v23 = vadd.f32 %v12355_v56, %v5877_v48 }
 0xa63   :  { %v5913_v60 = vmul.f32 %v9883_v58, %v5912_v61  ;;  %v5927_v20 = vsub.f32 1.0, %v5926_v9  ;;  %v5951_v25 = vand.u32 2147483648, %v12361_v38  ;;  %vm5884_vm7 = vcmp.eq.f32.partialorder %v5883_v0, 8.507059e+37  ;;  %v13957_v0 = vld [vmem:[#allocation48_spill] sm:$0xff] }
 0xa64   :  { %9892 = vtanh.f32 %v12374_v16  ;;  %vm5945_vm9 = vweird.f32 %v12361_v38  ;;  %v5949_v48 = vand.u32 2147483647, %v12361_v38 }
 0xa65   :  { %v5914_v11 = vadd.f32 %v9883_v58, %v5913_v60  ;;  %v9889_v53 = vpop.eup %9888  ;;  %v5928_v40 = vmul.f32 %v9887_v32, %v5927_v20 }
 0xa66   :  { %v5941_v8 = vmul.f32 %v9889_v53, %v12361_v38  ;;  %v9891_v3 = vpop.eup %9890  ;;  %vm5946_vm6 = vweird.f32 %v9889_v53  ;;  %vm5950_vm12 = vcmp.eq.f32.partialorder %v5949_v48, 8.507059e+37  ;;  %v13948_v38 = vld [vmem:[#allocation38_spill] sm:$0xff]  ;;  %v13963_v48 = vld [vmem:[#allocation55_spill] sm:$0xff] }
 0xa67   :  { %v5918_v5 = vsel %vm5917_vm15, %v9883_v58, %v5914_v11  ;;  %v5929_v10 = vadd.f32 %v9887_v32, %v5928_v40  ;;  %v5886_v40 = vor.u32 1.1754944e-38, %v5885_v1  ;;  %vm5947_vm10 = vmor %vm5945_vm9, %vm5946_vm6  ;;  %v13955_v1 = vld [vmem:[#allocation46_spill] sm:$0xff] }
 0xa68   :  { %v5923_v61 = vsel %vm5920_vm0, %v5922_v7, %v5918_v5  ;;  %v5942_v17 = vsub.f32 1.0, %v5941_v8 }
 0xa69   :  { %v5933_v9 = vsel %vm5932_vm1, %v9887_v32, %v5929_v10  ;;  %v5960_v60 = vmul.f32 %v9891_v3, %v5923_v61  ;;  %v5882_v32 = vsel %vm5881_vm5, %v12355_v56, %v5878_v23  ;;  %v5952_v3 = vor.u32 1.1754944e-38, %v5951_v25  ;;  %v13952_v23 = vld [vmem:[#allocation43_spill] sm:$0xff]  ;;  %v13962_v25 = vld [vmem:[#allocation54_spill] sm:$0xff] }
 0xa6a   :  { %v5943_v58 = vmul.f32 %v9889_v53, %v5942_v17  ;;  %v5938_v57 = vsel %vm5935_vm2, %v5937_v27, %v5933_v9  ;;  %v9893_v7 = vpop.eup %9892  ;;  %v5887_v8 = vsel %vm5884_vm7, %v5886_v40, %v5882_v32  ;;  %v13950_v9 = vld [vmem:[#allocation39_spill] sm:$0xff]  ;;  %v13958_v32 = vld [vmem:[#allocation49_spill] sm:$0xff] }
 0xa6b   :  { %v5959_v20 = vmul.f32 %v5957_v21, %v5938_v57  ;;  %v5897_v35 = vmul.f32 %v9893_v7, %v5887_v8  ;;  %v13954_v57 = vld [vmem:[#allocation45_spill] sm:$0xff]  ;;  %v13960_v7 = vld [vmem:[#allocation51_spill] sm:$0xff]  ;;  %v13964_v8 = vld [vmem:[#allocation56_spill] sm:$0xff] }
 0xa6c   :  { %v5944_v11 = vadd.f32 %v9889_v53, %v5943_v58  ;;  %v13953_v58 = vld [vmem:[#allocation44_spill] sm:$0xff]  ;;  %v13961_v40 = vld [vmem:[#allocation53_spill] sm:$0xff] }
 0xa6d   :  { %v12387_v28 = vadd.f32 %v5960_v60, %v5959_v20  ;;  %v5965_v10 = vrot.slane %v5897_v35, 4  ;;  %v13951_v60 = vld [vmem:[#allocation40_spill] sm:$0xff]  ;;  %v13956_v20 = vld [vmem:[#allocation47_spill] sm:$0xff]  ;;  %v13965_v35 = vld [vmem:[#allocation57_spill] sm:$0xff] }
 0xa6e   :  { %v5948_v5 = vsel %vm5947_vm10, %v9889_v53, %v5944_v11  ;;  %v13949_v53 = vld [vmem:[#allocation42_spill] sm:$0xff] }
 0xa6f   :  { %9894 = vtanh.f32 %v12387_v28  ;;  %v5953_v61 = vsel %vm5950_vm12, %v5952_v3, %v5948_v5  ;;  %v13959_v11 = vld [vmem:[#allocation50_spill] sm:$0xff]  ;;  %v13967_v3 = vld [vmem:[#allocation59_spill] sm:$0xff] }
 0xa70   :  { %v13966_v5 = vld [vmem:[#allocation58_spill] sm:$0xff] }
 0xa75   :  { %v9895_v56 = vpop.eup %9894 }
 0xa76   :  { %v5963_v27 = vmul.f32 %v9895_v56, %v5953_v61  ;;  %v13968_v56 = vld [vmem:[#allocation61_spill] sm:$0xff]  ;;  %v13969_v61 = vld [vmem:[#allocation62_spill] sm:$0xff] }
 0xa78   :  { %v5967_v17 = vsel %vm1879_vm8, %v5965_v10, %v5963_v27  ;;  %v13970_v10 = vld [vmem:[#allocation63_spill] sm:$0xff]  ;;  %v13971_v27 = vld [vmem:[#allocation64_spill] sm:$0xff] }
 0xa79   :  { %v5968_v21 = vpack.c.bf16 %v5967_v17, %v5967_v17  ;;  %v13972_v17 = vld [vmem:[#allocation65_spill] sm:$0xff] }
 0xa7b   :  { %5977 = vmatmul.bf16.vlgmr.msra.gmra.mxu0 %v5968_v21  ;;  %5990 = vmatmul.bf16.vlgmr.msra.gmra.mxu1 %v5968_v21 }
 0xa7c   :  { %6003 = vmatmul.bf16.vlgmr.msra.gmra.mxu2 %v5968_v21  ;;  %6016 = vmatmul.bf16.vlgmr.msra.gmra.mxu3 %v5968_v21 }
 0xa7d   :  { %6245 = vmatpush.bf16.msra.mxu0 %v11690_v54  ;;  %6258 = vmatpush.bf16.msra.mxu1 %v11692_v26 }
 0xa7e   :  { %6271 = vmatpush.bf16.msra.mxu2 %v11694_v47  ;;  %6284 = vmatpush.bf16.msra.mxu3 %v11696_v33 }
 0xa81   :  { %6246 = vmatpush.bf16.msra.mxu0 %v11699_v51  ;;  %6259 = vmatpush.bf16.msra.mxu1 %v11703_v29 }
 0xa82   :  { %6272 = vmatpush.bf16.msra.mxu2 %v11705_v30  ;;  %6285 = vmatpush.bf16.msra.mxu3 %v11708_v46 }
 0xa85   :  { %6247 = vmatpush.bf16.msra.mxu0 %v11714_v6  ;;  %6260 = vmatpush.bf16.msra.mxu1 %v11719_v22 }
 0xa86   :  { %6273 = vmatpush.bf16.msra.mxu2 %v11721_v34  ;;  %6286 = vmatpush.bf16.msra.mxu3 %v11724_v24 }
 0xa89   :  { %6248 = vmatpush.bf16.msra.mxu0 %v11727_v43  ;;  %6261 = vmatpush.bf16.msra.mxu1 %v11731_v50 }
 0xa8a   :  { %6274 = vmatpush.bf16.msra.mxu2 %v11733_v59  ;;  %6287 = vmatpush.bf16.msra.mxu3 %v11736_v15 }
 0xa8b   :  { %6029 = vmatmul.bf16.vlgmr.msrb.gmra.mxu0 %v5968_v21  ;;  %6042 = vmatmul.bf16.vlgmr.msrb.gmra.mxu1 %v5968_v21 }
 0xa8c   :  { %6055 = vmatmul.bf16.vlgmr.msrb.gmra.mxu2 %v5968_v21  ;;  %6068 = vmatmul.bf16.vlgmr.msrb.gmra.mxu3 %v5968_v21  ;;  %v13973_v21 = vld [vmem:[#allocation66_spill] sm:$0xff] }
 0xa8d   :  { %6249 = vmatpush.bf16.msra.mxu0 %v11739_v18  ;;  %6262 = vmatpush.bf16.msra.mxu1 %v11743_v31 }
 0xa8e   :  { %6275 = vmatpush.bf16.msra.mxu2 %v11745_v39  ;;  %6288 = vmatpush.bf16.msra.mxu3 %v11748_v55 }
 0xa91   :  { %6250 = vmatpush.bf16.msra.mxu0 %v11751_v52  ;;  %6263 = vmatpush.bf16.msra.mxu1 %v11755_v63 }
 0xa92   :  { %6276 = vmatpush.bf16.msra.mxu2 %v11757_v4  ;;  %6289 = vmatpush.bf16.msra.mxu3 %v11760_v36 }
 0xa95   :  { %6251 = vmatpush.bf16.msra.mxu0 %v11763_v49  ;;  %6264 = vmatpush.bf16.msra.mxu1 %v11767_v62 }
 0xa96   :  { %6277 = vmatpush.bf16.msra.mxu2 %v11769_v14  ;;  %6290 = vmatpush.bf16.msra.mxu3 %v11772_v42 }
 0xa99   :  { %6252 = vmatpush.bf16.msra.mxu0 %v11775_v45  ;;  %6265 = vmatpush.bf16.msra.mxu1 %v11779_v12 }
 0xa9a   :  { %6278 = vmatpush.bf16.msra.mxu2 %v11781_v19  ;;  %6291 = vmatpush.bf16.msra.mxu3 %v11784_v2 }
 0xa9d   :  { %6297 = vmatpush.bf16.msrb.mxu0 %v11786_v44  ;;  %6310 = vmatpush.bf16.msrb.mxu1 %v11788_v41 }
 0xa9e   :  { %6323 = vmatpush.bf16.msrb.mxu2 %v13908_v13  ;;  %6336 = vmatpush.bf16.msrb.mxu3 %v13948_v38 }
 0xaa1   :  { %6298 = vmatpush.bf16.msrb.mxu0 %v13949_v53  ;;  %6311 = vmatpush.bf16.msrb.mxu1 %v13950_v9 }
 0xaa2   :  { %6324 = vmatpush.bf16.msrb.mxu2 %v13951_v60  ;;  %6337 = vmatpush.bf16.msrb.mxu3 %v13952_v23 }
 0xaa5   :  { %6299 = vmatpush.bf16.msrb.mxu0 %v13953_v58  ;;  %6312 = vmatpush.bf16.msrb.mxu1 %v13954_v57 }
 0xaa6   :  { %6325 = vmatpush.bf16.msrb.mxu2 %v13955_v1  ;;  %6338 = vmatpush.bf16.msrb.mxu3 %v13956_v20 }
 0xaa9   :  { %6300 = vmatpush.bf16.msrb.mxu0 %v13957_v0  ;;  %6313 = vmatpush.bf16.msrb.mxu1 %v13958_v32 }
 0xaaa   :  { %6326 = vmatpush.bf16.msrb.mxu2 %v13959_v11  ;;  %6339 = vmatpush.bf16.msrb.mxu3 %v13960_v7  ;;  %v13978_v7 = vld [vmem:[#allocation60_spill] sm:$0xff] }
 0xaad   :  { %6301 = vmatpush.bf16.msrb.mxu0 %v13961_v40  ;;  %6314 = vmatpush.bf16.msrb.mxu1 %v13962_v25  ;;  %v13977_v40 = vld [vmem:[#allocation52_spill] sm:$0xff] }
 0xaae   :  { %6327 = vmatpush.bf16.msrb.mxu2 %v13963_v48  ;;  %6340 = vmatpush.bf16.msrb.mxu3 %v13964_v8  ;;  %v13974_v48 = vld [vmem:[#allocation67_spill] sm:$0xff]  ;;  %v13975_v8 = vld [vmem:[#allocation68_spill] sm:$0xff] }
 0xab1   :  { %6302 = vmatpush.bf16.msrb.mxu0 %v13965_v35  ;;  %6315 = vmatpush.bf16.msrb.mxu1 %v13966_v5  ;;  %v13976_v35 = vld [vmem:[#allocation69_spill] sm:$0xff] }
 0xab2   :  { %6328 = vmatpush.bf16.msrb.mxu2 %v13967_v3  ;;  %6341 = vmatpush.bf16.msrb.mxu3 %v13968_v56 }
 0xab5   :  { %6303 = vmatpush.bf16.msrb.mxu0 %v13969_v61  ;;  %6316 = vmatpush.bf16.msrb.mxu1 %v13970_v10 }
 0xab6   :  { %6329 = vmatpush.bf16.msrb.mxu2 %v13971_v27  ;;  %6342 = vmatpush.bf16.msrb.mxu3 %v13972_v17 }
 0xab9   :  { %6304 = vmatpush.bf16.msrb.mxu0 %v13973_v21  ;;  %6317 = vmatpush.bf16.msrb.mxu1 %v13974_v48 }
 0xaba   :  { %6330 = vmatpush.bf16.msrb.mxu2 %v13975_v8  ;;  %6343 = vmatpush.bf16.msrb.mxu3 %v13976_v35  ;;  %v13979_v8 = vld [vmem:[#allocation28_spill] sm:$0xff] }
 0xaf8   :  { %v5978_v5 = vpop.f32.mrf.mxu0  ;;  %v5991_v3 = vpop.f32.mrf.mxu1 }
 0xaf9   :  { %v6077_v25 = vrot.slane %v5978_v5, 2  ;;  %v6078_v56 = vrot.slane %v5991_v3, 2 }
 0xafb   :  { %v6085_v61 = vadd.f32 %v6077_v25, %v13977_v40  ;;  %v6086_v10 = vadd.f32 %v6078_v56, %v13978_v7  ;;  %v13980_v56 = vld [vmem:[#allocation74_spill] sm:$0xff] }
 0xafd   :  { %v9117_v11 = vmul.f32 -1.442695, %v6085_v61  ;;  %v9118_v27 = vmul.f32 -1.442695, %v6086_v10 }
 0xaff   :  { %9896 = vpow2.f32 %v9117_v11  ;;  %v6004_v17 = vpop.f32.mrf.mxu2  ;;  %v6017_v32 = vpop.f32.mrf.mxu3 }
 0xb00   :  { %9898 = vpow2.f32 %v9118_v27  ;;  %v6079_v21 = vrot.slane %v6004_v17, 2  ;;  %v5980_v48 = vpop.f32.mrf.mxu0  ;;  %v5993_v0 = vpop.f32.mrf.mxu1 }
 0xb02   :  { %v6087_v20 = vadd.f32 %v6079_v21, %v13979_v8 }
 0xb04   :  { %v9119_v35 = vmul.f32 -1.442695, %v6087_v20  ;;  %v13981_v20 = vld [vmem:[#allocation72_spill] sm:$0xff] }
 0xb05   :  { %v9897_v1 = vpop.eup %9896 }
 0xb06   :  { %v9899_v57 = vpop.eup %9898  ;;  %v12462_v5 = vadd.f32 1.0, %v9897_v1  ;;  %9900 = vpow2.f32 %v9119_v35 }
 0xb07   :  { %v12464_v3 = vadd.f32 1.0, %v9899_v57  ;;  %v6006_v7 = vpop.f32.mrf.mxu2  ;;  %v6019_v40 = vpop.f32.mrf.mxu3 }
 0xb08   :  { %9902 = vrcp.f32 %v12462_v5  ;;  %v6030_v11 = vpop.f32.mrf.mxu0  ;;  %v6043_v25 = vpop.f32.mrf.mxu1  ;;  %vm6122_vm11 = vweird.f32 %v12462_v5 }
 0xb09   :  { %9904 = vrcp.f32 %v12464_v3  ;;  %v6093_v48 = vrot.slane %v6030_v11, 2  ;;  %v6094_v0 = vrot.slane %v6043_v25, 2  ;;  %vm6137_vm15 = vweird.f32 %v12464_v3 }
 0xb0b   :  { %v6101_v8 = vadd.f32 %v6093_v48, %v13980_v56  ;;  %v6102_v61 = vadd.f32 %v6094_v0, %v13981_v20  ;;  %v13982_v0 = vld [vmem:[#allocation23_spill] sm:$0xff] }
 0xb0c   :  { %v9901_v10 = vpop.eup %9900 }
 0xb0d   :  { %v9120_v27 = vmul.f32 -1.442695, %v6101_v8  ;;  %v9121_v57 = vmul.f32 -1.442695, %v6102_v61  ;;  %v12472_v48 = vadd.f32 1.0, %v9901_v10  ;;  %v6080_v8 = vrot.slane %v6017_v32, 2 }
 0xb0e   :  { %v9903_v1 = vpop.eup %9902 }
 0xb0f   :  { %v9905_v17 = vpop.eup %9904  ;;  %v6118_v35 = vmul.f32 %v9903_v1, %v12462_v5  ;;  %v6056_v21 = vpop.f32.mrf.mxu2  ;;  %9906 = vpow2.f32 %v9120_v27  ;;  %vm6123_vm14 = vweird.f32 %v9903_v1 }
 0xb10   :  { %v6069_v7 = vpop.f32.mrf.mxu3  ;;  %v6133_v40 = vmul.f32 %v9905_v17, %v12464_v3  ;;  %v6032_v58 = vpop.f32.mrf.mxu0  ;;  %v6095_v11 = vrot.slane %v6056_v21, 2  ;;  %9908 = vpow2.f32 %v9121_v57  ;;  %vm6138_vm13 = vweird.f32 %v9905_v17  ;;  %vm6124_vm1 = vmor %vm6122_vm11, %vm6123_vm14 }
 0xb11   :  { %v6045_v23 = vpop.f32.mrf.mxu1  ;;  %v6119_v25 = vsub.f32 1.0, %v6118_v35  ;;  %9910 = vrcp.f32 %v12472_v48  ;;  %v13983_v35 = vld [vmem:[#allocation30_spill] sm:$0xff]  ;;  %v6128_v57 = vand.u32 2147483648, %v12462_v5  ;;  %vm12488_vm0 = vmor %vm6137_vm15, %vm6138_vm13  ;;  %vm6152_vm15 = vweird.f32 %v12472_v48 }
 0xb12   :  { %v6134_v60 = vsub.f32 1.0, %v6133_v40  ;;  %v6103_v56 = vadd.f32 %v6095_v11, %v13982_v0  ;;  %v6088_v10 = vadd.f32 %v6080_v8, %v13983_v35 }
 0xb13   :  { %v6120_v9 = vmul.f32 %v9903_v1, %v6119_v25  ;;  %v6141_v25 = vand.u32 2147483647, %v12464_v3 }
 0xb14   :  { %v9122_v20 = vmul.f32 -1.442695, %v6103_v56  ;;  %v6135_v61 = vmul.f32 %v9905_v17, %v6134_v60 }
 0xb15   :  { %v9907_v53 = vpop.eup %9906  ;;  %v6121_v32 = vadd.f32 %v9903_v1, %v6120_v9  ;;  %v6126_v9 = vand.u32 2147483647, %v12462_v5  ;;  %vm6142_vm3 = vcmp.eq.f32.partialorder %v6141_v25, 8.507059e+37 }
 0xb16   :  { %9912 = vpow2.f32 %v9122_v20  ;;  %v9909_v23 = vpop.eup %9908  ;;  %v12476_v27 = vadd.f32 1.0, %v9907_v53  ;;  %v6136_v60 = vadd.f32 %v9905_v17, %v6135_v61  ;;  %v6096_v53 = vrot.slane %v6069_v7, 2 }
 0xb17   :  { %v6058_v38 = vpop.f32.mrf.mxu2  ;;  %v12480_v21 = vadd.f32 1.0, %v9909_v23  ;;  %v12486_v40 = vpop.eup %9910  ;;  %v6125_v56 = vsel %vm6124_vm1, %v9903_v1, %v6121_v32  ;;  %vm6127_vm2 = vcmp.eq.f32.partialorder %v6126_v9, 8.507059e+37 }
 0xb18   :  { %v6071_v58 = vpop.f32.mrf.mxu3  ;;  %9914 = vrcp.f32 %v12476_v27  ;;  %v6143_v38 = vand.u32 2147483648, %v12464_v3  ;;  %v6140_v8 = vsel %vm12488_vm0, %v9905_v17, %v6136_v60  ;;  %v6148_v61 = vmul.f32 %v12486_v40, %v12472_v48 }
 0xb19   :  { %9916 = vrcp.f32 %v12480_v21  ;;  %v6129_v58 = vor.u32 1.1754944e-38, %v6128_v57  ;;  %v6104_v23 = vadd.f32 %v6096_v53, %v13947_v37  ;;  %v6164_v17 = vrot.slane %v12374_v16, 6 }
 0xb1a   :  { %9918 = vtanh.f32 %v6088_v10  ;;  %v6144_v20 = vor.u32 1.1754944e-38, %v6143_v38  ;;  %v6149_v38 = vsub.f32 1.0, %v6148_v61  ;;  %v6194_v9 = vand.u32 2147483648, %v12476_v27 }
 0xb1b   :  { %v6130_v3 = vsel %vm6127_vm2, %v6129_v58, %v6125_v56  ;;  %v6209_v25 = vand.u32 2147483648, %v12480_v21  ;;  %v6192_v56 = vand.u32 2147483647, %v12476_v27  ;;  %v6207_v16 = vand.u32 2147483647, %v12480_v21 }
 0xb1c   :  { %v9913_v0 = vpop.eup %9912  ;;  %v6145_v1 = vsel %vm6142_vm3, %v6144_v20, %v6140_v8  ;;  %v6150_v61 = vmul.f32 %v12486_v40, %v6149_v38  ;;  %vm6188_vm6 = vweird.f32 %v12476_v27  ;;  %vm6203_vm7 = vweird.f32 %v12480_v21 }
 0xb1d   :  { %v12497_v7 = vadd.f32 1.0, %v9913_v0  ;;  %v6166_v57 = vmul.f32 %v6164_v17, %v6145_v1  ;;  %v6195_v1 = vor.u32 1.1754944e-38, %v6194_v9  ;;  %vm6193_vm12 = vcmp.eq.f32.partialorder %v6192_v56, 8.507059e+37 }
 0xb1e   :  { %v9915_v35 = vpop.eup %9914  ;;  %v6230_v38 = vrot.slane %v12387_v28, 2  ;;  %vm6208_vm13 = vcmp.eq.f32.partialorder %v6207_v16, 8.507059e+37  ;;  %vm6153_vm14 = vweird.f32 %v12486_v40  ;;  %v6158_v9 = vand.u32 2147483648, %v12472_v48 }
 0xb1f   :  { %9920 = vrcp.f32 %v12497_v7  ;;  %v9917_v5 = vpop.eup %9916  ;;  %v6184_v10 = vmul.f32 %v9915_v35, %v12476_v27  ;;  %vm6189_vm4 = vweird.f32 %v9915_v35  ;;  %v6156_v28 = vand.u32 2147483647, %v12472_v48  ;;  %vm6154_vm11 = vmor %vm6152_vm15, %vm6153_vm14 }
 0xb20   :  { %v6199_v32 = vmul.f32 %v9917_v5, %v12480_v21  ;;  %v9919_v60 = vpop.eup %9918  ;;  %9922 = vtanh.f32 %v6104_v23  ;;  %vm6204_vm5 = vweird.f32 %v9917_v5  ;;  %vm6190_vm9 = vmor %vm6188_vm6, %vm6189_vm4  ;;  %vm6218_vm1 = vweird.f32 %v12497_v7 }
 0xb21   :  { %v6185_v11 = vsub.f32 1.0, %v6184_v10  ;;  %v6167_v37 = vmul.f32 %v9919_v60, %v6130_v3  ;;  %vm6205_vm10 = vmor %vm6203_vm7, %vm6204_vm5  ;;  %v6222_v56 = vand.u32 2147483647, %v12497_v7  ;;  %v6159_v16 = vor.u32 1.1754944e-38, %v6158_v9  ;;  %v13995_v9 = vld [vmem:[#allocation47_spill] sm:$0xff] }
 0xb22   :  { %v6200_v53 = vsub.f32 1.0, %v6199_v32  ;;  %v6210_v32 = vor.u32 1.1754944e-38, %v6209_v25  ;;  %vm6157_vm3 = vcmp.eq.f32.partialorder %v6156_v28, 8.507059e+37  ;;  %v13996_v28 = vld [vmem:[#allocation48_spill] sm:$0xff] }
 0xb23   :  { %v6186_v0 = vmul.f32 %v9915_v35, %v6185_v11  ;;  %v12513_v3 = vadd.f32 %v6167_v37, %v6166_v57  ;;  %v6151_v37 = vadd.f32 %v12486_v40, %v6150_v61  ;;  %vm6223_vm4 = vcmp.eq.f32.partialorder %v6222_v56, 8.507059e+37  ;;  %v14000_v56 = vld [vmem:[#allocation53_spill] sm:$0xff] }
 0xb24   :  { %v6201_v20 = vmul.f32 %v9917_v5, %v6200_v53 }
 0xb25   :  { %v9921_v8 = vpop.eup %9920  ;;  %v6187_v23 = vadd.f32 %v9915_v35, %v6186_v0  ;;  %9924 = vtanh.f32 %v12513_v3 }
 0xb26   :  { %v6214_v58 = vmul.f32 %v9921_v8, %v12497_v7  ;;  %v6202_v10 = vadd.f32 %v9917_v5, %v6201_v20  ;;  %v9923_v17 = vpop.eup %9922  ;;  %vm6219_vm0 = vweird.f32 %v9921_v8 }
 0xb27   :  { %v6191_v11 = vsel %vm6190_vm9, %v9915_v35, %v6187_v23  ;;  %vm6220_vm2 = vmor %vm6218_vm1, %vm6219_vm0 }
 0xb28   :  { %v6215_v60 = vsub.f32 1.0, %v6214_v58  ;;  %v6196_v53 = vsel %vm6193_vm12, %v6195_v1, %v6191_v11  ;;  %v6206_v13 = vsel %vm6205_vm10, %v9917_v5, %v6202_v10  ;;  %v6155_v5 = vsel %vm6154_vm11, %v12486_v40, %v6151_v37  ;;  %v13994_v37 = vld [vmem:[#allocation46_spill] sm:$0xff] }
 0xb29   :  { %v6211_v27 = vsel %vm6208_vm13, %v6210_v32, %v6206_v13  ;;  %v6233_v57 = vmul.f32 %v9923_v17, %v6196_v53  ;;  %v6224_v13 = vand.u32 2147483648, %v12497_v7  ;;  %v6160_v58 = vsel %vm6157_vm3, %v6159_v16, %v6155_v5  ;;  %v13986_v7 = vld [vmem:[#allocation36_spill] sm:$0xff]  ;;  %v13989_v53 = vld [vmem:[#allocation39_spill] sm:$0xff] }
 0xb2a   :  { %v6216_v0 = vmul.f32 %v9921_v8, %v6215_v60  ;;  %v6232_v21 = vmul.f32 %v6230_v38, %v6211_v27  ;;  %v13988_v38 = vld [vmem:[#allocation42_spill] sm:$0xff]  ;;  %v13991_v27 = vld [vmem:[#allocation43_spill] sm:$0xff] }
 0xb2b   :  { %v9925_v20 = vpop.eup %9924  ;;  %v6225_v48 = vor.u32 1.1754944e-38, %v6224_v13  ;;  %v13998_v13 = vld [vmem:[#allocation50_spill] sm:$0xff]  ;;  %v13999_v5 = vld [vmem:[#allocation51_spill] sm:$0xff] }
 0xb2c   :  { %v12521_v25 = vadd.f32 %v6233_v57, %v6232_v21  ;;  %v6217_v35 = vadd.f32 %v9921_v8, %v6216_v0  ;;  %v6170_v23 = vmul.f32 %v9925_v20, %v6160_v58  ;;  %v13990_v0 = vld [vmem:[#allocation40_spill] sm:$0xff]  ;;  %v13993_v21 = vld [vmem:[#allocation45_spill] sm:$0xff]  ;;  %v14001_v20 = vld [vmem:[#allocation54_spill] sm:$0xff] }
 0xb2d   :  { %v13992_v57 = vld [vmem:[#allocation44_spill] sm:$0xff]  ;;  %v14002_v16 = vld [vmem:[#allocation55_spill] sm:$0xff]  ;;  %v14004_v58 = vld [vmem:[#allocation57_spill] sm:$0xff] }
 0xb2e   :  { %9926 = vtanh.f32 %v12521_v25  ;;  %v6221_v61 = vsel %vm6220_vm2, %v9921_v8, %v6217_v35  ;;  %v6238_v32 = vrot.slane %v6170_v23, 6  ;;  %v13987_v8 = vld [vmem:[#allocation38_spill] sm:$0xff]  ;;  %v13997_v35 = vld [vmem:[#allocation49_spill] sm:$0xff]  ;;  %v14006_v23 = vld [vmem:[#allocation59_spill] sm:$0xff] }
 0xb2f   :  { %v6226_v10 = vsel %vm6223_vm4, %v6225_v48, %v6221_v61  ;;  %v14003_v61 = vld [vmem:[#allocation56_spill] sm:$0xff]  ;;  %v14005_v48 = vld [vmem:[#allocation58_spill] sm:$0xff] }
 0xb34   :  { %v9927_v1 = vpop.eup %9926 }
 0xb35   :  { %v6236_v17 = vmul.f32 %v9927_v1, %v6226_v10  ;;  %v14007_v1 = vld [vmem:[#allocation61_spill] sm:$0xff]  ;;  %v14008_v10 = vld [vmem:[#allocation62_spill] sm:$0xff] }
 0xb37   :  { %v6241_v60 = vrot.slane %v6236_v17, 6  ;;  %v14009_v17 = vld [vmem:[#allocation63_spill] sm:$0xff] }
 0xb39   :  { %v6243_v40 = vsel %vm1879_vm8, %v6238_v32, %v6241_v60  ;;  %v14010_v32 = vld [vmem:[#allocation64_spill] sm:$0xff]  ;;  %v14011_v60 = vld [vmem:[#allocation65_spill] sm:$0xff] }
 0xb3a   :  { %v6244_v11 = vpack.c.bf16 %v6243_v40, %v6243_v40  ;;  %v14012_v40 = vld [vmem:[#allocation66_spill] sm:$0xff] }
 0xb3c   :  { %6253 = vmatmul.bf16.vlgmr.msra.gmra.mxu0 %v6244_v11  ;;  %6266 = vmatmul.bf16.vlgmr.msra.gmra.mxu1 %v6244_v11 }
 0xb3d   :  { %6279 = vmatmul.bf16.vlgmr.msra.gmra.mxu2 %v6244_v11  ;;  %6292 = vmatmul.bf16.vlgmr.msra.gmra.mxu3 %v6244_v11 }
 0xb3e   :  { %6506 = vmatpush.bf16.msra.mxu0 %v11690_v54  ;;  %6519 = vmatpush.bf16.msra.mxu1 %v11692_v26 }
 0xb3f   :  { %6532 = vmatpush.bf16.msra.mxu2 %v11694_v47  ;;  %6545 = vmatpush.bf16.msra.mxu3 %v11696_v33 }
 0xb42   :  { %6507 = vmatpush.bf16.msra.mxu0 %v11699_v51  ;;  %6520 = vmatpush.bf16.msra.mxu1 %v11703_v29 }
 0xb43   :  { %6533 = vmatpush.bf16.msra.mxu2 %v11705_v30  ;;  %6546 = vmatpush.bf16.msra.mxu3 %v11708_v46 }
 0xb46   :  { %6508 = vmatpush.bf16.msra.mxu0 %v11714_v6  ;;  %6521 = vmatpush.bf16.msra.mxu1 %v11719_v22 }
 0xb47   :  { %6534 = vmatpush.bf16.msra.mxu2 %v11721_v34  ;;  %6547 = vmatpush.bf16.msra.mxu3 %v11724_v24 }
 0xb4a   :  { %6509 = vmatpush.bf16.msra.mxu0 %v11727_v43  ;;  %6522 = vmatpush.bf16.msra.mxu1 %v11731_v50 }
 0xb4b   :  { %6535 = vmatpush.bf16.msra.mxu2 %v11733_v59  ;;  %6548 = vmatpush.bf16.msra.mxu3 %v11736_v15 }
 0xb4c   :  { %6305 = vmatmul.bf16.vlgmr.msrb.gmra.mxu0 %v6244_v11  ;;  %6318 = vmatmul.bf16.vlgmr.msrb.gmra.mxu1 %v6244_v11 }
 0xb4d   :  { %6331 = vmatmul.bf16.vlgmr.msrb.gmra.mxu2 %v6244_v11  ;;  %6344 = vmatmul.bf16.vlgmr.msrb.gmra.mxu3 %v6244_v11  ;;  %v14013_v11 = vld [vmem:[#allocation67_spill] sm:$0xff] }
 0xb4e   :  { %6510 = vmatpush.bf16.msra.mxu0 %v11739_v18  ;;  %6523 = vmatpush.bf16.msra.mxu1 %v11743_v31 }
 0xb4f   :  { %6536 = vmatpush.bf16.msra.mxu2 %v11745_v39  ;;  %6549 = vmatpush.bf16.msra.mxu3 %v11748_v55 }
 0xb52   :  { %6511 = vmatpush.bf16.msra.mxu0 %v11751_v52  ;;  %6524 = vmatpush.bf16.msra.mxu1 %v11755_v63 }
 0xb53   :  { %6537 = vmatpush.bf16.msra.mxu2 %v11757_v4  ;;  %6550 = vmatpush.bf16.msra.mxu3 %v11760_v36 }
 0xb56   :  { %6512 = vmatpush.bf16.msra.mxu0 %v11763_v49  ;;  %6525 = vmatpush.bf16.msra.mxu1 %v11767_v62 }
 0xb57   :  { %6538 = vmatpush.bf16.msra.mxu2 %v11769_v14  ;;  %6551 = vmatpush.bf16.msra.mxu3 %v11772_v42 }
 0xb5a   :  { %6513 = vmatpush.bf16.msra.mxu0 %v11775_v45  ;;  %6526 = vmatpush.bf16.msra.mxu1 %v11779_v12 }
 0xb5b   :  { %6539 = vmatpush.bf16.msra.mxu2 %v11781_v19  ;;  %6552 = vmatpush.bf16.msra.mxu3 %v11784_v2 }
 0xb5e   :  { %6558 = vmatpush.bf16.msrb.mxu0 %v11786_v44  ;;  %6571 = vmatpush.bf16.msrb.mxu1 %v11788_v41  ;;  %v6494_v44 = vrot.slane %v12521_v25, 2 }
 0xb5f   :  { %6584 = vmatpush.bf16.msrb.mxu2 %v13986_v7  ;;  %6597 = vmatpush.bf16.msrb.mxu3 %v13987_v8 }
 0xb62   :  { %6559 = vmatpush.bf16.msrb.mxu0 %v13988_v38  ;;  %6572 = vmatpush.bf16.msrb.mxu1 %v13989_v53 }
 0xb63   :  { %6585 = vmatpush.bf16.msrb.mxu2 %v13990_v0  ;;  %6598 = vmatpush.bf16.msrb.mxu3 %v13991_v27 }
 0xb66   :  { %6560 = vmatpush.bf16.msrb.mxu0 %v13992_v57  ;;  %6573 = vmatpush.bf16.msrb.mxu1 %v13993_v21 }
 0xb67   :  { %6586 = vmatpush.bf16.msrb.mxu2 %v13994_v37  ;;  %6599 = vmatpush.bf16.msrb.mxu3 %v13995_v9 }
 0xb6a   :  { %6561 = vmatpush.bf16.msrb.mxu0 %v13996_v28  ;;  %6574 = vmatpush.bf16.msrb.mxu1 %v13997_v35 }
 0xb6b   :  { %6587 = vmatpush.bf16.msrb.mxu2 %v13998_v13  ;;  %6600 = vmatpush.bf16.msrb.mxu3 %v13999_v5 }
 0xb6e   :  { %6562 = vmatpush.bf16.msrb.mxu0 %v14000_v56  ;;  %6575 = vmatpush.bf16.msrb.mxu1 %v14001_v20  ;;  %v14020_v20 = vld [vmem:[#allocation24_spill] sm:$0xff]  ;;  %v14021_v56 = vld [vmem:[#allocation71_spill] sm:$0xff] }
 0xb6f   :  { %6588 = vmatpush.bf16.msrb.mxu2 %v14002_v16  ;;  %6601 = vmatpush.bf16.msrb.mxu3 %v14003_v61  ;;  %v14014_v61 = vld [vmem:[#allocation68_spill] sm:$0xff]  ;;  %v14018_v16 = vld [vmem:[#allocation70_spill] sm:$0xff] }
 0xb72   :  { %6563 = vmatpush.bf16.msrb.mxu0 %v14004_v58  ;;  %6576 = vmatpush.bf16.msrb.mxu1 %v14005_v48  ;;  %v14015_v58 = vld [vmem:[#allocation69_spill] sm:$0xff] }
 0xb73   :  { %6589 = vmatpush.bf16.msrb.mxu2 %v14006_v23  ;;  %6602 = vmatpush.bf16.msrb.mxu3 %v14007_v1  ;;  %v14016_v48 = vld [vmem:[#allocation41_spill] sm:$0xff] }
 0xb74   :  { %v14017_v23 = vperm.slane %v14016_v48, 0 }
 0xb76   :  { %6564 = vmatpush.bf16.msrb.mxu0 %v14008_v10  ;;  %6577 = vmatpush.bf16.msrb.mxu1 %v14009_v17  ;;  %v4581_v1 = vadd.f32 %v14018_v16, %v14017_v23  ;;  %v14019_v10 = vperm.slane %v14016_v48, 1  ;;  %v14025_v16 = vperm.slane %v14016_v48, 2  ;;  %v14026_v23 = vld [vmem:[#allocation31_spill] sm:$0xff] }
 0xb77   :  { %6590 = vmatpush.bf16.msrb.mxu2 %v14010_v32  ;;  %6603 = vmatpush.bf16.msrb.mxu3 %v14011_v60  ;;  %v14023_v60 = vld [vmem:[#allocation25_spill] sm:$0xff] }
 0xb78   :  { %v4609_v17 = vadd.f32 %v14020_v20, %v14019_v10  ;;  %v12602_v32 = vadd.f32 %v14021_v56, %v4581_v1  ;;  %v4637_v28 = vadd.f32 %v14026_v23, %v14025_v16 }
 0xb7a   :  { %6565 = vmatpush.bf16.msrb.mxu0 %v14012_v40  ;;  %6578 = vmatpush.bf16.msrb.mxu1 %v14013_v11  ;;  %14022 = vst [vmem:[#allocation75_spill] sm:$0xff] %v12602_v32  ;;  %v12605_v5 = vadd.f32 %v14023_v60, %v4609_v17  ;;  %v14027_v17 = vld [vmem:[#allocation29_spill] sm:$0xff] }
 0xb7b   :  { %6591 = vmatpush.bf16.msrb.mxu2 %v14014_v61  ;;  %6604 = vmatpush.bf16.msrb.mxu3 %v14015_v58  ;;  %v12613_v60 = vadd.f32 %v14027_v17, %v4637_v28 }
 0xb7c   :  { %14024 = vst [vmem:[#allocation52_spill] sm:$0xff] %v12605_v5 }
 0xb7d   :  { %14028 = vst [vmem:[#allocation60_spill] sm:$0xff] %v12613_v60 }
 0xbb9   :  { %v6254_v40 = vpop.f32.mrf.mxu0  ;;  %v6267_v11 = vpop.f32.mrf.mxu1 }
 0xbba   :  { %v6349_v61 = vadd.f32 %v6254_v40, %v12602_v32  ;;  %v6350_v58 = vadd.f32 %v6267_v11, %v12605_v5  ;;  %v14030_v5 = vld [vmem:[#allocation73_spill] sm:$0xff] }
 0xbbc   :  { %v9123_v13 = vmul.f32 -1.442695, %v6349_v61  ;;  %v9124_v35 = vmul.f32 -1.442695, %v6350_v58 }
 0xbbe   :  { %9928 = vpow2.f32 %v9123_v13 }
 0xbbf   :  { %9930 = vpow2.f32 %v9124_v35 }
 0xbc0   :  { %v6280_v20 = vpop.f32.mrf.mxu2  ;;  %v6293_v56 = vpop.f32.mrf.mxu3 }
 0xbc1   :  { %v6256_v1 = vpop.f32.mrf.mxu0  ;;  %v6269_v10 = vpop.f32.mrf.mxu1  ;;  %v6351_v61 = vadd.f32 %v6280_v20, %v12613_v60 }
 0xbc2   :  { %v14029_v10 = vld [vmem:[#allocation26_spill] sm:$0xff] }
 0xbc3   :  { %v9125_v35 = vmul.f32 -1.442695, %v6351_v61 }
 0xbc4   :  { %v9929_v9 = vpop.eup %9928 }
 0xbc5   :  { %v9931_v37 = vpop.eup %9930  ;;  %v12615_v40 = vadd.f32 1.0, %v9929_v9 }
 0xbc6   :  { %v12618_v58 = vadd.f32 1.0, %v9931_v37 }
 0xbc7   :  { %9932 = vrcp.f32 %v12615_v40  ;;  %vm6386_vm10 = vweird.f32 %v12615_v40 }
 0xbc8   :  { %v6282_v13 = vpop.f32.mrf.mxu2  ;;  %v6295_v11 = vpop.f32.mrf.mxu3  ;;  %9934 = vrcp.f32 %v12618_v58  ;;  %vm6401_vm7 = vweird.f32 %v12618_v58 }
 0xbc9   :  { %v6306_v16 = vpop.f32.mrf.mxu0  ;;  %v6319_v23 = vpop.f32.mrf.mxu1  ;;  %9936 = vpow2.f32 %v9125_v35  ;;  %v14031_v35 = vld [vmem:[#allocation37_spill] sm:$0xff] }
 0xbca   :  { %v6357_v1 = vrot.slane %v6306_v16, 4  ;;  %v6358_v28 = vrot.slane %v6319_v23, 4 }
 0xbcc   :  { %v6365_v17 = vadd.f32 %v6357_v1, %v14029_v10  ;;  %v6366_v9 = vadd.f32 %v6358_v28, %v14030_v5 }
 0xbcd   :  { %v12624_v32 = vpop.eup %9932 }
 0xbce   :  { %v12626_v37 = vpop.eup %9934  ;;  %v9126_v20 = vmul.f32 -1.442695, %v6365_v17  ;;  %v9127_v60 = vmul.f32 -1.442695, %v6366_v9  ;;  %v6382_v16 = vmul.f32 %v12624_v32, %v12615_v40  ;;  %vm6387_vm6 = vweird.f32 %v12624_v32 }
 0xbcf   :  { %v6397_v23 = vmul.f32 %v12626_v37, %v12618_v58  ;;  %v9937_v1 = vpop.eup %9936  ;;  %vm6402_vm5 = vweird.f32 %v12626_v37  ;;  %vm12671_vm12 = vmor %vm6386_vm10, %vm6387_vm6 }
 0xbd0   :  { %v6332_v13 = vpop.f32.mrf.mxu2  ;;  %v6345_v11 = vpop.f32.mrf.mxu3  ;;  %9938 = vpow2.f32 %v9126_v20  ;;  %v6383_v10 = vsub.f32 1.0, %v6382_v16  ;;  %v12633_v9 = vadd.f32 1.0, %v9937_v1  ;;  %v14034_v16 = vld [vmem:[#allocation35_spill] sm:$0xff]  ;;  %v6390_v1 = vand.u32 2147483647, %v12615_v40  ;;  %vm12663_vm9 = vmor %vm6401_vm7, %vm6402_vm5 }
 0xbd1   :  { %v6359_v21 = vrot.slane %v6332_v13, 4  ;;  %v6308_v57 = vpop.f32.mrf.mxu0  ;;  %v6321_v61 = vpop.f32.mrf.mxu1  ;;  %9940 = vpow2.f32 %v9127_v60  ;;  %v6398_v17 = vsub.f32 1.0, %v6397_v23  ;;  %v14032_v13 = vperm.slane %v14016_v48, 3 }
 0xbd2   :  { %v14033_v57 = vld [vmem:[#allocation34_spill] sm:$0xff]  ;;  %vm6391_vm13 = vcmp.eq.f32.partialorder %v6390_v1, 8.507059e+37  ;;  %v6420_v25 = vand.u32 2147483647, %v12633_v9 }
 0xbd3   :  { %v6367_v28 = vadd.f32 %v6359_v21, %v14031_v35  ;;  %v4665_v61 = vadd.f32 %v14033_v57, %v14032_v13  ;;  %v6399_v60 = vmul.f32 %v12626_v37, %v6398_v17  ;;  %v6384_v21 = vmul.f32 %v12624_v32, %v6383_v10  ;;  %v14038_v13 = vld [vmem:[#allocation22_spill] sm:$0xff] }
 0xbd4   :  { %v6407_v10 = vand.u32 2147483648, %v12618_v58  ;;  %v6405_v17 = vand.u32 2147483647, %v12618_v58  ;;  %v6428_v58 = vrot.slane %v12513_v3, 6 }
 0xbd5   :  { %v9128_v5 = vmul.f32 -1.442695, %v6367_v28  ;;  %v12646_v23 = vadd.f32 %v14034_v16, %v4665_v61 }
 0xbd6   :  { %v9939_v27 = vpop.eup %9938  ;;  %vm6406_vm14 = vcmp.eq.f32.partialorder %v6405_v17, 8.507059e+37 }
 0xbd7   :  { %9942 = vpow2.f32 %v9128_v5  ;;  %v9941_v38 = vpop.eup %9940  ;;  %v12638_v8 = vadd.f32 1.0, %v9939_v27  ;;  %14035 = vst [vmem:[#allocation28_spill] sm:$0xff] %v12646_v23  ;;  %v6352_v27 = vadd.f32 %v6293_v56, %v12646_v23  ;;  %v6385_v5 = vadd.f32 %v12624_v32, %v6384_v21 }
 0xbd8   :  { %v6334_v0 = vpop.f32.mrf.mxu2  ;;  %v6347_v53 = vpop.f32.mrf.mxu3  ;;  %9944 = vrcp.f32 %v12633_v9  ;;  %v12643_v20 = vadd.f32 1.0, %v9941_v38  ;;  %v6400_v38 = vadd.f32 %v12626_v37, %v6399_v60 }
 0xbd9   :  { %9946 = vrcp.f32 %v12638_v8  ;;  %v6360_v0 = vrot.slane %v6345_v11, 4  ;;  %v6392_v11 = vand.u32 2147483648, %v12615_v40  ;;  %v6389_v16 = vsel %vm12671_vm12, %v12624_v32, %v6385_v5 }
 0xbda   :  { %9948 = vrcp.f32 %v12643_v20  ;;  %v6404_v40 = vsel %vm12663_vm9, %v12626_v37, %v6400_v38  ;;  %v6458_v37 = vand.u32 2147483648, %v12638_v8  ;;  %v6473_v3 = vand.u32 2147483648, %v12643_v20 }
 0xbdb   :  { %v6368_v57 = vadd.f32 %v6360_v0, %v14038_v13  ;;  %v6408_v0 = vor.u32 1.1754944e-38, %v6407_v10  ;;  %v6393_v13 = vor.u32 1.1754944e-38, %v6392_v11  ;;  %v6456_v10 = vand.u32 2147483647, %v12638_v8 }
 0xbdc   :  { %v6471_v17 = vand.u32 2147483647, %v12643_v20  ;;  %vm6452_vm11 = vweird.f32 %v12638_v8  ;;  %vm6467_vm1 = vweird.f32 %v12643_v20  ;;  %vm6416_vm12 = vweird.f32 %v12633_v9 }
 0xbdd   :  { %v9943_v53 = vpop.eup %9942  ;;  %v6394_v32 = vsel %vm6391_vm13, %v6393_v13, %v6389_v16  ;;  %v6409_v5 = vsel %vm6406_vm14, %v6408_v0, %v6404_v40  ;;  %vm6457_vm4 = vcmp.eq.f32.partialorder %v6456_v10, 8.507059e+37 }
 0xbde   :  { %v12655_v48 = vadd.f32 1.0, %v9943_v53  ;;  %v12661_v28 = vpop.eup %9944  ;;  %vm6472_vm5 = vcmp.eq.f32.partialorder %v6471_v17, 8.507059e+37 }
 0xbdf   :  { %v9947_v61 = vpop.eup %9946  ;;  %vm6417_vm7 = vweird.f32 %v12661_v28 }
 0xbe0   :  { %9950 = vrcp.f32 %v12655_v48  ;;  %v9949_v21 = vpop.eup %9948  ;;  %v6448_v53 = vmul.f32 %v9947_v61, %v12638_v8  ;;  %vm6453_vm15 = vweird.f32 %v9947_v61  ;;  %vm6482_vm9 = vweird.f32 %v12655_v48  ;;  %vm6418_vm13 = vmor %vm6416_vm12, %vm6417_vm7 }
 0xbe1   :  { %9952 = vtanh.f32 %v6352_v27  ;;  %v6463_v23 = vmul.f32 %v9949_v21, %v12643_v20  ;;  %v6412_v27 = vmul.f32 %v12661_v28, %v12633_v9  ;;  %vm6468_vm0 = vweird.f32 %v9949_v21  ;;  %vm6454_vm2 = vmor %vm6452_vm11, %vm6453_vm15 }
 0xbe2   :  { %v6449_v35 = vsub.f32 1.0, %v6448_v53  ;;  %9954 = vtanh.f32 %v6368_v57  ;;  %v6430_v57 = vmul.f32 %v6428_v58, %v6409_v5  ;;  %vm6469_vm3 = vmor %vm6467_vm1, %vm6468_vm0  ;;  %vm6421_vm15 = vcmp.eq.f32.partialorder %v6420_v25, 8.507059e+37  ;;  %v14058_v25 = vld [vmem:[#allocation53_spill] sm:$0xff] }
 0xbe3   :  { %v6464_v60 = vsub.f32 1.0, %v6463_v23  ;;  %v6413_v0 = vsub.f32 1.0, %v6412_v27 }
 0xbe4   :  { %v6450_v56 = vmul.f32 %v9947_v61, %v6449_v35  ;;  %v6459_v35 = vor.u32 1.1754944e-38, %v6458_v37 }
 0xbe5   :  { %v6465_v11 = vmul.f32 %v9949_v21, %v6464_v60  ;;  %v6474_v60 = vor.u32 1.1754944e-38, %v6473_v3  ;;  %v6414_v37 = vmul.f32 %v12661_v28, %v6413_v0  ;;  %v14045_v0 = vld [vmem:[#allocation38_spill] sm:$0xff] }
 0xbe6   :  { %v9951_v38 = vpop.eup %9950  ;;  %v6451_v16 = vadd.f32 %v9947_v61, %v6450_v56 }
 0xbe7   :  { %v9953_v1 = vpop.eup %9952  ;;  %v6478_v7 = vmul.f32 %v9951_v38, %v12655_v48  ;;  %v6466_v40 = vadd.f32 %v9949_v21, %v6465_v11  ;;  %vm6483_vm6 = vweird.f32 %v9951_v38 }
 0xbe8   :  { %v6431_v13 = vmul.f32 %v9953_v1, %v6394_v32  ;;  %v9955_v53 = vpop.eup %9954  ;;  %v6455_v41 = vsel %vm6454_vm2, %v9947_v61, %v6451_v16  ;;  %v6488_v61 = vand.u32 2147483648, %v12655_v48  ;;  %vm6484_vm10 = vmor %vm6482_vm9, %vm6483_vm6 }
 0xbe9   :  { %v6479_v23 = vsub.f32 1.0, %v6478_v7  ;;  %v6460_v2 = vsel %vm6457_vm4, %v6459_v35, %v6455_v41  ;;  %v6470_v58 = vsel %vm6469_vm3, %v9949_v21, %v6466_v40  ;;  %v6415_v41 = vadd.f32 %v12661_v28, %v6414_v37  ;;  %v14052_v37 = vld [vmem:[#allocation46_spill] sm:$0xff] }
 0xbea   :  { %v12694_v32 = vadd.f32 %v6431_v13, %v6430_v57  ;;  %v6475_v5 = vsel %vm6472_vm5, %v6474_v60, %v6470_v58  ;;  %v6497_v20 = vmul.f32 %v9955_v53, %v6460_v2  ;;  %v6486_v2 = vand.u32 2147483647, %v12655_v48  ;;  %v14044_v53 = vld [vmem:[#allocation36_spill] sm:$0xff]  ;;  %v14046_v60 = vld [vmem:[#allocation42_spill] sm:$0xff]  ;;  %v14047_v58 = vld [vmem:[#allocation39_spill] sm:$0xff] }
 0xbeb   :  { %v6480_v8 = vmul.f32 %v9951_v38, %v6479_v23  ;;  %v6496_v7 = vmul.f32 %v6494_v44, %v6475_v5  ;;  %v6422_v44 = vand.u32 2147483648, %v12633_v9  ;;  %v6489_v3 = vor.u32 1.1754944e-38, %v6488_v61  ;;  %v14041_v9 = vld [vmem:[#allocation27_spill] sm:$0xff]  ;;  %v14054_v61 = vld [vmem:[#allocation48_spill] sm:$0xff] }
 0xbec   :  { %9956 = vtanh.f32 %v12694_v32  ;;  %v6419_v1 = vsel %vm6418_vm13, %v12661_v28, %v6415_v41  ;;  %vm6487_vm14 = vcmp.eq.f32.partialorder %v6486_v2, 8.507059e+37  ;;  %v14042_v28 = vld [vmem:[#allocation32_spill] sm:$0xff]  ;;  %v14049_v5 = vld [vmem:[#allocation43_spill] sm:$0xff]  ;;  %v14055_v41 = vld [vmem:[#allocation49_spill] sm:$0xff] }
 0xbed   :  { %v12697_v56 = vadd.f32 %v6497_v20, %v6496_v7  ;;  %v6481_v27 = vadd.f32 %v9951_v38, %v6480_v8  ;;  %v6423_v17 = vor.u32 1.1754944e-38, %v6422_v44  ;;  %v14048_v8 = vld [vmem:[#allocation40_spill] sm:$0xff]  ;;  %v14051_v7 = vld [vmem:[#allocation45_spill] sm:$0xff]  ;;  %v14056_v2 = vld [vmem:[#allocation50_spill] sm:$0xff] }
 0xbee   :  { %v14050_v20 = vld [vmem:[#allocation44_spill] sm:$0xff]  ;;  %v14057_v44 = vld [vmem:[#allocation51_spill] sm:$0xff] }
 0xbef   :  { %9958 = vtanh.f32 %v12697_v56  ;;  %v6485_v21 = vsel %vm6484_vm10, %v9951_v38, %v6481_v27  ;;  %v6424_v48 = vsel %vm6421_vm15, %v6423_v17, %v6419_v1  ;;  %v14043_v38 = vld [vmem:[#allocation33_spill] sm:$0xff]  ;;  %v14053_v27 = vld [vmem:[#allocation47_spill] sm:$0xff] }
 0xbf0   :  { %v6490_v57 = vsel %vm6487_vm14, %v6489_v3, %v6485_v21  ;;  %v14059_v21 = vld [vmem:[#allocation54_spill] sm:$0xff]  ;;  %v14060_v3 = vld [vmem:[#allocation55_spill] sm:$0xff]  ;;  %v14062_v1 = vld [vmem:[#allocation57_spill] sm:$0xff] }
 0xbf1   :  { %v14064_v17 = vld [vmem:[#allocation59_spill] sm:$0xff] }
 0xbf2   :  { %v9957_v10 = vpop.eup %9956 }
 0xbf3   :  { %v6434_v16 = vmul.f32 %v9957_v10, %v6424_v48  ;;  %v14061_v10 = vld [vmem:[#allocation56_spill] sm:$0xff]  ;;  %v14067_v48 = vld [vmem:[#allocation63_spill] sm:$0xff] }
 0xbf5   :  { %v9959_v11 = vpop.eup %9958 }
 0xbf6   :  { %v6500_v13 = vmul.f32 %v9959_v11, %v6490_v57  ;;  %v14063_v11 = vld [vmem:[#allocation58_spill] sm:$0xff]  ;;  %v14065_v57 = vld [vmem:[#allocation61_spill] sm:$0xff] }
 0xbf8   :  { %v6502_v23 = vrot.slane %v6500_v13, 4  ;;  %v14066_v13 = vld [vmem:[#allocation62_spill] sm:$0xff] }
 0xbfa   :  { %v6504_v35 = vsel %vm1879_vm8, %v6434_v16, %v6502_v23  ;;  %v14068_v16 = vld [vmem:[#allocation64_spill] sm:$0xff]  ;;  %v14069_v23 = vld [vmem:[#allocation65_spill] sm:$0xff] }
 0xbfb   :  { %v6505_v40 = vpack.c.bf16 %v6504_v35, %v6504_v35  ;;  %v14070_v35 = vld [vmem:[#allocation66_spill] sm:$0xff] }
 0xbfd   :  { %6514 = vmatmul.bf16.vlgmr.msra.gmra.mxu0 %v6505_v40  ;;  %6527 = vmatmul.bf16.vlgmr.msra.gmra.mxu1 %v6505_v40 }
 0xbfe   :  { %6540 = vmatmul.bf16.vlgmr.msra.gmra.mxu2 %v6505_v40  ;;  %6553 = vmatmul.bf16.vlgmr.msra.gmra.mxu3 %v6505_v40 }
 0xbff   :  { %6782 = vmatpush.bf16.msra.mxu0 %v11690_v54  ;;  %6795 = vmatpush.bf16.msra.mxu1 %v11692_v26 }
 0xc00   :  { %6808 = vmatpush.bf16.msra.mxu2 %v11694_v47  ;;  %6821 = vmatpush.bf16.msra.mxu3 %v11696_v33 }
 0xc03   :  { %6783 = vmatpush.bf16.msra.mxu0 %v11699_v51  ;;  %6796 = vmatpush.bf16.msra.mxu1 %v11703_v29 }
 0xc04   :  { %6809 = vmatpush.bf16.msra.mxu2 %v11705_v30  ;;  %6822 = vmatpush.bf16.msra.mxu3 %v11708_v46 }
 0xc07   :  { %6784 = vmatpush.bf16.msra.mxu0 %v11714_v6  ;;  %6797 = vmatpush.bf16.msra.mxu1 %v11719_v22 }
 0xc08   :  { %6810 = vmatpush.bf16.msra.mxu2 %v11721_v34  ;;  %6823 = vmatpush.bf16.msra.mxu3 %v11724_v24 }
 0xc0b   :  { %6785 = vmatpush.bf16.msra.mxu0 %v11727_v43  ;;  %6798 = vmatpush.bf16.msra.mxu1 %v11731_v50 }
 0xc0c   :  { %6811 = vmatpush.bf16.msra.mxu2 %v11733_v59  ;;  %6824 = vmatpush.bf16.msra.mxu3 %v11736_v15 }
 0xc0d   :  { %6566 = vmatmul.bf16.vlgmr.msrb.gmra.mxu0 %v6505_v40  ;;  %6579 = vmatmul.bf16.vlgmr.msrb.gmra.mxu1 %v6505_v40 }
 0xc0e   :  { %6592 = vmatmul.bf16.vlgmr.msrb.gmra.mxu2 %v6505_v40  ;;  %6605 = vmatmul.bf16.vlgmr.msrb.gmra.mxu3 %v6505_v40  ;;  %v14071_v40 = vld [vmem:[#allocation67_spill] sm:$0xff] }
 0xc0f   :  { %6786 = vmatpush.bf16.msra.mxu0 %v11739_v18  ;;  %6799 = vmatpush.bf16.msra.mxu1 %v11743_v31 }
 0xc10   :  { %6812 = vmatpush.bf16.msra.mxu2 %v11745_v39  ;;  %6825 = vmatpush.bf16.msra.mxu3 %v11748_v55 }
 0xc13   :  { %6787 = vmatpush.bf16.msra.mxu0 %v11751_v52  ;;  %6800 = vmatpush.bf16.msra.mxu1 %v11755_v63 }
 0xc14   :  { %6813 = vmatpush.bf16.msra.mxu2 %v11757_v4  ;;  %6826 = vmatpush.bf16.msra.mxu3 %v11760_v36 }
 0xc17   :  { %6788 = vmatpush.bf16.msra.mxu0 %v11763_v49  ;;  %6801 = vmatpush.bf16.msra.mxu1 %v11767_v62 }
 0xc18   :  { %6814 = vmatpush.bf16.msra.mxu2 %v11769_v14  ;;  %6827 = vmatpush.bf16.msra.mxu3 %v11772_v42 }
 0xc1b   :  { %6789 = vmatpush.bf16.msra.mxu0 %v11775_v45  ;;  %6802 = vmatpush.bf16.msra.mxu1 %v11779_v12 }
 0xc1c   :  { %6815 = vmatpush.bf16.msra.mxu2 %v11781_v19  ;;  %6828 = vmatpush.bf16.msra.mxu3 %v14041_v9 }
 0xc1f   :  { %6834 = vmatpush.bf16.msrb.mxu0 %v14042_v28  ;;  %6847 = vmatpush.bf16.msrb.mxu1 %v14043_v38 }
 0xc20   :  { %6860 = vmatpush.bf16.msrb.mxu2 %v14044_v53  ;;  %6873 = vmatpush.bf16.msrb.mxu3 %v14045_v0 }
 0xc23   :  { %6835 = vmatpush.bf16.msrb.mxu0 %v14046_v60  ;;  %6848 = vmatpush.bf16.msrb.mxu1 %v14047_v58 }
 0xc24   :  { %6861 = vmatpush.bf16.msrb.mxu2 %v14048_v8  ;;  %6874 = vmatpush.bf16.msrb.mxu3 %v14049_v5 }
 0xc27   :  { %6836 = vmatpush.bf16.msrb.mxu0 %v14050_v20  ;;  %6849 = vmatpush.bf16.msrb.mxu1 %v14051_v7 }
 0xc28   :  { %6862 = vmatpush.bf16.msrb.mxu2 %v14052_v37  ;;  %6875 = vmatpush.bf16.msrb.mxu3 %v14053_v27 }
 0xc2b   :  { %6837 = vmatpush.bf16.msrb.mxu0 %v14054_v61  ;;  %6850 = vmatpush.bf16.msrb.mxu1 %v14055_v41 }
 0xc2c   :  { %6863 = vmatpush.bf16.msrb.mxu2 %v14056_v2  ;;  %6876 = vmatpush.bf16.msrb.mxu3 %v14057_v44 }
 0xc2f   :  { %6838 = vmatpush.bf16.msrb.mxu0 %v14058_v25  ;;  %6851 = vmatpush.bf16.msrb.mxu1 %v14059_v21  ;;  %v14074_v25 = vld [vmem:[#allocation75_spill] sm:$0xff] }
 0xc30   :  { %6864 = vmatpush.bf16.msrb.mxu2 %v14060_v3  ;;  %6877 = vmatpush.bf16.msrb.mxu3 %v14061_v10  ;;  %v14072_v3 = vld [vmem:[#allocation68_spill] sm:$0xff] }
 0xc31   :  { %v14075_v10 = vld [vmem:[#allocation52_spill] sm:$0xff] }
 0xc33   :  { %6839 = vmatpush.bf16.msrb.mxu0 %v14062_v1  ;;  %6852 = vmatpush.bf16.msrb.mxu1 %v14063_v11  ;;  %v14073_v1 = vld [vmem:[#allocation69_spill] sm:$0xff] }
 0xc34   :  { %6865 = vmatpush.bf16.msrb.mxu2 %v14064_v17  ;;  %6878 = vmatpush.bf16.msrb.mxu3 %v14065_v57 }
 0xc37   :  { %6840 = vmatpush.bf16.msrb.mxu0 %v14066_v13  ;;  %6853 = vmatpush.bf16.msrb.mxu1 %v14067_v48 }
 0xc38   :  { %6866 = vmatpush.bf16.msrb.mxu2 %v14068_v16  ;;  %6879 = vmatpush.bf16.msrb.mxu3 %v14069_v23 }
 0xc3b   :  { %6841 = vmatpush.bf16.msrb.mxu0 %v14070_v35  ;;  %6854 = vmatpush.bf16.msrb.mxu1 %v14071_v40 }
 0xc3c   :  { %6867 = vmatpush.bf16.msrb.mxu2 %v14072_v3  ;;  %6880 = vmatpush.bf16.msrb.mxu3 %v14073_v1  ;;  %v14076_v3 = vld [vmem:[#allocation60_spill] sm:$0xff] }
 0xc7a   :  { %v6515_v11 = vpop.f32.mrf.mxu0  ;;  %v6528_v17 = vpop.f32.mrf.mxu1 }
 0xc7b   :  { %v6614_v21 = vrot.slane %v6515_v11, 6  ;;  %v6615_v57 = vrot.slane %v6528_v17, 6 }
 0xc7d   :  { %v6622_v13 = vadd.f32 %v6614_v21, %v14074_v25  ;;  %v6623_v48 = vadd.f32 %v6615_v57, %v14075_v10 }
 0xc7f   :  { %v9129_v2 = vmul.f32 -1.442695, %v6622_v13  ;;  %v9130_v16 = vmul.f32 -1.442695, %v6623_v48 }
 0xc81   :  { %9960 = vpow2.f32 %v9129_v2  ;;  %v6541_v23 = vpop.f32.mrf.mxu2  ;;  %v6554_v41 = vpop.f32.mrf.mxu3 }
 0xc82   :  { %9962 = vpow2.f32 %v9130_v16  ;;  %v6616_v35 = vrot.slane %v6541_v23, 6  ;;  %v6517_v40 = vpop.f32.mrf.mxu0  ;;  %v6530_v61 = vpop.f32.mrf.mxu1  ;;  %v14077_v16 = vld [vmem:[#allocation26_spill] sm:$0xff] }
 0xc84   :  { %v6624_v44 = vadd.f32 %v6616_v35, %v14076_v3 }
 0xc86   :  { %v9131_v1 = vmul.f32 -1.442695, %v6624_v44  ;;  %v14078_v44 = vld [vmem:[#allocation73_spill] sm:$0xff] }
 0xc87   :  { %v9961_v37 = vpop.eup %9960 }
 0xc88   :  { %v9963_v7 = vpop.eup %9962  ;;  %v12778_v11 = vadd.f32 1.0, %v9961_v37  ;;  %9964 = vpow2.f32 %v9131_v1 }
 0xc89   :  { %v12780_v17 = vadd.f32 1.0, %v9963_v7  ;;  %v6543_v21 = vpop.f32.mrf.mxu2  ;;  %v6556_v57 = vpop.f32.mrf.mxu3 }
 0xc8a   :  { %9966 = vrcp.f32 %v12778_v11  ;;  %v6567_v2 = vpop.f32.mrf.mxu0  ;;  %v6580_v13 = vpop.f32.mrf.mxu1  ;;  %vm6659_vm3 = vweird.f32 %v12778_v11 }
 0xc8b   :  { %9968 = vrcp.f32 %v12780_v17  ;;  %v6630_v48 = vrot.slane %v6567_v2, 6  ;;  %v6631_v61 = vrot.slane %v6580_v13, 6  ;;  %vm6674_vm1 = vweird.f32 %v12780_v17 }
 0xc8d   :  { %v6638_v23 = vadd.f32 %v6630_v48, %v14077_v16  ;;  %v6639_v35 = vadd.f32 %v6631_v61, %v14078_v44  ;;  %v14079_v61 = vld [vmem:[#allocation37_spill] sm:$0xff] }
 0xc8e   :  { %v9965_v40 = vpop.eup %9964 }
 0xc8f   :  { %v9132_v3 = vmul.f32 -1.442695, %v6638_v23  ;;  %v9133_v7 = vmul.f32 -1.442695, %v6639_v35  ;;  %v12788_v48 = vadd.f32 1.0, %v9965_v40  ;;  %v6617_v23 = vrot.slane %v6554_v41, 6 }
 0xc90   :  { %v9967_v37 = vpop.eup %9966 }
 0xc91   :  { %v9969_v10 = vpop.eup %9968  ;;  %v6655_v1 = vmul.f32 %v9967_v37, %v12778_v11  ;;  %v6593_v21 = vpop.f32.mrf.mxu2  ;;  %9970 = vpow2.f32 %v9132_v3  ;;  %vm6660_vm11 = vweird.f32 %v9967_v37 }
 0xc92   :  { %v6606_v57 = vpop.f32.mrf.mxu3  ;;  %v6670_v25 = vmul.f32 %v9969_v10, %v12780_v17  ;;  %v6569_v20 = vpop.f32.mrf.mxu0  ;;  %v6632_v2 = vrot.slane %v6593_v21, 6  ;;  %9972 = vpow2.f32 %v9133_v7  ;;  %vm6675_vm0 = vweird.f32 %v9969_v10  ;;  %vm6661_vm4 = vmor %vm6659_vm3, %vm6660_vm11 }
 0xc93   :  { %v6582_v27 = vpop.f32.mrf.mxu1  ;;  %v6656_v13 = vsub.f32 1.0, %v6655_v1  ;;  %9974 = vrcp.f32 %v12788_v48  ;;  %v6665_v7 = vand.u32 2147483648, %v12778_v11  ;;  %vm12804_vm2 = vmor %vm6674_vm1, %vm6675_vm0  ;;  %vm6689_vm1 = vweird.f32 %v12788_v48 }
 0xc94   :  { %v6671_v8 = vsub.f32 1.0, %v6670_v25  ;;  %v6640_v44 = vadd.f32 %v6632_v2, %v14079_v61  ;;  %v14080_v25 = vld [vmem:[#allocation28_spill] sm:$0xff] }
 0xc95   :  { %v6657_v58 = vmul.f32 %v9967_v37, %v6656_v13  ;;  %v6625_v40 = vadd.f32 %v6617_v23, %v14080_v25  ;;  %v14083_v25 = vld [vmem:[#allocation22_spill] sm:$0xff] }
 0xc96   :  { %v9134_v35 = vmul.f32 -1.442695, %v6640_v44  ;;  %v6672_v16 = vmul.f32 %v9969_v10, %v6671_v8 }
 0xc97   :  { %v9971_v60 = vpop.eup %9970  ;;  %v6658_v41 = vadd.f32 %v9967_v37, %v6657_v58  ;;  %v6663_v58 = vand.u32 2147483647, %v12778_v11 }
 0xc98   :  { %9976 = vpow2.f32 %v9134_v35  ;;  %v9973_v27 = vpop.eup %9972  ;;  %v12792_v3 = vadd.f32 1.0, %v9971_v60  ;;  %v6673_v8 = vadd.f32 %v9969_v10, %v6672_v16  ;;  %v6633_v60 = vrot.slane %v6606_v57, 6 }
 0xc99   :  { %v6595_v5 = vpop.f32.mrf.mxu2  ;;  %v12796_v1 = vadd.f32 1.0, %v9973_v27  ;;  %v12802_v44 = vpop.eup %9974  ;;  %v6678_v16 = vand.u32 2147483647, %v12780_v17  ;;  %v6662_v13 = vsel %vm6661_vm4, %v9967_v37, %v6658_v41  ;;  %v6666_v27 = vor.u32 1.1754944e-38, %v6665_v7 }
 0xc9a   :  { %v6608_v20 = vpop.f32.mrf.mxu3  ;;  %9978 = vrcp.f32 %v12792_v3  ;;  %v6680_v5 = vand.u32 2147483648, %v12780_v17  ;;  %v6677_v23 = vsel %vm12804_vm2, %v9969_v10, %v6673_v8  ;;  %v6641_v61 = vadd.f32 %v6633_v60, %v14083_v25 }
 0xc9b   :  { %9980 = vrcp.f32 %v12796_v1  ;;  %v6685_v20 = vmul.f32 %v12802_v44, %v12788_v48  ;;  %vm6664_vm5 = vcmp.eq.f32.partialorder %v6663_v58, 8.507059e+37  ;;  %vm6679_vm6 = vcmp.eq.f32.partialorder %v6678_v16, 8.507059e+37 }
 0xc9c   :  { %9982 = vtanh.f32 %v6625_v40  ;;  %v6681_v35 = vor.u32 1.1754944e-38, %v6680_v5  ;;  %v6667_v17 = vsel %vm6664_vm5, %v6666_v27, %v6662_v13  ;;  %v6701_v10 = vrot.slane %v12694_v32, 6 }
 0xc9d   :  { %v6686_v5 = vsub.f32 1.0, %v6685_v20  ;;  %v6731_v58 = vand.u32 2147483648, %v12792_v3  ;;  %v6746_v16 = vand.u32 2147483648, %v12796_v1  ;;  %v6729_v13 = vand.u32 2147483647, %v12792_v3 }
 0xc9e   :  { %v9977_v2 = vpop.eup %9976  ;;  %v6682_v37 = vsel %vm6679_vm6, %v6681_v35, %v6677_v23  ;;  %v6744_v32 = vand.u32 2147483647, %v12796_v1  ;;  %vm6725_vm10 = vweird.f32 %v12792_v3  ;;  %vm6740_vm12 = vweird.f32 %v12796_v1 }
 0xc9f   :  { %v12813_v57 = vadd.f32 1.0, %v9977_v2  ;;  %v6703_v7 = vmul.f32 %v6701_v10, %v6682_v37  ;;  %v6687_v20 = vmul.f32 %v12802_v44, %v6686_v5  ;;  %v6732_v37 = vor.u32 1.1754944e-38, %v6731_v58 }
 0xca0   :  { %v9979_v53 = vpop.eup %9978  ;;  %vm6730_vm15 = vcmp.eq.f32.partialorder %v6729_v13, 8.507059e+37  ;;  %v6767_v5 = vrot.slane %v12697_v56, 2  ;;  %vm6745_vm0 = vcmp.eq.f32.partialorder %v6744_v32, 8.507059e+37  ;;  %vm6690_vm11 = vweird.f32 %v12802_v44 }
 0xca1   :  { %9984 = vrcp.f32 %v12813_v57  ;;  %v9981_v11 = vpop.eup %9980  ;;  %v6721_v40 = vmul.f32 %v9979_v53, %v12792_v3  ;;  %vm6726_vm7 = vweird.f32 %v9979_v53  ;;  %v6695_v58 = vand.u32 2147483648, %v12788_v48  ;;  %vm6691_vm3 = vmor %vm6689_vm1, %vm6690_vm11 }
 0xca2   :  { %v6736_v41 = vmul.f32 %v9981_v11, %v12796_v1  ;;  %v9983_v8 = vpop.eup %9982  ;;  %9986 = vtanh.f32 %v6641_v61  ;;  %vm6741_vm9 = vweird.f32 %v9981_v11  ;;  %vm6727_vm13 = vmor %vm6725_vm10, %vm6726_vm7  ;;  %v6693_v56 = vand.u32 2147483647, %v12788_v48 }
 0xca3   :  { %v6722_v21 = vsub.f32 1.0, %v6721_v40  ;;  %v6704_v60 = vmul.f32 %v9983_v8, %v6667_v17  ;;  %vm6742_vm14 = vmor %vm6740_vm12, %vm6741_vm9  ;;  %vm6755_vm4 = vweird.f32 %v12813_v57  ;;  %v6759_v13 = vand.u32 2147483647, %v12813_v57 }
 0xca4   :  { %v6737_v2 = vsub.f32 1.0, %v6736_v41  ;;  %v6747_v41 = vor.u32 1.1754944e-38, %v6746_v16  ;;  %v6696_v32 = vor.u32 1.1754944e-38, %v6695_v58  ;;  %vm6694_vm6 = vcmp.eq.f32.partialorder %v6693_v56, 8.507059e+37 }
 0xca5   :  { %v6723_v25 = vmul.f32 %v9979_v53, %v6722_v21  ;;  %v12829_v17 = vadd.f32 %v6704_v60, %v6703_v7  ;;  %v6688_v60 = vadd.f32 %v12802_v44, %v6687_v20  ;;  %vm6760_vm7 = vcmp.eq.f32.partialorder %v6759_v13, 8.507059e+37 }
 0xca6   :  { %v6738_v35 = vmul.f32 %v9981_v11, %v6737_v2 }
 0xca7   :  { %v9985_v23 = vpop.eup %9984  ;;  %v6724_v27 = vadd.f32 %v9979_v53, %v6723_v25  ;;  %9988 = vtanh.f32 %v12829_v17 }
 0xca8   :  { %v6751_v61 = vmul.f32 %v9985_v23, %v12813_v57  ;;  %v6739_v40 = vadd.f32 %v9981_v11, %v6738_v35  ;;  %v9987_v10 = vpop.eup %9986  ;;  %vm6756_vm2 = vweird.f32 %v9985_v23 }
 0xca9   :  { %v6728_v21 = vsel %vm6727_vm13, %v9979_v53, %v6724_v27  ;;  %vm6757_vm5 = vmor %vm6755_vm4, %vm6756_vm2 }
 0xcaa   :  { %v6752_v8 = vsub.f32 1.0, %v6751_v61  ;;  %v6733_v2 = vsel %vm6730_vm15, %v6732_v37, %v6728_v21  ;;  %v6743_v38 = vsel %vm6742_vm14, %v9981_v11, %v6739_v40  ;;  %v6692_v11 = vsel %vm6691_vm3, %v12802_v44, %v6688_v60 }
 0xcab   :  { %v6748_v3 = vsel %vm6745_vm0, %v6747_v41, %v6743_v38  ;;  %v6770_v7 = vmul.f32 %v9987_v10, %v6733_v2  ;;  %v6761_v38 = vand.u32 2147483648, %v12813_v57  ;;  %v6697_v61 = vsel %vm6694_vm6, %v6696_v32, %v6692_v11  ;;  %v14114_v57 = vld [vmem:[#allocation75_spill] sm:$0xff] }
 0xcac   :  { %v6753_v25 = vmul.f32 %v9985_v23, %v6752_v8  ;;  %v6769_v1 = vmul.f32 %v6767_v5, %v6748_v3  ;;  %v14115_v5 = vld [vmem:[#allocation52_spill] sm:$0xff] }
 0xcad   :  { %v9989_v35 = vpop.eup %9988  ;;  %v6762_v48 = vor.u32 1.1754944e-38, %v6761_v38 }
 0xcae   :  { %v12837_v16 = vadd.f32 %v6770_v7, %v6769_v1  ;;  %v6754_v53 = vadd.f32 %v9985_v23, %v6753_v25  ;;  %v6707_v27 = vmul.f32 %v9989_v35, %v6697_v61 }
 0xcb0   :  { %9990 = vtanh.f32 %v12837_v16  ;;  %v6758_v20 = vsel %vm6757_vm5, %v9985_v23, %v6754_v53  ;;  %v6775_v41 = vrot.slane %v6707_v27, 2  ;;  %v14116_v53 = vld [vmem:[#allocation60_spill] sm:$0xff] }
 0xcb1   :  { %v6763_v40 = vsel %vm6760_vm7, %v6762_v48, %v6758_v20 }
 0xcb6   :  { %v9991_v37 = vpop.eup %9990 }
 0xcb7   :  { %v6773_v10 = vmul.f32 %v9991_v37, %v6763_v40  ;;  %v14117_v40 = vld [vmem:[#allocation26_spill] sm:$0xff] }
 0xcb9   :  { %v6778_v8 = vrot.slane %v6773_v10, 2 }
 0xcbb   :  { %v6780_v44 = vsel %vm1879_vm8, %v6775_v41, %v6778_v8  ;;  %v14118_v41 = vld [vmem:[#allocation73_spill] sm:$0xff] }
 0xcbc   :  { %v6781_v21 = vpack.c.bf16 %v6780_v44, %v6780_v44 }
 0xcbe   :  { %6790 = vmatmul.bf16.vlgmr.msra.gmra.mxu0 %v6781_v21  ;;  %6803 = vmatmul.bf16.vlgmr.msra.gmra.mxu1 %v6781_v21 }
 0xcbf   :  { %6816 = vmatmul.bf16.vlgmr.msra.gmra.mxu2 %v6781_v21  ;;  %6829 = vmatmul.bf16.vlgmr.msra.gmra.mxu3 %v6781_v21 }
 0xcc0   :  { %7082 = vmatpush.bf16.msra.mxu3 %v11696_v33  ;;  %7043 = vmatpush.bf16.msra.mxu0 %v11690_v54  ;;  %v14084_v54 = vld [vmem:[#allocation33_spill] sm:$0xff]  ;;  %v14087_v33 = vld [vmem:[#allocation42_spill] sm:$0xff] }
 0xcc1   :  { %7056 = vmatpush.bf16.msra.mxu1 %v11692_v26  ;;  %7069 = vmatpush.bf16.msra.mxu2 %v11694_v47  ;;  %v14085_v26 = vld [vmem:[#allocation36_spill] sm:$0xff]  ;;  %v14086_v47 = vld [vmem:[#allocation43_spill] sm:$0xff] }
 0xcc4   :  { %7083 = vmatpush.bf16.msra.mxu3 %v11708_v46  ;;  %7044 = vmatpush.bf16.msra.mxu0 %v11699_v51  ;;  %v14088_v51 = vld [vmem:[#allocation39_spill] sm:$0xff]  ;;  %v14091_v46 = vld [vmem:[#allocation44_spill] sm:$0xff] }
 0xcc5   :  { %7057 = vmatpush.bf16.msra.mxu1 %v11703_v29  ;;  %7070 = vmatpush.bf16.msra.mxu2 %v11705_v30  ;;  %v14089_v29 = vld [vmem:[#allocation40_spill] sm:$0xff]  ;;  %v14090_v30 = vld [vmem:[#allocation47_spill] sm:$0xff] }
 0xcc8   :  { %7084 = vmatpush.bf16.msra.mxu3 %v11724_v24  ;;  %7045 = vmatpush.bf16.msra.mxu0 %v11714_v6  ;;  %v14092_v6 = vld [vmem:[#allocation45_spill] sm:$0xff]  ;;  %v14095_v24 = vld [vmem:[#allocation48_spill] sm:$0xff] }
 0xcc9   :  { %7058 = vmatpush.bf16.msra.mxu1 %v11719_v22  ;;  %7071 = vmatpush.bf16.msra.mxu2 %v11721_v34  ;;  %v14093_v22 = vld [vmem:[#allocation46_spill] sm:$0xff]  ;;  %v14094_v34 = vld [vmem:[#allocation51_spill] sm:$0xff] }
 0xccc   :  { %7085 = vmatpush.bf16.msra.mxu3 %v11736_v15  ;;  %7046 = vmatpush.bf16.msra.mxu0 %v11727_v43  ;;  %v14096_v43 = vld [vmem:[#allocation49_spill] sm:$0xff] }
 0xccd   :  { %7059 = vmatpush.bf16.msra.mxu1 %v11731_v50  ;;  %7072 = vmatpush.bf16.msra.mxu2 %v11733_v59  ;;  %v14097_v50 = vld [vmem:[#allocation50_spill] sm:$0xff]  ;;  %v14098_v59 = vld [vmem:[#allocation56_spill] sm:$0xff]  ;;  %v14099_v15 = vld [vmem:[#allocation53_spill] sm:$0xff] }
 0xcce   :  { %6842 = vmatmul.bf16.vlgmr.msrb.gmra.mxu0 %v6781_v21  ;;  %6855 = vmatmul.bf16.vlgmr.msrb.gmra.mxu1 %v6781_v21 }
 0xccf   :  { %6868 = vmatmul.bf16.vlgmr.msrb.gmra.mxu2 %v6781_v21  ;;  %6881 = vmatmul.bf16.vlgmr.msrb.gmra.mxu3 %v6781_v21 }
 0xcd0   :  { %7086 = vmatpush.bf16.msra.mxu3 %v11748_v55  ;;  %7047 = vmatpush.bf16.msra.mxu0 %v11739_v18  ;;  %v14100_v18 = vld [vmem:[#allocation54_spill] sm:$0xff]  ;;  %v14103_v55 = vld [vmem:[#allocation57_spill] sm:$0xff] }
 0xcd1   :  { %7060 = vmatpush.bf16.msra.mxu1 %v11743_v31  ;;  %7073 = vmatpush.bf16.msra.mxu2 %v11745_v39  ;;  %v14101_v31 = vld [vmem:[#allocation55_spill] sm:$0xff]  ;;  %v14102_v39 = vld [vmem:[#allocation61_spill] sm:$0xff] }
 0xcd4   :  { %7087 = vmatpush.bf16.msra.mxu3 %v11760_v36  ;;  %7048 = vmatpush.bf16.msra.mxu0 %v11751_v52  ;;  %v14104_v52 = vld [vmem:[#allocation58_spill] sm:$0xff] }
 0xcd5   :  { %7061 = vmatpush.bf16.msra.mxu1 %v11755_v63  ;;  %7074 = vmatpush.bf16.msra.mxu2 %v11757_v4  ;;  %v14105_v63 = vld [vmem:[#allocation59_spill] sm:$0xff]  ;;  %v14106_v4 = vld [vmem:[#allocation65_spill] sm:$0xff]  ;;  %v14107_v36 = vld [vmem:[#allocation62_spill] sm:$0xff] }
 0xcd8   :  { %7088 = vmatpush.bf16.msra.mxu3 %v11772_v42  ;;  %7049 = vmatpush.bf16.msra.mxu0 %v11763_v49  ;;  %v14108_v49 = vld [vmem:[#allocation63_spill] sm:$0xff]  ;;  %v14111_v42 = vld [vmem:[#allocation66_spill] sm:$0xff] }
 0xcd9   :  { %7062 = vmatpush.bf16.msra.mxu1 %v11767_v62  ;;  %7075 = vmatpush.bf16.msra.mxu2 %v11769_v14  ;;  %v14109_v62 = vld [vmem:[#allocation64_spill] sm:$0xff]  ;;  %v14110_v14 = vld [vmem:[#allocation69_spill] sm:$0xff] }
 0xcdc   :  { %7089 = vmatpush.bf16.msra.mxu3 %v14041_v9  ;;  %7050 = vmatpush.bf16.msra.mxu0 %v11775_v45  ;;  %v14112_v45 = vld [vmem:[#allocation67_spill] sm:$0xff] }
 0xcdd   :  { %7063 = vmatpush.bf16.msra.mxu1 %v11779_v12  ;;  %7076 = vmatpush.bf16.msra.mxu2 %v11781_v19  ;;  %v14113_v12 = vld [vmem:[#allocation68_spill] sm:$0xff] }
 0xce0   :  { %7134 = vmatpush.bf16.msrb.mxu3 %v14045_v0  ;;  %7095 = vmatpush.bf16.msrb.mxu0 %v14042_v28 }
 0xce1   :  { %7108 = vmatpush.bf16.msrb.mxu1 %v14084_v54  ;;  %7121 = vmatpush.bf16.msrb.mxu2 %v14085_v26 }
 0xce4   :  { %7135 = vmatpush.bf16.msrb.mxu3 %v14086_v47  ;;  %7096 = vmatpush.bf16.msrb.mxu0 %v14087_v33 }
 0xce5   :  { %7109 = vmatpush.bf16.msrb.mxu1 %v14088_v51  ;;  %7122 = vmatpush.bf16.msrb.mxu2 %v14089_v29 }
 0xce8   :  { %7136 = vmatpush.bf16.msrb.mxu3 %v14090_v30  ;;  %7097 = vmatpush.bf16.msrb.mxu0 %v14091_v46 }
 0xce9   :  { %7110 = vmatpush.bf16.msrb.mxu1 %v14092_v6  ;;  %7123 = vmatpush.bf16.msrb.mxu2 %v14093_v22 }
 0xcec   :  { %7137 = vmatpush.bf16.msrb.mxu3 %v14094_v34  ;;  %7098 = vmatpush.bf16.msrb.mxu0 %v14095_v24 }
 0xced   :  { %7111 = vmatpush.bf16.msrb.mxu1 %v14096_v43  ;;  %7124 = vmatpush.bf16.msrb.mxu2 %v14097_v50  ;;  %v14119_v43 = vld [vmem:[#allocation37_spill] sm:$0xff] }
 0xcf0   :  { %7138 = vmatpush.bf16.msrb.mxu3 %v14098_v59  ;;  %7099 = vmatpush.bf16.msrb.mxu0 %v14099_v15 }
 0xcf1   :  { %7112 = vmatpush.bf16.msrb.mxu1 %v14100_v18  ;;  %7125 = vmatpush.bf16.msrb.mxu2 %v14101_v31 }
 0xcf4   :  { %7139 = vmatpush.bf16.msrb.mxu3 %v14102_v39  ;;  %7100 = vmatpush.bf16.msrb.mxu0 %v14103_v55  ;;  %v14120_v55 = vld [vmem:[#allocation28_spill] sm:$0xff] }
 0xcf5   :  { %7113 = vmatpush.bf16.msrb.mxu1 %v14104_v52  ;;  %7126 = vmatpush.bf16.msrb.mxu2 %v14105_v63 }
 0xcf8   :  { %7140 = vmatpush.bf16.msrb.mxu3 %v14106_v4  ;;  %7101 = vmatpush.bf16.msrb.mxu0 %v14107_v36 }
 0xcf9   :  { %7114 = vmatpush.bf16.msrb.mxu1 %v14108_v49  ;;  %7127 = vmatpush.bf16.msrb.mxu2 %v14109_v62 }
 0xcfc   :  { %7141 = vmatpush.bf16.msrb.mxu3 %v14110_v14  ;;  %7102 = vmatpush.bf16.msrb.mxu0 %v14111_v42 }
 0xcfd   :  { %7115 = vmatpush.bf16.msrb.mxu1 %v14112_v45  ;;  %7128 = vmatpush.bf16.msrb.mxu2 %v14113_v12 }
 0xd3b   :  { %v6791_v19 = vpop.f32.mrf.mxu0  ;;  %v6804_v9 = vpop.f32.mrf.mxu1 }
 0xd3c   :  { %v6890_v28 = vrot.slane %v6791_v19, 4  ;;  %v6891_v0 = vrot.slane %v6804_v9, 4 }
 0xd3e   :  { %v6898_v23 = vadd.f32 %v6890_v28, %v14114_v57  ;;  %v6899_v2 = vadd.f32 %v6891_v0, %v14115_v5 }
 0xd40   :  { %v9135_v25 = vmul.f32 -1.442695, %v6898_v23  ;;  %v9136_v3 = vmul.f32 -1.442695, %v6899_v2 }
 0xd42   :  { %9992 = vpow2.f32 %v9135_v25  ;;  %v6817_v7 = vpop.f32.mrf.mxu2  ;;  %v6830_v1 = vpop.f32.mrf.mxu3 }
 0xd43   :  { %9994 = vpow2.f32 %v9136_v3  ;;  %v6892_v60 = vrot.slane %v6817_v7, 4  ;;  %v6793_v58 = vpop.f32.mrf.mxu0  ;;  %v6806_v56 = vpop.f32.mrf.mxu1  ;;  %v6893_v24 = vrot.slane %v6830_v1, 4 }
 0xd44   :  { %v14123_v58 = vld [vmem:[#allocation22_spill] sm:$0xff] }
 0xd45   :  { %v6900_v38 = vadd.f32 %v6892_v60, %v14116_v53  ;;  %v6901_v52 = vadd.f32 %v6893_v24, %v14120_v55 }
 0xd47   :  { %v9137_v11 = vmul.f32 -1.442695, %v6900_v38 }
 0xd48   :  { %v9993_v13 = vpop.eup %9992 }
 0xd49   :  { %v9995_v35 = vpop.eup %9994  ;;  %v12914_v32 = vadd.f32 1.0, %v9993_v13  ;;  %9996 = vpow2.f32 %v9137_v11 }
 0xd4a   :  { %v12916_v20 = vadd.f32 1.0, %v9995_v35  ;;  %v6819_v61 = vpop.f32.mrf.mxu2  ;;  %v6832_v48 = vpop.f32.mrf.mxu3 }
 0xd4b   :  { %9998 = vrcp.f32 %v12914_v32  ;;  %v6843_v27 = vpop.f32.mrf.mxu0  ;;  %v6856_v37 = vpop.f32.mrf.mxu1  ;;  %v6929_v45 = vand.u32 2147483648, %v12914_v32  ;;  %vm6923_vm14 = vweird.f32 %v12914_v32  ;;  %v6927_v9 = vand.u32 2147483647, %v12914_v32 }
 0xd4c   :  { %10000 = vrcp.f32 %v12916_v20  ;;  %v6902_v10 = vadd.f32 %v6843_v27, %v14117_v40  ;;  %v6903_v8 = vadd.f32 %v6856_v37, %v14118_v41  ;;  %vm6938_vm12 = vweird.f32 %v12916_v20 }
 0xd4d   :  { %v6944_v42 = vand.u32 2147483648, %v12916_v20  ;;  %v6942_v28 = vand.u32 2147483647, %v12916_v20  ;;  %v6930_v7 = vor.u32 1.1754944e-38, %v6929_v45  ;;  %vm6928_vm0 = vcmp.eq.f32.partialorder %v6927_v9, 8.507059e+37 }
 0xd4e   :  { %v9138_v44 = vmul.f32 -1.442695, %v6902_v10  ;;  %v9139_v54 = vmul.f32 -1.442695, %v6903_v8 }
 0xd4f   :  { %v9997_v21 = vpop.eup %9996  ;;  %v6945_v3 = vor.u32 1.1754944e-38, %v6944_v42  ;;  %vm6943_vm11 = vcmp.eq.f32.partialorder %v6942_v28, 8.507059e+37 }
 0xd50   :  { %10002 = vpow2.f32 %v9138_v44  ;;  %v12924_v46 = vadd.f32 1.0, %v9997_v21 }
 0xd51   :  { %v9999_v26 = vpop.eup %9998  ;;  %10004 = vpow2.f32 %v9139_v54 }
 0xd52   :  { %v10001_v47 = vpop.eup %10000  ;;  %v6919_v33 = vmul.f32 %v9999_v26, %v12914_v32  ;;  %v6869_v51 = vpop.f32.mrf.mxu2  ;;  %10006 = vrcp.f32 %v12924_v46  ;;  %vm6924_vm10 = vweird.f32 %v9999_v26  ;;  %v6957_v42 = vand.u32 2147483647, %v12924_v46 }
 0xd53   :  { %v6882_v29 = vpop.f32.mrf.mxu3  ;;  %v6934_v30 = vmul.f32 %v10001_v47, %v12916_v20  ;;  %v6845_v6 = vpop.f32.mrf.mxu0  ;;  %v6904_v50 = vadd.f32 %v6869_v51, %v14119_v43  ;;  %vm6939_vm9 = vweird.f32 %v10001_v47  ;;  %vm6925_vm15 = vmor %vm6923_vm14, %vm6924_vm10  ;;  %v6965_v20 = vrot.slane %v12829_v17, 6 }
 0xd54   :  { %v6858_v22 = vpop.f32.mrf.mxu1  ;;  %v6920_v34 = vsub.f32 1.0, %v6919_v33  ;;  %vm12937_vm13 = vmor %vm6938_vm12, %vm6939_vm9  ;;  %v6905_v56 = vadd.f32 %v6882_v29, %v14123_v58  ;;  %vm6953_vm12 = vweird.f32 %v12924_v46 }
 0xd55   :  { %v6935_v59 = vsub.f32 1.0, %v6934_v30  ;;  %v9140_v18 = vmul.f32 -1.442695, %v6904_v50 }
 0xd56   :  { %v6921_v15 = vmul.f32 %v9999_v26, %v6920_v34  ;;  %v10003_v31 = vpop.eup %10002 }
 0xd57   :  { %v6936_v39 = vmul.f32 %v10001_v47, %v6935_v59  ;;  %v12929_v63 = vadd.f32 1.0, %v10003_v31  ;;  %10008 = vpow2.f32 %v9140_v18  ;;  %v10005_v4 = vpop.eup %10004 }
 0xd58   :  { %v6922_v36 = vadd.f32 %v9999_v26, %v6921_v15  ;;  %v12935_v12 = vadd.f32 1.0, %v10005_v4  ;;  %v12944_v0 = vpop.eup %10006 }
 0xd59   :  { %v6937_v49 = vadd.f32 %v10001_v47, %v6936_v39  ;;  %10010 = vrcp.f32 %v12929_v63  ;;  %v6949_v38 = vmul.f32 %v12944_v0, %v12924_v46  ;;  %v6995_v27 = vand.u32 2147483648, %v12929_v63 }
 0xd5a   :  { %v6871_v62 = vpop.f32.mrf.mxu2  ;;  %10012 = vtanh.f32 %v6901_v52  ;;  %v6926_v2 = vsel %vm6925_vm15, %v9999_v26, %v6922_v36  ;;  %v6993_v54 = vand.u32 2147483647, %v12929_v63  ;;  %vm6989_vm2 = vweird.f32 %v12929_v63 }
 0xd5b   :  { %v6884_v14 = vpop.f32.mrf.mxu3  ;;  %10014 = vrcp.f32 %v12935_v12  ;;  %v6941_v25 = vsel %vm12937_vm13, %v10001_v47, %v6937_v49  ;;  %v6931_v11 = vsel %vm6928_vm0, %v6930_v7, %v6926_v2  ;;  %v6950_v44 = vsub.f32 1.0, %v6949_v38 }
 0xd5c   :  { %v6946_v13 = vsel %vm6943_vm11, %v6945_v3, %v6941_v25  ;;  %v7010_v47 = vand.u32 2147483648, %v12935_v12  ;;  %v6996_v33 = vor.u32 1.1754944e-38, %v6995_v27  ;;  %v7008_v6 = vand.u32 2147483647, %v12935_v12  ;;  %v7372_v27 = vld [vmem:[%s13256_s7 + $0x1c0] sm:$0xff] }
 0xd5d   :  { %v10009_v23 = vpop.eup %10008  ;;  %v6967_v37 = vmul.f32 %v6965_v20, %v6946_v13  ;;  %v6951_v22 = vmul.f32 %v12944_v0, %v6950_v44  ;;  %vm6994_vm5 = vcmp.eq.f32.partialorder %v6993_v54, 8.507059e+37  ;;  %vm7004_vm6 = vweird.f32 %v12935_v12  ;;  %v7379_v13 = vld [vmem:[%s13256_s7 + $0x1f8] sm:$0xff]  ;;  %v7368_v44 = vld [vmem:[%s13256_s7 + $0x1a0] sm:$0xff]  ;;  %v7366_v54 = vld [vmem:[%s13256_s7 + $0x190] sm:$0xff] }
 0xd5e   :  { %v12950_v1 = vadd.f32 1.0, %v10009_v23  ;;  %v7011_v18 = vor.u32 1.1754944e-38, %v7010_v47  ;;  %v7031_v39 = vrot.slane %v12837_v16, 2  ;;  %vm7009_vm9 = vcmp.eq.f32.partialorder %v7008_v6, 8.507059e+37  ;;  %v7375_v20 = vld [vmem:[%s13256_s7 + $0x1d8] sm:$0xff]  ;;  %v7364_v47 = vld [vmem:[%s13256_s7 + $0x180] sm:$0xff] }
 0xd5f   :  { %v10011_v60 = vpop.eup %10010  ;;  %v6952_v4 = vadd.f32 %v12944_v0, %v6951_v22  ;;  %vm6954_vm10 = vweird.f32 %v12944_v0  ;;  %v6959_v62 = vand.u32 2147483648, %v12924_v46  ;;  %vm6958_vm15 = vcmp.eq.f32.partialorder %v6957_v42, 8.507059e+37  ;;  %v7361_v6 = vld [vmem:[%s13256_s7 + $0x168] sm:$0xff]  ;;  %v7347_v22 = vld [vmem:[%s13256_s7 + $0xf8] sm:$0xff] }
 0xd60   :  { %v6985_v35 = vmul.f32 %v10011_v60, %v12929_v63  ;;  %v10013_v32 = vpop.eup %10012  ;;  %10016 = vrcp.f32 %v12950_v1  ;;  %vm6990_vm1 = vweird.f32 %v10011_v60  ;;  %vm6955_vm13 = vmor %vm6953_vm12, %vm6954_vm10  ;;  %v7025_v28 = vand.u32 2147483648, %v12950_v1 }
 0xd61   :  { %v10015_v61 = vpop.eup %10014  ;;  %v6968_v10 = vmul.f32 %v10013_v32, %v6931_v11  ;;  %10018 = vtanh.f32 %v6905_v56  ;;  %vm6991_vm4 = vmor %vm6989_vm2, %vm6990_vm1  ;;  %v6956_v45 = vsel %vm6955_vm13, %v12944_v0, %v6952_v4  ;;  %v6960_v9 = vor.u32 1.1754944e-38, %v6959_v62  ;;  %v7376_v32 = vld [vmem:[%s13256_s7 + $0x1e0] sm:$0xff] }
 0xd62   :  { %v6986_v48 = vsub.f32 1.0, %v6985_v35  ;;  %v7000_v8 = vmul.f32 %v10015_v61, %v12935_v12  ;;  %vm7005_vm3 = vweird.f32 %v10015_v61  ;;  %vm7019_vm0 = vweird.f32 %v12950_v1  ;;  %v7377_v35 = vld [vmem:[%s13256_s7 + $0x1e8] sm:$0xff]  ;;  %v7356_v62 = vld [vmem:[%s13256_s7 + $0x140] sm:$0xff] }
 0xd63   :  { %v12963_v29 = vadd.f32 %v6968_v10, %v6967_v37  ;;  %vm7006_vm7 = vmor %vm7004_vm6, %vm7005_vm3  ;;  %v7023_v23 = vand.u32 2147483647, %v12950_v1  ;;  %v6961_v2 = vsel %vm6958_vm15, %v6960_v9, %v6956_v45  ;;  %v7026_v3 = vor.u32 1.1754944e-38, %v7025_v28  ;;  %v7371_v37 = vld [vmem:[%s13256_s7 + $0x1b8] sm:$0xff]  ;;  %v7370_v10 = vld [vmem:[%s13256_s7 + $0x1b0] sm:$0xff] }
 0xd64   :  { %v6987_v21 = vmul.f32 %v10011_v60, %v6986_v48  ;;  %v7001_v26 = vsub.f32 1.0, %v7000_v8  ;;  %v7373_v48 = vld [vmem:[%s13256_s7 + $0x1c8] sm:$0xff] }
 0xd65   :  { %10020 = vtanh.f32 %v12963_v29  ;;  %vm7024_vm1 = vcmp.eq.f32.partialorder %v7023_v23, 8.507059e+37  ;;  %v7369_v8 = vld [vmem:[%s13256_s7 + $0x1a8] sm:$0xff] }
 0xd66   :  { %v6988_v17 = vadd.f32 %v10011_v60, %v6987_v21  ;;  %v10017_v51 = vpop.eup %10016  ;;  %v7002_v30 = vmul.f32 %v10015_v61, %v7001_v26  ;;  %v7367_v21 = vld [vmem:[%s13256_s7 + $0x198] sm:$0xff]  ;;  %v7365_v26 = vld [vmem:[%s13256_s7 + $0x188] sm:$0xff] }
 0xd67   :  { %v7015_v34 = vmul.f32 %v10017_v51, %v12950_v1  ;;  %v10019_v50 = vpop.eup %10018  ;;  %vm7020_vm14 = vweird.f32 %v10017_v51  ;;  %v7378_v1 = vld [vmem:[%s13256_s7 + $0x1f0] sm:$0xff]  ;;  %v7341_v9 = vld [vmem:[%s13256_s7 + $0xc8] sm:$0xff] }
 0xd68   :  { %v6992_v24 = vsel %vm6991_vm4, %v10011_v60, %v6988_v17  ;;  %v7003_v15 = vadd.f32 %v10015_v61, %v7002_v30  ;;  %vm7021_vm11 = vmor %vm7019_vm0, %vm7020_vm14  ;;  %v14124_v17 = vld [vmem:[#allocation76_spill] sm:$0xff] }
 0xd69   :  { %v6997_v59 = vsel %vm6994_vm5, %v6996_v33, %v6992_v24  ;;  %v7016_v31 = vsub.f32 1.0, %v7015_v34  ;;  %v7314_v33 = vrot.slane %v14124_v17, 6  ;;  %v7362_v30 = vld [vmem:[%s13256_s7 + $0x170] sm:$0xff]  ;;  %v7360_v34 = vld [vmem:[%s13256_s7 + $0x160] sm:$0xff]  ;;  %v7349_v17 = vld [vmem:[%s13256_s7 + $0x108] sm:$0xff] }
 0xd6a   :  { %v7007_v52 = vsel %vm7006_vm7, %v10015_v61, %v7003_v15  ;;  %v7034_v63 = vmul.f32 %v10019_v50, %v6997_v59  ;;  %v7374_v61 = vld [vmem:[%s13256_s7 + $0x1d0] sm:$0xff]  ;;  %v7359_v50 = vld [vmem:[%s13256_s7 + $0x158] sm:$0xff]  ;;  %v7345_v59 = vld [vmem:[%s13256_s7 + $0xe8] sm:$0xff] }
 0xd6b   :  { %v7017_v36 = vmul.f32 %v10017_v51, %v7016_v31  ;;  %v7012_v49 = vsel %vm7009_vm9, %v7011_v18, %v7007_v52  ;;  %v10021_v19 = vpop.eup %10020  ;;  %v7346_v24 = vld [vmem:[%s13256_s7 + $0xf0] sm:$0xff]  ;;  %v7344_v18 = vld [vmem:[%s13256_s7 + $0xe0] sm:$0xff]  ;;  %v7357_v31 = vld [vmem:[%s13256_s7 + $0x148] sm:$0xff] }
 0xd6c   :  { %v7033_v14 = vmul.f32 %v7031_v39, %v7012_v49  ;;  %v6971_v46 = vmul.f32 %v10021_v19, %v6961_v2  ;;  %v7358_v15 = vld [vmem:[%s13256_s7 + $0x150] sm:$0xff]  ;;  %v7331_v49 = vld [vmem:[%s13256_s7 + $0x78] sm:$0xff]  ;;  %v7340_v2 = vld [vmem:[%s13256_s7 + $0xc0] sm:$0xff] }
 0xd6d   :  { %v7018_v12 = vadd.f32 %v10017_v51, %v7017_v36  ;;  %v7355_v19 = vld [vmem:[%s13256_s7 + $0x138] sm:$0xff] }
 0xd6e   :  { %v12976_v16 = vadd.f32 %v7034_v63, %v7033_v14  ;;  %v7039_v60 = vrot.slane %v6971_v46, 4  ;;  %v7343_v63 = vld [vmem:[%s13256_s7 + $0xd8] sm:$0xff]  ;;  %v7342_v14 = vld [vmem:[%s13256_s7 + $0xd0] sm:$0xff] }
 0xd6f   :  { %v7022_v25 = vsel %vm7021_vm11, %v10017_v51, %v7018_v12  ;;  %v7363_v51 = vld [vmem:[%s13256_s7 + $0x178] sm:$0xff]  ;;  %v7330_v12 = vld [vmem:[%s13256_s7 + $0x70] sm:$0xff] }
 0xd70   :  { %10022 = vtanh.f32 %v12976_v16  ;;  %v7027_v7 = vsel %vm7024_vm1, %v7026_v3, %v7022_v25  ;;  %v7328_v3 = vld [vmem:[%s13256_s7 + $0x60] sm:$0xff] }
 0xd76   :  { %v10023_v0 = vpop.eup %10022 }
 0xd77   :  { %v7037_v56 = vmul.f32 %v10023_v0, %v7027_v7  ;;  %v7353_v0 = vld [vmem:[%s13256_s7 + $0x128] sm:$0xff] }
 0xd79   :  { %v7041_v38 = vsel %vm1879_vm8, %v7039_v60, %v7037_v56 }
 0xd7a   :  { %v7042_v11 = vpack.c.bf16 %v7041_v38, %v7041_v38  ;;  %v7339_v38 = vld [vmem:[%s13256_s7 + $0xb8] sm:$0xff] }
 0xd7c   :  { %7051 = vmatmul.bf16.vlgmr.msra.gmra.mxu0 %v7042_v11  ;;  %7064 = vmatmul.bf16.vlgmr.msra.gmra.mxu1 %v7042_v11 }
 0xd7d   :  { %7077 = vmatmul.bf16.vlgmr.msra.gmra.mxu2 %v7042_v11  ;;  %7090 = vmatmul.bf16.vlgmr.msra.gmra.mxu3 %v7042_v11 }
 0xd7e   :  { %7444 = vmatpush.msra.mxu3 %v7379_v13  ;;  %7424 = vmatpush.msra.mxu2 %v7363_v51  ;;  %v7352_v13 = vld [vmem:[%s13256_s7 + $0x120] sm:$0xff]  ;;  %v7335_v51 = vld [vmem:[%s13256_s7 + $0x98] sm:$0xff] }
 0xd7f   :  { %7404 = vmatpush.msra.mxu1 %v7347_v22  ;;  %7384 = vmatpush.msra.mxu0 %v7331_v49  ;;  %v7348_v22 = vld [vmem:[%s13256_s7 + $0x100] sm:$0xff] }
 0xd80   :  { %7445 = vmatpush.msra.mxu3 %v7378_v1  ;;  %7425 = vmatpush.msra.mxu2 %v7362_v30  ;;  %v7320_v49 = vld [vmem:[%s13256_s7 + $0x20] sm:$0xff] }
 0xd81   :  { %7405 = vmatpush.msra.mxu1 %v7346_v24  ;;  %7385 = vmatpush.msra.mxu0 %v7330_v12 }
 0xd82   :  { %7446 = vmatpush.msra.mxu3 %v7377_v35  ;;  %7426 = vmatpush.msra.mxu2 %v7361_v6  ;;  %v7338_v35 = vld [vmem:[%s13256_s7 + $0xb0] sm:$0xff]  ;;  %v7323_v6 = vld [vmem:[%s13256_s7 + $0x38] sm:$0xff] }
 0xd83   :  { %7406 = vmatpush.msra.mxu1 %v7345_v59  ;;  %v7334_v59 = vld [vmem:[%s13256_s7 + $0x90] sm:$0xff] }
 0xd84   :  { %7447 = vmatpush.msra.mxu3 %v7376_v32  ;;  %7427 = vmatpush.msra.mxu2 %v7360_v34  ;;  %v7326_v32 = vld [vmem:[%s13256_s7 + $0x50] sm:$0xff] }
 0xd85   :  { %7407 = vmatpush.msra.mxu1 %v7344_v18  ;;  %v7333_v18 = vld [vmem:[%s13256_s7 + $0x88] sm:$0xff] }
 0xd86   :  { %7448 = vmatpush.msra.mxu3 %v7375_v20  ;;  %7428 = vmatpush.msra.mxu2 %v7359_v50  ;;  %v7351_v20 = vld [vmem:[%s13256_s7 + $0x118] sm:$0xff] }
 0xd87   :  { %7408 = vmatpush.msra.mxu1 %v7343_v63 }
 0xd88   :  { %7449 = vmatpush.msra.mxu3 %v7374_v61  ;;  %7429 = vmatpush.msra.mxu2 %v7358_v15  ;;  %v7322_v15 = vld [vmem:[%s13256_s7 + $0x30] sm:$0xff] }
 0xd89   :  { %7409 = vmatpush.msra.mxu1 %v7342_v14 }
 0xd8a   :  { %7450 = vmatpush.msra.mxu3 %v7373_v48  ;;  %7430 = vmatpush.msra.mxu2 %v7357_v31  ;;  %v7321_v31 = vld [vmem:[%s13256_s7 + $0x28] sm:$0xff] }
 0xd8b   :  { %7410 = vmatpush.msra.mxu1 %v7341_v9 }
 0xd8c   :  { %7451 = vmatpush.msra.mxu3 %v7372_v27  ;;  %7103 = vmatmul.bf16.vlgmr.msrb.gmra.mxu0 %v7042_v11  ;;  %v7325_v27 = vld [vmem:[%s13256_s7 + $0x48] sm:$0xff] }
 0xd8d   :  { %7116 = vmatmul.bf16.vlgmr.msrb.gmra.mxu1 %v7042_v11  ;;  %7129 = vmatmul.bf16.vlgmr.msrb.gmra.mxu2 %v7042_v11 }
 0xd8e   :  { %7142 = vmatmul.bf16.vlgmr.msrb.gmra.mxu3 %v7042_v11  ;;  %7431 = vmatpush.msra.mxu2 %v7356_v62  ;;  %v7327_v11 = vld [vmem:[%s13256_s7 + $0x58] sm:$0xff] }
 0xd8f   :  { %7452 = vmatpush.msra.mxu3 %v7371_v37  ;;  %7411 = vmatpush.msra.mxu1 %v7340_v2  ;;  %v7350_v37 = vld [vmem:[%s13256_s7 + $0x110] sm:$0xff] }
 0xd90   :  { %7432 = vmatpush.msra.mxu2 %v7355_v19  ;;  %v7319_v19 = vld [vmem:[%s13256_s7 + $0x18] sm:$0xff] }
 0xd91   :  { %7453 = vmatpush.msra.mxu3 %v7370_v10  ;;  %7412 = vmatpush.msra.mxu1 %v7339_v38  ;;  %v7317_v38 = vld [vmem:[%s13256_s7 + $0x8] sm:$0xff] }
 0xd93   :  { %7454 = vmatpush.msra.mxu3 %v7369_v8  ;;  %7413 = vmatpush.msra.mxu1 %v7338_v35 }
 0xd95   :  { %7455 = vmatpush.msra.mxu3 %v7368_v44  ;;  %v7336_v44 = vld [vmem:[%s13256_s7 + $0xa0] sm:$0xff] }
 0xd97   :  { %7456 = vmatpush.msra.mxu3 %v7367_v21 }
 0xd99   :  { %7457 = vmatpush.msra.mxu3 %v7366_v54 }
 0xd9b   :  { %7458 = vmatpush.msra.mxu3 %v7365_v26 }
 0xd9d   :  { %7459 = vmatpush.msra.mxu3 %v7364_v47  ;;  %v7324_v47 = vld [vmem:[%s13256_s7 + $0x40] sm:$0xff] }
 0xd9e   :  { %7460 = vmatmul.f32.vlgmr.msra.gmra.mxu3 %v7314_v33 }
 0xdf9   :  { %v7052_v39 = vpop.f32.mrf.mxu0  ;;  %v7065_v52 = vpop.f32.mrf.mxu1 }
 0xdfa   :  { %v7151_v4 = vrot.slane %v7052_v39, 2  ;;  %v7152_v36 = vrot.slane %v7065_v52, 2 }
 0xdfc   :  { %v7159_v42 = vadd.f32 %v7151_v4, %v14114_v57  ;;  %v7160_v45 = vadd.f32 %v7152_v36, %v14115_v5  ;;  %v7329_v57 = vld [vmem:[%s13256_s7 + $0x68] sm:$0xff]  ;;  %v7354_v5 = vld [vmem:[%s13256_s7 + $0x130] sm:$0xff]  ;;  %v7332_v4 = vld [vmem:[%s13256_s7 + $0x80] sm:$0xff] }
 0xdfd   :  { %7386 = vmatpush.msra.mxu0 %v7329_v57  ;;  %7433 = vmatpush.msra.mxu2 %v7354_v5 }
 0xdfe   :  { %v9141_v28 = vmul.f32 -1.442695, %v7159_v42  ;;  %v9142_v23 = vmul.f32 -1.442695, %v7160_v45 }
 0xdff   :  { %7387 = vmatpush.msra.mxu0 %v7328_v3  ;;  %7434 = vmatpush.msra.mxu2 %v7353_v0 }
 0xe00   :  { %10024 = vpow2.f32 %v9141_v28  ;;  %v7078_v46 = vpop.f32.mrf.mxu2  ;;  %v13098_v25 = vpop.f32.mrf.mxu3 }
 0xe01   :  { %10026 = vpow2.f32 %v9142_v23  ;;  %v7153_v7 = vrot.slane %v7078_v46, 2  ;;  %v7054_v60 = vpop.f32.mrf.mxu0  ;;  %v7067_v56 = vpop.f32.mrf.mxu1  ;;  %7388 = vmatpush.msra.mxu0 %v7327_v11  ;;  %7435 = vmatpush.msra.mxu2 %v7352_v13  ;;  %v7154_v34 = vrot.slane %v13098_v25, 2  ;;  %v7318_v46 = vld [vmem:[%s13256_s7 + $0x10] sm:$0xff]  ;;  %v7238_v11 = vrot.slane %v12963_v29, 6 }
 0xe03   :  { %v7161_v1 = vadd.f32 %v7153_v7, %v14116_v53  ;;  %7389 = vmatpush.msra.mxu0 %v7326_v32  ;;  %7436 = vmatpush.msra.mxu2 %v7351_v20  ;;  %v7337_v53 = vld [vmem:[%s13256_s7 + $0xa8] sm:$0xff]  ;;  %v7162_v14 = vadd.f32 %v7154_v34, %v14120_v55  ;;  %v7316_v20 = vld [vmem:[%s13256_s7] sm:$0xff] }
 0xe04   :  { %7414 = vmatpush.msra.mxu1 %v7337_v53 }
 0xe05   :  { %v9143_v61 = vmul.f32 -1.442695, %v7161_v1  ;;  %7390 = vmatpush.msra.mxu0 %v7325_v27  ;;  %7437 = vmatpush.msra.mxu2 %v7350_v37 }
 0xe06   :  { %v10025_v48 = vpop.eup %10024  ;;  %7415 = vmatpush.msra.mxu1 %v7336_v44 }
 0xe07   :  { %v10027_v10 = vpop.eup %10026  ;;  %v13134_v8 = vadd.f32 1.0, %v10025_v48  ;;  %10028 = vpow2.f32 %v9143_v61  ;;  %7391 = vmatpush.msra.mxu0 %v7324_v47  ;;  %7438 = vmatpush.msra.mxu2 %v7349_v17 }
 0xe08   :  { %v13139_v21 = vadd.f32 1.0, %v10027_v10  ;;  %v7080_v54 = vpop.f32.mrf.mxu2  ;;  %v7093_v26 = vpop.f32.mrf.mxu3  ;;  %7416 = vmatpush.msra.mxu1 %v7335_v51 }
 0xe09   :  { %10030 = vrcp.f32 %v13134_v8  ;;  %v7104_v33 = vpop.f32.mrf.mxu0  ;;  %7392 = vmatpush.msra.mxu0 %v7323_v6  ;;  %7439 = vmatpush.msra.mxu2 %v7348_v22  ;;  %v7200_v57 = vand.u32 2147483647, %v13134_v8  ;;  %v7202_v0 = vand.u32 2147483648, %v13134_v8  ;;  %vm7196_vm3 = vweird.f32 %v13134_v8 }
 0xe0a   :  { %10032 = vrcp.f32 %v13139_v21  ;;  %v7117_v30 = vpop.f32.mrf.mxu1  ;;  %v7167_v24 = vrot.slane %v7104_v33, 2  ;;  %7417 = vmatpush.msra.mxu1 %v7334_v59  ;;  %v7217_v3 = vand.u32 2147483648, %v13139_v21  ;;  %v7215_v60 = vand.u32 2147483647, %v13139_v21 }
 0xe0b   :  { %v7168_v50 = vrot.slane %v7117_v30, 2  ;;  %7393 = vmatpush.msra.mxu0 %v7322_v15  ;;  %vm7211_vm4 = vweird.f32 %v13139_v21  ;;  %vm13206_vm5 = vcmp.eq.f32.partialorder %v7200_v57, 8.507059e+37  ;;  %v7203_v48 = vor.u32 1.1754944e-38, %v7202_v0 }
 0xe0c   :  { %v7175_v52 = vadd.f32 %v7167_v24, %v14117_v40  ;;  %7418 = vmatpush.msra.mxu1 %v7333_v18  ;;  %v7218_v61 = vor.u32 1.1754944e-38, %v7217_v3  ;;  %vm7216_vm9 = vcmp.eq.f32.partialorder %v7215_v60, 8.507059e+37  ;;  %v7304_v3 = vrot.slane %v12976_v16, 2 }
 0xe0d   :  { %v10029_v39 = vpop.eup %10028  ;;  %v7176_v63 = vadd.f32 %v7168_v50, %v14118_v41  ;;  %7394 = vmatpush.msra.mxu0 %v7321_v31 }
 0xe0e   :  { %v13176_v36 = vadd.f32 1.0, %v10029_v39  ;;  %v9144_v42 = vmul.f32 -1.442695, %v7175_v52  ;;  %7419 = vmatpush.msra.mxu1 %v7332_v4 }
 0xe0f   :  { %v10031_v62 = vpop.eup %10030  ;;  %v9145_v45 = vmul.f32 -1.442695, %v7176_v63  ;;  %7395 = vmatpush.msra.mxu0 %v7320_v49 }
 0xe10   :  { %v10033_v40 = vpop.eup %10032  ;;  %v7192_v41 = vmul.f32 %v10031_v62, %v13134_v8  ;;  %10034 = vrcp.f32 %v13176_v36  ;;  %v7130_v12 = vpop.f32.mrf.mxu2  ;;  %vm7197_vm8 = vweird.f32 %v10031_v62  ;;  %v7232_v15 = vand.u32 2147483648, %v13176_v36 }
 0xe11   :  { %v7207_v9 = vmul.f32 %v10033_v40, %v13139_v21  ;;  %10036 = vpow2.f32 %v9144_v42  ;;  %v13188_v28 = vpop.f32.mrf.mxu3  ;;  %v7106_v55 = vpop.f32.mrf.mxu0  ;;  %v7169_v5 = vrot.slane %v7130_v12, 2  ;;  %7396 = vmatpush.msra.mxu0 %v7319_v19  ;;  %vm7212_vm2 = vweird.f32 %v10033_v40  ;;  %vm7198_vm6 = vmor %vm7196_vm3, %vm7197_vm8 }
 0xe12   :  { %v7193_v23 = vsub.f32 1.0, %v7192_v41  ;;  %10038 = vpow2.f32 %v9145_v45  ;;  %v7119_v2 = vpop.f32.mrf.mxu1  ;;  %vm7213_vm7 = vmor %vm7211_vm4, %vm7212_vm2  ;;  %v7170_v34 = vrot.slane %v13188_v28, 2  ;;  %v7230_v31 = vand.u32 2147483647, %v13176_v36 }
 0xe13   :  { %v7208_v25 = vsub.f32 1.0, %v7207_v9  ;;  %10040 = vtanh.f32 %v7162_v14  ;;  %v7177_v56 = vadd.f32 %v7169_v5, %v14119_v43  ;;  %7397 = vmatpush.msra.mxu0 %v7318_v46  ;;  %vm7226_vm12 = vweird.f32 %v13176_v36 }
 0xe14   :  { %v7194_v7 = vmul.f32 %v10031_v62, %v7193_v23  ;;  %v7178_v52 = vadd.f32 %v7170_v34, %v14123_v58  ;;  %vm7231_vm14 = vcmp.eq.f32.partialorder %v7230_v31, 8.507059e+37  ;;  %v7233_v42 = vor.u32 1.1754944e-38, %v7232_v15 }
 0xe15   :  { %v7209_v13 = vmul.f32 %v10033_v40, %v7208_v25  ;;  %v9146_v43 = vmul.f32 -1.442695, %v7177_v56  ;;  %7398 = vmatpush.msra.mxu0 %v7317_v38 }
 0xe16   :  { %v13203_v1 = vpop.eup %10034  ;;  %v7195_v35 = vadd.f32 %v10031_v62, %v7194_v7 }
 0xe17   :  { %v10037_v29 = vpop.eup %10036  ;;  %v7222_v53 = vmul.f32 %v13203_v1, %v13176_v36  ;;  %v7210_v27 = vadd.f32 %v10033_v40, %v7209_v13  ;;  %10042 = vpow2.f32 %v9146_v43  ;;  %7399 = vmatpush.msra.mxu0 %v7316_v20  ;;  %vm7227_vm10 = vweird.f32 %v13203_v1 }
 0xe18   :  { %v10039_v37 = vpop.eup %10038  ;;  %v7199_v10 = vsel %vm7198_vm6, %v10031_v62, %v7195_v35  ;;  %v13217_v8 = vadd.f32 1.0, %v10037_v29  ;;  %v7132_v44 = vpop.f32.mrf.mxu2  ;;  %vm7228_vm13 = vmor %vm7226_vm12, %vm7227_vm10  ;;  %vm7464_vm10 = vcmask 17408  }
 0xe19   :  { %v10041_v21 = vpop.eup %10040  ;;  %v7223_v54 = vsub.f32 1.0, %v7222_v53  ;;  %v7204_v26 = vsel %vm13206_vm5, %v7203_v48, %v7199_v10  ;;  %v7214_v47 = vsel %vm7213_vm7, %v10033_v40, %v7210_v27  ;;  %v13221_v17 = vadd.f32 1.0, %v10039_v37  ;;  %v7145_v33 = vpop.f32.mrf.mxu3  ;;  %v9799_v10 = vld [vmem:[%s13257_s8] ss:$0 sm:$0xff] }
 0xe1a   :  { %v7219_v51 = vsel %vm7216_vm9, %v7218_v61, %v7214_v47  ;;  %v7241_v30 = vmul.f32 %v10041_v21, %v7204_v26  ;;  %10044 = vrcp.f32 %v13217_v8  ;;  %v7268_v41 = vand.u32 2147483648, %v13217_v8 }
 0xe1b   :  { %v7224_v6 = vmul.f32 %v13203_v1, %v7223_v54  ;;  %v7240_v22 = vmul.f32 %v7238_v11, %v7219_v51  ;;  %10046 = vrcp.f32 %v13221_v17  ;;  %v7283_v40 = vand.u32 2147483648, %v13221_v17 }
 0xe1c   :  { %v7266_v12 = vand.u32 2147483647, %v13217_v8  ;;  %v7281_v55 = vand.u32 2147483647, %v13221_v17  ;;  %vm7277_vm11 = vweird.f32 %v13221_v17  ;;  %vm7262_vm1 = vweird.f32 %v13217_v8 }
 0xe1d   :  { %v7242_v24 = vadd.f32 %v7241_v30, %v7240_v22  ;;  %v10043_v50 = vpop.eup %10042  ;;  %v7225_v59 = vadd.f32 %v13203_v1, %v7224_v6  ;;  %v7269_v2 = vor.u32 1.1754944e-38, %v7268_v41  ;;  %v7284_v0 = vor.u32 1.1754944e-38, %v7283_v40 }
 0xe1e   :  { %v7256_v18 = vadd.f32 1.0, %v10043_v50  ;;  %vm7267_vm3 = vcmp.eq.f32.partialorder %v7266_v12, 8.507059e+37  ;;  %vm7282_vm4 = vcmp.eq.f32.partialorder %v7281_v55, 8.507059e+37 }
 0xe1f   :  { %10048 = vtanh.f32 %v7242_v24  ;;  %v7229_v62 = vsel %vm7228_vm13, %v13203_v1, %v7225_v59 }
 0xe20   :  { %v10045_v39 = vpop.eup %10044  ;;  %10050 = vrcp.f32 %v7256_v18  ;;  %v7234_v19 = vsel %vm7231_vm14, %v7233_v42, %v7229_v62  ;;  %v7298_v29 = vand.u32 2147483648, %v7256_v18  ;;  %vm7292_vm6 = vweird.f32 %v7256_v18 }
 0xe21   :  { %v10047_v63 = vpop.eup %10046  ;;  %v7258_v4 = vmul.f32 %v10045_v39, %v13217_v8  ;;  %10052 = vtanh.f32 %v7178_v52  ;;  %vm7263_vm15 = vweird.f32 %v10045_v39  ;;  %v7296_v16 = vand.u32 2147483647, %v7256_v18 }
 0xe22   :  { %v7273_v49 = vmul.f32 %v10047_v63, %v13221_v17  ;;  %vm7278_vm0 = vweird.f32 %v10047_v63  ;;  %vm7264_vm8 = vmor %vm7262_vm1, %vm7263_vm15  ;;  %v7299_v53 = vor.u32 1.1754944e-38, %v7298_v29  ;;  %v7461_v17 = vpop.f32.mrf.mxu3 }
 0xe23   :  { %v7259_v14 = vsub.f32 1.0, %v7258_v4  ;;  %vm7279_vm2 = vmor %vm7277_vm11, %vm7278_vm0  ;;  %vm7297_vm9 = vcmp.eq.f32.partialorder %v7296_v16, 8.507059e+37 }
 0xe24   :  { %v7274_v45 = vsub.f32 1.0, %v7273_v49 }
 0xe25   :  { %v10049_v36 = vpop.eup %10048  ;;  %v7260_v58 = vmul.f32 %v10045_v39, %v7259_v14 }
 0xe26   :  { %v7275_v9 = vmul.f32 %v10047_v63, %v7274_v45  ;;  %v7244_v28 = vmul.f32 %v10049_v36, %v7234_v19  ;;  %v10051_v23 = vpop.eup %10050 }
 0xe27   :  { %v7261_v57 = vadd.f32 %v10045_v39, %v7260_v58  ;;  %v7288_v5 = vmul.f32 %v10051_v23, %v7256_v18  ;;  %v10053_v60 = vpop.eup %10052  ;;  %vm7293_vm5 = vweird.f32 %v10051_v23 }
 0xe28   :  { %v7312_v46 = vrot.slane %v7244_v28, 6  ;;  %v7276_v25 = vadd.f32 %v10047_v63, %v7275_v9  ;;  %vm7294_vm7 = vmor %vm7292_vm6, %vm7293_vm5 }
 0xe29   :  { %v7265_v7 = vsel %vm7264_vm8, %v10045_v39, %v7261_v57  ;;  %v7289_v56 = vsub.f32 1.0, %v7288_v5 }
 0xe2a   :  { %v7270_v38 = vsel %vm7267_vm3, %v7269_v2, %v7265_v7  ;;  %7440 = vmatmul.f32.vlgmr.msra.gmra.mxu2 %v7312_v46  ;;  %v7280_v11 = vsel %vm7279_vm2, %v10047_v63, %v7276_v25 }
 0xe2b   :  { %v7307_v13 = vmul.f32 %v10053_v60, %v7270_v38  ;;  %v7285_v1 = vsel %vm7282_vm4, %v7284_v0, %v7280_v11  ;;  %v7290_v35 = vmul.f32 %v10051_v23, %v7289_v56 }
 0xe2c   :  { %v7306_v32 = vmul.f32 %v7304_v3, %v7285_v1 }
 0xe2d   :  { %v7291_v20 = vadd.f32 %v10051_v23, %v7290_v35 }
 0xe2e   :  { %v7308_v43 = vadd.f32 %v7307_v13, %v7306_v32 }
 0xe2f   :  { %v7295_v61 = vsel %vm7294_vm7, %v10051_v23, %v7291_v20 }
 0xe30   :  { %10054 = vtanh.f32 %v7308_v43  ;;  %7420 = vmatmul.f32.vlgmr.msra.gmra.mxu1 %v7308_v43  ;;  %v7300_v27 = vsel %vm7297_vm9, %v7299_v53, %v7295_v61 }
 0xe36   :  { %v10055_v48 = vpop.eup %10054 }
 0xe37   :  { %v7310_v37 = vmul.f32 %v10055_v48, %v7300_v27 }
 0xe39   :  { %7400 = vmatmul.f32.vlgmr.msra.gmra.mxu0 %v7310_v37 }
 0xead   :  { %v7421_v21 = vpop.f32.mrf.mxu1  ;;  %v7441_v26 = vpop.f32.mrf.mxu2 }
 0xeb6   :  { %v7401_v8 = vpop.f32.mrf.mxu0 }
 0xeb7   :  { %v7402_v44 = vadd.f32 %v9799_v10, %v7401_v8 }
 0xeb9   :  { %v7422_v54 = vadd.f32 %v7421_v21, %v7402_v44 }
 0xebb   :  { %v7442_v47 = vadd.f32 %v7441_v26, %v7422_v54 }
 0xebd   :  { %v7462_v33 = vadd.f32 %v7461_v17, %v7442_v47 }
 0xebf   :  { %7465 = vst.msk [vmem:[#allocation9] sm:$0x3] %vm7464_vm10, %v7462_v33 }
 0xec0   :  { %7476 = dma.vmem_to_hbm [thread:$0]  %s7472_s1, 32, %s7474_s24, [#allocation8]  }
 0xec1   :  { %10160 = dma.done.wait [#allocation8], 32  }
 0xec2   :  { %10161 = vsyncadd [#allocation8], 4294967264 }
 0xec3   :  { %7481 = vsyncpa [#allocation7], 1 }
 0xec4   :  { %7482 = vsyncpa [#allocation8], 1 }
 0xec5   :  { %7483 = vsyncmov [#allocation5] }
 0xec8   :  { %s7484_s8 = vpop.sfrf %7483 }
 0xec9   :  { %p9147_p0 = scmp.ne.s32.totalorder %s7484_s8, 0 }
 0xecb   :  { %7488 = shalt.err (%p9147_p0)  }
 0xecc   :  { %7490 = vsyncmov [#allocation5 + $0x1] }
 0xecf   :  { %s7491_s25 = vpop.sfrf %7490 }
 0xed0   :  { %p9148_p1 = scmp.ne.s32.totalorder %s7491_s25, 0 }
 0xed2   :  { %7495 = shalt.err (%p9148_p1)  }
 0xed3   :  { %7497 = vsyncmov [#allocation5 + $0x2] }
 0xed6   :  { %s7498_s9 = vpop.sfrf %7497 }
 0xed7   :  { %p9149_p2 = scmp.ne.s32.totalorder %s7498_s9, 0 }
 0xed9   :  { %7502 = shalt.err (%p9149_p2)  }

</bundles_post_ra>
